<compile_context>
chip_gen: v7x
topology: tpu7x:2x2x1
jax: 0.10.0
libtpu: 0.0.40
codegen_flags: <defaults>
</compile_context>

<pallas_src>
import functools
import math

import jax
import jax.numpy as jnp
from jax.experimental import pallas as pl
from jax.experimental.pallas import tpu as pltpu

_BN_EPS = 1e-5
_Q_TILE = 512           # output-row tile once Q exceeds it (multiple of 8)
_VMEM_LIMIT = 48 * 1024 * 1024


# ----------------------------------------------------------------------------
# Pallas kernels
# ----------------------------------------------------------------------------
def _conv_tap_kernel(x_ref, w_ref, b_ref, *rest, taps, q_tile, tiled, relu,
                     has_residual):
    """KW-packed tap-accumulated GEMM with fused BN-shift (+residual) (+ReLU).

    x_ref : (P, R, K)     bf16  per-image stride-phase slabs (resident over q)
    w_ref : (KH, K, Cout) bf16  BN-scale-folded, KW-packed weights
    b_ref : (1, Cout)     f32   BN shift
    r_ref : (QT, Cout)    bf16  optional residual tile
    o_ref : (QT, Cout)    bf16  compact (OH*OW row-major) output tile
    """
    if has_residual:
        r_ref, o_ref = rest
    else:
        (o_ref,) = rest
    cout = o_ref.shape[-1]

    if tiled:
        base = pl.multiple_of(pl.program_id(1) * q_tile, q_tile)

    acc = jnp.zeros((q_tile, cout), jnp.float32)
    for t, (pid, off) in enumerate(taps):              # static, <= KH iters
        if tiled:
            a = x_ref[pid, pl.ds(base + off, q_tile), :]
        else:
            a = x_ref[pid, off:off + q_tile, :]
        acc = acc + jnp.dot(a, w_ref[t], preferred_element_type=jnp.float32)

    out = acc + b_ref[...]
    if has_residual:
        out = out + r_ref[...].astype(jnp.float32)
    if relu:
        out = jnp.maximum(out, 0.0)
    o_ref[...] = out.astype(o_ref.dtype)


def _maxpool_tap_kernel(x_ref, o_ref, *, taps, q_rows):
    """MaxPool over phase-packed slabs; running max stays in bf16."""
    pid0, off0 = taps[0]
    acc = x_ref[pid0, off0:off0 + q_rows, :]
    for pid, off in taps[1:]:                          # static, unrolled
        acc = jnp.maximum(acc, x_ref[pid, off:off + q_rows, :])
    o_ref[...] = acc


# ----------------------------------------------------------------------------
# Conv wrapper: phase/KW-packed slab construction + pallas_call
# ----------------------------------------------------------------------------
def conv2d_bn(x, layer, residual=None):
    """Conv2d(bias=False) + folded BN (+fused residual +ReLU).

    x        : (N, H, W, Cin) bf16, NHWC
    residual : optional (N, OH, OW, Cout) or (N, OH*OW, Cout)
    returns  : (N, OH, OW, Cout) bf16
    """
    N, H, W, Cin = x.shape
    KH, KW = layer["ksize"]
    s, p = layer["stride"], layer["padding"]
    OH = (H + 2 * p - KH) // s + 1
    OW = (W + 2 * p - KW) // s + 1
    Q = OH * OW
    DH = (KH - 1) // s
    PH = OH + DH
    K = KW * Cin
    KH_w, Kpad, Cout = layer["w"].shape
    assert KH_w == KH and Kpad >= K, (layer["w"].shape, KH, K)

    # kh stride-phases actually used (first-appearance order)
    phases = []
    for kh in range(KH):
        if kh % s not in phases:
            phases.append(kh % s)

    # zero-pad: `p` on all sides, plus extra bottom rows so every phase can be
    # sliced to a uniform PH rows
    need_h = max(ph + s * (PH - 1) + 1 for ph in phases)
    pad_bottom = max(p, need_h - H - p)
    xp = jnp.pad(x, ((0, 0), (p, pad_bottom), (p, p), (0, 0)))

    # per-phase KW-packed slabs:
    #   slab[ph][i*OW + j, kw*Cin:(kw+1)*Cin] = x_pad[ph + s*i, s*j + kw, :]
    slabs = []
    for ph in phases:
        rows = xp[:, ph:ph + s * (PH - 1) + 1:s, :, :]            # (N,PH,Wp,Cin)
        cols = [rows[:, :, kw:kw + s * (OW - 1) + 1:s, :] for kw in range(KW)]
        packed = jnp.concatenate(cols, axis=-1)                    # (N,PH,OW,K)
        slabs.append(packed.reshape(N, PH * OW, K))
    slab = jnp.stack(slabs, axis=1)                                # (N,P,PH*OW,K)

    # Q (output-row) tiling
    if Q <= _Q_TILE:
        QT, n_qt = Q, 1
    else:
        QT = _Q_TILE
        n_qt = -(-Q // QT)
    Qpad = QT * n_qt
    if Qpad > Q:
        slab = jnp.pad(slab, ((0, 0), (0, 0), (0, Qpad - Q), (0, 0)))
    if Kpad > K:
        slab = jnp.pad(slab, ((0, 0), (0, 0), (0, 0), (0, Kpad - K)))
    slab = slab.astype(jnp.bfloat16)
    P, R = slab.shape[1], slab.shape[2]

    # tap kh reads phase (kh % s) rows [(kh//s)*OW, (kh//s)*OW + Q)
    taps = [(phases.index(kh % s), (kh // s) * OW) for kh in range(KH)]

    has_res = residual is not None
    kernel = functools.partial(
        _conv_tap_kernel, taps=taps, q_tile=QT, tiled=(n_qt > 1),
        relu=layer["relu"], has_residual=has_res)

    in_specs = [
        pl.BlockSpec((None, P, R, Kpad), lambda n, q: (n, 0, 0, 0)),
        pl.BlockSpec((KH, Kpad, Cout), lambda n, q: (0, 0, 0)),
        pl.BlockSpec((1, Cout), lambda n, q: (0, 0)),
    ]
    args = [slab, layer["w"], layer["b"]]
    bytes_accessed = (slab.size * 2 + layer["w"].size * 2 + layer["b"].size * 4
                      + N * Qpad * Cout * 2)
    if has_res:
        r = residual.reshape(N, Q, Cout).astype(jnp.bfloat16)
        if Qpad > Q:
            r = jnp.pad(r, ((0, 0), (0, Qpad - Q), (0, 0)))
        args.append(r)
        in_specs.append(pl.BlockSpec((None, QT, Cout), lambda n, q: (n, q, 0)))
        bytes_accessed += N * Qpad * Cout * 2

    out = pl.pallas_call(
        kernel,
        out_shape=jax.ShapeDtypeStruct((N, Qpad, Cout), jnp.bfloat16),
        grid=(N, n_qt),
        in_specs=in_specs,
        out_specs=pl.BlockSpec((None, QT, Cout), lambda n, q: (n, q, 0)),
        compiler_params=pltpu.CompilerParams(
            dimension_semantics=("parallel", "arbitrary"),
            vmem_limit_bytes=_VMEM_LIMIT),
        cost_estimate=pl.CostEstimate(
            flops=2 * N * Qpad * KH * Kpad * Cout,
            transcendentals=0,
            bytes_accessed=int(bytes_accessed)),
    )(*args)

    if Qpad > Q:
        out = out[:, :Q, :]
    return out.reshape(N, OH, OW, Cout)


def maxpool2d(x, ksize=3, stride=2, padding=1):
    N, H, W, C = x.shape
    k, s, p = ksize, stride, padding
    OH = (H + 2 * p - k) // s + 1
    OW = (W + 2 * p - k) // s + 1
    D = (k - 1) // s
    PH, PW = OH + D, OW + D
    neg = float("-inf")

    phase_keys = []
    for kh in range(k):
        for kw in range(k):
            key = (kh % s, kw % s)
            if key not in phase_keys:
                phase_keys.append(key)

    need_h = max(ph + s * (PH - 1) + 1 for ph, _ in phase_keys)
    need_w = max(pw + s * (PW - 1) + 1 for _, pw in phase_keys)
    xp = jnp.pad(x, ((0, 0), (p, max(p, need_h - H - p)),
                     (p, max(p, need_w - W - p)), (0, 0)),
                 constant_values=neg)

    slabs = []
    for ph, pw in phase_keys:
        sl = xp[:, ph:ph + s * (PH - 1) + 1:s, pw:pw + s * (PW - 1) + 1:s, :]
        slabs.append(sl.reshape(N, PH * PW, C))
    slab = jnp.stack(slabs, axis=1)                        # (N, P, PH*PW, C)
    if D > 0:                                              # room for last tap
        slab = jnp.pad(slab, ((0, 0), (0, 0), (0, D), (0, 0)),
                       constant_values=neg)

    taps = [(phase_keys.index((kh % s, kw % s)), (kh // s) * PW + (kw // s))
            for kh in range(k) for kw in range(k)]
    Q = OH * PW
    P, PHW = slab.shape[1], slab.shape[2]

    out = pl.pallas_call(
        functools.partial(_maxpool_tap_kernel, taps=taps, q_rows=Q),
        out_shape=jax.ShapeDtypeStruct((N, Q, C), x.dtype),
        grid=(N,),
        in_specs=[pl.BlockSpec((None, P, PHW, C), lambda n: (n, 0, 0, 0))],
        out_specs=pl.BlockSpec((None, Q, C), lambda n: (n, 0, 0)),
        compiler_params=pltpu.CompilerParams(
            dimension_semantics=("parallel",),
            vmem_limit_bytes=_VMEM_LIMIT),
        cost_estimate=pl.CostEstimate(
            flops=len(taps) * N * Q * C,
            transcendentals=0,
            bytes_accessed=int(slab.size * 2 + N * Q * C * 2)),
    )(slab)
    return out.reshape(N, OH, PW, C)[:, :, :OW, :]


# ----------------------------------------------------------------------------
# Parameter construction (deterministic, mirrors the module's __init__)
# ----------------------------------------------------------------------------
def _init_conv(key, cout, cin, kh, kw):
    # kaiming_normal_(mode='fan_out', nonlinearity='relu'): std = sqrt(2/fan_out)
    std = (2.0 / (cout * kh * kw)) ** 0.5
    return jax.random.normal(key, (cout, cin, kh, kw), jnp.float32) * std


def _fold_conv_bn(w_oihw, relu, stride, padding):
    """Fold BN (init stats: gamma=1, beta=0, mean=0, var=1) into the weights,
    KW-pack kernel columns into the contraction axis, pre-cast to bf16."""
    cout, cin, kh, kw = w_oihw.shape
    scale = 1.0 / math.sqrt(1.0 + _BN_EPS)
    shift = jnp.zeros((1, cout), jnp.float32)
    k = kw * cin
    kpad = -(-k // 8) * 8
    w_t = jnp.transpose(w_oihw, (2, 3, 1, 0)).reshape(kh, k, cout) * scale
    if kpad > k:
        w_t = jnp.pad(w_t, ((0, 0), (0, kpad - k), (0, 0)))
    return {"w": w_t.astype(jnp.bfloat16), "b": shift,
            "ksize": (kh, kw), "stride": stride, "padding": padding,
            "relu": relu}


def _make_layer(key, inplanes, planes, blocks, stride):
    """BasicBlock (expansion = 1) layer, matching ResNet._make_layer."""
    layer = []
    for i in range(blocks):
        key, k1, k2, k3 = jax.random.split(key, 4)
        s = stride if i == 0 else 1
        cin = inplanes if i == 0 else planes
        blk = {
            "conv1": _fold_conv_bn(_init_conv(k1, planes, cin, 3, 3),
                                   relu=True, stride=s, padding=1),
            # conv2's ReLU runs after the fused residual add in the kernel.
            "conv2": _fold_conv_bn(_init_conv(k2, planes, planes, 3, 3),
                                   relu=True, stride=1, padding=1),
            "downsample": None,
        }
        if i == 0 and (stride != 1 or inplanes != planes):
            blk["downsample"] = _fold_conv_bn(
                _init_conv(k3, planes, inplanes, 1, 1),
                relu=False, stride=s, padding=0)
        layer.append(blk)
    return layer, planes, key


def init_resnet_params(key, layers=(1, 1, 1), pad_input=False):
    input_channels = 4 if pad_input else 3
    key, kc1 = jax.random.split(key)
    params = {
        "conv1": _fold_conv_bn(_init_conv(kc1, 64, input_channels, 7, 7),
                               relu=True, stride=2, padding=3),
    }
    inplanes = 64
    layer_params = []
    layer1, inplanes, key = _make_layer(key, inplanes, 64, layers[0], stride=1)
    layer_params.append(layer1)
    layer2, inplanes, key = _make_layer(key, inplanes, 128, layers[1], stride=2)
    layer_params.append(layer2)
    layer3, inplanes, key = _make_layer(key, inplanes, 256, layers[2], stride=1)
    layer_params.append(layer3)
    params["layers"] = layer_params
    return params


# ----------------------------------------------------------------------------
# Forward pass
# ----------------------------------------------------------------------------
def _basic_block(x, blk):
    out = conv2d_bn(x, blk["conv1"])
    if blk["downsample"] is not None:
        residual = conv2d_bn(x, blk["downsample"])
    else:
        residual = x
    # second conv: BN shift + residual add + ReLU fused in the kernel epilogue
    return conv2d_bn(out, blk["conv2"], residual=residual)


def resnet_forward(params, x_nchw):
    # NCHW (PyTorch) -> NHWC bf16 (TPU lane-friendly kernel layout)
    x = jnp.transpose(x_nchw, (0, 2, 3, 1)).astype(jnp.bfloat16)
    # conv1 (7x7 /2) + bn1(fuse_relu=True)
    x = conv2d_bn(x, params["conv1"])
    # maxpool 3x3 /2 pad 1
    x = maxpool2d(x, 3, 2, 1)
    # layer1, layer2, layer3
    for layer in params["layers"]:
        for blk in layer:
            x = _basic_block(x, blk)
    # TODO(synk): forward() also references self.layer4 / self.classifier,
    # which are never defined in the module's __init__; omitted.
    return jnp.transpose(x, (0, 3, 1, 2)).astype(jnp.float32)  # back to NCHW


# ----------------------------------------------------------------------------
if __name__ == "__main__":
    key = jax.random.PRNGKey(0)
    kx, kp = jax.random.split(key)
    x = jax.random.normal(kx, (2, 3, 32, 32), jnp.float32)    # NCHW like PyTorch
    params = init_resnet_params(kp, layers=(1, 1, 1), pad_input=False)

    fwd = jax.jit(lambda inp: resnet_forward(params, inp))
    out = jax.block_until_ready(fwd(x))
    assert out.shape == (2, 256, 4, 4), out.shape
    print("KERNEL_OK")
</pallas_src>

<mosaic_0001>
module attributes {stable_mosaic.version = 11 : i64} {
  func.func @_conv_tap_kernel(%arg0: i32, %arg1: i32, %arg2: memref<1x2x304x24xbf16, #tpu.memory_space<vmem>>, %arg3: memref<7x24x64xbf16, #tpu.memory_space<vmem>>, %arg4: memref<1x64xf32, #tpu.memory_space<vmem>>, %arg5: memref<1x256x64xbf16, #tpu.memory_space<vmem>>) attributes {dimension_semantics = [#tpu.dimension_semantics<parallel>, #tpu.dimension_semantics<arbitrary>], iteration_bounds = array<i64: 2, 1>, scalar_prefetch = 0 : i64, scratch_operands = 0 : i64, tpu.core_type = #tpu.core_type<tc>, window_params = [{transform_indices = @transform_0, window_bounds = array<i64: 1, 2, 304, 24>}, {pipeline_mode = #tpu.pipeline_mode<synchronous>, transform_indices = @transform_1, window_bounds = array<i64: 7, 24, 64>}, {pipeline_mode = #tpu.pipeline_mode<synchronous>, transform_indices = @transform_2, window_bounds = array<i64: 1, 64>}, {transform_indices = @transform_3, window_bounds = array<i64: 1, 256, 64>}]} {
    %cst = arith.constant 0.000000e+00 : f32
    %0 = vector.broadcast %cst : f32 to vector<256x64xf32>
    %c0 = arith.constant 0 : index
    %c0_0 = arith.constant 0 : index
    %c0_1 = arith.constant 0 : index
    %c0_2 = arith.constant 0 : index
    %1 = vector.load %arg2[%c0, %c0_0, %c0_1, %c0_2] : memref<1x2x304x24xbf16, #tpu.memory_space<vmem>>, vector<1x1x256x24xbf16>
    %2 = vector.shape_cast %1 : vector<1x1x256x24xbf16> to vector<256x24xbf16>
    %c0_3 = arith.constant 0 : index
    %c0_4 = arith.constant 0 : index
    %c0_5 = arith.constant 0 : index
    %3 = vector.load %arg3[%c0_3, %c0_4, %c0_5] : memref<7x24x64xbf16, #tpu.memory_space<vmem>>, vector<1x24x64xbf16>
    %4 = vector.shape_cast %3 : vector<1x24x64xbf16> to vector<24x64xbf16>
    %cst_6 = arith.constant dense<0.000000e+00> : vector<256x64xf32>
    %5 = tpu.matmul %2, %4, %cst_6 {dimension_numbers = #tpu.dot_dimension_numbers<[1], [0], [0], [1], [0, 0, 1, 1], [], []>} : vector<256x24xbf16>, vector<24x64xbf16>, vector<256x64xf32> -> vector<256x64xf32>
    %6 = arith.addf %0, %5 : vector<256x64xf32>
    %c0_7 = arith.constant 0 : index
    %c1 = arith.constant 1 : index
    %c0_8 = arith.constant 0 : index
    %c0_9 = arith.constant 0 : index
    %7 = vector.load %arg2[%c0_7, %c1, %c0_8, %c0_9] : memref<1x2x304x24xbf16, #tpu.memory_space<vmem>>, vector<1x1x256x24xbf16>
    %8 = vector.shape_cast %7 : vector<1x1x256x24xbf16> to vector<256x24xbf16>
    %c1_10 = arith.constant 1 : index
    %c0_11 = arith.constant 0 : index
    %c0_12 = arith.constant 0 : index
    %9 = vector.load %arg3[%c1_10, %c0_11, %c0_12] : memref<7x24x64xbf16, #tpu.memory_space<vmem>>, vector<1x24x64xbf16>
    %10 = vector.shape_cast %9 : vector<1x24x64xbf16> to vector<24x64xbf16>
    %cst_13 = arith.constant dense<0.000000e+00> : vector<256x64xf32>
    %11 = tpu.matmul %8, %10, %cst_13 {dimension_numbers = #tpu.dot_dimension_numbers<[1], [0], [0], [1], [0, 0, 1, 1], [], []>} : vector<256x24xbf16>, vector<24x64xbf16>, vector<256x64xf32> -> vector<256x64xf32>
    %12 = arith.addf %6, %11 : vector<256x64xf32>
    %c0_14 = arith.constant 0 : index
    %c0_15 = arith.constant 0 : index
    %c16 = arith.constant 16 : index
    %c0_16 = arith.constant 0 : index
    %13 = vector.load %arg2[%c0_14, %c0_15, %c16, %c0_16] : memref<1x2x304x24xbf16, #tpu.memory_space<vmem>>, vector<1x1x256x24xbf16>
    %14 = vector.shape_cast %13 : vector<1x1x256x24xbf16> to vector<256x24xbf16>
    %c2 = arith.constant 2 : index
    %c0_17 = arith.constant 0 : index
    %c0_18 = arith.constant 0 : index
    %15 = vector.load %arg3[%c2, %c0_17, %c0_18] : memref<7x24x64xbf16, #tpu.memory_space<vmem>>, vector<1x24x64xbf16>
    %16 = vector.shape_cast %15 : vector<1x24x64xbf16> to vector<24x64xbf16>
    %cst_19 = arith.constant dense<0.000000e+00> : vector<256x64xf32>
    %17 = tpu.matmul %14, %16, %cst_19 {dimension_numbers = #tpu.dot_dimension_numbers<[1], [0], [0], [1], [0, 0, 1, 1], [], []>} : vector<256x24xbf16>, vector<24x64xbf16>, vector<256x64xf32> -> vector<256x64xf32>
    %18 = arith.addf %12, %17 : vector<256x64xf32>
    %c0_20 = arith.constant 0 : index
    %c1_21 = arith.constant 1 : index
    %c16_22 = arith.constant 16 : index
    %c0_23 = arith.constant 0 : index
    %19 = vector.load %arg2[%c0_20, %c1_21, %c16_22, %c0_23] : memref<1x2x304x24xbf16, #tpu.memory_space<vmem>>, vector<1x1x256x24xbf16>
    %20 = vector.shape_cast %19 : vector<1x1x256x24xbf16> to vector<256x24xbf16>
    %c3 = arith.constant 3 : index
    %c0_24 = arith.constant 0 : index
    %c0_25 = arith.constant 0 : index
    %21 = vector.load %arg3[%c3, %c0_24, %c0_25] : memref<7x24x64xbf16, #tpu.memory_space<vmem>>, vector<1x24x64xbf16>
    %22 = vector.shape_cast %21 : vector<1x24x64xbf16> to vector<24x64xbf16>
    %cst_26 = arith.constant dense<0.000000e+00> : vector<256x64xf32>
    %23 = tpu.matmul %20, %22, %cst_26 {dimension_numbers = #tpu.dot_dimension_numbers<[1], [0], [0], [1], [0, 0, 1, 1], [], []>} : vector<256x24xbf16>, vector<24x64xbf16>, vector<256x64xf32> -> vector<256x64xf32>
    %24 = arith.addf %18, %23 : vector<256x64xf32>
    %c0_27 = arith.constant 0 : index
    %c0_28 = arith.constant 0 : index
    %c32 = arith.constant 32 : index
    %c0_29 = arith.constant 0 : index
    %25 = vector.load %arg2[%c0_27, %c0_28, %c32, %c0_29] : memref<1x2x304x24xbf16, #tpu.memory_space<vmem>>, vector<1x1x256x24xbf16>
    %26 = vector.shape_cast %25 : vector<1x1x256x24xbf16> to vector<256x24xbf16>
    %c4 = arith.constant 4 : index
    %c0_30 = arith.constant 0 : index
    %c0_31 = arith.constant 0 : index
    %27 = vector.load %arg3[%c4, %c0_30, %c0_31] : memref<7x24x64xbf16, #tpu.memory_space<vmem>>, vector<1x24x64xbf16>
    %28 = vector.shape_cast %27 : vector<1x24x64xbf16> to vector<24x64xbf16>
    %cst_32 = arith.constant dense<0.000000e+00> : vector<256x64xf32>
    %29 = tpu.matmul %26, %28, %cst_32 {dimension_numbers = #tpu.dot_dimension_numbers<[1], [0], [0], [1], [0, 0, 1, 1], [], []>} : vector<256x24xbf16>, vector<24x64xbf16>, vector<256x64xf32> -> vector<256x64xf32>
    %30 = arith.addf %24, %29 : vector<256x64xf32>
    %c0_33 = arith.constant 0 : index
    %c1_34 = arith.constant 1 : index
    %c32_35 = arith.constant 32 : index
    %c0_36 = arith.constant 0 : index
    %31 = vector.load %arg2[%c0_33, %c1_34, %c32_35, %c0_36] : memref<1x2x304x24xbf16, #tpu.memory_space<vmem>>, vector<1x1x256x24xbf16>
    %32 = vector.shape_cast %31 : vector<1x1x256x24xbf16> to vector<256x24xbf16>
    %c5 = arith.constant 5 : index
    %c0_37 = arith.constant 0 : index
    %c0_38 = arith.constant 0 : index
    %33 = vector.load %arg3[%c5, %c0_37, %c0_38] : memref<7x24x64xbf16, #tpu.memory_space<vmem>>, vector<1x24x64xbf16>
    %34 = vector.shape_cast %33 : vector<1x24x64xbf16> to vector<24x64xbf16>
    %cst_39 = arith.constant dense<0.000000e+00> : vector<256x64xf32>
    %35 = tpu.matmul %32, %34, %cst_39 {dimension_numbers = #tpu.dot_dimension_numbers<[1], [0], [0], [1], [0, 0, 1, 1], [], []>} : vector<256x24xbf16>, vector<24x64xbf16>, vector<256x64xf32> -> vector<256x64xf32>
    %36 = arith.addf %30, %35 : vector<256x64xf32>
    %c0_40 = arith.constant 0 : index
    %c0_41 = arith.constant 0 : index
    %c48 = arith.constant 48 : index
    %c0_42 = arith.constant 0 : index
    %37 = vector.load %arg2[%c0_40, %c0_41, %c48, %c0_42] : memref<1x2x304x24xbf16, #tpu.memory_space<vmem>>, vector<1x1x256x24xbf16>
    %38 = vector.shape_cast %37 : vector<1x1x256x24xbf16> to vector<256x24xbf16>
    %c6 = arith.constant 6 : index
    %c0_43 = arith.constant 0 : index
    %c0_44 = arith.constant 0 : index
    %39 = vector.load %arg3[%c6, %c0_43, %c0_44] : memref<7x24x64xbf16, #tpu.memory_space<vmem>>, vector<1x24x64xbf16>
    %40 = vector.shape_cast %39 : vector<1x24x64xbf16> to vector<24x64xbf16>
    %cst_45 = arith.constant dense<0.000000e+00> : vector<256x64xf32>
    %41 = tpu.matmul %38, %40, %cst_45 {dimension_numbers = #tpu.dot_dimension_numbers<[1], [0], [0], [1], [0, 0, 1, 1], [], []>} : vector<256x24xbf16>, vector<24x64xbf16>, vector<256x64xf32> -> vector<256x64xf32>
    %42 = arith.addf %36, %41 : vector<256x64xf32>
    %c0_46 = arith.constant 0 : index
    %c0_47 = arith.constant 0 : index
    %43 = vector.load %arg4[%c0_46, %c0_47] : memref<1x64xf32, #tpu.memory_space<vmem>>, vector<1x64xf32>
    %44 = vector.broadcast %43 : vector<1x64xf32> to vector<256x64xf32>
    %45 = arith.addf %42, %44 : vector<256x64xf32>
    %cst_48 = arith.constant 0.000000e+00 : f32
    %46 = vector.broadcast %cst_48 : f32 to vector<256x64xf32>
    %47 = arith.maximumf %45, %46 : vector<256x64xf32>
    %48 = arith.truncf %47 : vector<256x64xf32> to vector<256x64xbf16>
    %c0_49 = arith.constant 0 : index
    %c0_50 = arith.constant 0 : index
    %c0_51 = arith.constant 0 : index
    %49 = vector.load %arg5[%c0_49, %c0_50, %c0_51] : memref<1x256x64xbf16, #tpu.memory_space<vmem>>, vector<1x256x64xbf16>
    %50 = vector.shape_cast %49 : vector<1x256x64xbf16> to vector<256x64xbf16>
    %51 = vector.shape_cast %48 : vector<256x64xbf16> to vector<1x256x64xbf16>
    tpu.vector_store %arg5[%c0_49, %c0_50, %c0_51], %51 {strides = array<i32>} : memref<1x256x64xbf16, #tpu.memory_space<vmem>>, vector<1x256x64xbf16>,
    return
  }
  func.func @transform_0(%arg0: i32, %arg1: i32) -> (i32, i32, i32, i32) {
    %c0_i32 = arith.constant 0 : i32
    %c0_i32_0 = arith.constant 0 : i32
    %c0_i32_1 = arith.constant 0 : i32
    %c0_i32_2 = arith.constant 0 : i32
    return %arg0, %c0_i32, %c0_i32_0, %c0_i32_1 : i32, i32, i32, i32
  }
  func.func @transform_1(%arg0: i32, %arg1: i32) -> (i32, i32, i32) {
    %c0_i32 = arith.constant 0 : i32
    %c0_i32_0 = arith.constant 0 : i32
    %c0_i32_1 = arith.constant 0 : i32
    %c0_i32_2 = arith.constant 0 : i32
    return %c0_i32, %c0_i32_0, %c0_i32_1 : i32, i32, i32
  }
  func.func @transform_2(%arg0: i32, %arg1: i32) -> (i32, i32) {
    %c0_i32 = arith.constant 0 : i32
    %c0_i32_0 = arith.constant 0 : i32
    %c0_i32_1 = arith.constant 0 : i32
    return %c0_i32, %c0_i32_0 : i32, i32
  }
  func.func @transform_3(%arg0: i32, %arg1: i32) -> (i32, i32, i32) {
    %c0_i32 = arith.constant 0 : i32
    %c0_i32_0 = arith.constant 0 : i32
    return %arg0, %arg1, %c0_i32 : i32, i32, i32
  }
}

module attributes {stable_mosaic.version = 11 : i64} {
  func.func @_maxpool_tap_kernel(%arg0: i32, %arg1: memref<1x4x82x64xbf16, #tpu.memory_space<vmem>>, %arg2: memref<1x72x64xbf16, #tpu.memory_space<vmem>>) attributes {dimension_semantics = [#tpu.dimension_semantics<parallel>], iteration_bounds = array<i64: 2>, scalar_prefetch = 0 : i64, scratch_operands = 0 : i64, tpu.core_type = #tpu.core_type<tc>, window_params = [{transform_indices = @transform_0, window_bounds = array<i64: 1, 4, 82, 64>}, {transform_indices = @transform_1, window_bounds = array<i64: 1, 72, 64>}]} {
    %c0 = arith.constant 0 : index
    %c0_0 = arith.constant 0 : index
    %c0_1 = arith.constant 0 : index
    %c0_2 = arith.constant 0 : index
    %0 = vector.load %arg1[%c0, %c0_0, %c0_1, %c0_2] : memref<1x4x82x64xbf16, #tpu.memory_space<vmem>>, vector<1x1x72x64xbf16>
    %1 = vector.shape_cast %0 : vector<1x1x72x64xbf16> to vector<72x64xbf16>
    %c0_3 = arith.constant 0 : index
    %c1 = arith.constant 1 : index
    %c0_4 = arith.constant 0 : index
    %c0_5 = arith.constant 0 : index
    %2 = vector.load %arg1[%c0_3, %c1, %c0_4, %c0_5] : memref<1x4x82x64xbf16, #tpu.memory_space<vmem>>, vector<1x1x72x64xbf16>
    %3 = vector.shape_cast %2 : vector<1x1x72x64xbf16> to vector<72x64xbf16>
    %4 = arith.maximumf %1, %3 : vector<72x64xbf16>
    %c0_6 = arith.constant 0 : index
    %c0_7 = arith.constant 0 : index
    %c1_8 = arith.constant 1 : index
    %c0_9 = arith.constant 0 : index
    %5 = vector.load %arg1[%c0_6, %c0_7, %c1_8, %c0_9] : memref<1x4x82x64xbf16, #tpu.memory_space<vmem>>, vector<1x1x72x64xbf16>
    %6 = vector.shape_cast %5 : vector<1x1x72x64xbf16> to vector<72x64xbf16>
    %7 = arith.maximumf %4, %6 : vector<72x64xbf16>
    %c0_10 = arith.constant 0 : index
    %c2 = arith.constant 2 : index
    %c0_11 = arith.constant 0 : index
    %c0_12 = arith.constant 0 : index
    %8 = vector.load %arg1[%c0_10, %c2, %c0_11, %c0_12] : memref<1x4x82x64xbf16, #tpu.memory_space<vmem>>, vector<1x1x72x64xbf16>
    %9 = vector.shape_cast %8 : vector<1x1x72x64xbf16> to vector<72x64xbf16>
    %10 = arith.maximumf %7, %9 : vector<72x64xbf16>
    %c0_13 = arith.constant 0 : index
    %c3 = arith.constant 3 : index
    %c0_14 = arith.constant 0 : index
    %c0_15 = arith.constant 0 : index
    %11 = vector.load %arg1[%c0_13, %c3, %c0_14, %c0_15] : memref<1x4x82x64xbf16, #tpu.memory_space<vmem>>, vector<1x1x72x64xbf16>
    %12 = vector.shape_cast %11 : vector<1x1x72x64xbf16> to vector<72x64xbf16>
    %13 = arith.maximumf %10, %12 : vector<72x64xbf16>
    %c0_16 = arith.constant 0 : index
    %c2_17 = arith.constant 2 : index
    %c1_18 = arith.constant 1 : index
    %c0_19 = arith.constant 0 : index
    %14 = vector.load %arg1[%c0_16, %c2_17, %c1_18, %c0_19] : memref<1x4x82x64xbf16, #tpu.memory_space<vmem>>, vector<1x1x72x64xbf16>
    %15 = vector.shape_cast %14 : vector<1x1x72x64xbf16> to vector<72x64xbf16>
    %16 = arith.maximumf %13, %15 : vector<72x64xbf16>
    %c0_20 = arith.constant 0 : index
    %c0_21 = arith.constant 0 : index
    %c9 = arith.constant 9 : index
    %c0_22 = arith.constant 0 : index
    %17 = vector.load %arg1[%c0_20, %c0_21, %c9, %c0_22] : memref<1x4x82x64xbf16, #tpu.memory_space<vmem>>, vector<1x1x72x64xbf16>
    %18 = vector.shape_cast %17 : vector<1x1x72x64xbf16> to vector<72x64xbf16>
    %19 = arith.maximumf %16, %18 : vector<72x64xbf16>
    %c0_23 = arith.constant 0 : index
    %c1_24 = arith.constant 1 : index
    %c9_25 = arith.constant 9 : index
    %c0_26 = arith.constant 0 : index
    %20 = vector.load %arg1[%c0_23, %c1_24, %c9_25, %c0_26] : memref<1x4x82x64xbf16, #tpu.memory_space<vmem>>, vector<1x1x72x64xbf16>
    %21 = vector.shape_cast %20 : vector<1x1x72x64xbf16> to vector<72x64xbf16>
    %22 = arith.maximumf %19, %21 : vector<72x64xbf16>
    %c0_27 = arith.constant 0 : index
    %c0_28 = arith.constant 0 : index
    %c10 = arith.constant 10 : index
    %c0_29 = arith.constant 0 : index
    %23 = vector.load %arg1[%c0_27, %c0_28, %c10, %c0_29] : memref<1x4x82x64xbf16, #tpu.memory_space<vmem>>, vector<1x1x72x64xbf16>
    %24 = vector.shape_cast %23 : vector<1x1x72x64xbf16> to vector<72x64xbf16>
    %25 = arith.maximumf %22, %24 : vector<72x64xbf16>
    %c0_30 = arith.constant 0 : index
    %c0_31 = arith.constant 0 : index
    %c0_32 = arith.constant 0 : index
    %26 = vector.load %arg2[%c0_30, %c0_31, %c0_32] : memref<1x72x64xbf16, #tpu.memory_space<vmem>>, vector<1x72x64xbf16>
    %27 = vector.shape_cast %26 : vector<1x72x64xbf16> to vector<72x64xbf16>
    %28 = vector.shape_cast %25 : vector<72x64xbf16> to vector<1x72x64xbf16>
    tpu.vector_store %arg2[%c0_30, %c0_31, %c0_32], %28 {strides = array<i32>} : memref<1x72x64xbf16, #tpu.memory_space<vmem>>, vector<1x72x64xbf16>,
    return
  }
  func.func @transform_0(%arg0: i32) -> (i32, i32, i32, i32) {
    %c0_i32 = arith.constant 0 : i32
    %c0_i32_0 = arith.constant 0 : i32
    %c0_i32_1 = arith.constant 0 : i32
    %c0_i32_2 = arith.constant 0 : i32
    return %arg0, %c0_i32, %c0_i32_0, %c0_i32_1 : i32, i32, i32, i32
  }
  func.func @transform_1(%arg0: i32) -> (i32, i32, i32) {
    %c0_i32 = arith.constant 0 : i32
    %c0_i32_0 = arith.constant 0 : i32
    %c0_i32_1 = arith.constant 0 : i32
    return %arg0, %c0_i32, %c0_i32_0 : i32, i32, i32
  }
}

module attributes {stable_mosaic.version = 11 : i64} {
  func.func @_conv_tap_kernel(%arg0: i32, %arg1: i32, %arg2: memref<1x1x80x192xbf16, #tpu.memory_space<vmem>>, %arg3: memref<3x192x64xbf16, #tpu.memory_space<vmem>>, %arg4: memref<1x64xf32, #tpu.memory_space<vmem>>, %arg5: memref<1x64x64xbf16, #tpu.memory_space<vmem>>) attributes {dimension_semantics = [#tpu.dimension_semantics<parallel>, #tpu.dimension_semantics<arbitrary>], iteration_bounds = array<i64: 2, 1>, scalar_prefetch = 0 : i64, scratch_operands = 0 : i64, tpu.core_type = #tpu.core_type<tc>, window_params = [{transform_indices = @transform_0, window_bounds = array<i64: 1, 1, 80, 192>}, {pipeline_mode = #tpu.pipeline_mode<synchronous>, transform_indices = @transform_1, window_bounds = array<i64: 3, 192, 64>}, {pipeline_mode = #tpu.pipeline_mode<synchronous>, transform_indices = @transform_2, window_bounds = array<i64: 1, 64>}, {transform_indices = @transform_3, window_bounds = array<i64: 1, 64, 64>}]} {
    %cst = arith.constant 0.000000e+00 : f32
    %0 = vector.broadcast %cst : f32 to vector<64x64xf32>
    %c0 = arith.constant 0 : index
    %c0_0 = arith.constant 0 : index
    %c0_1 = arith.constant 0 : index
    %c0_2 = arith.constant 0 : index
    %1 = vector.load %arg2[%c0, %c0_0, %c0_1, %c0_2] : memref<1x1x80x192xbf16, #tpu.memory_space<vmem>>, vector<1x1x64x192xbf16>
    %2 = vector.shape_cast %1 : vector<1x1x64x192xbf16> to vector<64x192xbf16>
    %c0_3 = arith.constant 0 : index
    %c0_4 = arith.constant 0 : index
    %c0_5 = arith.constant 0 : index
    %3 = vector.load %arg3[%c0_3, %c0_4, %c0_5] : memref<3x192x64xbf16, #tpu.memory_space<vmem>>, vector<1x192x64xbf16>
    %4 = vector.shape_cast %3 : vector<1x192x64xbf16> to vector<192x64xbf16>
    %cst_6 = arith.constant dense<0.000000e+00> : vector<64x64xf32>
    %5 = tpu.matmul %2, %4, %cst_6 {dimension_numbers = #tpu.dot_dimension_numbers<[1], [0], [0], [1], [0, 0, 1, 1], [], []>} : vector<64x192xbf16>, vector<192x64xbf16>, vector<64x64xf32> -> vector<64x64xf32>
    %6 = arith.addf %0, %5 : vector<64x64xf32>
    %c0_7 = arith.constant 0 : index
    %c0_8 = arith.constant 0 : index
    %c8 = arith.constant 8 : index
    %c0_9 = arith.constant 0 : index
    %7 = vector.load %arg2[%c0_7, %c0_8, %c8, %c0_9] : memref<1x1x80x192xbf16, #tpu.memory_space<vmem>>, vector<1x1x64x192xbf16>
    %8 = vector.shape_cast %7 : vector<1x1x64x192xbf16> to vector<64x192xbf16>
    %c1 = arith.constant 1 : index
    %c0_10 = arith.constant 0 : index
    %c0_11 = arith.constant 0 : index
    %9 = vector.load %arg3[%c1, %c0_10, %c0_11] : memref<3x192x64xbf16, #tpu.memory_space<vmem>>, vector<1x192x64xbf16>
    %10 = vector.shape_cast %9 : vector<1x192x64xbf16> to vector<192x64xbf16>
    %cst_12 = arith.constant dense<0.000000e+00> : vector<64x64xf32>
    %11 = tpu.matmul %8, %10, %cst_12 {dimension_numbers = #tpu.dot_dimension_numbers<[1], [0], [0], [1], [0, 0, 1, 1], [], []>} : vector<64x192xbf16>, vector<192x64xbf16>, vector<64x64xf32> -> vector<64x64xf32>
    %12 = arith.addf %6, %11 : vector<64x64xf32>
    %c0_13 = arith.constant 0 : index
    %c0_14 = arith.constant 0 : index
    %c16 = arith.constant 16 : index
    %c0_15 = arith.constant 0 : index
    %13 = vector.load %arg2[%c0_13, %c0_14, %c16, %c0_15] : memref<1x1x80x192xbf16, #tpu.memory_space<vmem>>, vector<1x1x64x192xbf16>
    %14 = vector.shape_cast %13 : vector<1x1x64x192xbf16> to vector<64x192xbf16>
    %c2 = arith.constant 2 : index
    %c0_16 = arith.constant 0 : index
    %c0_17 = arith.constant 0 : index
    %15 = vector.load %arg3[%c2, %c0_16, %c0_17] : memref<3x192x64xbf16, #tpu.memory_space<vmem>>, vector<1x192x64xbf16>
    %16 = vector.shape_cast %15 : vector<1x192x64xbf16> to vector<192x64xbf16>
    %cst_18 = arith.constant dense<0.000000e+00> : vector<64x64xf32>
    %17 = tpu.matmul %14, %16, %cst_18 {dimension_numbers = #tpu.dot_dimension_numbers<[1], [0], [0], [1], [0, 0, 1, 1], [], []>} : vector<64x192xbf16>, vector<192x64xbf16>, vector<64x64xf32> -> vector<64x64xf32>
    %18 = arith.addf %12, %17 : vector<64x64xf32>
    %c0_19 = arith.constant 0 : index
    %c0_20 = arith.constant 0 : index
    %19 = vector.load %arg4[%c0_19, %c0_20] : memref<1x64xf32, #tpu.memory_space<vmem>>, vector<1x64xf32>
    %20 = vector.broadcast %19 : vector<1x64xf32> to vector<64x64xf32>
    %21 = arith.addf %18, %20 : vector<64x64xf32>
    %cst_21 = arith.constant 0.000000e+00 : f32
    %22 = vector.broadcast %cst_21 : f32 to vector<64x64xf32>
    %23 = arith.maximumf %21, %22 : vector<64x64xf32>
    %24 = arith.truncf %23 : vector<64x64xf32> to vector<64x64xbf16>
    %c0_22 = arith.constant 0 : index
    %c0_23 = arith.constant 0 : index
    %c0_24 = arith.constant 0 : index
    %25 = vector.load %arg5[%c0_22, %c0_23, %c0_24] : memref<1x64x64xbf16, #tpu.memory_space<vmem>>, vector<1x64x64xbf16>
    %26 = vector.shape_cast %25 : vector<1x64x64xbf16> to vector<64x64xbf16>
    %27 = vector.shape_cast %24 : vector<64x64xbf16> to vector<1x64x64xbf16>
    tpu.vector_store %arg5[%c0_22, %c0_23, %c0_24], %27 {strides = array<i32>} : memref<1x64x64xbf16, #tpu.memory_space<vmem>>, vector<1x64x64xbf16>,
    return
  }
  func.func @transform_0(%arg0: i32, %arg1: i32) -> (i32, i32, i32, i32) {
    %c0_i32 = arith.constant 0 : i32
    %c0_i32_0 = arith.constant 0 : i32
    %c0_i32_1 = arith.constant 0 : i32
    %c0_i32_2 = arith.constant 0 : i32
    return %arg0, %c0_i32, %c0_i32_0, %c0_i32_1 : i32, i32, i32, i32
  }
  func.func @transform_1(%arg0: i32, %arg1: i32) -> (i32, i32, i32) {
    %c0_i32 = arith.constant 0 : i32
    %c0_i32_0 = arith.constant 0 : i32
    %c0_i32_1 = arith.constant 0 : i32
    %c0_i32_2 = arith.constant 0 : i32
    return %c0_i32, %c0_i32_0, %c0_i32_1 : i32, i32, i32
  }
  func.func @transform_2(%arg0: i32, %arg1: i32) -> (i32, i32) {
    %c0_i32 = arith.constant 0 : i32
    %c0_i32_0 = arith.constant 0 : i32
    %c0_i32_1 = arith.constant 0 : i32
    return %c0_i32, %c0_i32_0 : i32, i32
  }
  func.func @transform_3(%arg0: i32, %arg1: i32) -> (i32, i32, i32) {
    %c0_i32 = arith.constant 0 : i32
    %c0_i32_0 = arith.constant 0 : i32
    return %arg0, %arg1, %c0_i32 : i32, i32, i32
  }
}

module attributes {stable_mosaic.version = 11 : i64} {
  func.func @_conv_tap_kernel(%arg0: i32, %arg1: i32, %arg2: memref<1x1x80x192xbf16, #tpu.memory_space<vmem>>, %arg3: memref<3x192x64xbf16, #tpu.memory_space<vmem>>, %arg4: memref<1x64xf32, #tpu.memory_space<vmem>>, %arg5: memref<1x64x64xbf16, #tpu.memory_space<vmem>>, %arg6: memref<1x64x64xbf16, #tpu.memory_space<vmem>>) attributes {dimension_semantics = [#tpu.dimension_semantics<parallel>, #tpu.dimension_semantics<arbitrary>], iteration_bounds = array<i64: 2, 1>, scalar_prefetch = 0 : i64, scratch_operands = 0 : i64, tpu.core_type = #tpu.core_type<tc>, window_params = [{transform_indices = @transform_0, window_bounds = array<i64: 1, 1, 80, 192>}, {pipeline_mode = #tpu.pipeline_mode<synchronous>, transform_indices = @transform_1, window_bounds = array<i64: 3, 192, 64>}, {pipeline_mode = #tpu.pipeline_mode<synchronous>, transform_indices = @transform_2, window_bounds = array<i64: 1, 64>}, {transform_indices = @transform_3, window_bounds = array<i64: 1, 64, 64>}, {transform_indices = @transform_4, window_bounds = array<i64: 1, 64, 64>}]} {
    %cst = arith.constant 0.000000e+00 : f32
    %0 = vector.broadcast %cst : f32 to vector<64x64xf32>
    %c0 = arith.constant 0 : index
    %c0_0 = arith.constant 0 : index
    %c0_1 = arith.constant 0 : index
    %c0_2 = arith.constant 0 : index
    %1 = vector.load %arg2[%c0, %c0_0, %c0_1, %c0_2] : memref<1x1x80x192xbf16, #tpu.memory_space<vmem>>, vector<1x1x64x192xbf16>
    %2 = vector.shape_cast %1 : vector<1x1x64x192xbf16> to vector<64x192xbf16>
    %c0_3 = arith.constant 0 : index
    %c0_4 = arith.constant 0 : index
    %c0_5 = arith.constant 0 : index
    %3 = vector.load %arg3[%c0_3, %c0_4, %c0_5] : memref<3x192x64xbf16, #tpu.memory_space<vmem>>, vector<1x192x64xbf16>
    %4 = vector.shape_cast %3 : vector<1x192x64xbf16> to vector<192x64xbf16>
    %cst_6 = arith.constant dense<0.000000e+00> : vector<64x64xf32>
    %5 = tpu.matmul %2, %4, %cst_6 {dimension_numbers = #tpu.dot_dimension_numbers<[1], [0], [0], [1], [0, 0, 1, 1], [], []>} : vector<64x192xbf16>, vector<192x64xbf16>, vector<64x64xf32> -> vector<64x64xf32>
    %6 = arith.addf %0, %5 : vector<64x64xf32>
    %c0_7 = arith.constant 0 : index
    %c0_8 = arith.constant 0 : index
    %c8 = arith.constant 8 : index
    %c0_9 = arith.constant 0 : index
    %7 = vector.load %arg2[%c0_7, %c0_8, %c8, %c0_9] : memref<1x1x80x192xbf16, #tpu.memory_space<vmem>>, vector<1x1x64x192xbf16>
    %8 = vector.shape_cast %7 : vector<1x1x64x192xbf16> to vector<64x192xbf16>
    %c1 = arith.constant 1 : index
    %c0_10 = arith.constant 0 : index
    %c0_11 = arith.constant 0 : index
    %9 = vector.load %arg3[%c1, %c0_10, %c0_11] : memref<3x192x64xbf16, #tpu.memory_space<vmem>>, vector<1x192x64xbf16>
    %10 = vector.shape_cast %9 : vector<1x192x64xbf16> to vector<192x64xbf16>
    %cst_12 = arith.constant dense<0.000000e+00> : vector<64x64xf32>
    %11 = tpu.matmul %8, %10, %cst_12 {dimension_numbers = #tpu.dot_dimension_numbers<[1], [0], [0], [1], [0, 0, 1, 1], [], []>} : vector<64x192xbf16>, vector<192x64xbf16>, vector<64x64xf32> -> vector<64x64xf32>
    %12 = arith.addf %6, %11 : vector<64x64xf32>
    %c0_13 = arith.constant 0 : index
    %c0_14 = arith.constant 0 : index
    %c16 = arith.constant 16 : index
    %c0_15 = arith.constant 0 : index
    %13 = vector.load %arg2[%c0_13, %c0_14, %c16, %c0_15] : memref<1x1x80x192xbf16, #tpu.memory_space<vmem>>, vector<1x1x64x192xbf16>
    %14 = vector.shape_cast %13 : vector<1x1x64x192xbf16> to vector<64x192xbf16>
    %c2 = arith.constant 2 : index
    %c0_16 = arith.constant 0 : index
    %c0_17 = arith.constant 0 : index
    %15 = vector.load %arg3[%c2, %c0_16, %c0_17] : memref<3x192x64xbf16, #tpu.memory_space<vmem>>, vector<1x192x64xbf16>
    %16 = vector.shape_cast %15 : vector<1x192x64xbf16> to vector<192x64xbf16>
    %cst_18 = arith.constant dense<0.000000e+00> : vector<64x64xf32>
    %17 = tpu.matmul %14, %16, %cst_18 {dimension_numbers = #tpu.dot_dimension_numbers<[1], [0], [0], [1], [0, 0, 1, 1], [], []>} : vector<64x192xbf16>, vector<192x64xbf16>, vector<64x64xf32> -> vector<64x64xf32>
    %18 = arith.addf %12, %17 : vector<64x64xf32>
    %c0_19 = arith.constant 0 : index
    %c0_20 = arith.constant 0 : index
    %19 = vector.load %arg4[%c0_19, %c0_20] : memref<1x64xf32, #tpu.memory_space<vmem>>, vector<1x64xf32>
    %20 = vector.broadcast %19 : vector<1x64xf32> to vector<64x64xf32>
    %21 = arith.addf %18, %20 : vector<64x64xf32>
    %c0_21 = arith.constant 0 : index
    %c0_22 = arith.constant 0 : index
    %c0_23 = arith.constant 0 : index
    %22 = vector.load %arg5[%c0_21, %c0_22, %c0_23] : memref<1x64x64xbf16, #tpu.memory_space<vmem>>, vector<1x64x64xbf16>
    %23 = vector.shape_cast %22 : vector<1x64x64xbf16> to vector<64x64xbf16>
    %24 = arith.extf %23 : vector<64x64xbf16> to vector<64x64xf32>
    %25 = arith.addf %21, %24 : vector<64x64xf32>
    %cst_24 = arith.constant 0.000000e+00 : f32
    %26 = vector.broadcast %cst_24 : f32 to vector<64x64xf32>
    %27 = arith.maximumf %25, %26 : vector<64x64xf32>
    %28 = arith.truncf %27 : vector<64x64xf32> to vector<64x64xbf16>
    %c0_25 = arith.constant 0 : index
    %c0_26 = arith.constant 0 : index
    %c0_27 = arith.constant 0 : index
    %29 = vector.load %arg6[%c0_25, %c0_26, %c0_27] : memref<1x64x64xbf16, #tpu.memory_space<vmem>>, vector<1x64x64xbf16>
    %30 = vector.shape_cast %29 : vector<1x64x64xbf16> to vector<64x64xbf16>
    %31 = vector.shape_cast %28 : vector<64x64xbf16> to vector<1x64x64xbf16>
    tpu.vector_store %arg6[%c0_25, %c0_26, %c0_27], %31 {strides = array<i32>} : memref<1x64x64xbf16, #tpu.memory_space<vmem>>, vector<1x64x64xbf16>,
    return
  }
  func.func @transform_0(%arg0: i32, %arg1: i32) -> (i32, i32, i32, i32) {
    %c0_i32 = arith.constant 0 : i32
    %c0_i32_0 = arith.constant 0 : i32
    %c0_i32_1 = arith.constant 0 : i32
    %c0_i32_2 = arith.constant 0 : i32
    return %arg0, %c0_i32, %c0_i32_0, %c0_i32_1 : i32, i32, i32, i32
  }
  func.func @transform_1(%arg0: i32, %arg1: i32) -> (i32, i32, i32) {
    %c0_i32 = arith.constant 0 : i32
    %c0_i32_0 = arith.constant 0 : i32
    %c0_i32_1 = arith.constant 0 : i32
    %c0_i32_2 = arith.constant 0 : i32
    return %c0_i32, %c0_i32_0, %c0_i32_1 : i32, i32, i32
  }
  func.func @transform_2(%arg0: i32, %arg1: i32) -> (i32, i32) {
    %c0_i32 = arith.constant 0 : i32
    %c0_i32_0 = arith.constant 0 : i32
    %c0_i32_1 = arith.constant 0 : i32
    return %c0_i32, %c0_i32_0 : i32, i32
  }
  func.func @transform_3(%arg0: i32, %arg1: i32) -> (i32, i32, i32) {
    %c0_i32 = arith.constant 0 : i32
    %c0_i32_0 = arith.constant 0 : i32
    return %arg0, %arg1, %c0_i32 : i32, i32, i32
  }
  func.func @transform_4(%arg0: i32, %arg1: i32) -> (i32, i32, i32) {
    %c0_i32 = arith.constant 0 : i32
    %c0_i32_0 = arith.constant 0 : i32
    return %arg0, %arg1, %c0_i32 : i32, i32, i32
  }
}

module attributes {stable_mosaic.version = 11 : i64} {
  func.func @_conv_tap_kernel(%arg0: i32, %arg1: i32, %arg2: memref<1x1x16x64xbf16, #tpu.memory_space<vmem>>, %arg3: memref<1x64x128xbf16, #tpu.memory_space<vmem>>, %arg4: memref<1x128xf32, #tpu.memory_space<vmem>>, %arg5: memref<1x16x128xbf16, #tpu.memory_space<vmem>>) attributes {dimension_semantics = [#tpu.dimension_semantics<parallel>, #tpu.dimension_semantics<arbitrary>], iteration_bounds = array<i64: 2, 1>, scalar_prefetch = 0 : i64, scratch_operands = 0 : i64, tpu.core_type = #tpu.core_type<tc>, window_params = [{transform_indices = @transform_0, window_bounds = array<i64: 1, 1, 16, 64>}, {pipeline_mode = #tpu.pipeline_mode<synchronous>, transform_indices = @transform_1, window_bounds = array<i64: 1, 64, 128>}, {pipeline_mode = #tpu.pipeline_mode<synchronous>, transform_indices = @transform_2, window_bounds = array<i64: 1, 128>}, {transform_indices = @transform_3, window_bounds = array<i64: 1, 16, 128>}]} {
    %cst = arith.constant 0.000000e+00 : f32
    %0 = vector.broadcast %cst : f32 to vector<16x128xf32>
    %c0 = arith.constant 0 : index
    %c0_0 = arith.constant 0 : index
    %c0_1 = arith.constant 0 : index
    %c0_2 = arith.constant 0 : index
    %1 = vector.load %arg2[%c0, %c0_0, %c0_1, %c0_2] : memref<1x1x16x64xbf16, #tpu.memory_space<vmem>>, vector<1x1x16x64xbf16>
    %2 = vector.shape_cast %1 : vector<1x1x16x64xbf16> to vector<16x64xbf16>
    %c0_3 = arith.constant 0 : index
    %c0_4 = arith.constant 0 : index
    %c0_5 = arith.constant 0 : index
    %3 = vector.load %arg3[%c0_3, %c0_4, %c0_5] : memref<1x64x128xbf16, #tpu.memory_space<vmem>>, vector<1x64x128xbf16>
    %4 = vector.shape_cast %3 : vector<1x64x128xbf16> to vector<64x128xbf16>
    %cst_6 = arith.constant dense<0.000000e+00> : vector<16x128xf32>
    %5 = tpu.matmul %2, %4, %cst_6 {dimension_numbers = #tpu.dot_dimension_numbers<[1], [0], [0], [1], [0, 0, 1, 1], [], []>} : vector<16x64xbf16>, vector<64x128xbf16>, vector<16x128xf32> -> vector<16x128xf32>
    %6 = arith.addf %0, %5 : vector<16x128xf32>
    %c0_7 = arith.constant 0 : index
    %c0_8 = arith.constant 0 : index
    %7 = vector.load %arg4[%c0_7, %c0_8] : memref<1x128xf32, #tpu.memory_space<vmem>>, vector<1x128xf32>
    %8 = vector.broadcast %7 : vector<1x128xf32> to vector<16x128xf32>
    %9 = arith.addf %6, %8 : vector<16x128xf32>
    %10 = arith.truncf %9 : vector<16x128xf32> to vector<16x128xbf16>
    %c0_9 = arith.constant 0 : index
    %c0_10 = arith.constant 0 : index
    %c0_11 = arith.constant 0 : index
    %11 = vector.load %arg5[%c0_9, %c0_10, %c0_11] : memref<1x16x128xbf16, #tpu.memory_space<vmem>>, vector<1x16x128xbf16>
    %12 = vector.shape_cast %11 : vector<1x16x128xbf16> to vector<16x128xbf16>
    %13 = vector.shape_cast %10 : vector<16x128xbf16> to vector<1x16x128xbf16>
    tpu.vector_store %arg5[%c0_9, %c0_10, %c0_11], %13 {strides = array<i32>} : memref<1x16x128xbf16, #tpu.memory_space<vmem>>, vector<1x16x128xbf16>,
    return
  }
  func.func @transform_0(%arg0: i32, %arg1: i32) -> (i32, i32, i32, i32) {
    %c0_i32 = arith.constant 0 : i32
    %c0_i32_0 = arith.constant 0 : i32
    %c0_i32_1 = arith.constant 0 : i32
    %c0_i32_2 = arith.constant 0 : i32
    return %arg0, %c0_i32, %c0_i32_0, %c0_i32_1 : i32, i32, i32, i32
  }
  func.func @transform_1(%arg0: i32, %arg1: i32) -> (i32, i32, i32) {
    %c0_i32 = arith.constant 0 : i32
    %c0_i32_0 = arith.constant 0 : i32
    %c0_i32_1 = arith.constant 0 : i32
    %c0_i32_2 = arith.constant 0 : i32
    return %c0_i32, %c0_i32_0, %c0_i32_1 : i32, i32, i32
  }
  func.func @transform_2(%arg0: i32, %arg1: i32) -> (i32, i32) {
    %c0_i32 = arith.constant 0 : i32
    %c0_i32_0 = arith.constant 0 : i32
    %c0_i32_1 = arith.constant 0 : i32
    return %c0_i32, %c0_i32_0 : i32, i32
  }
  func.func @transform_3(%arg0: i32, %arg1: i32) -> (i32, i32, i32) {
    %c0_i32 = arith.constant 0 : i32
    %c0_i32_0 = arith.constant 0 : i32
    return %arg0, %arg1, %c0_i32 : i32, i32, i32
  }
}

module attributes {stable_mosaic.version = 11 : i64} {
  func.func @_conv_tap_kernel(%arg0: i32, %arg1: i32, %arg2: memref<1x2x20x192xbf16, #tpu.memory_space<vmem>>, %arg3: memref<3x192x128xbf16, #tpu.memory_space<vmem>>, %arg4: memref<1x128xf32, #tpu.memory_space<vmem>>, %arg5: memref<1x16x128xbf16, #tpu.memory_space<vmem>>) attributes {dimension_semantics = [#tpu.dimension_semantics<parallel>, #tpu.dimension_semantics<arbitrary>], iteration_bounds = array<i64: 2, 1>, scalar_prefetch = 0 : i64, scratch_operands = 0 : i64, tpu.core_type = #tpu.core_type<tc>, window_params = [{transform_indices = @transform_0, window_bounds = array<i64: 1, 2, 20, 192>}, {pipeline_mode = #tpu.pipeline_mode<synchronous>, transform_indices = @transform_1, window_bounds = array<i64: 3, 192, 128>}, {pipeline_mode = #tpu.pipeline_mode<synchronous>, transform_indices = @transform_2, window_bounds = array<i64: 1, 128>}, {transform_indices = @transform_3, window_bounds = array<i64: 1, 16, 128>}]} {
    %cst = arith.constant 0.000000e+00 : f32
    %0 = vector.broadcast %cst : f32 to vector<16x128xf32>
    %c0 = arith.constant 0 : index
    %c0_0 = arith.constant 0 : index
    %c0_1 = arith.constant 0 : index
    %c0_2 = arith.constant 0 : index
    %1 = vector.load %arg2[%c0, %c0_0, %c0_1, %c0_2] : memref<1x2x20x192xbf16, #tpu.memory_space<vmem>>, vector<1x1x16x192xbf16>
    %2 = vector.shape_cast %1 : vector<1x1x16x192xbf16> to vector<16x192xbf16>
    %c0_3 = arith.constant 0 : index
    %c0_4 = arith.constant 0 : index
    %c0_5 = arith.constant 0 : index
    %3 = vector.load %arg3[%c0_3, %c0_4, %c0_5] : memref<3x192x128xbf16, #tpu.memory_space<vmem>>, vector<1x192x128xbf16>
    %4 = vector.shape_cast %3 : vector<1x192x128xbf16> to vector<192x128xbf16>
    %cst_6 = arith.constant dense<0.000000e+00> : vector<16x128xf32>
    %5 = tpu.matmul %2, %4, %cst_6 {dimension_numbers = #tpu.dot_dimension_numbers<[1], [0], [0], [1], [0, 0, 1, 1], [], []>} : vector<16x192xbf16>, vector<192x128xbf16>, vector<16x128xf32> -> vector<16x128xf32>
    %6 = arith.addf %0, %5 : vector<16x128xf32>
    %c0_7 = arith.constant 0 : index
    %c1 = arith.constant 1 : index
    %c0_8 = arith.constant 0 : index
    %c0_9 = arith.constant 0 : index
    %7 = vector.load %arg2[%c0_7, %c1, %c0_8, %c0_9] : memref<1x2x20x192xbf16, #tpu.memory_space<vmem>>, vector<1x1x16x192xbf16>
    %8 = vector.shape_cast %7 : vector<1x1x16x192xbf16> to vector<16x192xbf16>
    %c1_10 = arith.constant 1 : index
    %c0_11 = arith.constant 0 : index
    %c0_12 = arith.constant 0 : index
    %9 = vector.load %arg3[%c1_10, %c0_11, %c0_12] : memref<3x192x128xbf16, #tpu.memory_space<vmem>>, vector<1x192x128xbf16>
    %10 = vector.shape_cast %9 : vector<1x192x128xbf16> to vector<192x128xbf16>
    %cst_13 = arith.constant dense<0.000000e+00> : vector<16x128xf32>
    %11 = tpu.matmul %8, %10, %cst_13 {dimension_numbers = #tpu.dot_dimension_numbers<[1], [0], [0], [1], [0, 0, 1, 1], [], []>} : vector<16x192xbf16>, vector<192x128xbf16>, vector<16x128xf32> -> vector<16x128xf32>
    %12 = arith.addf %6, %11 : vector<16x128xf32>
    %c0_14 = arith.constant 0 : index
    %c0_15 = arith.constant 0 : index
    %c4 = arith.constant 4 : index
    %c0_16 = arith.constant 0 : index
    %13 = vector.load %arg2[%c0_14, %c0_15, %c4, %c0_16] : memref<1x2x20x192xbf16, #tpu.memory_space<vmem>>, vector<1x1x16x192xbf16>
    %14 = vector.shape_cast %13 : vector<1x1x16x192xbf16> to vector<16x192xbf16>
    %c2 = arith.constant 2 : index
    %c0_17 = arith.constant 0 : index
    %c0_18 = arith.constant 0 : index
    %15 = vector.load %arg3[%c2, %c0_17, %c0_18] : memref<3x192x128xbf16, #tpu.memory_space<vmem>>, vector<1x192x128xbf16>
    %16 = vector.shape_cast %15 : vector<1x192x128xbf16> to vector<192x128xbf16>
    %cst_19 = arith.constant dense<0.000000e+00> : vector<16x128xf32>
    %17 = tpu.matmul %14, %16, %cst_19 {dimension_numbers = #tpu.dot_dimension_numbers<[1], [0], [0], [1], [0, 0, 1, 1], [], []>} : vector<16x192xbf16>, vector<192x128xbf16>, vector<16x128xf32> -> vector<16x128xf32>
    %18 = arith.addf %12, %17 : vector<16x128xf32>
    %c0_20 = arith.constant 0 : index
    %c0_21 = arith.constant 0 : index
    %19 = vector.load %arg4[%c0_20, %c0_21] : memref<1x128xf32, #tpu.memory_space<vmem>>, vector<1x128xf32>
    %20 = vector.broadcast %19 : vector<1x128xf32> to vector<16x128xf32>
    %21 = arith.addf %18, %20 : vector<16x128xf32>
    %cst_22 = arith.constant 0.000000e+00 : f32
    %22 = vector.broadcast %cst_22 : f32 to vector<16x128xf32>
    %23 = arith.maximumf %21, %22 : vector<16x128xf32>
    %24 = arith.truncf %23 : vector<16x128xf32> to vector<16x128xbf16>
    %c0_23 = arith.constant 0 : index
    %c0_24 = arith.constant 0 : index
    %c0_25 = arith.constant 0 : index
    %25 = vector.load %arg5[%c0_23, %c0_24, %c0_25] : memref<1x16x128xbf16, #tpu.memory_space<vmem>>, vector<1x16x128xbf16>
    %26 = vector.shape_cast %25 : vector<1x16x128xbf16> to vector<16x128xbf16>
    %27 = vector.shape_cast %24 : vector<16x128xbf16> to vector<1x16x128xbf16>
    tpu.vector_store %arg5[%c0_23, %c0_24, %c0_25], %27 {strides = array<i32>} : memref<1x16x128xbf16, #tpu.memory_space<vmem>>, vector<1x16x128xbf16>,
    return
  }
  func.func @transform_0(%arg0: i32, %arg1: i32) -> (i32, i32, i32, i32) {
    %c0_i32 = arith.constant 0 : i32
    %c0_i32_0 = arith.constant 0 : i32
    %c0_i32_1 = arith.constant 0 : i32
    %c0_i32_2 = arith.constant 0 : i32
    return %arg0, %c0_i32, %c0_i32_0, %c0_i32_1 : i32, i32, i32, i32
  }
  func.func @transform_1(%arg0: i32, %arg1: i32) -> (i32, i32, i32) {
    %c0_i32 = arith.constant 0 : i32
    %c0_i32_0 = arith.constant 0 : i32
    %c0_i32_1 = arith.constant 0 : i32
    %c0_i32_2 = arith.constant 0 : i32
    return %c0_i32, %c0_i32_0, %c0_i32_1 : i32, i32, i32
  }
  func.func @transform_2(%arg0: i32, %arg1: i32) -> (i32, i32) {
    %c0_i32 = arith.constant 0 : i32
    %c0_i32_0 = arith.constant 0 : i32
    %c0_i32_1 = arith.constant 0 : i32
    return %c0_i32, %c0_i32_0 : i32, i32
  }
  func.func @transform_3(%arg0: i32, %arg1: i32) -> (i32, i32, i32) {
    %c0_i32 = arith.constant 0 : i32
    %c0_i32_0 = arith.constant 0 : i32
    return %arg0, %arg1, %c0_i32 : i32, i32, i32
  }
}

module attributes {stable_mosaic.version = 11 : i64} {
  func.func @_conv_tap_kernel(%arg0: i32, %arg1: i32, %arg2: memref<1x1x24x384xbf16, #tpu.memory_space<vmem>>, %arg3: memref<3x384x128xbf16, #tpu.memory_space<vmem>>, %arg4: memref<1x128xf32, #tpu.memory_space<vmem>>, %arg5: memref<1x16x128xbf16, #tpu.memory_space<vmem>>, %arg6: memref<1x16x128xbf16, #tpu.memory_space<vmem>>) attributes {dimension_semantics = [#tpu.dimension_semantics<parallel>, #tpu.dimension_semantics<arbitrary>], iteration_bounds = array<i64: 2, 1>, scalar_prefetch = 0 : i64, scratch_operands = 0 : i64, tpu.core_type = #tpu.core_type<tc>, window_params = [{transform_indices = @transform_0, window_bounds = array<i64: 1, 1, 24, 384>}, {pipeline_mode = #tpu.pipeline_mode<synchronous>, transform_indices = @transform_1, window_bounds = array<i64: 3, 384, 128>}, {pipeline_mode = #tpu.pipeline_mode<synchronous>, transform_indices = @transform_2, window_bounds = array<i64: 1, 128>}, {transform_indices = @transform_3, window_bounds = array<i64: 1, 16, 128>}, {transform_indices = @transform_4, window_bounds = array<i64: 1, 16, 128>}]} {
    %cst = arith.constant 0.000000e+00 : f32
    %0 = vector.broadcast %cst : f32 to vector<16x128xf32>
    %c0 = arith.constant 0 : index
    %c0_0 = arith.constant 0 : index
    %c0_1 = arith.constant 0 : index
    %c0_2 = arith.constant 0 : index
    %1 = vector.load %arg2[%c0, %c0_0, %c0_1, %c0_2] : memref<1x1x24x384xbf16, #tpu.memory_space<vmem>>, vector<1x1x16x384xbf16>
    %2 = vector.shape_cast %1 : vector<1x1x16x384xbf16> to vector<16x384xbf16>
    %c0_3 = arith.constant 0 : index
    %c0_4 = arith.constant 0 : index
    %c0_5 = arith.constant 0 : index
    %3 = vector.load %arg3[%c0_3, %c0_4, %c0_5] : memref<3x384x128xbf16, #tpu.memory_space<vmem>>, vector<1x384x128xbf16>
    %4 = vector.shape_cast %3 : vector<1x384x128xbf16> to vector<384x128xbf16>
    %cst_6 = arith.constant dense<0.000000e+00> : vector<16x128xf32>
    %5 = tpu.matmul %2, %4, %cst_6 {dimension_numbers = #tpu.dot_dimension_numbers<[1], [0], [0], [1], [0, 0, 1, 1], [], []>} : vector<16x384xbf16>, vector<384x128xbf16>, vector<16x128xf32> -> vector<16x128xf32>
    %6 = arith.addf %0, %5 : vector<16x128xf32>
    %c0_7 = arith.constant 0 : index
    %c0_8 = arith.constant 0 : index
    %c4 = arith.constant 4 : index
    %c0_9 = arith.constant 0 : index
    %7 = vector.load %arg2[%c0_7, %c0_8, %c4, %c0_9] : memref<1x1x24x384xbf16, #tpu.memory_space<vmem>>, vector<1x1x16x384xbf16>
    %8 = vector.shape_cast %7 : vector<1x1x16x384xbf16> to vector<16x384xbf16>
    %c1 = arith.constant 1 : index
    %c0_10 = arith.constant 0 : index
    %c0_11 = arith.constant 0 : index
    %9 = vector.load %arg3[%c1, %c0_10, %c0_11] : memref<3x384x128xbf16, #tpu.memory_space<vmem>>, vector<1x384x128xbf16>
    %10 = vector.shape_cast %9 : vector<1x384x128xbf16> to vector<384x128xbf16>
    %cst_12 = arith.constant dense<0.000000e+00> : vector<16x128xf32>
    %11 = tpu.matmul %8, %10, %cst_12 {dimension_numbers = #tpu.dot_dimension_numbers<[1], [0], [0], [1], [0, 0, 1, 1], [], []>} : vector<16x384xbf16>, vector<384x128xbf16>, vector<16x128xf32> -> vector<16x128xf32>
    %12 = arith.addf %6, %11 : vector<16x128xf32>
    %c0_13 = arith.constant 0 : index
    %c0_14 = arith.constant 0 : index
    %c8 = arith.constant 8 : index
    %c0_15 = arith.constant 0 : index
    %13 = vector.load %arg2[%c0_13, %c0_14, %c8, %c0_15] : memref<1x1x24x384xbf16, #tpu.memory_space<vmem>>, vector<1x1x16x384xbf16>
    %14 = vector.shape_cast %13 : vector<1x1x16x384xbf16> to vector<16x384xbf16>
    %c2 = arith.constant 2 : index
    %c0_16 = arith.constant 0 : index
    %c0_17 = arith.constant 0 : index
    %15 = vector.load %arg3[%c2, %c0_16, %c0_17] : memref<3x384x128xbf16, #tpu.memory_space<vmem>>, vector<1x384x128xbf16>
    %16 = vector.shape_cast %15 : vector<1x384x128xbf16> to vector<384x128xbf16>
    %cst_18 = arith.constant dense<0.000000e+00> : vector<16x128xf32>
    %17 = tpu.matmul %14, %16, %cst_18 {dimension_numbers = #tpu.dot_dimension_numbers<[1], [0], [0], [1], [0, 0, 1, 1], [], []>} : vector<16x384xbf16>, vector<384x128xbf16>, vector<16x128xf32> -> vector<16x128xf32>
    %18 = arith.addf %12, %17 : vector<16x128xf32>
    %c0_19 = arith.constant 0 : index
    %c0_20 = arith.constant 0 : index
    %19 = vector.load %arg4[%c0_19, %c0_20] : memref<1x128xf32, #tpu.memory_space<vmem>>, vector<1x128xf32>
    %20 = vector.broadcast %19 : vector<1x128xf32> to vector<16x128xf32>
    %21 = arith.addf %18, %20 : vector<16x128xf32>
    %c0_21 = arith.constant 0 : index
    %c0_22 = arith.constant 0 : index
    %c0_23 = arith.constant 0 : index
    %22 = vector.load %arg5[%c0_21, %c0_22, %c0_23] : memref<1x16x128xbf16, #tpu.memory_space<vmem>>, vector<1x16x128xbf16>
    %23 = vector.shape_cast %22 : vector<1x16x128xbf16> to vector<16x128xbf16>
    %24 = arith.extf %23 : vector<16x128xbf16> to vector<16x128xf32>
    %25 = arith.addf %21, %24 : vector<16x128xf32>
    %cst_24 = arith.constant 0.000000e+00 : f32
    %26 = vector.broadcast %cst_24 : f32 to vector<16x128xf32>
    %27 = arith.maximumf %25, %26 : vector<16x128xf32>
    %28 = arith.truncf %27 : vector<16x128xf32> to vector<16x128xbf16>
    %c0_25 = arith.constant 0 : index
    %c0_26 = arith.constant 0 : index
    %c0_27 = arith.constant 0 : index
    %29 = vector.load %arg6[%c0_25, %c0_26, %c0_27] : memref<1x16x128xbf16, #tpu.memory_space<vmem>>, vector<1x16x128xbf16>
    %30 = vector.shape_cast %29 : vector<1x16x128xbf16> to vector<16x128xbf16>
    %31 = vector.shape_cast %28 : vector<16x128xbf16> to vector<1x16x128xbf16>
    tpu.vector_store %arg6[%c0_25, %c0_26, %c0_27], %31 {strides = array<i32>} : memref<1x16x128xbf16, #tpu.memory_space<vmem>>, vector<1x16x128xbf16>,
    return
  }
  func.func @transform_0(%arg0: i32, %arg1: i32) -> (i32, i32, i32, i32) {
    %c0_i32 = arith.constant 0 : i32
    %c0_i32_0 = arith.constant 0 : i32
    %c0_i32_1 = arith.constant 0 : i32
    %c0_i32_2 = arith.constant 0 : i32
    return %arg0, %c0_i32, %c0_i32_0, %c0_i32_1 : i32, i32, i32, i32
  }
  func.func @transform_1(%arg0: i32, %arg1: i32) -> (i32, i32, i32) {
    %c0_i32 = arith.constant 0 : i32
    %c0_i32_0 = arith.constant 0 : i32
    %c0_i32_1 = arith.constant 0 : i32
    %c0_i32_2 = arith.constant 0 : i32
    return %c0_i32, %c0_i32_0, %c0_i32_1 : i32, i32, i32
  }
  func.func @transform_2(%arg0: i32, %arg1: i32) -> (i32, i32) {
    %c0_i32 = arith.constant 0 : i32
    %c0_i32_0 = arith.constant 0 : i32
    %c0_i32_1 = arith.constant 0 : i32
    return %c0_i32, %c0_i32_0 : i32, i32
  }
  func.func @transform_3(%arg0: i32, %arg1: i32) -> (i32, i32, i32) {
    %c0_i32 = arith.constant 0 : i32
    %c0_i32_0 = arith.constant 0 : i32
    return %arg0, %arg1, %c0_i32 : i32, i32, i32
  }
  func.func @transform_4(%arg0: i32, %arg1: i32) -> (i32, i32, i32) {
    %c0_i32 = arith.constant 0 : i32
    %c0_i32_0 = arith.constant 0 : i32
    return %arg0, %arg1, %c0_i32 : i32, i32, i32
  }
}

module attributes {stable_mosaic.version = 11 : i64} {
  func.func @_conv_tap_kernel(%arg0: i32, %arg1: i32, %arg2: memref<1x1x16x128xbf16, #tpu.memory_space<vmem>>, %arg3: memref<1x128x256xbf16, #tpu.memory_space<vmem>>, %arg4: memref<1x256xf32, #tpu.memory_space<vmem>>, %arg5: memref<1x16x256xbf16, #tpu.memory_space<vmem>>) attributes {dimension_semantics = [#tpu.dimension_semantics<parallel>, #tpu.dimension_semantics<arbitrary>], iteration_bounds = array<i64: 2, 1>, scalar_prefetch = 0 : i64, scratch_operands = 0 : i64, tpu.core_type = #tpu.core_type<tc>, window_params = [{transform_indices = @transform_0, window_bounds = array<i64: 1, 1, 16, 128>}, {pipeline_mode = #tpu.pipeline_mode<synchronous>, transform_indices = @transform_1, window_bounds = array<i64: 1, 128, 256>}, {pipeline_mode = #tpu.pipeline_mode<synchronous>, transform_indices = @transform_2, window_bounds = array<i64: 1, 256>}, {transform_indices = @transform_3, window_bounds = array<i64: 1, 16, 256>}]} {
    %cst = arith.constant 0.000000e+00 : f32
    %0 = vector.broadcast %cst : f32 to vector<16x256xf32>
    %c0 = arith.constant 0 : index
    %c0_0 = arith.constant 0 : index
    %c0_1 = arith.constant 0 : index
    %c0_2 = arith.constant 0 : index
    %1 = vector.load %arg2[%c0, %c0_0, %c0_1, %c0_2] : memref<1x1x16x128xbf16, #tpu.memory_space<vmem>>, vector<1x1x16x128xbf16>
    %2 = vector.shape_cast %1 : vector<1x1x16x128xbf16> to vector<16x128xbf16>
    %c0_3 = arith.constant 0 : index
    %c0_4 = arith.constant 0 : index
    %c0_5 = arith.constant 0 : index
    %3 = vector.load %arg3[%c0_3, %c0_4, %c0_5] : memref<1x128x256xbf16, #tpu.memory_space<vmem>>, vector<1x128x256xbf16>
    %4 = vector.shape_cast %3 : vector<1x128x256xbf16> to vector<128x256xbf16>
    %cst_6 = arith.constant dense<0.000000e+00> : vector<16x256xf32>
    %5 = tpu.matmul %2, %4, %cst_6 {dimension_numbers = #tpu.dot_dimension_numbers<[1], [0], [0], [1], [0, 0, 1, 1], [], []>} : vector<16x128xbf16>, vector<128x256xbf16>, vector<16x256xf32> -> vector<16x256xf32>
    %6 = arith.addf %0, %5 : vector<16x256xf32>
    %c0_7 = arith.constant 0 : index
    %c0_8 = arith.constant 0 : index
    %7 = vector.load %arg4[%c0_7, %c0_8] : memref<1x256xf32, #tpu.memory_space<vmem>>, vector<1x256xf32>
    %8 = vector.broadcast %7 : vector<1x256xf32> to vector<16x256xf32>
    %9 = arith.addf %6, %8 : vector<16x256xf32>
    %10 = arith.truncf %9 : vector<16x256xf32> to vector<16x256xbf16>
    %c0_9 = arith.constant 0 : index
    %c0_10 = arith.constant 0 : index
    %c0_11 = arith.constant 0 : index
    %11 = vector.load %arg5[%c0_9, %c0_10, %c0_11] : memref<1x16x256xbf16, #tpu.memory_space<vmem>>, vector<1x16x256xbf16>
    %12 = vector.shape_cast %11 : vector<1x16x256xbf16> to vector<16x256xbf16>
    %13 = vector.shape_cast %10 : vector<16x256xbf16> to vector<1x16x256xbf16>
    tpu.vector_store %arg5[%c0_9, %c0_10, %c0_11], %13 {strides = array<i32>} : memref<1x16x256xbf16, #tpu.memory_space<vmem>>, vector<1x16x256xbf16>,
    return
  }
  func.func @transform_0(%arg0: i32, %arg1: i32) -> (i32, i32, i32, i32) {
    %c0_i32 = arith.constant 0 : i32
    %c0_i32_0 = arith.constant 0 : i32
    %c0_i32_1 = arith.constant 0 : i32
    %c0_i32_2 = arith.constant 0 : i32
    return %arg0, %c0_i32, %c0_i32_0, %c0_i32_1 : i32, i32, i32, i32
  }
  func.func @transform_1(%arg0: i32, %arg1: i32) -> (i32, i32, i32) {
    %c0_i32 = arith.constant 0 : i32
    %c0_i32_0 = arith.constant 0 : i32
    %c0_i32_1 = arith.constant 0 : i32
    %c0_i32_2 = arith.constant 0 : i32
    return %c0_i32, %c0_i32_0, %c0_i32_1 : i32, i32, i32
  }
  func.func @transform_2(%arg0: i32, %arg1: i32) -> (i32, i32) {
    %c0_i32 = arith.constant 0 : i32
    %c0_i32_0 = arith.constant 0 : i32
    %c0_i32_1 = arith.constant 0 : i32
    return %c0_i32, %c0_i32_0 : i32, i32
  }
  func.func @transform_3(%arg0: i32, %arg1: i32) -> (i32, i32, i32) {
    %c0_i32 = arith.constant 0 : i32
    %c0_i32_0 = arith.constant 0 : i32
    return %arg0, %arg1, %c0_i32 : i32, i32, i32
  }
}

module attributes {stable_mosaic.version = 11 : i64} {
  func.func @_conv_tap_kernel(%arg0: i32, %arg1: i32, %arg2: memref<1x1x24x384xbf16, #tpu.memory_space<vmem>>, %arg3: memref<3x384x256xbf16, #tpu.memory_space<vmem>>, %arg4: memref<1x256xf32, #tpu.memory_space<vmem>>, %arg5: memref<1x16x256xbf16, #tpu.memory_space<vmem>>) attributes {dimension_semantics = [#tpu.dimension_semantics<parallel>, #tpu.dimension_semantics<arbitrary>], iteration_bounds = array<i64: 2, 1>, scalar_prefetch = 0 : i64, scratch_operands = 0 : i64, tpu.core_type = #tpu.core_type<tc>, window_params = [{transform_indices = @transform_0, window_bounds = array<i64: 1, 1, 24, 384>}, {pipeline_mode = #tpu.pipeline_mode<synchronous>, transform_indices = @transform_1, window_bounds = array<i64: 3, 384, 256>}, {pipeline_mode = #tpu.pipeline_mode<synchronous>, transform_indices = @transform_2, window_bounds = array<i64: 1, 256>}, {transform_indices = @transform_3, window_bounds = array<i64: 1, 16, 256>}]} {
    %cst = arith.constant 0.000000e+00 : f32
    %0 = vector.broadcast %cst : f32 to vector<16x256xf32>
    %c0 = arith.constant 0 : index
    %c0_0 = arith.constant 0 : index
    %c0_1 = arith.constant 0 : index
    %c0_2 = arith.constant 0 : index
    %1 = vector.load %arg2[%c0, %c0_0, %c0_1, %c0_2] : memref<1x1x24x384xbf16, #tpu.memory_space<vmem>>, vector<1x1x16x384xbf16>
    %2 = vector.shape_cast %1 : vector<1x1x16x384xbf16> to vector<16x384xbf16>
    %c0_3 = arith.constant 0 : index
    %c0_4 = arith.constant 0 : index
    %c0_5 = arith.constant 0 : index
    %3 = vector.load %arg3[%c0_3, %c0_4, %c0_5] : memref<3x384x256xbf16, #tpu.memory_space<vmem>>, vector<1x384x256xbf16>
    %4 = vector.shape_cast %3 : vector<1x384x256xbf16> to vector<384x256xbf16>
    %cst_6 = arith.constant dense<0.000000e+00> : vector<16x256xf32>
    %5 = tpu.matmul %2, %4, %cst_6 {dimension_numbers = #tpu.dot_dimension_numbers<[1], [0], [0], [1], [0, 0, 1, 1], [], []>} : vector<16x384xbf16>, vector<384x256xbf16>, vector<16x256xf32> -> vector<16x256xf32>
    %6 = arith.addf %0, %5 : vector<16x256xf32>
    %c0_7 = arith.constant 0 : index
    %c0_8 = arith.constant 0 : index
    %c4 = arith.constant 4 : index
    %c0_9 = arith.constant 0 : index
    %7 = vector.load %arg2[%c0_7, %c0_8, %c4, %c0_9] : memref<1x1x24x384xbf16, #tpu.memory_space<vmem>>, vector<1x1x16x384xbf16>
    %8 = vector.shape_cast %7 : vector<1x1x16x384xbf16> to vector<16x384xbf16>
    %c1 = arith.constant 1 : index
    %c0_10 = arith.constant 0 : index
    %c0_11 = arith.constant 0 : index
    %9 = vector.load %arg3[%c1, %c0_10, %c0_11] : memref<3x384x256xbf16, #tpu.memory_space<vmem>>, vector<1x384x256xbf16>
    %10 = vector.shape_cast %9 : vector<1x384x256xbf16> to vector<384x256xbf16>
    %cst_12 = arith.constant dense<0.000000e+00> : vector<16x256xf32>
    %11 = tpu.matmul %8, %10, %cst_12 {dimension_numbers = #tpu.dot_dimension_numbers<[1], [0], [0], [1], [0, 0, 1, 1], [], []>} : vector<16x384xbf16>, vector<384x256xbf16>, vector<16x256xf32> -> vector<16x256xf32>
    %12 = arith.addf %6, %11 : vector<16x256xf32>
    %c0_13 = arith.constant 0 : index
    %c0_14 = arith.constant 0 : index
    %c8 = arith.constant 8 : index
    %c0_15 = arith.constant 0 : index
    %13 = vector.load %arg2[%c0_13, %c0_14, %c8, %c0_15] : memref<1x1x24x384xbf16, #tpu.memory_space<vmem>>, vector<1x1x16x384xbf16>
    %14 = vector.shape_cast %13 : vector<1x1x16x384xbf16> to vector<16x384xbf16>
    %c2 = arith.constant 2 : index
    %c0_16 = arith.constant 0 : index
    %c0_17 = arith.constant 0 : index
    %15 = vector.load %arg3[%c2, %c0_16, %c0_17] : memref<3x384x256xbf16, #tpu.memory_space<vmem>>, vector<1x384x256xbf16>
    %16 = vector.shape_cast %15 : vector<1x384x256xbf16> to vector<384x256xbf16>
    %cst_18 = arith.constant dense<0.000000e+00> : vector<16x256xf32>
    %17 = tpu.matmul %14, %16, %cst_18 {dimension_numbers = #tpu.dot_dimension_numbers<[1], [0], [0], [1], [0, 0, 1, 1], [], []>} : vector<16x384xbf16>, vector<384x256xbf16>, vector<16x256xf32> -> vector<16x256xf32>
    %18 = arith.addf %12, %17 : vector<16x256xf32>
    %c0_19 = arith.constant 0 : index
    %c0_20 = arith.constant 0 : index
    %19 = vector.load %arg4[%c0_19, %c0_20] : memref<1x256xf32, #tpu.memory_space<vmem>>, vector<1x256xf32>
    %20 = vector.broadcast %19 : vector<1x256xf32> to vector<16x256xf32>
    %21 = arith.addf %18, %20 : vector<16x256xf32>
    %cst_21 = arith.constant 0.000000e+00 : f32
    %22 = vector.broadcast %cst_21 : f32 to vector<16x256xf32>
    %23 = arith.maximumf %21, %22 : vector<16x256xf32>
    %24 = arith.truncf %23 : vector<16x256xf32> to vector<16x256xbf16>
    %c0_22 = arith.constant 0 : index
    %c0_23 = arith.constant 0 : index
    %c0_24 = arith.constant 0 : index
    %25 = vector.load %arg5[%c0_22, %c0_23, %c0_24] : memref<1x16x256xbf16, #tpu.memory_space<vmem>>, vector<1x16x256xbf16>
    %26 = vector.shape_cast %25 : vector<1x16x256xbf16> to vector<16x256xbf16>
    %27 = vector.shape_cast %24 : vector<16x256xbf16> to vector<1x16x256xbf16>
    tpu.vector_store %arg5[%c0_22, %c0_23, %c0_24], %27 {strides = array<i32>} : memref<1x16x256xbf16, #tpu.memory_space<vmem>>, vector<1x16x256xbf16>,
    return
  }
  func.func @transform_0(%arg0: i32, %arg1: i32) -> (i32, i32, i32, i32) {
    %c0_i32 = arith.constant 0 : i32
    %c0_i32_0 = arith.constant 0 : i32
    %c0_i32_1 = arith.constant 0 : i32
    %c0_i32_2 = arith.constant 0 : i32
    return %arg0, %c0_i32, %c0_i32_0, %c0_i32_1 : i32, i32, i32, i32
  }
  func.func @transform_1(%arg0: i32, %arg1: i32) -> (i32, i32, i32) {
    %c0_i32 = arith.constant 0 : i32
    %c0_i32_0 = arith.constant 0 : i32
    %c0_i32_1 = arith.constant 0 : i32
    %c0_i32_2 = arith.constant 0 : i32
    return %c0_i32, %c0_i32_0, %c0_i32_1 : i32, i32, i32
  }
  func.func @transform_2(%arg0: i32, %arg1: i32) -> (i32, i32) {
    %c0_i32 = arith.constant 0 : i32
    %c0_i32_0 = arith.constant 0 : i32
    %c0_i32_1 = arith.constant 0 : i32
    return %c0_i32, %c0_i32_0 : i32, i32
  }
  func.func @transform_3(%arg0: i32, %arg1: i32) -> (i32, i32, i32) {
    %c0_i32 = arith.constant 0 : i32
    %c0_i32_0 = arith.constant 0 : i32
    return %arg0, %arg1, %c0_i32 : i32, i32, i32
  }
}

module attributes {stable_mosaic.version = 11 : i64} {
  func.func @_conv_tap_kernel(%arg0: i32, %arg1: i32, %arg2: memref<1x1x24x768xbf16, #tpu.memory_space<vmem>>, %arg3: memref<3x768x256xbf16, #tpu.memory_space<vmem>>, %arg4: memref<1x256xf32, #tpu.memory_space<vmem>>, %arg5: memref<1x16x256xbf16, #tpu.memory_space<vmem>>, %arg6: memref<1x16x256xbf16, #tpu.memory_space<vmem>>) attributes {dimension_semantics = [#tpu.dimension_semantics<parallel>, #tpu.dimension_semantics<arbitrary>], iteration_bounds = array<i64: 2, 1>, scalar_prefetch = 0 : i64, scratch_operands = 0 : i64, tpu.core_type = #tpu.core_type<tc>, window_params = [{transform_indices = @transform_0, window_bounds = array<i64: 1, 1, 24, 768>}, {pipeline_mode = #tpu.pipeline_mode<synchronous>, transform_indices = @transform_1, window_bounds = array<i64: 3, 768, 256>}, {pipeline_mode = #tpu.pipeline_mode<synchronous>, transform_indices = @transform_2, window_bounds = array<i64: 1, 256>}, {transform_indices = @transform_3, window_bounds = array<i64: 1, 16, 256>}, {transform_indices = @transform_4, window_bounds = array<i64: 1, 16, 256>}]} {
    %cst = arith.constant 0.000000e+00 : f32
    %0 = vector.broadcast %cst : f32 to vector<16x256xf32>
    %c0 = arith.constant 0 : index
    %c0_0 = arith.constant 0 : index
    %c0_1 = arith.constant 0 : index
    %c0_2 = arith.constant 0 : index
    %1 = vector.load %arg2[%c0, %c0_0, %c0_1, %c0_2] : memref<1x1x24x768xbf16, #tpu.memory_space<vmem>>, vector<1x1x16x768xbf16>
    %2 = vector.shape_cast %1 : vector<1x1x16x768xbf16> to vector<16x768xbf16>
    %c0_3 = arith.constant 0 : index
    %c0_4 = arith.constant 0 : index
    %c0_5 = arith.constant 0 : index
    %3 = vector.load %arg3[%c0_3, %c0_4, %c0_5] : memref<3x768x256xbf16, #tpu.memory_space<vmem>>, vector<1x768x256xbf16>
    %4 = vector.shape_cast %3 : vector<1x768x256xbf16> to vector<768x256xbf16>
    %cst_6 = arith.constant dense<0.000000e+00> : vector<16x256xf32>
    %5 = tpu.matmul %2, %4, %cst_6 {dimension_numbers = #tpu.dot_dimension_numbers<[1], [0], [0], [1], [0, 0, 1, 1], [], []>} : vector<16x768xbf16>, vector<768x256xbf16>, vector<16x256xf32> -> vector<16x256xf32>
    %6 = arith.addf %0, %5 : vector<16x256xf32>
    %c0_7 = arith.constant 0 : index
    %c0_8 = arith.constant 0 : index
    %c4 = arith.constant 4 : index
    %c0_9 = arith.constant 0 : index
    %7 = vector.load %arg2[%c0_7, %c0_8, %c4, %c0_9] : memref<1x1x24x768xbf16, #tpu.memory_space<vmem>>, vector<1x1x16x768xbf16>
    %8 = vector.shape_cast %7 : vector<1x1x16x768xbf16> to vector<16x768xbf16>
    %c1 = arith.constant 1 : index
    %c0_10 = arith.constant 0 : index
    %c0_11 = arith.constant 0 : index
    %9 = vector.load %arg3[%c1, %c0_10, %c0_11] : memref<3x768x256xbf16, #tpu.memory_space<vmem>>, vector<1x768x256xbf16>
    %10 = vector.shape_cast %9 : vector<1x768x256xbf16> to vector<768x256xbf16>
    %cst_12 = arith.constant dense<0.000000e+00> : vector<16x256xf32>
    %11 = tpu.matmul %8, %10, %cst_12 {dimension_numbers = #tpu.dot_dimension_numbers<[1], [0], [0], [1], [0, 0, 1, 1], [], []>} : vector<16x768xbf16>, vector<768x256xbf16>, vector<16x256xf32> -> vector<16x256xf32>
    %12 = arith.addf %6, %11 : vector<16x256xf32>
    %c0_13 = arith.constant 0 : index
    %c0_14 = arith.constant 0 : index
    %c8 = arith.constant 8 : index
    %c0_15 = arith.constant 0 : index
    %13 = vector.load %arg2[%c0_13, %c0_14, %c8, %c0_15] : memref<1x1x24x768xbf16, #tpu.memory_space<vmem>>, vector<1x1x16x768xbf16>
    %14 = vector.shape_cast %13 : vector<1x1x16x768xbf16> to vector<16x768xbf16>
    %c2 = arith.constant 2 : index
    %c0_16 = arith.constant 0 : index
    %c0_17 = arith.constant 0 : index
    %15 = vector.load %arg3[%c2, %c0_16, %c0_17] : memref<3x768x256xbf16, #tpu.memory_space<vmem>>, vector<1x768x256xbf16>
    %16 = vector.shape_cast %15 : vector<1x768x256xbf16> to vector<768x256xbf16>
    %cst_18 = arith.constant dense<0.000000e+00> : vector<16x256xf32>
    %17 = tpu.matmul %14, %16, %cst_18 {dimension_numbers = #tpu.dot_dimension_numbers<[1], [0], [0], [1], [0, 0, 1, 1], [], []>} : vector<16x768xbf16>, vector<768x256xbf16>, vector<16x256xf32> -> vector<16x256xf32>
    %18 = arith.addf %12, %17 : vector<16x256xf32>
    %c0_19 = arith.constant 0 : index
    %c0_20 = arith.constant 0 : index
    %19 = vector.load %arg4[%c0_19, %c0_20] : memref<1x256xf32, #tpu.memory_space<vmem>>, vector<1x256xf32>
    %20 = vector.broadcast %19 : vector<1x256xf32> to vector<16x256xf32>
    %21 = arith.addf %18, %20 : vector<16x256xf32>
    %c0_21 = arith.constant 0 : index
    %c0_22 = arith.constant 0 : index
    %c0_23 = arith.constant 0 : index
    %22 = vector.load %arg5[%c0_21, %c0_22, %c0_23] : memref<1x16x256xbf16, #tpu.memory_space<vmem>>, vector<1x16x256xbf16>
    %23 = vector.shape_cast %22 : vector<1x16x256xbf16> to vector<16x256xbf16>
    %24 = arith.extf %23 : vector<16x256xbf16> to vector<16x256xf32>
    %25 = arith.addf %21, %24 : vector<16x256xf32>
    %cst_24 = arith.constant 0.000000e+00 : f32
    %26 = vector.broadcast %cst_24 : f32 to vector<16x256xf32>
    %27 = arith.maximumf %25, %26 : vector<16x256xf32>
    %28 = arith.truncf %27 : vector<16x256xf32> to vector<16x256xbf16>
    %c0_25 = arith.constant 0 : index
    %c0_26 = arith.constant 0 : index
    %c0_27 = arith.constant 0 : index
    %29 = vector.load %arg6[%c0_25, %c0_26, %c0_27] : memref<1x16x256xbf16, #tpu.memory_space<vmem>>, vector<1x16x256xbf16>
    %30 = vector.shape_cast %29 : vector<1x16x256xbf16> to vector<16x256xbf16>
    %31 = vector.shape_cast %28 : vector<16x256xbf16> to vector<1x16x256xbf16>
    tpu.vector_store %arg6[%c0_25, %c0_26, %c0_27], %31 {strides = array<i32>} : memref<1x16x256xbf16, #tpu.memory_space<vmem>>, vector<1x16x256xbf16>,
    return
  }
  func.func @transform_0(%arg0: i32, %arg1: i32) -> (i32, i32, i32, i32) {
    %c0_i32 = arith.constant 0 : i32
    %c0_i32_0 = arith.constant 0 : i32
    %c0_i32_1 = arith.constant 0 : i32
    %c0_i32_2 = arith.constant 0 : i32
    return %arg0, %c0_i32, %c0_i32_0, %c0_i32_1 : i32, i32, i32, i32
  }
  func.func @transform_1(%arg0: i32, %arg1: i32) -> (i32, i32, i32) {
    %c0_i32 = arith.constant 0 : i32
    %c0_i32_0 = arith.constant 0 : i32
    %c0_i32_1 = arith.constant 0 : i32
    %c0_i32_2 = arith.constant 0 : i32
    return %c0_i32, %c0_i32_0, %c0_i32_1 : i32, i32, i32
  }
  func.func @transform_2(%arg0: i32, %arg1: i32) -> (i32, i32) {
    %c0_i32 = arith.constant 0 : i32
    %c0_i32_0 = arith.constant 0 : i32
    %c0_i32_1 = arith.constant 0 : i32
    return %c0_i32, %c0_i32_0 : i32, i32
  }
  func.func @transform_3(%arg0: i32, %arg1: i32) -> (i32, i32, i32) {
    %c0_i32 = arith.constant 0 : i32
    %c0_i32_0 = arith.constant 0 : i32
    return %arg0, %arg1, %c0_i32 : i32, i32, i32
  }
  func.func @transform_4(%arg0: i32, %arg1: i32) -> (i32, i32, i32) {
    %c0_i32 = arith.constant 0 : i32
    %c0_i32_0 = arith.constant 0 : i32
    return %arg0, %arg1, %c0_i32 : i32, i32, i32
  }
}

</mosaic_0001>

<bundles_post_ra>
// kernel: _lambda_.11
= control target key start
LH: loop header
LB: loop body
LE: loop exit
PB: predicated region body
PF: predicated region fallthrough
CT: control target
= control target key end

     0   :  { %s747_s6 = smov 0   ;;  %s1006_s0 = inlined_call_operand.vmem [shape: bf16[2,4,82,64], index: 0, kind: input, shape index: {}]   ;;  %s1007_s1 = inlined_call_operand.vmem [shape: bf16[2,72,64], index: 1, kind: output, shape index: {}]  }
   0x1 LB: > { %s679_s7 = sadd.s32 4294967295, %s735_s6   ;;  %p683_p0 = scmp.ge.s32.totalorder %s735_s6, 1  ;;  %s735_s6 = sphi %s747_s6, %s11_s6  }
   0x2   : > { %p87_p1 = scmp.lt.s32.totalorder %s735_s6, 3 }
   0x4   : > { %p88_p2 = pnand %p683_p0, %p87_p1 }
   0x5   : > { %p107_p3 = scmp.lt.s32.totalorder (!%p88_p2), %s679_s7, 1  ;;  %vm146_vm0 = vsmask.f32 (!%p88_p2), 3328  ;;  %vm147_vm1 = vsmask.f32 (!%p88_p2), 7440  ;;  %vm565_vm2 = vcmask (!%p88_p2), 1042432  }
   0x6   : > { %91 = sbr.rel (%p88_p2) target bundleno = 105 (0x69), region = 24  ;;  %vm566_vm3 = vcmask (!%p88_p2), 1046532   ;;  %vm783_vm4 = vmor (!%p88_p2), %vm146_vm0, %vm147_vm1  ;;  %vm614_vm6 = vcmask (!%p88_p2), 519168  }
   0x7   : > { %vm790_vm5 = vmor (!%p88_p2), %vm565_vm2, %vm566_vm3 }
   0xd   : > { %s1013_s7 = smov (!%p107_p3, %s679_s7), 1 }
   0xe   : > { %s719_s8 = smul.u32 176, %s1013_s7 }
   0xf   : > { %s720_s12 = smul.u32 36, %s1013_s7 }
  0x10   : > { %s761_s11 = scalar_lea.vmem %s1006_s0, %s719_s8 }
  0x11   : > { %v117_v0 = vld [vmem:[%s761_s11] sm:$0xf]  ;;  %v118_v1 = vld [vmem:[%s761_s11 + $0x4] sm:$0xf]  ;;  %v766_v2 = vld [vmem:[%s761_s11 + $0x8] sm:$0xf]  ;;  %s843_s15 = scalar_lea.vmem %s1007_s1, %s720_s12 }
  0x12   : > { %v686_v3 = vld [vmem:[%s761_s11 + $0x2c] sm:$0xf]  ;;  %v687_v4 = vld [vmem:[%s761_s11 + $0x30] sm:$0xf]  ;;  %v150_v7 = vshrl.u32 %v117_v0, 16  ;;  %v153_v8 = vshll.u32 %v117_v0, 16 }
  0x13   : > { %v136_v5 = vmax.bf16 %v686_v3, %v117_v0  ;;  %v137_v6 = vmax.bf16 %v687_v4, %v118_v1  ;;  %v695_v9 = vld [vmem:[%s761_s11 + $0x58] sm:$0xf]  ;;  %v772_v10 = vld [vmem:[%s761_s11 + $0x5c] sm:$0xf]  ;;  %v159_v11 = vshll.u32 %v118_v1, 16  ;;  %v163_v12 = vshrl.u32 %v118_v1, 16 }
  0x14   : > { %v169_v13 = vshll.u32 %v766_v2, 16  ;;  %v301_v14 = vshrl.u32 %v695_v9, 16  ;;  %v152_v15 = vrot.slane %v150_v7, 4  ;;  %v155_v16 = vrot.slane %v153_v8, 5  ;;  %v554_v23 = vld [vmem:[%s761_s11 + $0x4] sm:$0xe] }
  0x15   : > { %v304_v17 = vshll.u32 %v695_v9, 16  ;;  %v310_v18 = vshll.u32 %v772_v10, 16  ;;  %v161_v19 = vrot.slane %v159_v11, 5  ;;  %v165_v20 = vrot.slane %v163_v12, 4  ;;  %v778_v24 = vld [vmem:[%s761_s11 + $0x34] sm:$0xf] }
  0x16   : > { %v171_v21 = vrot.slane %v169_v13, 5  ;;  %v303_v22 = vrot.slane %v301_v14, 4  ;;  %v156_v25 = vor.u32 %v155_v16, %v152_v15  ;;  %v314_v28 = vshrl.u32 %v772_v10, 16  ;;  %v795_v43 = vld [vmem:[%s761_s11 + $0xc] sm:$0xf] }
  0x17   : > { %v306_v26 = vrot.slane %v304_v17, 5  ;;  %v312_v27 = vrot.slane %v310_v18, 5  ;;  %v166_v30 = vor.u32 %v165_v20, %v161_v19  ;;  %v443_v31 = vshrl.u32 %v687_v4, 16  ;;  %v697_v52 = vld [vmem:[%s761_s11 + $0x60] sm:$0xf] }
  0x18   : > { %v446_v32 = vshll.u32 %v687_v4, 16  ;;  %v452_v33 = vshll.u32 %v778_v24, 16  ;;  %v157_v34 = vrot.slane %v156_v25, 4  ;;  %v316_v36 = vrot.slane %v314_v28, 4  ;;  %v704_v54 = vld [vmem:[%s761_s11 + $0x84] sm:$0xf] }
  0x19   : > { %v307_v35 = vor.u32 %v306_v26, %v303_v22  ;;  %v716_v37 = vrot.slane %v554_v23, 9  ;;  %v167_v38 = vrot.slane %v166_v30, 4  ;;  %v445_v39 = vrot.slane %v443_v31, 4  ;;  %v705_v61 = vld [vmem:[%s761_s11 + $0x88] sm:$0xf] }
  0x1a   : > { %v448_v40 = vrot.slane %v446_v32, 5  ;;  %v454_v41 = vrot.slane %v452_v33, 5  ;;  %v162_v44 = vsel %vm783_vm4, %v157_v34, %v161_v19  ;;  %v570_v46 = vrot.slane %v766_v2, 5  ;;  %v826_v19 = vld [vmem:[%s761_s11 + $0x10] sm:$0xf] }
  0x1b   : > { %v308_v45 = vrot.slane %v307_v35, 4  ;;  %v138_v47 = vmax.bf16 %v778_v24, %v766_v2  ;;  %v172_v48 = vsel %vm783_vm4, %v167_v38, %v171_v21  ;;  %v252_v49 = vmax.bf16 %v162_v44, %v136_v5  ;;  %v817_v5 = vld [vmem:[%s761_s11 + $0x38] sm:$0xf]  ;;  %v833_v25 = vld [vmem:[%s761_s11 + $0x64] sm:$0xf] }
  0x1c   : > { %v449_v50 = vor.u32 %v448_v40, %v445_v39  ;;  %v173_v51 = vshrl.u32 %v766_v2, 16  ;;  %v253_v53 = vmax.bf16 %v172_v48, %v137_v6  ;;  %v571_v56 = vsel %vm790_vm5, %v716_v37, %v570_v46  ;;  %v706_v34 = vld [vmem:[%s761_s11 + $0x8c] sm:$0xf] }
  0x1d   : > { %v313_v55 = vsel %vm783_vm4, %v308_v45, %v312_v27  ;;  %v179_v57 = vshll.u32 %v795_v43, 16  ;;  %v271_v58 = vmax.bf16 %v695_v9, %v252_v49  ;;  %v317_v62 = vor.u32 %v316_v36, %v312_v27 }
  0x1e   : > { %v450_v59 = vrot.slane %v449_v50, 4  ;;  %v175_v60 = vrot.slane %v173_v51, 4  ;;  %v272_v63 = vmax.bf16 %v772_v10, %v253_v53  ;;  %v320_v1 = vshll.u32 %v697_v52, 16 }
  0x1f   : > { %v181_v0 = vrot.slane %v179_v57, 5  ;;  %v324_v2 = vshrl.u32 %v697_v52, 16  ;;  %v290_v3 = vmax.bf16 %v704_v54, %v271_v58  ;;  %v318_v7 = vrot.slane %v317_v62, 4  ;;  %v857_v58 = vld [vmem:[%s761_s11 + $0x14] sm:$0xf] }
  0x20   : > { %v455_v4 = vsel %vm783_vm4, %v450_v59, %v454_v41  ;;  %v176_v6 = vor.u32 %v175_v60, %v171_v21  ;;  %v291_v8 = vmax.bf16 %v705_v61, %v272_v63  ;;  %v322_v9 = vrot.slane %v320_v1, 5  ;;  %v699_v63 = vld [vmem:[%s761_s11 + $0x68] sm:$0xf] }
  0x21   : > { %v326_v11 = vrot.slane %v324_v2, 4  ;;  %v456_v10 = vshrl.u32 %v778_v24, 16  ;;  %v403_v12 = vmax.bf16 %v313_v55, %v290_v3  ;;  %v462_v14 = vshll.u32 %v817_v5, 16 }
  0x22   : > { %v177_v13 = vrot.slane %v176_v6, 4  ;;  %v572_v15 = vrot.slane %v570_v46, 4  ;;  %v323_v16 = vsel %vm783_vm4, %v318_v7, %v322_v9  ;;  %v573_v18 = vrot.slane %v795_v43, 5  ;;  %v690_v46 = vld [vmem:[%s761_s11 + $0x3c] sm:$0xf] }
  0x23   : > { %v458_v17 = vrot.slane %v456_v10, 4  ;;  %v139_v20 = vmax.bf16 %v817_v5, %v795_v43  ;;  %v431_v21 = vmax.bf16 %v403_v12, %v172_v48  ;;  %v404_v23 = vmax.bf16 %v323_v16, %v291_v8 }
  0x24   : > { %v182_v22 = vsel %vm783_vm4, %v177_v13, %v181_v0  ;;  %v464_v24 = vrot.slane %v462_v14, 5  ;;  %v574_v28 = vsel %vm790_vm5, %v572_v15, %v573_v18  ;;  %v183_v30 = vshrl.u32 %v795_v43, 16 }
  0x25   : > { %v254_v26 = vmax.bf16 %v182_v22, %v138_v47  ;;  %v459_v27 = vor.u32 %v458_v17, %v454_v41  ;;  %v545_v31 = vmax.bf16 %v455_v4, %v431_v21  ;;  %v432_v32 = vmax.bf16 %v404_v23, %v182_v22  ;;  %v691_v17 = vld [vmem:[%s761_s11 + $0x40] sm:$0xf] }
  0x26   : > { %v189_v33 = vshll.u32 %v826_v19, 16  ;;  %v327_v35 = vor.u32 %v326_v11, %v322_v9  ;;  %v185_v38 = vrot.slane %v183_v30, 4  ;;  %v330_v39 = vshll.u32 %v833_v25, 16  ;;  %v707_v9 = vld [vmem:[%s761_s11 + $0x90] sm:$0xf] }
  0x27   : > { %v273_v36 = vmax.bf16 %v697_v52, %v254_v26  ;;  %v460_v37 = vrot.slane %v459_v27, 4  ;;  %v605_v40 = vmax.bf16 %v571_v56, %v545_v31  ;;  %v334_v44 = vshrl.u32 %v833_v25, 16 }
  0x28   : > { %v191_v41 = vrot.slane %v189_v33, 5  ;;  %v328_v43 = vrot.slane %v327_v35, 4  ;;  %v186_v47 = vor.u32 %v185_v38, %v181_v0  ;;  %v332_v49 = vrot.slane %v330_v39, 5  ;;  %v878_v35 = vld [vmem:[%s761_s11 + $0x18] sm:$0xf] }
  0x29   : > { %v465_v45 = vsel %vm783_vm4, %v460_v37, %v464_v24  ;;  %v292_v48 = vmax.bf16 %v706_v34, %v273_v36  ;;  %615 = vst.msk [vmem:[%s843_s15] sm:$0xf] %vm614_vm6, %v605_v40  ;;  %v336_v51 = vrot.slane %v334_v44, 4  ;;  %v466_v52 = vshrl.u32 %v817_v5, 16  ;;  %v700_v36 = vld [vmem:[%s761_s11 + $0x6c] sm:$0xf] }
  0x2a   : > { %v546_v50 = vmax.bf16 %v465_v45, %v432_v32  ;;  %v472_v53 = vshll.u32 %v690_v46, 16  ;;  %v187_v54 = vrot.slane %v186_v47, 4  ;;  %v333_v55 = vsel %vm783_vm4, %v328_v43, %v332_v49 }
  0x2b   : > { %v575_v56 = vrot.slane %v573_v18, 4  ;;  %v576_v57 = vrot.slane %v826_v19, 5  ;;  %v405_v60 = vmax.bf16 %v333_v55, %v292_v48  ;;  %v468_v61 = vrot.slane %v466_v52, 4  ;;  %v708_v48 = vld [vmem:[%s761_s11 + $0x94] sm:$0xf] }
  0x2c   : > { %v606_v59 = vmax.bf16 %v574_v28, %v546_v50  ;;  %v474_v62 = vrot.slane %v472_v53, 5  ;;  %v192_v0 = vsel %vm783_vm4, %v187_v54, %v191_v41  ;;  %v140_v2 = vmax.bf16 %v690_v46, %v826_v19 }
  0x2d   : > { %v577_v1 = vsel %vm790_vm5, %v575_v56, %v576_v57  ;;  %v193_v3 = vshrl.u32 %v826_v19, 16  ;;  %v255_v4 = vmax.bf16 %v192_v0, %v139_v20  ;;  %v433_v5 = vmax.bf16 %v405_v60, %v192_v0  ;;  %v692_v56 = vld [vmem:[%s761_s11 + $0x44] sm:$0xf] }
  0x2e   : > { %616 = vst.msk [vmem:[%s843_s15 + $0x4] sm:$0xf] %vm614_vm6, %v606_v59  ;;  %v469_v6 = vor.u32 %v468_v61, %v464_v24  ;;  %v199_v7 = vshll.u32 %v857_v58, 16  ;;  %v337_v11 = vor.u32 %v336_v51, %v332_v49  ;;  %v340_v10 = vshll.u32 %v699_v63, 16 }
  0x2f   : > { %v195_v8 = vrot.slane %v193_v3, 4  ;;  %v344_v12 = vshrl.u32 %v699_v63, 16  ;;  %v274_v13 = vmax.bf16 %v833_v25, %v255_v4  ;;  %v476_v16 = vshrl.u32 %v690_v46, 16  ;;  %v895_v4 = vld [vmem:[%s761_s11 + $0x1c] sm:$0xf] }
  0x30   : > { %v470_v14 = vrot.slane %v469_v6, 4  ;;  %v201_v15 = vrot.slane %v199_v7, 5  ;;  %v338_v19 = vrot.slane %v337_v11, 4  ;;  %v342_v20 = vrot.slane %v340_v10, 5 }
  0x31   : > { %v196_v18 = vor.u32 %v195_v8, %v191_v41  ;;  %v346_v21 = vrot.slane %v344_v12, 4  ;;  %v293_v23 = vmax.bf16 %v707_v9, %v274_v13  ;;  %v478_v24 = vrot.slane %v476_v16, 4  ;;  %v902_v9 = vld [vmem:[%s761_s11 + $0x70] sm:$0xf] }
  0x32   : > { %v475_v22 = vsel %vm783_vm4, %v470_v14, %v474_v62  ;;  %v482_v26 = vshll.u32 %v691_v17, 16  ;;  %v343_v25 = vsel %vm783_vm4, %v338_v19, %v342_v20  ;;  %v578_v30 = vrot.slane %v576_v57, 4 }
  0x33   : > { %v547_v27 = vmax.bf16 %v475_v22, %v433_v5  ;;  %v197_v28 = vrot.slane %v196_v18, 4  ;;  %v406_v31 = vmax.bf16 %v343_v25, %v293_v23  ;;  %v479_v32 = vor.u32 %v478_v24, %v474_v62  ;;  %v693_v25 = vld [vmem:[%s761_s11 + $0x48] sm:$0xf] }
  0x34   : > { %v484_v33 = vrot.slane %v482_v26, 5  ;;  %v579_v34 = vrot.slane %v857_v58, 5  ;;  %v141_v39 = vmax.bf16 %v691_v17, %v857_v58  ;;  %v203_v40 = vshrl.u32 %v857_v58, 16 }
  0x35   : > { %v607_v37 = vmax.bf16 %v577_v1, %v547_v27  ;;  %v202_v38 = vsel %vm783_vm4, %v197_v28, %v201_v15  ;;  %v480_v44 = vrot.slane %v479_v32, 4  ;;  %v209_v47 = vshll.u32 %v878_v35, 16 }
  0x36   : > { %v256_v41 = vmax.bf16 %v202_v38, %v140_v2  ;;  %v434_v43 = vmax.bf16 %v406_v31, %v202_v38  ;;  %v580_v45 = vsel %vm790_vm5, %v578_v30, %v579_v34  ;;  %v205_v46 = vrot.slane %v203_v40, 4  ;;  %v919_v38 = vld [vmem:[%s761_s11 + $0x4c] sm:$0xf] }
  0x37   : > { %617 = vst.msk [vmem:[%s843_s15 + $0x8] sm:$0xf] %vm614_vm6, %v607_v37  ;;  %v347_v49 = vor.u32 %v346_v21, %v342_v20  ;;  %v350_v50 = vshll.u32 %v700_v36, 16  ;;  %v485_v52 = vsel %vm783_vm4, %v480_v44, %v484_v33  ;;  %v354_v53 = vshrl.u32 %v700_v36, 16  ;;  %v709_v20 = vld [vmem:[%s761_s11 + $0x98] sm:$0xf] }
  0x38   : > { %v275_v51 = vmax.bf16 %v699_v63, %v256_v41  ;;  %v486_v54 = vshrl.u32 %v691_v17, 16  ;;  %v548_v55 = vmax.bf16 %v485_v52, %v434_v43  ;;  %v206_v57 = vor.u32 %v205_v46, %v201_v15  ;;  %v924_v43 = vld [vmem:[%s761_s11 + $0x20] sm:$0xf] }
  0x39   : > { %v211_v58 = vrot.slane %v209_v47, 5  ;;  %v348_v59 = vrot.slane %v347_v49, 4  ;;  %v352_v61 = vrot.slane %v350_v50, 5  ;;  %v356_v62 = vrot.slane %v354_v53, 4 }
  0x3a   : > { %v294_v60 = vmax.bf16 %v708_v48, %v275_v51  ;;  %v488_v0 = vrot.slane %v486_v54, 4  ;;  %v608_v1 = vmax.bf16 %v580_v45, %v548_v55  ;;  %v207_v2 = vrot.slane %v206_v57, 4  ;;  %v702_v48 = vld [vmem:[%s761_s11 + $0x74] sm:$0xf] }
  0x3b   : > { %v492_v63 = vshll.u32 %v692_v56, 16  ;;  %v581_v3 = vrot.slane %v579_v34, 4  ;;  %v353_v5 = vsel %vm783_vm4, %v348_v59, %v352_v61  ;;  %v582_v7 = vrot.slane %v878_v35, 5  ;;  %v710_v59 = vld [vmem:[%s761_s11 + $0x9c] sm:$0xf] }
  0x3c   : > { %v489_v6 = vor.u32 %v488_v0, %v484_v33  ;;  %v142_v8 = vmax.bf16 %v692_v56, %v878_v35  ;;  %618 = vst.msk [vmem:[%s843_s15 + $0xc] sm:$0xf] %vm614_vm6, %v608_v1  ;;  %v212_v11 = vsel %vm783_vm4, %v207_v2, %v211_v58  ;;  %v407_v10 = vmax.bf16 %v353_v5, %v294_v60 }
  0x3d   : > { %v494_v12 = vrot.slane %v492_v63, 5  ;;  %v213_v13 = vshrl.u32 %v878_v35, 16  ;;  %v257_v14 = vmax.bf16 %v212_v11, %v141_v39  ;;  %v583_v16 = vsel %vm790_vm5, %v581_v3, %v582_v7 }
  0x3e   : > { %v490_v15 = vrot.slane %v489_v6, 4  ;;  %v219_v17 = vshll.u32 %v895_v4, 16  ;;  %v435_v18 = vmax.bf16 %v407_v10, %v212_v11  ;;  %v357_v21 = vor.u32 %v356_v62, %v352_v61 }
  0x3f   : > { %v215_v19 = vrot.slane %v213_v13, 4  ;;  %v360_v22 = vshll.u32 %v902_v9, 16  ;;  %v276_v23 = vmax.bf16 %v700_v36, %v257_v14  ;;  %v364_v27 = vshrl.u32 %v902_v9, 16 }
  0x40   : > { %v495_v24 = vsel %vm783_vm4, %v490_v15, %v494_v12  ;;  %v221_v26 = vrot.slane %v219_v17, 5  ;;  %v358_v31 = vrot.slane %v357_v21, 4  ;;  %v496_v35 = vshrl.u32 %v692_v56, 16 }
  0x41   : > { %v549_v28 = vmax.bf16 %v495_v24, %v435_v18  ;;  %v216_v30 = vor.u32 %v215_v19, %v211_v58  ;;  %v362_v32 = vrot.slane %v360_v22, 5  ;;  %v295_v33 = vmax.bf16 %v709_v20, %v276_v23  ;;  %v948_v18 = vld [vmem:[%s761_s11 + $0x78] sm:$0xf]  ;;  %v951_v19 = vld [vmem:[%s761_s11 + $0x24] sm:$0xf] }
  0x42   : > { %v366_v34 = vrot.slane %v364_v27, 4  ;;  %v502_v37 = vshll.u32 %v693_v25, 16  ;;  %v584_v41 = vrot.slane %v582_v7, 4  ;;  %v498_v45 = vrot.slane %v496_v35, 4 }
  0x43   : > { %v609_v36 = vmax.bf16 %v583_v16, %v549_v28  ;;  %v217_v39 = vrot.slane %v216_v30, 4  ;;  %v363_v40 = vsel %vm783_vm4, %v358_v31, %v362_v32  ;;  %v585_v47 = vrot.slane %v895_v4, 5  ;;  %v711_v30 = vld [vmem:[%s761_s11 + $0xa0] sm:$0xf] }
  0x44   : > { %v408_v44 = vmax.bf16 %v363_v40, %v295_v33  ;;  %v504_v46 = vrot.slane %v502_v37, 5  ;;  %v143_v50 = vmax.bf16 %v693_v25, %v895_v4  ;;  %v144_v51 = vmax.bf16 %v919_v38, %v924_v43 }
  0x45   : > { %619 = vst.msk [vmem:[%s843_s15 + $0x10] sm:$0xf] %vm614_vm6, %v609_v36  ;;  %v222_v49 = vsel %vm783_vm4, %v217_v39, %v221_v26  ;;  %v223_v52 = vshrl.u32 %v895_v4, 16  ;;  %v499_v55 = vor.u32 %v498_v45, %v494_v12  ;;  %v586_v56 = vsel %vm790_vm5, %v584_v41, %v585_v47  ;;  %v714_v36 = vld [vmem:[%s761_s11 + $0x50] sm:$0xf] }
  0x46   : > { %v258_v53 = vmax.bf16 %v222_v49, %v142_v8  ;;  %v436_v54 = vmax.bf16 %v408_v44, %v222_v49  ;;  %v229_v58 = vshll.u32 %v924_v43, 16  ;;  %v367_v60 = vor.u32 %v366_v34, %v362_v32 }
  0x47   : > { %v225_v57 = vrot.slane %v223_v52, 4  ;;  %v370_v61 = vshll.u32 %v702_v48, 16  ;;  %v500_v0 = vrot.slane %v499_v55, 4  ;;  %v374_v1 = vshrl.u32 %v702_v48, 16 }
  0x48   : > { %v277_v62 = vmax.bf16 %v902_v9, %v258_v53  ;;  %v506_v2 = vshrl.u32 %v693_v25, 16  ;;  %v231_v3 = vrot.slane %v229_v58, 5  ;;  %v368_v4 = vrot.slane %v367_v60, 4 }
  0x49   : > { %v226_v63 = vor.u32 %v225_v57, %v221_v26  ;;  %v372_v5 = vrot.slane %v370_v61, 5  ;;  %v505_v6 = vsel %vm783_vm4, %v500_v0, %v504_v46  ;;  %v376_v8 = vrot.slane %v374_v1, 4  ;;  %v413_v61 = vld [vmem:[%s761_s11 + $0x28] sm:$0x1] }
  0x4a   : > { %v296_v7 = vmax.bf16 %v710_v59, %v277_v62  ;;  %v508_v11 = vrot.slane %v506_v2, 4  ;;  %v550_v10 = vmax.bf16 %v505_v6, %v436_v54  ;;  %v512_v13 = vshll.u32 %v919_v38, 16 }
  0x4b   : > { %v227_v12 = vrot.slane %v226_v63, 4  ;;  %v373_v9 = vsel %vm783_vm4, %v368_v4, %v372_v5  ;;  %v587_v16 = vrot.slane %v585_v47, 4  ;;  %v588_v17 = vrot.slane %v924_v43, 5 }
  0x4c   : > { %v409_v14 = vmax.bf16 %v373_v9, %v296_v7  ;;  %v509_v15 = vor.u32 %v508_v11, %v504_v46  ;;  %v610_v20 = vmax.bf16 %v586_v56, %v550_v10  ;;  %v514_v22 = vrot.slane %v512_v13, 5  ;;  %v713_v56 = vld [vmem:[%s761_s11 + $0x7c] sm:$0x1]  ;;  %v715_v11 = vld [vmem:[%s761_s11 + $0x54] sm:$0x1] }
  0x4d   : > { %v232_v21 = vsel %vm783_vm4, %v227_v12, %v231_v3  ;;  %v233_v23 = vshrl.u32 %v924_v43, 16  ;;  %v589_v28 = vsel %vm790_vm5, %v587_v16, %v588_v17  ;;  %v377_v31 = vor.u32 %v376_v8, %v372_v5 }
  0x4e   : > { %v259_v24 = vmax.bf16 %v232_v21, %v143_v50  ;;  %v437_v26 = vmax.bf16 %v409_v14, %v232_v21  ;;  %v510_v27 = vrot.slane %v509_v15, 4  ;;  %620 = vst.msk [vmem:[%s843_s15 + $0x14] sm:$0xf] %vm614_vm6, %v610_v20  ;;  %v380_v32 = vshll.u32 %v948_v18, 16 }
  0x4f   : > { %v235_v25 = vrot.slane %v233_v23, 4  ;;  %v415_v33 = vshll.u32 %v951_v19, 16  ;;  %v419_v37 = vshrl.u32 %v951_v19, 16  ;;  %v516_v39 = vshrl.u32 %v919_v38, 16  ;;  %v712_v23 = vld [vmem:[%s761_s11 + $0xa4] sm:$0xf] }
  0x50   : > { %v278_v34 = vmax.bf16 %v702_v48, %v259_v24  ;;  %v515_v35 = vsel %vm783_vm4, %v510_v27, %v514_v22  ;;  %v378_v44 = vrot.slane %v377_v31, 4  ;;  %v382_v45 = vrot.slane %v380_v32, 5  ;;  %v145_v48 = vld [vmem:[%s761_s11 + $0x24] sm:$0x1] }
  0x51   : > { %v551_v40 = vmax.bf16 %v515_v35, %v437_v26  ;;  %v236_v41 = vor.u32 %v235_v25, %v231_v3  ;;  %v417_v47 = vrot.slane %v415_v33, 5  ;;  %v421_v49 = vrot.slane %v419_v37, 4 }
  0x52   : > { %v297_v46 = vmax.bf16 %v711_v30, %v278_v34  ;;  %v518_v50 = vrot.slane %v516_v39, 4  ;;  %v383_v54 = vsel %vm783_vm4, %v378_v44, %v382_v45  ;;  %v522_v55 = vshll.u32 %v714_v36, 16 }
  0x53   : > { %v611_v52 = vmax.bf16 %v589_v28, %v551_v40  ;;  %v237_v53 = vrot.slane %v236_v41, 4  ;;  %v526_v59 = vshrl.u32 %v714_v36, 16  ;;  %v590_v60 = vrot.slane %v588_v17, 4 }
  0x54   : > { %v410_v57 = vmax.bf16 %v383_v54, %v297_v46  ;;  %v519_v58 = vor.u32 %v518_v50, %v514_v22  ;;  %v524_v0 = vrot.slane %v522_v55, 5  ;;  %v591_v1 = vrot.slane %v951_v19, 5 }
  0x55   : > { %621 = vst.msk [vmem:[%s843_s15 + $0x18] sm:$0xf] %vm614_vm6, %v611_v52  ;;  %v418_v62 = vsel %vm783_vm4, %v237_v53, %v417_v47  ;;  %v239_v2 = vshll.u32 %v145_v48, 16  ;;  %v384_v4 = vshrl.u32 %v948_v18, 16  ;;  %v390_v5 = vshll.u32 %v713_v56, 16 }
  0x56   : > { %v438_v63 = vmax.bf16 %v418_v62, %v410_v57  ;;  %v520_v3 = vrot.slane %v519_v58, 4  ;;  %v422_v7 = vor.u32 %v421_v49, %v417_v47  ;;  %v425_v8 = vshll.u32 %v413_v61, 16 }
  0x57   : > { %v241_v6 = vrot.slane %v239_v2, 5  ;;  %v592_v12 = vsel %vm790_vm5, %v590_v60, %v591_v1  ;;  %v386_v9 = vrot.slane %v384_v4, 4  ;;  %v528_v13 = vrot.slane %v526_v59, 4 }
  0x58   : > { %v525_v10 = vsel %vm783_vm4, %v520_v3, %v524_v0  ;;  %v392_v16 = vrot.slane %v390_v5, 5  ;;  %v532_v21 = vshll.u32 %v715_v11, 16  ;;  %v423_v24 = vrot.slane %v422_v7, 4 }
  0x59   : > { %v552_v14 = vmax.bf16 %v525_v10, %v438_v63  ;;  %v242_v15 = vsel %vm783_vm4, %v237_v53, %v241_v6  ;;  %v387_v19 = vor.u32 %v386_v9, %v382_v45  ;;  %v529_v20 = vor.u32 %v528_v13, %v524_v0 }
  0x5a   : > { %v260_v17 = vmax.bf16 %v242_v15, %v144_v51  ;;  %v427_v26 = vrot.slane %v425_v8, 5  ;;  %v534_v30 = vrot.slane %v532_v21, 5  ;;  %v593_v51 = vrot.slane %v591_v1, 4 }
  0x5b   : > { %v612_v22 = vmax.bf16 %v592_v12, %v552_v14  ;;  %v388_v28 = vrot.slane %v387_v19, 4  ;;  %v530_v25 = vrot.slane %v529_v20, 4  ;;  %v594_v32 = vrot.slane %v413_v61, 5 }
  0x5c   : > { %v279_v27 = vmax.bf16 %v948_v18, %v260_v17  ;;  %v428_v43 = vsel %vm783_vm4, %v423_v24, %v427_v26 }
  0x5d   : > { %622 = vst.msk [vmem:[%s843_s15 + $0x1c] sm:$0xf] %vm614_vm6, %v612_v22  ;;  %v393_v38 = vsel %vm783_vm4, %v388_v28, %v392_v16  ;;  %v535_v34 = vsel %vm783_vm4, %v530_v25, %v534_v30  ;;  %v595_v35 = vsel %vm790_vm5, %v593_v51, %v594_v32 }
  0x5e   : > { %v298_v31 = vmax.bf16 %v712_v23, %v279_v27 }
  0x60   : > { %v411_v33 = vmax.bf16 %v393_v38, %v298_v31 }
  0x62   : > { %v439_v18 = vmax.bf16 %v428_v43, %v411_v33 }
  0x64   : > { %v553_v37 = vmax.bf16 %v535_v34, %v439_v18 }
  0x66   : > { %v613_v36 = vmax.bf16 %v595_v35, %v553_v37 }
  0x68   : > { %623 = vst.msk [vmem:[%s843_s15 + $0x20] sm:$0xf] %vm614_vm6, %v613_v36 }
  0x69 PF: > { %s11_s6 = sadd.s32 1, %s735_s6  }
  0x6a   : > { %p8_p4 = scmp.ge.s32.totalorder %s11_s6, 4  }
  0x6c   :  { %10 = sbr.rel (!%p8_p4) target bundleno = 1 (0x1), region = 57 }

// kernel: _lambda_.10
= control target key start
LH: loop header
LB: loop body
LE: loop exit
PB: predicated region body
PF: predicated region fallthrough
CT: control target
= control target key end

     0   :  { %s4234_s12 = smov 0   ;;  %s4236_s13 = smov 0   ;;  %s4690_s0 = inlined_call_operand.vmem [shape: bf16[2,2,304,24], index: 0, kind: input, shape index: {}]   ;;  %s4691_s1 = inlined_call_operand.vmem [shape: bf16[7,24,64], index: 1, kind: input, shape index: {}]   ;;  %s4692_s2 = inlined_call_operand.vmem [shape: f32[1,64], index: 2, kind: input, shape index: {}]   ;;  %s4693_s3 = inlined_call_operand.vmem [shape: bf16[2,256,64], index: 3, kind: output, shape index: {}]  }
   0x1   :  { %s4238_s14 = smov 0  }
   0x2 LB: > { %s25_s15 = sadd.s32 1, %s4208_s13  ;;  %p3033_p0 = scmp.ge.s32.totalorder %s4212_s14, 1  ;;  %s4212_s14 = sphi %s4238_s14, %s13_s14   ;;  %s4208_s13 = sphi %s4236_s13, %s4695_s13   ;;  %s4204_s12 = sphi %s4234_s12, %s4694_s12  }
   0x3   : > { %p27_p1 = scmp.ge.s32.totalorder %s25_s15, 2  ;;  %p151_p2 = scmp.lt.s32.totalorder %s4212_s14, 3 }
   0x5   : > { %s4697_s15 = smov (%p27_p1, %s25_s15), 0  ;;  %p152_p3 = pnand %p3033_p0, %p151_p2 }
   0x6   : > { %v4064_v0 = vld [vmem:[%s4691_s1 + $0xc] sm:$0xff] (!%p152_p3)   ;;  %vm405_vm0 = vcmask (!%p152_p3), 1043456   ;;  %v4258_v1 = vld [vmem:[%s4691_s1 + $0x24] sm:$0xff] (!%p152_p3)   ;;  %p179_p4 = scmp.lt.s32.totalorder (!%p152_p3), %s4204_s12, 1  ;;  %v4066_v2 = vld [vmem:[%s4691_s1 + $0x14] ss:$0 sps:$4 sm:$0xff] (!%p152_p3)  }
   0x7   : > { %155 = sbr.rel (%p152_p3) target bundleno = 460 (0x1cc), region = 32  ;;  %3583 = vmatprep.subr.bf16.mxu1 (!%p152_p3), %v4064_v0  ;;  %3691 = vmatprep.subr.bf16.mxu0 (!%p152_p3), %v4258_v1  ;;  %v4267_v3 = vld [vmem:[%s4691_s1 + $0x2c] ss:$0 sps:$4 sm:$0xff] (!%p152_p3)   ;;  %v407_v4 = vsel (!%p152_p3), %vm405_vm0, %v4066_v2, 0  ;;  %v4071_v5 = vld [vmem:[%s4691_s1] sm:$0xff] (!%p152_p3)   ;;  %v4073_v7 = vld [vmem:[%s4691_s1 + $0x30] sm:$0xff] (!%p152_p3)  }
   0x8   : > { %3584 = vmatpush3.bf16.msra.mxu1 (!%p152_p3), %v4064_v0  ;;  %3692 = vmatpush3.bf16.msra.mxu0 (!%p152_p3), %v4258_v1  ;;  %v4281_v6 = vsel (!%p152_p3), %vm405_vm0, %v4267_v3, 0  ;;  %vm356_vm1 = vcmask (!%p152_p3), 195584   ;;  %v4090_v9 = vld [vmem:[%s4691_s1 + $0x8] ss:$0 sps:$4 sm:$0xff] (!%p152_p3)   ;;  %v4082_v11 = vld [vmem:[%s4691_s1 + $0x38] ss:$0 sps:$4 sm:$0xff] (!%p152_p3)  }
   0x9   : > { %4031 = vmatprep.subr.msk.bf16.mxu1 (!%p152_p3), %vm405_vm0, %v4066_v2  ;;  %4034 = vmatprep.subr.msk.bf16.mxu0 (!%p152_p3), %vm405_vm0, %v4267_v3  ;;  %v4092_v16 = vld [vmem:[%s4691_s1 + $0x3c] sm:$0xff] (!%p152_p3)   ;;  %v708_v17 = vsel (!%p152_p3), %vm405_vm0, %v4090_v9, 0  ;;  %v1783_v19 = vsel (!%p152_p3), %vm405_vm0, %v4082_v11, 0  ;;  %v4110_v36 = vld [vmem:[%s4691_s1 + $0x44] ss:$0 sps:$4 sm:$0xff] (!%p152_p3)   ;;  %v4128_v47 = vld [vmem:[%s4691_s1 + $0x48] sm:$0xff] (!%p152_p3)  }
   0xa   : > { %v4108_v35 = vld [vmem:[%s4691_s1 + $0x18] sm:$0xff] (!%p152_p3)   ;;  %v2152_v38 = vsel (!%p152_p3), %vm405_vm0, %v4110_v36, 0  ;;  %v4126_v55 = vld [vmem:[%s4691_s1 + $0x20] ss:$0 sps:$4 sm:$0xff] (!%p152_p3)   ;;  %vm2915_vm2 = vcmask (!%p152_p3), 519168  }
   0xb   : > { %v1045_v56 = vsel (!%p152_p3), %vm405_vm0, %v4126_v55, 0 }
   0xc   : > { %3586 = vmatpush3.bf16.msra.mxu1 (!%p152_p3), %v407_v4  ;;  %3694 = vmatpush3.bf16.msra.mxu0 (!%p152_p3), %v4281_v6 }
   0xd   : > { %3619 = vmatprep.subr.bf16.mxu1 (!%p152_p3), %v4071_v5  ;;  %3727 = vmatprep.subr.bf16.mxu0 (!%p152_p3), %v4073_v7 }
   0xe   : > { %s4699_s12 = smov (!%p179_p4, %s4204_s12), 1 }
   0xf   : > { %s4039_s26 = smul.u32 304, %s4699_s12  ;;  %s3424_s27 = sshll.u32 %s4699_s12, 7 }
  0x10   : > { %s4580_s30 = scalar_lea.vmem %s4693_s3, %s3424_s27 }
  0x11   : > { %s4290_s4 = scalar_lea.vmem %s4690_s0, %s4039_s26 }
  0x12   : > { %v4068_v8 = vld [vmem:[%s4290_s4 + $0x98] sm:$0xff]   ;;  %v4069_v10 = vld [vmem:[%s4290_s4 + $0xa0] sm:$0xff]   ;;  %v4072_v13 = vld [vmem:[%s4290_s4 + $0xa8] sm:$0xff]  }
  0x13   : > { %3587 = vmatprep.mubr.msk.bf16.mxu1 %vm356_vm1, %v4068_v8  ;;  %v4070_v12 = vld [vmem:[%s4290_s4 + $0xa0] sm:$0xff]   ;;  %3695 = vmatprep.mubr.msk.bf16.mxu0 %vm356_vm1, %v4069_v10  ;;  %v4074_v14 = vld [vmem:[%s4290_s4 + $0xa8] sm:$0xff]   ;;  %v4075_v15 = vld [vmem:[%s4290_s4 + $0xb0] sm:$0xff]  }
  0x14   : > { %3588 = vmatmul.mubr.msk.bf16.vlgmr.msra.gmra.mrb[0].mxu1 %vm356_vm1, %v4070_v12  ;;  %3696 = vmatmul.mubr.msk.bf16.vlgmr.msra.gmra.mrb[0].mxu0 %vm356_vm1, %v4072_v13  ;;  %v4076_v18 = vld [vmem:[%s4290_s4 + $0xb0] sm:$0xff]   ;;  %v4077_v20 = vld [vmem:[%s4290_s4 + $0xb8] sm:$0xff]   ;;  %v4079_v22 = vld [vmem:[%s4290_s4 + $0xc0] sm:$0xff]  }
  0x15   : > { %3620 = vmatpush3.bf16.msra.mxu1 %v4071_v5  ;;  %3728 = vmatpush3.bf16.msra.mxu0 %v4073_v7  ;;  %v4078_v21 = vld [vmem:[%s4290_s4 + $0xb8] sm:$0xff]   ;;  %v4080_v23 = vld [vmem:[%s4290_s4 + $0xc0] sm:$0xff]   ;;  %v4081_v24 = vld [vmem:[%s4290_s4 + $0xc8] sm:$0xff]  }
  0x16   : > { %3591 = vmatprep.mubr.msk.bf16.mxu1 %vm356_vm1, %v4074_v14  ;;  %3699 = vmatprep.mubr.msk.bf16.mxu0 %vm356_vm1, %v4075_v15  ;;  %v4083_v25 = vld [vmem:[%s4290_s4 + $0xc8] sm:$0xff]   ;;  %v4084_v26 = vld [vmem:[%s4290_s4 + $0xd0] sm:$0xff]   ;;  %v4086_v28 = vld [vmem:[%s4290_s4 + $0xd8] sm:$0xff]  }
  0x17   : > { %4036 = vmatprep.subr.msk.bf16.mxu0 %vm405_vm0, %v4082_v11  ;;  %4032 = vmatprep.subr.msk.bf16.mxu1 %vm405_vm0, %v4090_v9  ;;  %v4085_v27 = vld [vmem:[%s4290_s4 + $0xd0] sm:$0xff]   ;;  %v4087_v29 = vld [vmem:[%s4290_s4 + $0xd8] sm:$0xff]   ;;  %v4089_v31 = vld [vmem:[%s4290_s4 + $0xe0] sm:$0xff]  }
  0x18   : > { %v4088_v30 = vld [vmem:[%s4290_s4 + $0x10] sm:$0xff]   ;;  %v4091_v32 = vld [vmem:[%s4290_s4 + $0x18] sm:$0xff]   ;;  %v4093_v33 = vld [vmem:[%s4290_s4 + $0xe8] sm:$0xff]  }
  0x19   : > { %3622 = vmatpush3.bf16.msra.mxu1 %v708_v17  ;;  %3730 = vmatpush3.bf16.msra.mxu0 %v1783_v19  ;;  %v4094_v34 = vld [vmem:[%s4290_s4 + $0x20] sm:$0xff]   ;;  %v4095_v37 = vld [vmem:[%s4290_s4 + $0xf0] sm:$0xff]   ;;  %v4096_v39 = vld [vmem:[%s4290_s4 + $0x28] sm:$0xff]  }
  0x1a   : > { %3763 = vmatprep.subr.bf16.mxu0 %v4092_v16  ;;  %3655 = vmatprep.subr.bf16.mxu1 %v4108_v35  ;;  %v4097_v40 = vld [vmem:[%s4290_s4 + $0xf8] sm:$0xff]   ;;  %v4098_v41 = vld [vmem:[%s4290_s4 + $0x30] sm:$0xff]   ;;  %v4099_v42 = vld [vmem:[%s4290_s4 + $0x100] sm:$0xff]  }
  0x1b   : > { %v4100_v43 = vld [vmem:[%s4290_s4 + $0x38] sm:$0xff]   ;;  %v4101_v44 = vld [vmem:[%s4290_s4 + $0x108] sm:$0xff]   ;;  %v4102_v45 = vld [vmem:[%s4290_s4 + $0x40] sm:$0xff]  }
  0x1c   : > { %3592 = vmatmul.mubr.msk.bf16.gmra.mrb[4].mxu1 %vm356_vm1, %v4076_v18  ;;  %3700 = vmatmul.mubr.msk.bf16.gmra.mrb[4].mxu0 %vm356_vm1, %v4077_v20  ;;  %v4103_v46 = vld [vmem:[%s4290_s4 + $0x110] sm:$0xff]   ;;  %v4104_v48 = vld [vmem:[%s4290_s4 + $0x48] sm:$0xff]   ;;  %v4105_v49 = vld [vmem:[%s4290_s4] sm:$0xff]  }
  0x1d   : > { %3595 = vmatprep.mubr.msk.bf16.mxu1 %vm356_vm1, %v4078_v21  ;;  %3703 = vmatprep.mubr.msk.bf16.mxu0 %vm356_vm1, %v4079_v22  ;;  %v4106_v50 = vld [vmem:[%s4290_s4 + $0x50] sm:$0xff]   ;;  %v4107_v51 = vld [vmem:[%s4290_s4 + $0x8] sm:$0xff]   ;;  %v4109_v52 = vld [vmem:[%s4290_s4 + $0x58] sm:$0xff]  }
  0x1e   : > { %v4111_v53 = vld [vmem:[%s4290_s4 + $0x10] sm:$0xff]   ;;  %v4112_v54 = vld [vmem:[%s4290_s4 + $0x60] sm:$0xff]   ;;  %v4113_v57 = vld [vmem:[%s4290_s4 + $0x18] sm:$0xff]  }
  0x1f   : > { %v4114_v58 = vld [vmem:[%s4290_s4 + $0x68] sm:$0xff]   ;;  %v4115_v59 = vld [vmem:[%s4290_s4 + $0x20] sm:$0xff]   ;;  %v4116_v60 = vld [vmem:[%s4290_s4 + $0x70] sm:$0xff]  }
  0x20   : > { %v4117_v61 = vld [vmem:[%s4290_s4 + $0x28] sm:$0xff]   ;;  %v4118_v62 = vld [vmem:[%s4290_s4 + $0x78] sm:$0xff]   ;;  %v4119_v63 = vld [vmem:[%s4290_s4 + $0x30] sm:$0xff]  }
  0x21   : > { %v4120_v0 = vld [vmem:[%s4290_s4 + $0x80] sm:$0xff]   ;;  %v4121_v2 = vld [vmem:[%s4290_s4 + $0x38] sm:$0xff]   ;;  %v4122_v4 = vld [vmem:[%s4290_s4 + $0x88] sm:$0xff]  }
  0x22   : > { %v4123_v5 = vld [vmem:[%s4290_s4 + $0x40] sm:$0xff]   ;;  %v4124_v7 = vld [vmem:[%s4290_s4 + $0xa8] sm:$0xff]   ;;  %v4127_v9 = vld [vmem:[%s4290_s4 + $0xb0] sm:$0xff]  }
  0x23   : > { %v4125_v8 = vld [vmem:[%s4290_s4 + $0x48] sm:$0xff]   ;;  %v4129_v10 = vld [vmem:[%s4290_s4 + $0x50] sm:$0xff]   ;;  %v4130_v11 = vld [vmem:[%s4290_s4 + $0xb8] sm:$0xff]  }
  0x24   : > { %3596 = vmatmul.mubr.msk.bf16.gmra.mrb[8].mxu1 %vm356_vm1, %v4080_v23  ;;  %3704 = vmatmul.mubr.msk.bf16.gmra.mrb[8].mxu0 %vm356_vm1, %v4081_v24  ;;  %v4145_v12 = vld [vmem:[%s4691_s1 + $0x50] ss:$0 sps:$4 sm:$0xff]   ;;  %v4131_v13 = vld [vmem:[%s4290_s4 + $0x58] sm:$0xff]   ;;  %v4132_v15 = vld [vmem:[%s4290_s4 + $0xc0] sm:$0xff]  }
  0x25   : > { %3599 = vmatprep.mubr.msk.bf16.mxu1 %vm356_vm1, %v4083_v25  ;;  %3707 = vmatprep.mubr.msk.bf16.mxu0 %vm356_vm1, %v4084_v26  ;;  %v2521_v14 = vsel %vm405_vm0, %v4145_v12, 0  ;;  %v4134_v17 = vld [vmem:[%s4290_s4 + $0xc8] sm:$0xff]   ;;  %v4136_v19 = vld [vmem:[%s4290_s4 + $0xd0] sm:$0xff]   ;;  %v4138_v21 = vld [vmem:[%s4290_s4 + $0xd8] sm:$0xff]  }
  0x26   : > { %v4135_v18 = vld [vmem:[%s4290_s4 + $0x68] sm:$0xff]   ;;  %v4137_v20 = vld [vmem:[%s4290_s4 + $0x70] sm:$0xff]   ;;  %v4139_v22 = vld [vmem:[%s4290_s4 + $0x78] sm:$0xff]  }
  0x27   : > { %v4140_v23 = vld [vmem:[%s4290_s4 + $0xe0] sm:$0xff]   ;;  %v4141_v24 = vld [vmem:[%s4290_s4 + $0x8] sm:$0xff]   ;;  %v4143_v26 = vld [vmem:[%s4290_s4 + $0x10] sm:$0xff]  }
  0x28   : > { %v4142_v25 = vld [vmem:[%s4290_s4 + $0xe8] sm:$0xff]  }
  0x2c   : > { %3600 = vmatmul.mubr.msk.bf16.gmra.mrb[12].mxu1 %vm356_vm1, %v4085_v27  ;;  %3708 = vmatmul.mubr.msk.bf16.gmra.mrb[12].mxu0 %vm356_vm1, %v4086_v28  ;;  %v4144_v27 = vld [vmem:[%s4290_s4 + $0xf0] sm:$0xff]   ;;  %v4146_v28 = vld [vmem:[%s4290_s4 + $0x18] sm:$0xff]  }
  0x2d   : > { %3603 = vmatprep.mubr.msk.bf16.mxu1 %vm356_vm1, %v4087_v29  ;;  %3731 = vmatprep.mubr.msk.bf16.mxu0 %vm356_vm1, %v4088_v30  ;;  %v4147_v29 = vld [vmem:[%s4290_s4 + $0xf8] sm:$0xff]   ;;  %v4148_v30 = vld [vmem:[%s4290_s4 + $0x20] sm:$0xff]  }
  0x34   : > { %3604 = vmatmul.mubr.msk.bf16.gmra.mrb[16].mxu1 %vm356_vm1, %v4089_v31  ;;  %3732 = vmatmul.mubr.msk.bf16.vlgmr.msra.gmra.mrb[0].mxu0 %vm356_vm1, %v4091_v32  ;;  %v4149_v31 = vld [vmem:[%s4290_s4 + $0x100] sm:$0xff]   ;;  %v4150_v32 = vld [vmem:[%s4290_s4 + $0x28] sm:$0xff]  }
  0x35   : > { %3607 = vmatprep.mubr.msk.bf16.mxu1 %vm356_vm1, %v4093_v33  ;;  %3764 = vmatpush3.bf16.msra.mxu0 %v4092_v16  ;;  %v4133_v16 = vld [vmem:[%s4290_s4 + $0x60] sm:$0xff]   ;;  %v4151_v33 = vld [vmem:[%s4290_s4 + $0x108] sm:$0xff]  }
  0x36   : > { %3735 = vmatprep.mubr.msk.bf16.mxu0 %vm356_vm1, %v4094_v34  ;;  %4037 = vmatprep.subr.msk.bf16.mxu0 %vm405_vm0, %v4110_v36  ;;  %v4154_v34 = vld [vmem:[%s4290_s4 + $0x38] sm:$0xff]   ;;  %v4157_v36 = vld [vmem:[%s4290_s4 + $0x120] sm:$0xff]  }
  0x39   : > { %3766 = vmatpush3.bf16.msra.mxu0 %v2152_v38  ;;  %v4159_v38 = vld [vmem:[%s4290_s4 + $0x18] sm:$0xff]  }
  0x3a   : > { %3799 = vmatprep.subr.bf16.mxu0 %v4128_v47 }
  0x3c   : > { %3608 = vmatmul.mubr.msk.bf16.gmra.mrb[20].mxu1 %vm356_vm1, %v4095_v37  ;;  %3736 = vmatmul.mubr.msk.bf16.gmra.mrb[4].mxu0 %vm356_vm1, %v4096_v39  ;;  %v4158_v37 = vld [vmem:[%s4290_s4 + $0x48] sm:$0xff]   ;;  %v4160_v39 = vld [vmem:[%s4290_s4 + $0x50] sm:$0xff]  }
  0x3d   : > { %3611 = vmatprep.mubr.msk.bf16.mxu1 %vm356_vm1, %v4097_v40  ;;  %3739 = vmatprep.mubr.msk.bf16.mxu0 %vm356_vm1, %v4098_v41  ;;  %v4161_v40 = vld [vmem:[%s4290_s4 + $0x20] sm:$0xff]   ;;  %v4162_v41 = vld [vmem:[%s4290_s4 + $0x58] sm:$0xff]  }
  0x44   : > { %3612 = vmatmul.mubr.msk.bf16.gmra.mrb[24].mxu1 %vm356_vm1, %v4099_v42  ;;  %3740 = vmatmul.mubr.msk.bf16.gmra.mrb[8].mxu0 %vm356_vm1, %v4100_v43  ;;  %v4163_v42 = vld [vmem:[%s4290_s4 + $0x28] sm:$0xff]   ;;  %v4164_v43 = vld [vmem:[%s4290_s4 + $0x60] sm:$0xff]  }
  0x45   : > { %3615 = vmatprep.mubr.msk.bf16.mxu1 %vm356_vm1, %v4101_v44  ;;  %3743 = vmatprep.mubr.msk.bf16.mxu0 %vm356_vm1, %v4102_v45  ;;  %v4165_v44 = vld [vmem:[%s4290_s4 + $0x30] sm:$0xff]   ;;  %v4166_v45 = vld [vmem:[%s4290_s4 + $0x68] sm:$0xff]  }
  0x4c   : > { %3616 = vmatmul.mubr.msk.bf16.gmra.mrb[28].mxu1 %vm356_vm1, %v4103_v46  ;;  %3744 = vmatmul.mubr.msk.bf16.gmra.mrb[12].mxu0 %vm356_vm1, %v4104_v48  ;;  %v4167_v46 = vld [vmem:[%s4290_s4 + $0x38] sm:$0xff]   ;;  %v4169_v48 = vld [vmem:[%s4290_s4 + $0x40] sm:$0xff]  }
  0x4d   : > { %3623 = vmatprep.mubr.msk.bf16.mxu1 %vm356_vm1, %v4105_v49  ;;  %3747 = vmatprep.mubr.msk.bf16.mxu0 %vm356_vm1, %v4106_v50  ;;  %v4170_v49 = vld [vmem:[%s4290_s4 + $0x78] sm:$0xff]   ;;  %v4171_v50 = vld [vmem:[%s4290_s4 + $0x48] sm:$0xff]  }
  0x54   : > { %3624 = vmatmul.mubr.msk.bf16.vlgmr.msra.gmra.mrb[0].mxu1 %vm356_vm1, %v4107_v51  ;;  %3748 = vmatmul.mubr.msk.bf16.gmra.mrb[16].mxu0 %vm356_vm1, %v4109_v52  ;;  %v4172_v51 = vld [vmem:[%s4290_s4 + $0x80] sm:$0xff]   ;;  %v4173_v52 = vld [vmem:[%s4290_s4 + $0x50] sm:$0xff]  }
  0x55   : > { %3656 = vmatpush3.bf16.msra.mxu1 %v4108_v35  ;;  %3627 = vmatprep.mubr.msk.bf16.mxu1 %vm356_vm1, %v4111_v53  ;;  %v4155_v35 = vld [vmem:[%s4290_s4 + $0x118] sm:$0xff]   ;;  %v4174_v53 = vld [vmem:[%s4290_s4 + $0xe0] sm:$0xff]  }
  0x56   : > { %3751 = vmatprep.mubr.msk.bf16.mxu0 %vm356_vm1, %v4112_v54  ;;  %4033 = vmatprep.subr.msk.bf16.mxu1 %vm405_vm0, %v4126_v55  ;;  %v4175_v54 = vld [vmem:[%s4290_s4 + $0x58] sm:$0xff]   ;;  %v4176_v55 = vld [vmem:[%s4290_s4 + $0xe8] sm:$0xff]  }
  0x59   : > { %3658 = vmatpush3.bf16.msra.mxu1 %v1045_v56  ;;  %v4177_v56 = vld [vmem:[%s4290_s4 + $0x60] sm:$0xff]  }
  0x5a   : > { %3835 = vmatprep.subr.bf16.mxu1 %v4258_v1 }
  0x5c   : > { %3628 = vmatmul.mubr.msk.bf16.gmra.mrb[4].mxu1 %vm356_vm1, %v4113_v57  ;;  %3752 = vmatmul.mubr.msk.bf16.gmra.mrb[20].mxu0 %vm356_vm1, %v4114_v58  ;;  %v4178_v57 = vld [vmem:[%s4290_s4 + $0xf0] sm:$0xff]   ;;  %v4179_v58 = vld [vmem:[%s4290_s4 + $0x68] sm:$0xff]  }
  0x5d   : > { %3631 = vmatprep.mubr.msk.bf16.mxu1 %vm356_vm1, %v4115_v59  ;;  %3755 = vmatprep.mubr.msk.bf16.mxu0 %vm356_vm1, %v4116_v60  ;;  %v4180_v59 = vld [vmem:[%s4290_s4 + $0xf8] sm:$0xff]   ;;  %v4181_v60 = vld [vmem:[%s4290_s4 + $0x70] sm:$0xff]  }
  0x64   : > { %3632 = vmatmul.mubr.msk.bf16.gmra.mrb[8].mxu1 %vm356_vm1, %v4117_v61  ;;  %3756 = vmatmul.mubr.msk.bf16.gmra.mrb[24].mxu0 %vm356_vm1, %v4118_v62  ;;  %v4182_v61 = vld [vmem:[%s4290_s4 + $0x100] sm:$0xff]   ;;  %v4183_v62 = vld [vmem:[%s4290_s4 + $0x78] sm:$0xff]  }
  0x65   : > { %3635 = vmatprep.mubr.msk.bf16.mxu1 %vm356_vm1, %v4119_v63  ;;  %3759 = vmatprep.mubr.msk.bf16.mxu0 %vm356_vm1, %v4120_v0  ;;  %v4184_v63 = vld [vmem:[%s4290_s4 + $0x108] sm:$0xff]   ;;  %v4185_v0 = vld [vmem:[%s4290_s4 + $0x80] sm:$0xff]  }
  0x6c   : > { %3636 = vmatmul.mubr.msk.bf16.gmra.mrb[12].mxu1 %vm356_vm1, %v4121_v2  ;;  %3760 = vmatmul.mubr.msk.bf16.gmra.mrb[28].mxu0 %vm356_vm1, %v4122_v4  ;;  %v4186_v2 = vld [vmem:[%s4290_s4 + $0x110] sm:$0xff]   ;;  %v4187_v4 = vld [vmem:[%s4290_s4 + $0x88] sm:$0xff]  }
  0x6d   : > { %3639 = vmatprep.mubr.msk.bf16.mxu1 %vm356_vm1, %v4123_v5  ;;  %3767 = vmatprep.mubr.msk.bf16.mxu0 %vm356_vm1, %v4124_v7  ;;  %v4188_v5 = vld [vmem:[%s4290_s4 + $0x118] sm:$0xff]   ;;  %v4189_v7 = vld [vmem:[%s4290_s4 + $0x90] sm:$0xff]  }
  0x74   : > { %3640 = vmatmul.mubr.msk.bf16.gmra.mrb[16].mxu1 %vm356_vm1, %v4125_v8  ;;  %3768 = vmatmul.mubr.msk.bf16.vlgmr.msra.gmra.mrb[0].mxu0 %vm356_vm1, %v4127_v9 }
  0x75   : > { %3643 = vmatprep.mubr.msk.bf16.mxu1 %vm356_vm1, %v4129_v10  ;;  %3800 = vmatpush3.bf16.msra.mxu0 %v4128_v47  ;;  %v4168_v47 = vld [vmem:[%s4290_s4 + $0x70] sm:$0xff]  }
  0x76   : > { %3771 = vmatprep.mubr.msk.bf16.mxu0 %vm356_vm1, %v4130_v11  ;;  %4038 = vmatprep.subr.msk.bf16.mxu0 %vm405_vm0, %v4145_v12 }
  0x79   : > { %3802 = vmatpush3.bf16.msra.mxu0 %v2521_v14 }
  0x7c   : > { %3644 = vmatmul.mubr.msk.bf16.gmra.mrb[20].mxu1 %vm356_vm1, %v4131_v13  ;;  %3772 = vmatmul.mubr.msk.bf16.gmra.mrb[4].mxu0 %vm356_vm1, %v4132_v15 }
  0x7d   : > { %3647 = vmatprep.mubr.msk.bf16.mxu1 %vm356_vm1, %v4133_v16  ;;  %3775 = vmatprep.mubr.msk.bf16.mxu0 %vm356_vm1, %v4134_v17 }
  0x84   : > { %3648 = vmatmul.mubr.msk.bf16.gmra.mrb[24].mxu1 %vm356_vm1, %v4135_v18  ;;  %3776 = vmatmul.mubr.msk.bf16.gmra.mrb[8].mxu0 %vm356_vm1, %v4136_v19 }
  0x85   : > { %3651 = vmatprep.mubr.msk.bf16.mxu1 %vm356_vm1, %v4137_v20  ;;  %3779 = vmatprep.mubr.msk.bf16.mxu0 %vm356_vm1, %v4138_v21 }
  0x8c   : > { %3652 = vmatmul.mubr.msk.bf16.gmra.mrb[28].mxu1 %vm356_vm1, %v4139_v22  ;;  %3780 = vmatmul.mubr.msk.bf16.gmra.mrb[12].mxu0 %vm356_vm1, %v4140_v23 }
  0x8d   : > { %3659 = vmatprep.mubr.msk.bf16.mxu1 %vm356_vm1, %v4141_v24  ;;  %3783 = vmatprep.mubr.msk.bf16.mxu0 %vm356_vm1, %v4142_v25  ;;  %v4571_v25 = vld [vmem:[%s4692_s2] ss:$0 sm:$0xff] }
  0x94   : > { %3660 = vmatmul.mubr.msk.bf16.vlgmr.msra.gmra.mrb[0].mxu1 %vm356_vm1, %v4143_v26  ;;  %3784 = vmatmul.mubr.msk.bf16.gmra.mrb[16].mxu0 %vm356_vm1, %v4144_v27 }
  0x95   : > { %3837 = vmatpush3.bf16.msra.mxu1 %v4258_v1  ;;  %3663 = vmatprep.mubr.msk.bf16.mxu1 %vm356_vm1, %v4146_v28  ;;  %v4152_v1 = vld [vmem:[%s4290_s4 + $0x30] sm:$0xff]  }
  0x96   : > { %3787 = vmatprep.mubr.msk.bf16.mxu0 %vm356_vm1, %v4147_v29  ;;  %4035 = vmatprep.subr.msk.bf16.mxu1 %vm405_vm0, %v4267_v3  ;;  %v4153_v3 = vld [vmem:[%s4290_s4 + $0x110] sm:$0xff]  }
  0x99   : > { %3838 = vmatpush3.bf16.msra.mxu1 %v4281_v6  ;;  %v4156_v6 = vld [vmem:[%s4290_s4 + $0x40] sm:$0xff]  }
  0x9c   : > { %3664 = vmatmul.mubr.msk.bf16.gmra.mrb[4].mxu1 %vm356_vm1, %v4148_v30  ;;  %3788 = vmatmul.mubr.msk.bf16.gmra.mrb[20].mxu0 %vm356_vm1, %v4149_v31 }
  0x9d   : > { %3667 = vmatprep.mubr.msk.bf16.mxu1 %vm356_vm1, %v4150_v32  ;;  %3791 = vmatprep.mubr.msk.bf16.mxu0 %vm356_vm1, %v4151_v33 }
  0xa4   : > { %3668 = vmatmul.mubr.msk.bf16.gmra.mrb[8].mxu1 %vm356_vm1, %v4152_v1  ;;  %3792 = vmatmul.mubr.msk.bf16.gmra.mrb[24].mxu0 %vm356_vm1, %v4153_v3 }
  0xa5   : > { %3671 = vmatprep.mubr.msk.bf16.mxu1 %vm356_vm1, %v4154_v34  ;;  %3795 = vmatprep.mubr.msk.bf16.mxu0 %vm356_vm1, %v4155_v35 }
  0xac   : > { %3672 = vmatmul.mubr.msk.bf16.gmra.mrb[12].mxu1 %vm356_vm1, %v4156_v6  ;;  %3796 = vmatmul.mubr.msk.bf16.gmra.mrb[28].mxu0 %vm356_vm1, %v4157_v36 }
  0xad   : > { %3675 = vmatprep.mubr.msk.bf16.mxu1 %vm356_vm1, %v4158_v37  ;;  %3803 = vmatprep.mubr.msk.bf16.mxu0 %vm356_vm1, %v4159_v38 }
  0xb4   : > { %3676 = vmatmul.mubr.msk.bf16.gmra.mrb[16].mxu1 %vm356_vm1, %v4160_v39  ;;  %3804 = vmatmul.mubr.msk.bf16.vlgmr.msra.gmra.mrb[0].mxu0 %vm356_vm1, %v4161_v40 }
  0xb5   : > { %3679 = vmatprep.mubr.msk.bf16.mxu1 %vm356_vm1, %v4162_v41  ;;  %3807 = vmatprep.mubr.msk.bf16.mxu0 %vm356_vm1, %v4163_v42 }
  0xbc   : > { %3680 = vmatmul.mubr.msk.bf16.gmra.mrb[20].mxu1 %vm356_vm1, %v4164_v43  ;;  %3808 = vmatmul.mubr.msk.bf16.gmra.mrb[4].mxu0 %vm356_vm1, %v4165_v44 }
  0xbd   : > { %3683 = vmatprep.mubr.msk.bf16.mxu1 %vm356_vm1, %v4166_v45  ;;  %3811 = vmatprep.mubr.msk.bf16.mxu0 %vm356_vm1, %v4167_v46 }
  0xc4   : > { %3684 = vmatmul.mubr.msk.bf16.gmra.mrb[24].mxu1 %vm356_vm1, %v4168_v47  ;;  %3812 = vmatmul.mubr.msk.bf16.gmra.mrb[8].mxu0 %vm356_vm1, %v4169_v48 }
  0xc5   : > { %3687 = vmatprep.mubr.msk.bf16.mxu1 %vm356_vm1, %v4170_v49  ;;  %3815 = vmatprep.mubr.msk.bf16.mxu0 %vm356_vm1, %v4171_v50 }
  0xcc   : > { %3688 = vmatmul.mubr.msk.bf16.gmra.mrb[28].mxu1 %vm356_vm1, %v4172_v51  ;;  %3816 = vmatmul.mubr.msk.bf16.gmra.mrb[12].mxu0 %vm356_vm1, %v4173_v52 }
  0xcd   : > { %3711 = vmatprep.mubr.msk.bf16.mxu1 %vm356_vm1, %v4174_v53  ;;  %3819 = vmatprep.mubr.msk.bf16.mxu0 %vm356_vm1, %v4175_v54 }
  0xd4   : > { %3712 = vmatmul.mubr.msk.bf16.vlgmr.msra.gmra.mrb[16].mxu1 %vm356_vm1, %v4176_v55  ;;  %3820 = vmatmul.mubr.msk.bf16.gmra.mrb[16].mxu0 %vm356_vm1, %v4177_v56 }
  0xd5   : > { %3715 = vmatprep.mubr.msk.bf16.mxu1 %vm356_vm1, %v4178_v57  ;;  %3823 = vmatprep.mubr.msk.bf16.mxu0 %vm356_vm1, %v4179_v58 }
  0xdc   : > { %3716 = vmatmul.mubr.msk.bf16.gmra.mrb[20].mxu1 %vm356_vm1, %v4180_v59  ;;  %3824 = vmatmul.mubr.msk.bf16.gmra.mrb[20].mxu0 %vm356_vm1, %v4181_v60 }
  0xdd   : > { %3719 = vmatprep.mubr.msk.bf16.mxu1 %vm356_vm1, %v4182_v61  ;;  %3827 = vmatprep.mubr.msk.bf16.mxu0 %vm356_vm1, %v4183_v62 }
  0xe4   : > { %3720 = vmatmul.mubr.msk.bf16.gmra.mrb[24].mxu1 %vm356_vm1, %v4184_v63  ;;  %3828 = vmatmul.mubr.msk.bf16.gmra.mrb[24].mxu0 %vm356_vm1, %v4185_v0 }
  0xe5   : > { %3723 = vmatprep.mubr.msk.bf16.mxu1 %vm356_vm1, %v4186_v2  ;;  %3831 = vmatprep.mubr.msk.bf16.mxu0 %vm356_vm1, %v4187_v4 }
  0xec   : > { %3724 = vmatmul.mubr.msk.bf16.gmra.mrb[28].mxu1 %vm356_vm1, %v4188_v5  ;;  %3832 = vmatmul.mubr.msk.bf16.gmra.mrb[28].mxu0 %vm356_vm1, %v4189_v7 }
 0x167   : > { %v3661_v8 = vpop.f32.mrb[0].mxu1 }
 0x168   : > { %v1081_v9 = vpop.f32.mrb[1].mxu1 }
 0x169   : > { %v3662_v10 = vpop.f32.mrb[2].mxu1 }
 0x16a   : > { %v1084_v11 = vpop.f32.mrb[3].mxu1 }
 0x16f   : > { %v3665_v12 = vpop.f32.mrb[4].mxu1 }
 0x170   : > { %v1097_v13 = vpop.f32.mrb[5].mxu1 }
 0x171   : > { %v3666_v14 = vpop.f32.mrb[6].mxu1 }
 0x172   : > { %v1100_v15 = vpop.f32.mrb[7].mxu1 }
 0x177   : > { %v3669_v16 = vpop.f32.mrb[8].mxu1 }
 0x178   : > { %v1113_v17 = vpop.f32.mrb[9].mxu1 }
 0x179   : > { %v4556_v18 = vpop.f32.mrb[10].mxu1 }
 0x17a   : > { %v4558_v19 = vpop.f32.mrb[11].mxu1 }
 0x17f   : > { %v4560_v20 = vpop.f32.mrb[12].mxu1 }
 0x180   : > { %v4562_v21 = vpop.f32.mrb[13].mxu1 }
 0x181   : > { %v4564_v22 = vpop.f32.mrb[14].mxu1 }
 0x182   : > { %v4566_v23 = vpop.f32.mrb[15].mxu1 }
 0x187   : > { %v3805_v24 = vpop.f32.mrb[0].mxu0 }
 0x188   : > { %v3839_v26 = vadd.f32 %v3805_v24, %v3661_v8  ;;  %v2557_v27 = vpop.f32.mrb[1].mxu0 }
 0x189   : > { %v3840_v28 = vadd.f32 %v2557_v27, %v1081_v9  ;;  %v3806_v29 = vpop.f32.mrb[2].mxu0 }
 0x18a   : > { %v2725_v30 = vadd.f32 %v3839_v26, %v4571_v25  ;;  %v3841_v31 = vadd.f32 %v3806_v29, %v3662_v10  ;;  %v2560_v32 = vpop.f32.mrb[3].mxu0 }
 0x18b   : > { %v2723_v33 = vadd.f32 %v3840_v28, %v4571_v25  ;;  %v3842_v1 = vadd.f32 %v2560_v32, %v1084_v11 }
 0x18c   : > { %v2757_v3 = vmax.f32 %v2725_v30, 0.0  ;;  %v2726_v34 = vadd.f32 %v3841_v31, %v4571_v25 }
 0x18d   : > { %v2755_v35 = vmax.f32 %v2723_v33, 0.0  ;;  %v2724_v6 = vadd.f32 %v3842_v1, %v4571_v25 }
 0x18e   : > { %v3427_v36 = vpack.c.bf16 %v2757_v3, %v2757_v3  ;;  %v2758_v37 = vmax.f32 %v2726_v34, 0.0 }
 0x18f   : > { %v3425_v38 = vpack.c.bf16 %v2755_v35, %v2755_v35  ;;  %v2756_v39 = vmax.f32 %v2724_v6, 0.0  ;;  %v3809_v40 = vpop.f32.mrb[4].mxu0 }
 0x190   : > { %2918 = vst.msk [vmem:[%s4580_s30 + $0x8] sm:$0xf] %vm2915_vm2, %v3427_v36  ;;  %v3428_v41 = vpack.c.bf16 %v2758_v37, %v2758_v37  ;;  %v3843_v42 = vadd.f32 %v3809_v40, %v3665_v12  ;;  %v2573_v43 = vpop.f32.mrb[5].mxu0 }
 0x191   : > { %2916 = vst.msk [vmem:[%s4580_s30] sm:$0xf] %vm2915_vm2, %v3425_v38  ;;  %v3426_v44 = vpack.c.bf16 %v2756_v39, %v2756_v39  ;;  %v3844_v45 = vadd.f32 %v2573_v43, %v1097_v13  ;;  %v3810_v46 = vpop.f32.mrb[6].mxu0 }
 0x192   : > { %2919 = vst.msk [vmem:[%s4580_s30 + $0xc] sm:$0xf] %vm2915_vm2, %v3428_v41  ;;  %v2729_v47 = vadd.f32 %v3843_v42, %v4571_v25  ;;  %v3845_v48 = vadd.f32 %v3810_v46, %v3666_v14  ;;  %v2576_v49 = vpop.f32.mrb[7].mxu0 }
 0x193   : > { %2917 = vst.msk [vmem:[%s4580_s30 + $0x4] sm:$0xf] %vm2915_vm2, %v3426_v44  ;;  %v2727_v50 = vadd.f32 %v3844_v45, %v4571_v25  ;;  %v3846_v51 = vadd.f32 %v2576_v49, %v1100_v15 }
 0x194   : > { %v2761_v52 = vmax.f32 %v2729_v47, 0.0  ;;  %v2730_v53 = vadd.f32 %v3845_v48, %v4571_v25 }
 0x195   : > { %v2759_v54 = vmax.f32 %v2727_v50, 0.0  ;;  %v2728_v55 = vadd.f32 %v3846_v51, %v4571_v25 }
 0x196   : > { %v3431_v56 = vpack.c.bf16 %v2761_v52, %v2761_v52  ;;  %v2762_v57 = vmax.f32 %v2730_v53, 0.0 }
 0x197   : > { %v3429_v58 = vpack.c.bf16 %v2759_v54, %v2759_v54  ;;  %v2760_v59 = vmax.f32 %v2728_v55, 0.0  ;;  %v3813_v60 = vpop.f32.mrb[8].mxu0 }
 0x198   : > { %2922 = vst.msk [vmem:[%s4580_s30 + $0x18] sm:$0xf] %vm2915_vm2, %v3431_v56  ;;  %v3432_v61 = vpack.c.bf16 %v2762_v57, %v2762_v57  ;;  %v3847_v62 = vadd.f32 %v3813_v60, %v3669_v16  ;;  %v2589_v63 = vpop.f32.mrb[9].mxu0 }
 0x199   : > { %2920 = vst.msk [vmem:[%s4580_s30 + $0x10] sm:$0xf] %vm2915_vm2, %v3429_v58  ;;  %v3430_v0 = vpack.c.bf16 %v2760_v59, %v2760_v59  ;;  %v3848_v2 = vadd.f32 %v2589_v63, %v1113_v17  ;;  %v3814_v4 = vpop.f32.mrb[10].mxu0 }
 0x19a   : > { %2923 = vst.msk [vmem:[%s4580_s30 + $0x1c] sm:$0xf] %vm2915_vm2, %v3432_v61  ;;  %v2733_v5 = vadd.f32 %v3847_v62, %v4571_v25  ;;  %v3849_v7 = vadd.f32 %v3814_v4, %v4556_v18  ;;  %v2592_v8 = vpop.f32.mrb[11].mxu0 }
 0x19b   : > { %2921 = vst.msk [vmem:[%s4580_s30 + $0x14] sm:$0xf] %vm2915_vm2, %v3430_v0  ;;  %v2731_v9 = vadd.f32 %v3848_v2, %v4571_v25  ;;  %v3850_v10 = vadd.f32 %v2592_v8, %v4558_v19 }
 0x19c   : > { %v2765_v11 = vmax.f32 %v2733_v5, 0.0  ;;  %v2734_v12 = vadd.f32 %v3849_v7, %v4571_v25 }
 0x19d   : > { %v2763_v13 = vmax.f32 %v2731_v9, 0.0  ;;  %v2732_v14 = vadd.f32 %v3850_v10, %v4571_v25 }
 0x19e   : > { %v3435_v15 = vpack.c.bf16 %v2765_v11, %v2765_v11  ;;  %v2766_v16 = vmax.f32 %v2734_v12, 0.0 }
 0x19f   : > { %v3433_v17 = vpack.c.bf16 %v2763_v13, %v2763_v13  ;;  %v2764_v18 = vmax.f32 %v2732_v14, 0.0  ;;  %v3817_v24 = vpop.f32.mrb[12].mxu0 }
 0x1a0   : > { %2926 = vst.msk [vmem:[%s4580_s30 + $0x28] sm:$0xf] %vm2915_vm2, %v3435_v15  ;;  %v3436_v26 = vpack.c.bf16 %v2766_v16, %v2766_v16  ;;  %v3851_v27 = vadd.f32 %v3817_v24, %v4560_v20  ;;  %v2605_v28 = vpop.f32.mrb[13].mxu0 }
 0x1a1   : > { %2924 = vst.msk [vmem:[%s4580_s30 + $0x20] sm:$0xf] %vm2915_vm2, %v3433_v17  ;;  %v3434_v19 = vpack.c.bf16 %v2764_v18, %v2764_v18  ;;  %v3852_v29 = vadd.f32 %v2605_v28, %v4562_v21  ;;  %v3818_v30 = vpop.f32.mrb[14].mxu0 }
 0x1a2   : > { %2927 = vst.msk [vmem:[%s4580_s30 + $0x2c] sm:$0xf] %vm2915_vm2, %v3436_v26  ;;  %v2737_v31 = vadd.f32 %v3851_v27, %v4571_v25  ;;  %v3853_v32 = vadd.f32 %v3818_v30, %v4564_v22  ;;  %v2608_v33 = vpop.f32.mrb[15].mxu0 }
 0x1a3   : > { %2925 = vst.msk [vmem:[%s4580_s30 + $0x24] sm:$0xf] %vm2915_vm2, %v3434_v19  ;;  %v2735_v1 = vadd.f32 %v3852_v29, %v4571_v25  ;;  %v3854_v20 = vadd.f32 %v2608_v33, %v4566_v23 }
 0x1a4   : > { %v2769_v3 = vmax.f32 %v2737_v31, 0.0  ;;  %v2738_v34 = vadd.f32 %v3853_v32, %v4571_v25 }
 0x1a5   : > { %v2767_v21 = vmax.f32 %v2735_v1, 0.0  ;;  %v2736_v35 = vadd.f32 %v3854_v20, %v4571_v25 }
 0x1a6   : > { %v3439_v6 = vpack.c.bf16 %v2769_v3, %v2769_v3  ;;  %v2770_v36 = vmax.f32 %v2738_v34, 0.0 }
 0x1a7   : > { %v3713_v37 = vpop.f32.mrb[16].mxu1  ;;  %v3437_v22 = vpack.c.bf16 %v2767_v21, %v2767_v21  ;;  %v2768_v38 = vmax.f32 %v2736_v35, 0.0  ;;  %v3821_v39 = vpop.f32.mrb[16].mxu0 }
 0x1a8   : > { %v1514_v40 = vpop.f32.mrb[17].mxu1  ;;  %2930 = vst.msk [vmem:[%s4580_s30 + $0x38] sm:$0xf] %vm2915_vm2, %v3439_v6  ;;  %v3440_v41 = vpack.c.bf16 %v2770_v36, %v2770_v36  ;;  %v3855_v23 = vadd.f32 %v3821_v39, %v3713_v37  ;;  %v2621_v42 = vpop.f32.mrb[17].mxu0 }
 0x1a9   : > { %v3714_v43 = vpop.f32.mrb[18].mxu1  ;;  %2928 = vst.msk [vmem:[%s4580_s30 + $0x30] sm:$0xf] %vm2915_vm2, %v3437_v22  ;;  %v3438_v44 = vpack.c.bf16 %v2768_v38, %v2768_v38  ;;  %v3856_v45 = vadd.f32 %v2621_v42, %v1514_v40  ;;  %v3822_v46 = vpop.f32.mrb[18].mxu0 }
 0x1aa   : > { %v1517_v47 = vpop.f32.mrb[19].mxu1  ;;  %2931 = vst.msk [vmem:[%s4580_s30 + $0x3c] sm:$0xf] %vm2915_vm2, %v3440_v41  ;;  %v2741_v48 = vadd.f32 %v3855_v23, %v4571_v25  ;;  %v3857_v49 = vadd.f32 %v3822_v46, %v3714_v43  ;;  %v2624_v50 = vpop.f32.mrb[19].mxu0 }
 0x1ab   : > { %2929 = vst.msk [vmem:[%s4580_s30 + $0x34] sm:$0xf] %vm2915_vm2, %v3438_v44  ;;  %v2739_v51 = vadd.f32 %v3856_v45, %v4571_v25  ;;  %v3858_v52 = vadd.f32 %v2624_v50, %v1517_v47 }
 0x1ac   : > { %v2773_v53 = vmax.f32 %v2741_v48, 0.0  ;;  %v2742_v54 = vadd.f32 %v3857_v49, %v4571_v25 }
 0x1ad   : > { %v2771_v55 = vmax.f32 %v2739_v51, 0.0  ;;  %v2740_v56 = vadd.f32 %v3858_v52, %v4571_v25 }
 0x1ae   : > { %v3443_v57 = vpack.c.bf16 %v2773_v53, %v2773_v53  ;;  %v2774_v58 = vmax.f32 %v2742_v54, 0.0 }
 0x1af   : > { %v3717_v59 = vpop.f32.mrb[20].mxu1  ;;  %v3441_v60 = vpack.c.bf16 %v2771_v55, %v2771_v55  ;;  %v2772_v61 = vmax.f32 %v2740_v56, 0.0  ;;  %v3825_v62 = vpop.f32.mrb[20].mxu0 }
 0x1b0   : > { %v1530_v63 = vpop.f32.mrb[21].mxu1  ;;  %2934 = vst.msk [vmem:[%s4580_s30 + $0x48] sm:$0xf] %vm2915_vm2, %v3443_v57  ;;  %v3444_v0 = vpack.c.bf16 %v2774_v58, %v2774_v58  ;;  %v3859_v2 = vadd.f32 %v3825_v62, %v3717_v59  ;;  %v2637_v4 = vpop.f32.mrb[21].mxu0 }
 0x1b1   : > { %v3718_v5 = vpop.f32.mrb[22].mxu1  ;;  %2932 = vst.msk [vmem:[%s4580_s30 + $0x40] sm:$0xf] %vm2915_vm2, %v3441_v60  ;;  %v3442_v7 = vpack.c.bf16 %v2772_v61, %v2772_v61  ;;  %v3860_v8 = vadd.f32 %v2637_v4, %v1530_v63  ;;  %v3826_v9 = vpop.f32.mrb[22].mxu0 }
 0x1b2   : > { %v1533_v10 = vpop.f32.mrb[23].mxu1  ;;  %2935 = vst.msk [vmem:[%s4580_s30 + $0x4c] sm:$0xf] %vm2915_vm2, %v3444_v0  ;;  %v2745_v11 = vadd.f32 %v3859_v2, %v4571_v25  ;;  %v3861_v12 = vadd.f32 %v3826_v9, %v3718_v5  ;;  %v2640_v13 = vpop.f32.mrb[23].mxu0 }
 0x1b3   : > { %2933 = vst.msk [vmem:[%s4580_s30 + $0x44] sm:$0xf] %vm2915_vm2, %v3442_v7  ;;  %v2743_v14 = vadd.f32 %v3860_v8, %v4571_v25  ;;  %v3862_v15 = vadd.f32 %v2640_v13, %v1533_v10 }
 0x1b4   : > { %v2777_v16 = vmax.f32 %v2745_v11, 0.0  ;;  %v2746_v17 = vadd.f32 %v3861_v12, %v4571_v25 }
 0x1b5   : > { %v2775_v18 = vmax.f32 %v2743_v14, 0.0  ;;  %v2744_v24 = vadd.f32 %v3862_v15, %v4571_v25 }
 0x1b6   : > { %v3447_v26 = vpack.c.bf16 %v2777_v16, %v2777_v16  ;;  %v2778_v27 = vmax.f32 %v2746_v17, 0.0 }
 0x1b7   : > { %v3721_v28 = vpop.f32.mrb[24].mxu1  ;;  %v3445_v19 = vpack.c.bf16 %v2775_v18, %v2775_v18  ;;  %v2776_v29 = vmax.f32 %v2744_v24, 0.0  ;;  %v3829_v30 = vpop.f32.mrb[24].mxu0 }
 0x1b8   : > { %v1546_v31 = vpop.f32.mrb[25].mxu1  ;;  %2938 = vst.msk [vmem:[%s4580_s30 + $0x58] sm:$0xf] %vm2915_vm2, %v3447_v26  ;;  %v3448_v32 = vpack.c.bf16 %v2778_v27, %v2778_v27  ;;  %v3863_v33 = vadd.f32 %v3829_v30, %v3721_v28  ;;  %v2653_v1 = vpop.f32.mrb[25].mxu0 }
 0x1b9   : > { %v3722_v20 = vpop.f32.mrb[26].mxu1  ;;  %2936 = vst.msk [vmem:[%s4580_s30 + $0x50] sm:$0xf] %vm2915_vm2, %v3445_v19  ;;  %v3446_v3 = vpack.c.bf16 %v2776_v29, %v2776_v29  ;;  %v3864_v34 = vadd.f32 %v2653_v1, %v1546_v31  ;;  %v3830_v21 = vpop.f32.mrb[26].mxu0 }
 0x1ba   : > { %v1549_v35 = vpop.f32.mrb[27].mxu1  ;;  %2939 = vst.msk [vmem:[%s4580_s30 + $0x5c] sm:$0xf] %vm2915_vm2, %v3448_v32  ;;  %v2749_v6 = vadd.f32 %v3863_v33, %v4571_v25  ;;  %v3865_v36 = vadd.f32 %v3830_v21, %v3722_v20  ;;  %v2656_v37 = vpop.f32.mrb[27].mxu0 }
 0x1bb   : > { %2937 = vst.msk [vmem:[%s4580_s30 + $0x54] sm:$0xf] %vm2915_vm2, %v3446_v3  ;;  %v2747_v22 = vadd.f32 %v3864_v34, %v4571_v25  ;;  %v3866_v38 = vadd.f32 %v2656_v37, %v1549_v35 }
 0x1bc   : > { %v2781_v39 = vmax.f32 %v2749_v6, 0.0  ;;  %v2750_v40 = vadd.f32 %v3865_v36, %v4571_v25 }
 0x1bd   : > { %v2779_v41 = vmax.f32 %v2747_v22, 0.0  ;;  %v2748_v23 = vadd.f32 %v3866_v38, %v4571_v25 }
 0x1be   : > { %v3451_v42 = vpack.c.bf16 %v2781_v39, %v2781_v39  ;;  %v2782_v43 = vmax.f32 %v2750_v40, 0.0 }
 0x1bf   : > { %v3725_v44 = vpop.f32.mrb[28].mxu1  ;;  %v3449_v45 = vpack.c.bf16 %v2779_v41, %v2779_v41  ;;  %v2780_v46 = vmax.f32 %v2748_v23, 0.0  ;;  %v3833_v47 = vpop.f32.mrb[28].mxu0 }
 0x1c0   : > { %v1562_v48 = vpop.f32.mrb[29].mxu1  ;;  %2942 = vst.msk [vmem:[%s4580_s30 + $0x68] sm:$0xf] %vm2915_vm2, %v3451_v42  ;;  %v3452_v49 = vpack.c.bf16 %v2782_v43, %v2782_v43  ;;  %v3867_v50 = vadd.f32 %v3833_v47, %v3725_v44  ;;  %v2669_v51 = vpop.f32.mrb[29].mxu0 }
 0x1c1   : > { %v3726_v52 = vpop.f32.mrb[30].mxu1  ;;  %2940 = vst.msk [vmem:[%s4580_s30 + $0x60] sm:$0xf] %vm2915_vm2, %v3449_v45  ;;  %v3450_v53 = vpack.c.bf16 %v2780_v46, %v2780_v46  ;;  %v3868_v54 = vadd.f32 %v2669_v51, %v1562_v48  ;;  %v3834_v55 = vpop.f32.mrb[30].mxu0 }
 0x1c2   : > { %v1565_v56 = vpop.f32.mrb[31].mxu1  ;;  %2943 = vst.msk [vmem:[%s4580_s30 + $0x6c] sm:$0xf] %vm2915_vm2, %v3452_v49  ;;  %v2753_v57 = vadd.f32 %v3867_v50, %v4571_v25  ;;  %v3869_v58 = vadd.f32 %v3834_v55, %v3726_v52  ;;  %v2672_v59 = vpop.f32.mrb[31].mxu0 }
 0x1c3   : > { %2941 = vst.msk [vmem:[%s4580_s30 + $0x64] sm:$0xf] %vm2915_vm2, %v3450_v53  ;;  %v2751_v60 = vadd.f32 %v3868_v54, %v4571_v25  ;;  %v3870_v61 = vadd.f32 %v2672_v59, %v1565_v56 }
 0x1c4   : > { %v2785_v62 = vmax.f32 %v2753_v57, 0.0  ;;  %v2754_v63 = vadd.f32 %v3869_v58, %v4571_v25 }
 0x1c5   : > { %v2783_v0 = vmax.f32 %v2751_v60, 0.0  ;;  %v2752_v2 = vadd.f32 %v3870_v61, %v4571_v25 }
 0x1c6   : > { %v3455_v4 = vpack.c.bf16 %v2785_v62, %v2785_v62  ;;  %v2786_v5 = vmax.f32 %v2754_v63, 0.0 }
 0x1c7   : > { %v3453_v7 = vpack.c.bf16 %v2783_v0, %v2783_v0  ;;  %v2784_v8 = vmax.f32 %v2752_v2, 0.0 }
 0x1c8   : > { %2946 = vst.msk [vmem:[%s4580_s30 + $0x78] sm:$0xf] %vm2915_vm2, %v3455_v4  ;;  %v3456_v9 = vpack.c.bf16 %v2786_v5, %v2786_v5 }
 0x1c9   : > { %2944 = vst.msk [vmem:[%s4580_s30 + $0x70] sm:$0xf] %vm2915_vm2, %v3453_v7  ;;  %v3454_v10 = vpack.c.bf16 %v2784_v8, %v2784_v8 }
 0x1ca   : > { %2947 = vst.msk [vmem:[%s4580_s30 + $0x7c] sm:$0xf] %vm2915_vm2, %v3456_v9 }
 0x1cb   : > { %2945 = vst.msk [vmem:[%s4580_s30 + $0x74] sm:$0xf] %vm2915_vm2, %v3454_v10 }
 0x1cc PF: > { %s13_s14 = sadd.s32 1, %s4212_s14   ;;  %s4694_s12 = smov %s4208_s13 }
 0x1cd   : > { %p10_p5 = scmp.ge.s32.totalorder %s13_s14, 4   ;;  %s4695_s13 = smov %s4697_s15 }
 0x1cf   :  { %12 = sbr.rel (!%p10_p5) target bundleno = 2 (0x2), region = 69 }

// kernel: _lambda_.12
= control target key start
LH: loop header
LB: loop body
LE: loop exit
PB: predicated region body
PF: predicated region fallthrough
CT: control target
= control target key end

     0   :  { %s1271_s12 = smov 0   ;;  %s1273_s13 = smov 0   ;;  %s1531_s0 = inlined_call_operand.vmem [shape: bf16[2,1,80,192], index: 0, kind: input, shape index: {}]   ;;  %s1532_s1 = inlined_call_operand.vmem [shape: bf16[3,192,64], index: 1, kind: input, shape index: {}]   ;;  %s1533_s2 = inlined_call_operand.vmem [shape: f32[1,64], index: 2, kind: input, shape index: {}]   ;;  %s1534_s3 = inlined_call_operand.vmem [shape: bf16[2,64,64], index: 3, kind: output, shape index: {}]  }
   0x1   :  { %s1275_s14 = smov 0  }
   0x2 LB: > { %s25_s15 = sadd.s32 1, %s1244_s13  ;;  %p978_p0 = scmp.ge.s32.totalorder %s1248_s14, 1  ;;  %s1248_s14 = sphi %s1275_s14, %s13_s14   ;;  %s1244_s13 = sphi %s1273_s13, %s1536_s13   ;;  %s1240_s12 = sphi %s1271_s12, %s1535_s12  }
   0x3   : > { %p27_p1 = scmp.ge.s32.totalorder %s25_s15, 2  ;;  %p151_p2 = scmp.lt.s32.totalorder %s1248_s14, 3 }
   0x5   : > { %s1538_s15 = smov (%p27_p1, %s25_s15), 0  ;;  %p152_p3 = pnand %p978_p0, %p151_p2 }
   0x6   : > { %v1172_v0 = vld [vmem:[%s1532_s1 + $0x60] sm:$0xff] (!%p152_p3)   ;;  %v1250_v1 = vmov (!%p152_p3), 0   ;;  %v1174_v3 = vld [vmem:[%s1532_s1 + $0x68] sm:$0xff] (!%p152_p3)   ;;  %v1176_v5 = vld [vmem:[%s1532_s1 + $0x70] sm:$0xff] (!%p152_p3)   ;;  %p179_p4 = scmp.lt.s32.totalorder (!%p152_p3), %s1240_s12, 1  ;;  %vm361_vm0 = vcmask (!%p152_p3), 523264  }
   0x7   : > { %155 = sbr.rel (%p152_p3) target bundleno = 334 (0x14e), region = 32  ;;  %374 = vmatprep.subr.bf16.mxu0 (!%p152_p3), %v1250_v1  ;;  %538 = vmatprep.subr.bf16.mxu1 (!%p152_p3), %v1250_v1  ;;  %v1173_v2 = vld [vmem:[%s1532_s1] sm:$0xff] (!%p152_p3)   ;;  %v1175_v4 = vld [vmem:[%s1532_s1 + $0x8] sm:$0xff] (!%p152_p3)   ;;  %v1177_v6 = vld [vmem:[%s1532_s1 + $0x10] sm:$0xff] (!%p152_p3)   ;;  %vm884_vm1 = vcmask (!%p152_p3), 519168  }
   0x8   : > { %375 = vmatpush1.bf16.msra.mxu0 (!%p152_p3), %v1172_v0  ;;  %539 = vmatpush1.bf16.msra.mxu1 (!%p152_p3), %v1173_v2  ;;  %v1178_v7 = vld [vmem:[%s1532_s1 + $0x78] sm:$0xff] (!%p152_p3)   ;;  %v1180_v9 = vld [vmem:[%s1532_s1 + $0x80] sm:$0xff] (!%p152_p3)   ;;  %v1182_v11 = vld [vmem:[%s1532_s1 + $0x88] sm:$0xff] (!%p152_p3)  }
   0x9   : > { %376 = vmatprep.subr.bf16.mxu0 (!%p152_p3), %v1250_v1  ;;  %540 = vmatprep.subr.bf16.mxu1 (!%p152_p3), %v1250_v1  ;;  %v1179_v8 = vld [vmem:[%s1532_s1 + $0x18] sm:$0xff] (!%p152_p3)   ;;  %v1181_v10 = vld [vmem:[%s1532_s1 + $0x20] sm:$0xff] (!%p152_p3)   ;;  %v1183_v12 = vld [vmem:[%s1532_s1 + $0x28] sm:$0xff] (!%p152_p3)  }
   0xa   : > { %v1184_v13 = vld [vmem:[%s1532_s1 + $0x90] sm:$0xff] (!%p152_p3)   ;;  %v1186_v20 = vld [vmem:[%s1532_s1 + $0x98] sm:$0xff] (!%p152_p3)   ;;  %v1188_v22 = vld [vmem:[%s1532_s1 + $0xa0] sm:$0xff] (!%p152_p3)  }
   0xb   : > { %v1185_v14 = vld [vmem:[%s1532_s1 + $0x30] sm:$0xff] (!%p152_p3)   ;;  %v1187_v21 = vld [vmem:[%s1532_s1 + $0x38] sm:$0xff] (!%p152_p3)   ;;  %v1189_v23 = vld [vmem:[%s1532_s1 + $0x40] sm:$0xff] (!%p152_p3)  }
   0xc   : > { %377 = vmatpush1.bf16.msra.mxu0 (!%p152_p3), %v1174_v3  ;;  %541 = vmatpush1.bf16.msra.mxu1 (!%p152_p3), %v1175_v4  ;;  %v1190_v24 = vld [vmem:[%s1532_s1 + $0xa8] sm:$0xff] (!%p152_p3)   ;;  %v1192_v26 = vld [vmem:[%s1532_s1 + $0xb0] sm:$0xff] (!%p152_p3)   ;;  %v1194_v28 = vld [vmem:[%s1532_s1 + $0xb8] sm:$0xff] (!%p152_p3)  }
   0xd   : > { %378 = vmatprep.subr.bf16.mxu0 (!%p152_p3), %v1250_v1  ;;  %542 = vmatprep.subr.bf16.mxu1 (!%p152_p3), %v1250_v1  ;;  %v1191_v25 = vld [vmem:[%s1532_s1 + $0x48] sm:$0xff] (!%p152_p3)   ;;  %v1193_v27 = vld [vmem:[%s1532_s1 + $0x50] sm:$0xff] (!%p152_p3)   ;;  %v1195_v29 = vld [vmem:[%s1532_s1 + $0x58] sm:$0xff] (!%p152_p3)  }
   0xe   : > { %s1540_s12 = smov (!%p179_p4, %s1240_s12), 1  ;;  %v1200_v34 = vld [vmem:[%s1532_s1 + $0xc0] sm:$0xff]   ;;  %v1201_v37 = vld [vmem:[%s1532_s1 + $0xc8] sm:$0xff]   ;;  %v1202_v41 = vld [vmem:[%s1532_s1 + $0xd0] sm:$0xff]  }
   0xf   : > { %s1146_s9 = smul.u32 80, %s1540_s12  ;;  %v1203_v45 = vld [vmem:[%s1532_s1 + $0xd8] sm:$0xff]   ;;  %v1204_v49 = vld [vmem:[%s1532_s1 + $0xe0] sm:$0xff]   ;;  %v1209_v53 = vld [vmem:[%s1532_s1 + $0xe8] sm:$0xff]   ;;  %s1113_s26 = sshll.u32 %s1540_s12, 5 }
  0x10   : > { %379 = vmatpush1.bf16.msra.mxu0 %v1176_v5  ;;  %543 = vmatpush1.bf16.msra.mxu1 %v1177_v6  ;;  %v1210_v55 = vld [vmem:[%s1532_s1 + $0xf0] sm:$0xff]   ;;  %v1215_v57 = vld [vmem:[%s1532_s1 + $0xf8] sm:$0xff]   ;;  %v1216_v58 = vld [vmem:[%s1532_s1 + $0x100] sm:$0xff]   ;;  %s1504_s29 = scalar_lea.vmem %s1534_s3, %s1113_s26 }
  0x11   : > { %380 = vmatprep.subr.bf16.mxu0 %v1250_v1  ;;  %544 = vmatprep.subr.bf16.mxu1 %v1250_v1  ;;  %s1347_s20 = scalar_lea.vmem %s1531_s0, %s1146_s9  ;;  %v1221_v59 = vld [vmem:[%s1532_s1 + $0x108] sm:$0xff]   ;;  %v1222_v60 = vld [vmem:[%s1532_s1 + $0x110] sm:$0xff]   ;;  %v1223_v61 = vld [vmem:[%s1532_s1 + $0x118] sm:$0xff]  }
  0x12   : > { %v196_v15 = vld [vmem:[%s1347_s20 + $0x8] sm:$0xff]  ;;  %v197_v16 = vld [vmem:[%s1347_s20 + $0x10] sm:$0xff]  ;;  %v195_v17 = vld [vmem:[%s1347_s20] sm:$0xff] }
  0x13   : > { %v1007_v18 = vcombine.high %v196_v15, %v197_v16  ;;  %v1031_v19 = vcombine.high %v195_v17, %v196_v15  ;;  %v1006_v30 = vcombine.low %v196_v15, %v197_v16  ;;  %v198_v31 = vld [vmem:[%s1347_s20 + $0x18] sm:$0xff]  ;;  %v199_v32 = vld [vmem:[%s1347_s20 + $0x20] sm:$0xff]  ;;  %v1030_v33 = vcombine.low %v195_v17, %v196_v15  ;;  %v200_v39 = vld [vmem:[%s1347_s20 + $0x28] sm:$0xff] }
  0x14   : > { %381 = vmatpush1.bf16.msra.mxu0 %v1178_v7  ;;  %545 = vmatpush1.bf16.msra.mxu1 %v1179_v8  ;;  %v1009_v35 = vcombine.high %v198_v31, %v199_v32  ;;  %v1409_v36 = vcombine.high %v197_v16, %v198_v31  ;;  %v1008_v38 = vcombine.low %v198_v31, %v199_v32  ;;  %v201_v40 = vld [vmem:[%s1347_s20 + $0x30] sm:$0xff]  ;;  %v202_v47 = vld [vmem:[%s1347_s20 + $0x38] sm:$0xff]  ;;  %v1441_v48 = vld [vmem:[%s1347_s20 + $0x40] sm:$0xff] }
  0x15   : > { %382 = vmatprep.subr.bf16.mxu0 %v1250_v1  ;;  %546 = vmatprep.subr.bf16.mxu1 %v1250_v1  ;;  %v1424_v42 = vcombine.low %v197_v16, %v198_v31  ;;  %v1011_v43 = vcombine.high %v200_v39, %v201_v40  ;;  %v1428_v44 = vcombine.high %v199_v32, %v200_v39  ;;  %v610_v62 = vld [vmem:[%s1347_s20 + $0x48] sm:$0xff] }
  0x16   : > { %1026 = vmatprep.mubr.msk.bf16.mxu0 %vm361_vm0, %v1007_v18  ;;  %1050 = vmatprep.mubr.msk.bf16.mxu1 %vm361_vm0, %v1031_v19  ;;  %v1010_v46 = vcombine.low %v200_v39, %v201_v40  ;;  %v1034_v50 = vcombine.low %v199_v32, %v200_v39  ;;  %v1013_v51 = vcombine.high %v202_v47, %v1441_v48 }
  0x17   : > { %v1037_v52 = vcombine.high %v201_v40, %v202_v47  ;;  %v1012_v54 = vcombine.low %v202_v47, %v1441_v48  ;;  %v1036_v56 = vcombine.low %v201_v40, %v202_v47  ;;  %v1085_v63 = vcombine.high %v1441_v48, %v610_v62 }
  0x18   : > { %383 = vmatpush1.bf16.msra.mxu0 %v1180_v9  ;;  %547 = vmatpush1.bf16.msra.mxu1 %v1181_v10  ;;  %v1084_v0 = vcombine.low %v1441_v48, %v610_v62 }
  0x19   : > { %384 = vmatprep.subr.bf16.mxu0 %v1250_v1  ;;  %548 = vmatprep.subr.bf16.mxu1 %v1250_v1 }
  0x1c   : > { %385 = vmatpush1.bf16.msra.mxu0 %v1182_v11  ;;  %549 = vmatpush1.bf16.msra.mxu1 %v1183_v12 }
  0x1d   : > { %386 = vmatprep.subr.bf16.mxu0 %v1250_v1  ;;  %550 = vmatprep.subr.bf16.mxu1 %v1250_v1 }
  0x20   : > { %387 = vmatpush1.bf16.msra.mxu0 %v1184_v13  ;;  %551 = vmatpush1.bf16.msra.mxu1 %v1185_v14 }
  0x21   : > { %388 = vmatprep.subr.bf16.mxu0 %v1250_v1  ;;  %552 = vmatprep.subr.bf16.mxu1 %v1250_v1 }
  0x24   : > { %389 = vmatpush1.bf16.msra.mxu0 %v1186_v20  ;;  %553 = vmatpush1.bf16.msra.mxu1 %v1187_v21 }
  0x25   : > { %390 = vmatprep.subr.bf16.mxu0 %v1250_v1  ;;  %554 = vmatprep.subr.bf16.mxu1 %v1250_v1 }
  0x28   : > { %391 = vmatpush1.bf16.msra.mxu0 %v1188_v22  ;;  %555 = vmatpush1.bf16.msra.mxu1 %v1189_v23 }
  0x29   : > { %392 = vmatprep.subr.bf16.mxu0 %v1250_v1  ;;  %556 = vmatprep.subr.bf16.mxu1 %v1250_v1 }
  0x2c   : > { %393 = vmatpush1.bf16.msra.mxu0 %v1190_v24  ;;  %557 = vmatpush1.bf16.msra.mxu1 %v1191_v25 }
  0x2d   : > { %394 = vmatprep.subr.bf16.mxu0 %v1250_v1  ;;  %558 = vmatprep.subr.bf16.mxu1 %v1250_v1 }
  0x30   : > { %395 = vmatpush1.bf16.msra.mxu0 %v1192_v26  ;;  %559 = vmatpush1.bf16.msra.mxu1 %v1193_v27 }
  0x31   : > { %396 = vmatprep.subr.bf16.mxu0 %v1250_v1  ;;  %560 = vmatprep.subr.bf16.mxu1 %v1250_v1 }
  0x34   : > { %397 = vmatpush1.bf16.msra.mxu0 %v1194_v28  ;;  %561 = vmatpush1.bf16.msra.mxu1 %v1195_v29 }
  0x35   : > { %756 = vmatprep.subr.bf16.mxu0 %v1250_v1  ;;  %1122 = vmatprep.subr.bf16.mxu1 %v1250_v1 }
  0x37   : > { %407 = vmatmul.mubr.bf16.vlgmr.msra.gmra.mrb[0].mxu0 %v1006_v30  ;;  %571 = vmatmul.mubr.bf16.vlgmr.msra.gmra.mrb[0].mxu1 %v1030_v33 }
  0x38   : > { %757 = vmatpush1.bf16.msra.mxu0 %v1200_v34  ;;  %1134 = vmatpush1.bf16.msra.mxu1 %v1200_v34 }
  0x39   : > { %758 = vmatprep.subr.bf16.mxu0 %v1250_v1  ;;  %1123 = vmatprep.subr.bf16.mxu1 %v1250_v1 }
  0x3a   : > { %1027 = vmatprep.mubr.msk.bf16.mxu0 %vm361_vm0, %v1009_v35  ;;  %1051 = vmatprep.mubr.msk.bf16.mxu1 %vm361_vm0, %v1409_v36 }
  0x3c   : > { %759 = vmatpush1.bf16.msra.mxu0 %v1201_v37  ;;  %1135 = vmatpush1.bf16.msra.mxu1 %v1201_v37 }
  0x3d   : > { %760 = vmatprep.subr.bf16.mxu0 %v1250_v1  ;;  %1124 = vmatprep.subr.bf16.mxu1 %v1250_v1 }
  0x3f   : > { %415 = vmatmul.mubr.bf16.gmra.mrb[4].mxu0 %v1008_v38  ;;  %579 = vmatmul.mubr.bf16.gmra.mrb[4].mxu1 %v1424_v42 }
  0x40   : > { %761 = vmatpush1.bf16.msra.mxu0 %v1202_v41  ;;  %1136 = vmatpush1.bf16.msra.mxu1 %v1202_v41 }
  0x41   : > { %762 = vmatprep.subr.bf16.mxu0 %v1250_v1  ;;  %1125 = vmatprep.subr.bf16.mxu1 %v1250_v1 }
  0x42   : > { %1028 = vmatprep.mubr.msk.bf16.mxu0 %vm361_vm0, %v1011_v43  ;;  %1052 = vmatprep.mubr.msk.bf16.mxu1 %vm361_vm0, %v1428_v44 }
  0x44   : > { %763 = vmatpush1.bf16.msra.mxu0 %v1203_v45  ;;  %1137 = vmatpush1.bf16.msra.mxu1 %v1203_v45 }
  0x45   : > { %764 = vmatprep.subr.bf16.mxu0 %v1250_v1  ;;  %1126 = vmatprep.subr.bf16.mxu1 %v1250_v1 }
  0x47   : > { %423 = vmatmul.mubr.bf16.gmra.mrb[8].mxu0 %v1010_v46  ;;  %587 = vmatmul.mubr.bf16.gmra.mrb[8].mxu1 %v1034_v50 }
  0x48   : > { %765 = vmatpush1.bf16.msra.mxu0 %v1204_v49  ;;  %1138 = vmatpush1.bf16.msra.mxu1 %v1204_v49 }
  0x49   : > { %766 = vmatprep.subr.bf16.mxu0 %v1250_v1  ;;  %1127 = vmatprep.subr.bf16.mxu1 %v1250_v1 }
  0x4a   : > { %1029 = vmatprep.mubr.msk.bf16.mxu0 %vm361_vm0, %v1013_v51  ;;  %1053 = vmatprep.mubr.msk.bf16.mxu1 %vm361_vm0, %v1037_v52 }
  0x4c   : > { %767 = vmatpush1.bf16.msra.mxu0 %v1209_v53  ;;  %1139 = vmatpush1.bf16.msra.mxu1 %v1209_v53 }
  0x4d   : > { %768 = vmatprep.subr.bf16.mxu0 %v1250_v1  ;;  %1128 = vmatprep.subr.bf16.mxu1 %v1250_v1 }
  0x4f   : > { %431 = vmatmul.mubr.bf16.gmra.mrb[12].mxu0 %v1012_v54  ;;  %595 = vmatmul.mubr.bf16.gmra.mrb[12].mxu1 %v1036_v56 }
  0x50   : > { %769 = vmatpush1.bf16.msra.mxu0 %v1210_v55  ;;  %1140 = vmatpush1.bf16.msra.mxu1 %v1210_v55 }
  0x51   : > { %770 = vmatprep.subr.bf16.mxu0 %v1250_v1  ;;  %1129 = vmatprep.subr.bf16.mxu1 %v1250_v1 }
  0x52   : > { %1098 = vmatprep.mubr.msk.bf16.mxu0 %vm361_vm0, %v1409_v36  ;;  %1100 = vmatprep.mubr.msk.bf16.mxu1 %vm361_vm0, %v1037_v52 }
  0x54   : > { %771 = vmatpush1.bf16.msra.mxu0 %v1215_v57  ;;  %1141 = vmatpush1.bf16.msra.mxu1 %v1215_v57 }
  0x55   : > { %772 = vmatprep.subr.bf16.mxu0 %v1250_v1  ;;  %1130 = vmatprep.subr.bf16.mxu1 %v1250_v1 }
  0x58   : > { %773 = vmatpush1.bf16.msra.mxu0 %v1216_v58  ;;  %1142 = vmatpush1.bf16.msra.mxu1 %v1216_v58 }
  0x59   : > { %774 = vmatprep.subr.bf16.mxu0 %v1250_v1  ;;  %1131 = vmatprep.subr.bf16.mxu1 %v1250_v1 }
  0x5c   : > { %775 = vmatpush1.bf16.msra.mxu0 %v1221_v59  ;;  %1143 = vmatpush1.bf16.msra.mxu1 %v1221_v59 }
  0x5d   : > { %776 = vmatprep.subr.bf16.mxu0 %v1250_v1  ;;  %1132 = vmatprep.subr.bf16.mxu1 %v1250_v1 }
  0x60   : > { %777 = vmatpush1.bf16.msra.mxu0 %v1222_v60  ;;  %1144 = vmatpush1.bf16.msra.mxu1 %v1222_v60 }
  0x61   : > { %778 = vmatprep.subr.bf16.mxu0 %v1250_v1  ;;  %1133 = vmatprep.subr.bf16.mxu1 %v1250_v1 }
  0x64   : > { %779 = vmatpush1.bf16.msra.mxu0 %v1223_v61  ;;  %1145 = vmatpush1.bf16.msra.mxu1 %v1223_v61 }
  0x67   : > { %789 = vmatmul.mubr.bf16.vlgmr.msra.gmra.mrb[16].mxu0 %v1424_v42  ;;  %805 = vmatmul.mubr.bf16.vlgmr.msra.gmra.mrb[16].mxu1 %v1036_v56  ;;  %v1102_v42 = vld [vmem:[%s1533_s2] ss:$0 sm:$0xff] }
  0x68   : > { %1099 = vmatprep.mubr.msk.bf16.mxu0 %vm361_vm0, %v1428_v44  ;;  %1101 = vmatprep.mubr.msk.bf16.mxu1 %vm361_vm0, %v1085_v63 }
  0x6f   : > { %797 = vmatmul.mubr.bf16.gmra.mrb[20].mxu0 %v1034_v50  ;;  %813 = vmatmul.mubr.bf16.gmra.mrb[20].mxu1 %v1084_v0 }
 0x10a   : > { %v408_v2 = vpop.f32.mrb[0].mxu0  ;;  %v572_v3 = vpop.f32.mrb[0].mxu1 }
 0x10b   : > { %v410_v1 = vpop.f32.mrb[1].mxu0  ;;  %v573_v4 = vadd.f32 %v572_v3, %v408_v2  ;;  %v574_v5 = vpop.f32.mrb[1].mxu1 }
 0x10c   : > { %v411_v6 = vpop.f32.mrb[2].mxu0  ;;  %v575_v7 = vpop.f32.mrb[2].mxu1 }
 0x10d   : > { %v413_v8 = vpop.f32.mrb[3].mxu0  ;;  %v576_v9 = vadd.f32 %v575_v7, %v411_v6  ;;  %v577_v10 = vpop.f32.mrb[3].mxu1 }
 0x112   : > { %v416_v11 = vpop.f32.mrb[4].mxu0  ;;  %v580_v12 = vpop.f32.mrb[4].mxu1 }
 0x113   : > { %v418_v13 = vpop.f32.mrb[5].mxu0  ;;  %v581_v14 = vadd.f32 %v580_v12, %v416_v11  ;;  %v582_v15 = vpop.f32.mrb[5].mxu1 }
 0x114   : > { %v419_v16 = vpop.f32.mrb[6].mxu0  ;;  %v583_v17 = vpop.f32.mrb[6].mxu1 }
 0x115   : > { %v421_v18 = vpop.f32.mrb[7].mxu0  ;;  %v584_v19 = vadd.f32 %v583_v17, %v419_v16  ;;  %v585_v20 = vpop.f32.mrb[7].mxu1 }
 0x11a   : > { %v424_v21 = vpop.f32.mrb[8].mxu0  ;;  %v588_v22 = vpop.f32.mrb[8].mxu1 }
 0x11b   : > { %v426_v23 = vpop.f32.mrb[9].mxu0  ;;  %v589_v24 = vadd.f32 %v588_v22, %v424_v21  ;;  %v590_v25 = vpop.f32.mrb[9].mxu1 }
 0x11c   : > { %v427_v26 = vpop.f32.mrb[10].mxu0  ;;  %v591_v27 = vpop.f32.mrb[10].mxu1 }
 0x11d   : > { %v429_v28 = vpop.f32.mrb[11].mxu0  ;;  %v592_v29 = vadd.f32 %v591_v27, %v427_v26  ;;  %v593_v30 = vpop.f32.mrb[11].mxu1 }
 0x122   : > { %v432_v31 = vpop.f32.mrb[12].mxu0  ;;  %v596_v32 = vpop.f32.mrb[12].mxu1 }
 0x123   : > { %v434_v33 = vpop.f32.mrb[13].mxu0  ;;  %v597_v34 = vadd.f32 %v596_v32, %v432_v31  ;;  %v598_v35 = vpop.f32.mrb[13].mxu1 }
 0x124   : > { %v435_v36 = vpop.f32.mrb[14].mxu0  ;;  %v599_v37 = vpop.f32.mrb[14].mxu1 }
 0x125   : > { %v437_v38 = vpop.f32.mrb[15].mxu0  ;;  %v600_v39 = vadd.f32 %v599_v37, %v435_v36  ;;  %v601_v40 = vpop.f32.mrb[15].mxu1 }
 0x13a   : > { %v790_v41 = vpop.f32.mrb[16].mxu0  ;;  %v806_v44 = vpop.f32.mrb[16].mxu1 }
 0x13b   : > { %v821_v43 = vadd.f32 %v790_v41, %v573_v4  ;;  %v792_v45 = vpop.f32.mrb[17].mxu0  ;;  %v825_v46 = vadd.f32 %v806_v44, %v589_v24  ;;  %v808_v47 = vpop.f32.mrb[17].mxu1 }
 0x13c   : > { %v793_v48 = vpop.f32.mrb[18].mxu0  ;;  %v809_v51 = vpop.f32.mrb[18].mxu1 }
 0x13d   : > { %v836_v49 = vadd.f32 %v1102_v42, %v821_v43  ;;  %v822_v50 = vadd.f32 %v793_v48, %v576_v9  ;;  %v795_v52 = vpop.f32.mrb[19].mxu0  ;;  %v840_v53 = vadd.f32 %v1102_v42, %v825_v46  ;;  %v826_v54 = vadd.f32 %v809_v51, %v592_v29  ;;  %v811_v55 = vpop.f32.mrb[19].mxu1 }
 0x13f   : > { %v844_v56 = vmax.f32 %v836_v49, 0.0  ;;  %v837_v57 = vadd.f32 %v1102_v42, %v822_v50  ;;  %v848_v58 = vmax.f32 %v840_v53, 0.0  ;;  %v841_v59 = vadd.f32 %v1102_v42, %v826_v54 }
 0x141   : > { %v1114_v60 = vpack.c.bf16 %v844_v56, %v844_v56  ;;  %v845_v61 = vmax.f32 %v837_v57, 0.0  ;;  %v1118_v62 = vpack.c.bf16 %v848_v58, %v848_v58  ;;  %v849_v63 = vmax.f32 %v841_v59, 0.0 }
 0x142   : > { %v798_v0 = vpop.f32.mrb[20].mxu0  ;;  %v814_v1 = vpop.f32.mrb[20].mxu1 }
 0x143   : > { %885 = vst.msk [vmem:[%s1504_s29] sm:$0xf] %vm884_vm1, %v1114_v60  ;;  %v1115_v2 = vpack.c.bf16 %v845_v61, %v845_v61  ;;  %v823_v3 = vadd.f32 %v798_v0, %v581_v14  ;;  %v800_v4 = vpop.f32.mrb[21].mxu0  ;;  %889 = vst.msk [vmem:[%s1504_s29 + $0x10] sm:$0xf] %vm884_vm1, %v1118_v62  ;;  %v1119_v5 = vpack.c.bf16 %v849_v63, %v849_v63  ;;  %v816_v7 = vpop.f32.mrb[21].mxu1 }
 0x144   : > { %v827_v6 = vadd.f32 %v814_v1, %v597_v34  ;;  %v801_v8 = vpop.f32.mrb[22].mxu0  ;;  %v817_v11 = vpop.f32.mrb[22].mxu1 }
 0x145   : > { %886 = vst.msk [vmem:[%s1504_s29 + $0x4] sm:$0xf] %vm884_vm1, %v1115_v2  ;;  %v838_v9 = vadd.f32 %v1102_v42, %v823_v3  ;;  %v824_v10 = vadd.f32 %v801_v8, %v584_v19  ;;  %v803_v12 = vpop.f32.mrb[23].mxu0  ;;  %890 = vst.msk [vmem:[%s1504_s29 + $0x14] sm:$0xf] %vm884_vm1, %v1119_v5  ;;  %v828_v14 = vadd.f32 %v817_v11, %v600_v39  ;;  %v819_v15 = vpop.f32.mrb[23].mxu1 }
 0x146   : > { %v842_v13 = vadd.f32 %v1102_v42, %v827_v6 }
 0x147   : > { %v846_v16 = vmax.f32 %v838_v9, 0.0  ;;  %v839_v17 = vadd.f32 %v1102_v42, %v824_v10  ;;  %v843_v20 = vadd.f32 %v1102_v42, %v828_v14 }
 0x148   : > { %v850_v18 = vmax.f32 %v842_v13, 0.0 }
 0x149   : > { %v1116_v21 = vpack.c.bf16 %v846_v16, %v846_v16  ;;  %v847_v22 = vmax.f32 %v839_v17, 0.0  ;;  %v851_v24 = vmax.f32 %v843_v20, 0.0 }
 0x14a   : > { %v1120_v23 = vpack.c.bf16 %v850_v18, %v850_v18 }
 0x14b   : > { %887 = vst.msk [vmem:[%s1504_s29 + $0x8] sm:$0xf] %vm884_vm1, %v1116_v21  ;;  %v1117_v19 = vpack.c.bf16 %v847_v22, %v847_v22  ;;  %v1121_v25 = vpack.c.bf16 %v851_v24, %v851_v24 }
 0x14c   : > { %891 = vst.msk [vmem:[%s1504_s29 + $0x18] sm:$0xf] %vm884_vm1, %v1120_v23 }
 0x14d   : > { %888 = vst.msk [vmem:[%s1504_s29 + $0xc] sm:$0xf] %vm884_vm1, %v1117_v19  ;;  %892 = vst.msk [vmem:[%s1504_s29 + $0x1c] sm:$0xf] %vm884_vm1, %v1121_v25 }
 0x14e PF: > { %s13_s14 = sadd.s32 1, %s1248_s14   ;;  %s1535_s12 = smov %s1244_s13 }
 0x14f   : > { %p10_p5 = scmp.ge.s32.totalorder %s13_s14, 4   ;;  %s1536_s13 = smov %s1538_s15 }
 0x151   :  { %12 = sbr.rel (!%p10_p5) target bundleno = 2 (0x2), region = 64 }

// kernel: _lambda_.13
= control target key start
LH: loop header
LB: loop body
LE: loop exit
PB: predicated region body
PF: predicated region fallthrough
CT: control target
= control target key end

     0   :  { %s1403_s15 = smov 0   ;;  %s1405_s16 = smov 0   ;;  %s1676_s0 = inlined_call_operand.vmem [shape: bf16[2,1,80,192], index: 0, kind: input, shape index: {}]   ;;  %s1677_s1 = inlined_call_operand.vmem [shape: bf16[3,192,64], index: 1, kind: input, shape index: {}]   ;;  %s1678_s2 = inlined_call_operand.vmem [shape: f32[1,64], index: 2, kind: input, shape index: {}]   ;;  %s1679_s3 = inlined_call_operand.vmem [shape: bf16[2,64,64], index: 3, kind: input, shape index: {}]   ;;  %s1680_s4 = inlined_call_operand.vmem [shape: bf16[2,64,64], index: 4, kind: output, shape index: {}]  }
   0x1   :  { %s1407_s17 = smov 0  }
   0x2 LB: > { %s26_s18 = sadd.s32 1, %s1371_s16  ;;  %p1083_p0 = scmp.ge.s32.totalorder %s1375_s17, 1  ;;  %s1375_s17 = sphi %s1407_s17, %s14_s17   ;;  %s1371_s16 = sphi %s1405_s16, %s1682_s16   ;;  %s1367_s15 = sphi %s1403_s15, %s1681_s15  }
   0x3   : > { %p28_p1 = scmp.ge.s32.totalorder %s26_s18, 2  ;;  %p193_p2 = scmp.lt.s32.totalorder %s1375_s17, 3 }
   0x5   : > { %s1684_s18 = smov (%p28_p1, %s26_s18), 0  ;;  %p194_p3 = pnand %p1083_p0, %p193_p2 }
   0x6   : > { %v1299_v0 = vld [vmem:[%s1677_s1 + $0x60] sm:$0xff] (!%p194_p3)   ;;  %v1377_v1 = vmov (!%p194_p3), 0   ;;  %v1301_v3 = vld [vmem:[%s1677_s1 + $0x68] sm:$0xff] (!%p194_p3)   ;;  %v1303_v5 = vld [vmem:[%s1677_s1 + $0x70] sm:$0xff] (!%p194_p3)   ;;  %p232_p4 = scmp.lt.s32.totalorder (!%p194_p3), %s1367_s15, 1  ;;  %vm424_vm0 = vcmask (!%p194_p3), 523264  }
   0x7   : > { %197 = sbr.rel (%p194_p3) target bundleno = 337 (0x151), region = 36  ;;  %437 = vmatprep.subr.bf16.mxu0 (!%p194_p3), %v1377_v1  ;;  %601 = vmatprep.subr.bf16.mxu1 (!%p194_p3), %v1377_v1  ;;  %v1300_v2 = vld [vmem:[%s1677_s1] sm:$0xff] (!%p194_p3)   ;;  %v1302_v4 = vld [vmem:[%s1677_s1 + $0x8] sm:$0xff] (!%p194_p3)   ;;  %v1304_v6 = vld [vmem:[%s1677_s1 + $0x10] sm:$0xff] (!%p194_p3)   ;;  %vm971_vm1 = vcmask (!%p194_p3), 519168  }
   0x8   : > { %438 = vmatpush1.bf16.msra.mxu0 (!%p194_p3), %v1299_v0  ;;  %602 = vmatpush1.bf16.msra.mxu1 (!%p194_p3), %v1300_v2  ;;  %v1305_v7 = vld [vmem:[%s1677_s1 + $0x78] sm:$0xff] (!%p194_p3)   ;;  %v1307_v9 = vld [vmem:[%s1677_s1 + $0x80] sm:$0xff] (!%p194_p3)   ;;  %v1309_v11 = vld [vmem:[%s1677_s1 + $0x88] sm:$0xff] (!%p194_p3)  }
   0x9   : > { %439 = vmatprep.subr.bf16.mxu0 (!%p194_p3), %v1377_v1  ;;  %603 = vmatprep.subr.bf16.mxu1 (!%p194_p3), %v1377_v1  ;;  %v1306_v8 = vld [vmem:[%s1677_s1 + $0x18] sm:$0xff] (!%p194_p3)   ;;  %v1308_v10 = vld [vmem:[%s1677_s1 + $0x20] sm:$0xff] (!%p194_p3)   ;;  %v1310_v12 = vld [vmem:[%s1677_s1 + $0x28] sm:$0xff] (!%p194_p3)  }
   0xa   : > { %v1311_v13 = vld [vmem:[%s1677_s1 + $0x90] sm:$0xff] (!%p194_p3)   ;;  %v1313_v20 = vld [vmem:[%s1677_s1 + $0x98] sm:$0xff] (!%p194_p3)   ;;  %v1315_v22 = vld [vmem:[%s1677_s1 + $0xa0] sm:$0xff] (!%p194_p3)  }
   0xb   : > { %v1312_v14 = vld [vmem:[%s1677_s1 + $0x30] sm:$0xff] (!%p194_p3)   ;;  %v1314_v21 = vld [vmem:[%s1677_s1 + $0x38] sm:$0xff] (!%p194_p3)   ;;  %v1316_v23 = vld [vmem:[%s1677_s1 + $0x40] sm:$0xff] (!%p194_p3)  }
   0xc   : > { %440 = vmatpush1.bf16.msra.mxu0 (!%p194_p3), %v1301_v3  ;;  %604 = vmatpush1.bf16.msra.mxu1 (!%p194_p3), %v1302_v4  ;;  %v1317_v24 = vld [vmem:[%s1677_s1 + $0xa8] sm:$0xff] (!%p194_p3)   ;;  %v1319_v26 = vld [vmem:[%s1677_s1 + $0xb0] sm:$0xff] (!%p194_p3)   ;;  %v1321_v28 = vld [vmem:[%s1677_s1 + $0xb8] sm:$0xff] (!%p194_p3)  }
   0xd   : > { %441 = vmatprep.subr.bf16.mxu0 (!%p194_p3), %v1377_v1  ;;  %605 = vmatprep.subr.bf16.mxu1 (!%p194_p3), %v1377_v1  ;;  %v1318_v25 = vld [vmem:[%s1677_s1 + $0x48] sm:$0xff] (!%p194_p3)   ;;  %v1320_v27 = vld [vmem:[%s1677_s1 + $0x50] sm:$0xff] (!%p194_p3)   ;;  %v1322_v29 = vld [vmem:[%s1677_s1 + $0x58] sm:$0xff] (!%p194_p3)  }
   0xe   : > { %s1686_s15 = smov (!%p232_p4, %s1367_s15), 1  ;;  %v1327_v34 = vld [vmem:[%s1677_s1 + $0xc0] sm:$0xff]   ;;  %v1328_v37 = vld [vmem:[%s1677_s1 + $0xc8] sm:$0xff]   ;;  %v1329_v41 = vld [vmem:[%s1677_s1 + $0xd0] sm:$0xff]  }
   0xf   : > { %s1273_s13 = smul.u32 80, %s1686_s15  ;;  %v1330_v45 = vld [vmem:[%s1677_s1 + $0xd8] sm:$0xff]   ;;  %v1331_v49 = vld [vmem:[%s1677_s1 + $0xe0] sm:$0xff]   ;;  %v1336_v53 = vld [vmem:[%s1677_s1 + $0xe8] sm:$0xff]  }
  0x10   : > { %442 = vmatpush1.bf16.msra.mxu0 %v1303_v5  ;;  %606 = vmatpush1.bf16.msra.mxu1 %v1304_v6  ;;  %v1337_v55 = vld [vmem:[%s1677_s1 + $0xf0] sm:$0xff]   ;;  %v1342_v57 = vld [vmem:[%s1677_s1 + $0xf8] sm:$0xff]   ;;  %v1343_v58 = vld [vmem:[%s1677_s1 + $0x100] sm:$0xff]  }
  0x11   : > { %443 = vmatprep.subr.bf16.mxu0 %v1377_v1  ;;  %607 = vmatprep.subr.bf16.mxu1 %v1377_v1  ;;  %s1479_s24 = scalar_lea.vmem %s1676_s0, %s1273_s13  ;;  %v1348_v59 = vld [vmem:[%s1677_s1 + $0x108] sm:$0xff]   ;;  %v1349_v60 = vld [vmem:[%s1677_s1 + $0x110] sm:$0xff]   ;;  %v1350_v61 = vld [vmem:[%s1677_s1 + $0x118] sm:$0xff]  }
  0x12   : > { %v259_v15 = vld [vmem:[%s1479_s24 + $0x8] sm:$0xff]  ;;  %v260_v16 = vld [vmem:[%s1479_s24 + $0x10] sm:$0xff]  ;;  %v258_v17 = vld [vmem:[%s1479_s24] sm:$0xff] }
  0x13   : > { %v1114_v18 = vcombine.high %v259_v15, %v260_v16  ;;  %v1138_v19 = vcombine.high %v258_v17, %v259_v15  ;;  %v1113_v30 = vcombine.low %v259_v15, %v260_v16  ;;  %v261_v31 = vld [vmem:[%s1479_s24 + $0x18] sm:$0xff]  ;;  %v262_v32 = vld [vmem:[%s1479_s24 + $0x20] sm:$0xff]  ;;  %v1137_v33 = vcombine.low %v258_v17, %v259_v15  ;;  %v263_v39 = vld [vmem:[%s1479_s24 + $0x28] sm:$0xff] }
  0x14   : > { %444 = vmatpush1.bf16.msra.mxu0 %v1305_v7  ;;  %608 = vmatpush1.bf16.msra.mxu1 %v1306_v8  ;;  %v1116_v35 = vcombine.high %v261_v31, %v262_v32  ;;  %v1541_v36 = vcombine.high %v260_v16, %v261_v31  ;;  %v1115_v38 = vcombine.low %v261_v31, %v262_v32  ;;  %v264_v40 = vld [vmem:[%s1479_s24 + $0x30] sm:$0xff]  ;;  %v265_v47 = vld [vmem:[%s1479_s24 + $0x38] sm:$0xff]  ;;  %v1573_v48 = vld [vmem:[%s1479_s24 + $0x40] sm:$0xff] }
  0x15   : > { %445 = vmatprep.subr.bf16.mxu0 %v1377_v1  ;;  %609 = vmatprep.subr.bf16.mxu1 %v1377_v1  ;;  %v1556_v42 = vcombine.low %v260_v16, %v261_v31  ;;  %v1118_v43 = vcombine.high %v263_v39, %v264_v40  ;;  %v1560_v44 = vcombine.high %v262_v32, %v263_v39  ;;  %v673_v62 = vld [vmem:[%s1479_s24 + $0x48] sm:$0xff]  ;;  %s1220_s24 = sshll.u32 %s1686_s15, 5 }
  0x16   : > { %1133 = vmatprep.mubr.msk.bf16.mxu0 %vm424_vm0, %v1114_v18  ;;  %1157 = vmatprep.mubr.msk.bf16.mxu1 %vm424_vm0, %v1138_v19  ;;  %v1117_v46 = vcombine.low %v263_v39, %v264_v40  ;;  %v1141_v50 = vcombine.low %v262_v32, %v263_v39  ;;  %v1120_v51 = vcombine.high %v265_v47, %v1573_v48  ;;  %s245_s7 = scalar_lea.vmem %s1679_s3, %s1220_s24  ;;  %s1647_s12 = scalar_lea.vmem %s1680_s4, %s1220_s24 }
  0x17   : > { %v1144_v52 = vcombine.high %v264_v40, %v265_v47  ;;  %v1119_v54 = vcombine.low %v265_v47, %v1573_v48  ;;  %v1143_v56 = vcombine.low %v264_v40, %v265_v47  ;;  %v1192_v63 = vcombine.high %v1573_v48, %v673_v62 }
  0x18   : > { %446 = vmatpush1.bf16.msra.mxu0 %v1307_v9  ;;  %610 = vmatpush1.bf16.msra.mxu1 %v1308_v10  ;;  %v1191_v0 = vcombine.low %v1573_v48, %v673_v62 }
  0x19   : > { %447 = vmatprep.subr.bf16.mxu0 %v1377_v1  ;;  %611 = vmatprep.subr.bf16.mxu1 %v1377_v1 }
  0x1c   : > { %448 = vmatpush1.bf16.msra.mxu0 %v1309_v11  ;;  %612 = vmatpush1.bf16.msra.mxu1 %v1310_v12 }
  0x1d   : > { %449 = vmatprep.subr.bf16.mxu0 %v1377_v1  ;;  %613 = vmatprep.subr.bf16.mxu1 %v1377_v1 }
  0x20   : > { %450 = vmatpush1.bf16.msra.mxu0 %v1311_v13  ;;  %614 = vmatpush1.bf16.msra.mxu1 %v1312_v14 }
  0x21   : > { %451 = vmatprep.subr.bf16.mxu0 %v1377_v1  ;;  %615 = vmatprep.subr.bf16.mxu1 %v1377_v1 }
  0x24   : > { %452 = vmatpush1.bf16.msra.mxu0 %v1313_v20  ;;  %616 = vmatpush1.bf16.msra.mxu1 %v1314_v21 }
  0x25   : > { %453 = vmatprep.subr.bf16.mxu0 %v1377_v1  ;;  %617 = vmatprep.subr.bf16.mxu1 %v1377_v1 }
  0x28   : > { %454 = vmatpush1.bf16.msra.mxu0 %v1315_v22  ;;  %618 = vmatpush1.bf16.msra.mxu1 %v1316_v23 }
  0x29   : > { %455 = vmatprep.subr.bf16.mxu0 %v1377_v1  ;;  %619 = vmatprep.subr.bf16.mxu1 %v1377_v1 }
  0x2c   : > { %456 = vmatpush1.bf16.msra.mxu0 %v1317_v24  ;;  %620 = vmatpush1.bf16.msra.mxu1 %v1318_v25 }
  0x2d   : > { %457 = vmatprep.subr.bf16.mxu0 %v1377_v1  ;;  %621 = vmatprep.subr.bf16.mxu1 %v1377_v1 }
  0x30   : > { %458 = vmatpush1.bf16.msra.mxu0 %v1319_v26  ;;  %622 = vmatpush1.bf16.msra.mxu1 %v1320_v27 }
  0x31   : > { %459 = vmatprep.subr.bf16.mxu0 %v1377_v1  ;;  %623 = vmatprep.subr.bf16.mxu1 %v1377_v1 }
  0x34   : > { %460 = vmatpush1.bf16.msra.mxu0 %v1321_v28  ;;  %624 = vmatpush1.bf16.msra.mxu1 %v1322_v29 }
  0x35   : > { %819 = vmatprep.subr.bf16.mxu0 %v1377_v1  ;;  %1249 = vmatprep.subr.bf16.mxu1 %v1377_v1 }
  0x37   : > { %470 = vmatmul.mubr.bf16.vlgmr.msra.gmra.mrb[0].mxu0 %v1113_v30  ;;  %634 = vmatmul.mubr.bf16.vlgmr.msra.gmra.mrb[0].mxu1 %v1137_v33 }
  0x38   : > { %820 = vmatpush1.bf16.msra.mxu0 %v1327_v34  ;;  %1261 = vmatpush1.bf16.msra.mxu1 %v1327_v34 }
  0x39   : > { %821 = vmatprep.subr.bf16.mxu0 %v1377_v1  ;;  %1250 = vmatprep.subr.bf16.mxu1 %v1377_v1 }
  0x3a   : > { %1134 = vmatprep.mubr.msk.bf16.mxu0 %vm424_vm0, %v1116_v35  ;;  %1158 = vmatprep.mubr.msk.bf16.mxu1 %vm424_vm0, %v1541_v36 }
  0x3c   : > { %822 = vmatpush1.bf16.msra.mxu0 %v1328_v37  ;;  %1262 = vmatpush1.bf16.msra.mxu1 %v1328_v37 }
  0x3d   : > { %823 = vmatprep.subr.bf16.mxu0 %v1377_v1  ;;  %1251 = vmatprep.subr.bf16.mxu1 %v1377_v1 }
  0x3f   : > { %478 = vmatmul.mubr.bf16.gmra.mrb[4].mxu0 %v1115_v38  ;;  %642 = vmatmul.mubr.bf16.gmra.mrb[4].mxu1 %v1556_v42 }
  0x40   : > { %824 = vmatpush1.bf16.msra.mxu0 %v1329_v41  ;;  %1263 = vmatpush1.bf16.msra.mxu1 %v1329_v41  ;;  %v1231_v41 = vld [vmem:[%s245_s7] sm:$0xff]  }
  0x41   : > { %825 = vmatprep.subr.bf16.mxu0 %v1377_v1  ;;  %1252 = vmatprep.subr.bf16.mxu1 %v1377_v1 }
  0x42   : > { %1135 = vmatprep.mubr.msk.bf16.mxu0 %vm424_vm0, %v1118_v43  ;;  %1159 = vmatprep.mubr.msk.bf16.mxu1 %vm424_vm0, %v1560_v44 }
  0x44   : > { %826 = vmatpush1.bf16.msra.mxu0 %v1330_v45  ;;  %1264 = vmatpush1.bf16.msra.mxu1 %v1330_v45 }
  0x45   : > { %827 = vmatprep.subr.bf16.mxu0 %v1377_v1  ;;  %1253 = vmatprep.subr.bf16.mxu1 %v1377_v1 }
  0x47   : > { %486 = vmatmul.mubr.bf16.gmra.mrb[8].mxu0 %v1117_v46  ;;  %650 = vmatmul.mubr.bf16.gmra.mrb[8].mxu1 %v1141_v50  ;;  %v1232_v46 = vunpack.c.l.bf16 %v1231_v41 }
  0x48   : > { %828 = vmatpush1.bf16.msra.mxu0 %v1331_v49  ;;  %1265 = vmatpush1.bf16.msra.mxu1 %v1331_v49 }
  0x49   : > { %829 = vmatprep.subr.bf16.mxu0 %v1377_v1  ;;  %1254 = vmatprep.subr.bf16.mxu1 %v1377_v1 }
  0x4a   : > { %1136 = vmatprep.mubr.msk.bf16.mxu0 %vm424_vm0, %v1120_v51  ;;  %1160 = vmatprep.mubr.msk.bf16.mxu1 %vm424_vm0, %v1144_v52 }
  0x4c   : > { %830 = vmatpush1.bf16.msra.mxu0 %v1336_v53  ;;  %1266 = vmatpush1.bf16.msra.mxu1 %v1336_v53 }
  0x4d   : > { %831 = vmatprep.subr.bf16.mxu0 %v1377_v1  ;;  %1255 = vmatprep.subr.bf16.mxu1 %v1377_v1 }
  0x4f   : > { %494 = vmatmul.mubr.bf16.gmra.mrb[12].mxu0 %v1119_v54  ;;  %658 = vmatmul.mubr.bf16.gmra.mrb[12].mxu1 %v1143_v56 }
  0x50   : > { %832 = vmatpush1.bf16.msra.mxu0 %v1337_v55  ;;  %1267 = vmatpush1.bf16.msra.mxu1 %v1337_v55  ;;  %v1233_v55 = vunpack.c.h.bf16 %v1231_v41 }
  0x51   : > { %833 = vmatprep.subr.bf16.mxu0 %v1377_v1  ;;  %1256 = vmatprep.subr.bf16.mxu1 %v1377_v1 }
  0x52   : > { %1205 = vmatprep.mubr.msk.bf16.mxu0 %vm424_vm0, %v1541_v36  ;;  %1207 = vmatprep.mubr.msk.bf16.mxu1 %vm424_vm0, %v1144_v52 }
  0x54   : > { %834 = vmatpush1.bf16.msra.mxu0 %v1342_v57  ;;  %1268 = vmatpush1.bf16.msra.mxu1 %v1342_v57 }
  0x55   : > { %835 = vmatprep.subr.bf16.mxu0 %v1377_v1  ;;  %1257 = vmatprep.subr.bf16.mxu1 %v1377_v1 }
  0x58   : > { %836 = vmatpush1.bf16.msra.mxu0 %v1343_v58  ;;  %1269 = vmatpush1.bf16.msra.mxu1 %v1343_v58 }
  0x59   : > { %837 = vmatprep.subr.bf16.mxu0 %v1377_v1  ;;  %1258 = vmatprep.subr.bf16.mxu1 %v1377_v1 }
  0x5c   : > { %838 = vmatpush1.bf16.msra.mxu0 %v1348_v59  ;;  %1270 = vmatpush1.bf16.msra.mxu1 %v1348_v59 }
  0x5d   : > { %839 = vmatprep.subr.bf16.mxu0 %v1377_v1  ;;  %1259 = vmatprep.subr.bf16.mxu1 %v1377_v1 }
  0x60   : > { %840 = vmatpush1.bf16.msra.mxu0 %v1349_v60  ;;  %1271 = vmatpush1.bf16.msra.mxu1 %v1349_v60 }
  0x61   : > { %841 = vmatprep.subr.bf16.mxu0 %v1377_v1  ;;  %1260 = vmatprep.subr.bf16.mxu1 %v1377_v1 }
  0x64   : > { %842 = vmatpush1.bf16.msra.mxu0 %v1350_v61  ;;  %1272 = vmatpush1.bf16.msra.mxu1 %v1350_v61 }
  0x67   : > { %852 = vmatmul.mubr.bf16.vlgmr.msra.gmra.mrb[16].mxu0 %v1556_v42  ;;  %868 = vmatmul.mubr.bf16.vlgmr.msra.gmra.mrb[16].mxu1 %v1143_v56  ;;  %v1247_v42 = vld [vmem:[%s245_s7 + $0x10] sm:$0xff]  }
  0x68   : > { %1206 = vmatprep.mubr.msk.bf16.mxu0 %vm424_vm0, %v1560_v44  ;;  %1208 = vmatprep.mubr.msk.bf16.mxu1 %vm424_vm0, %v1192_v63  ;;  %v1209_v44 = vld [vmem:[%s1678_s2] ss:$0 sm:$0xff]  ;;  %v1241_v60 = vunpack.c.h.bf16 %v1247_v42 }
  0x6f   : > { %860 = vmatmul.mubr.bf16.gmra.mrb[20].mxu0 %v1141_v50  ;;  %876 = vmatmul.mubr.bf16.gmra.mrb[20].mxu1 %v1191_v0  ;;  %v1240_v50 = vunpack.c.l.bf16 %v1247_v42 }
 0x10a   : > { %v471_v2 = vpop.f32.mrb[0].mxu0  ;;  %v635_v3 = vpop.f32.mrb[0].mxu1 }
 0x10b   : > { %v473_v1 = vpop.f32.mrb[1].mxu0  ;;  %v636_v4 = vadd.f32 %v635_v3, %v471_v2  ;;  %v637_v5 = vpop.f32.mrb[1].mxu1  ;;  %v1246_v3 = vld [vmem:[%s245_s7 + $0x8] sm:$0xff]  }
 0x10c   : > { %v474_v6 = vpop.f32.mrb[2].mxu0  ;;  %v638_v7 = vpop.f32.mrb[2].mxu1  ;;  %v1248_v5 = vld [vmem:[%s245_s7 + $0x18] sm:$0xff]  }
 0x10d   : > { %v476_v8 = vpop.f32.mrb[3].mxu0  ;;  %v639_v9 = vadd.f32 %v638_v7, %v474_v6  ;;  %v640_v10 = vpop.f32.mrb[3].mxu1 }
 0x112   : > { %v479_v11 = vpop.f32.mrb[4].mxu0  ;;  %v643_v12 = vpop.f32.mrb[4].mxu1 }
 0x113   : > { %v481_v13 = vpop.f32.mrb[5].mxu0  ;;  %v1629_v14 = vadd.f32 %v643_v12, %v479_v11  ;;  %v645_v15 = vpop.f32.mrb[5].mxu1  ;;  %v1236_v12 = vunpack.c.l.bf16 %v1246_v3 }
 0x114   : > { %v482_v16 = vpop.f32.mrb[6].mxu0  ;;  %v646_v17 = vpop.f32.mrb[6].mxu1 }
 0x115   : > { %v484_v18 = vpop.f32.mrb[7].mxu0  ;;  %v1631_v19 = vadd.f32 %v646_v17, %v482_v16  ;;  %v648_v20 = vpop.f32.mrb[7].mxu1 }
 0x116   : > { %v1244_v20 = vunpack.c.l.bf16 %v1248_v5 }
 0x11a   : > { %v487_v21 = vpop.f32.mrb[8].mxu0  ;;  %v651_v22 = vpop.f32.mrb[8].mxu1 }
 0x11b   : > { %v489_v23 = vpop.f32.mrb[9].mxu0  ;;  %v652_v24 = vadd.f32 %v651_v22, %v487_v21  ;;  %v653_v25 = vpop.f32.mrb[9].mxu1 }
 0x11c   : > { %v490_v26 = vpop.f32.mrb[10].mxu0  ;;  %v654_v27 = vpop.f32.mrb[10].mxu1 }
 0x11d   : > { %v492_v28 = vpop.f32.mrb[11].mxu0  ;;  %v655_v29 = vadd.f32 %v654_v27, %v490_v26  ;;  %v656_v30 = vpop.f32.mrb[11].mxu1  ;;  %v1237_v26 = vunpack.c.h.bf16 %v1246_v3 }
 0x122   : > { %v495_v31 = vpop.f32.mrb[12].mxu0  ;;  %v659_v32 = vpop.f32.mrb[12].mxu1 }
 0x123   : > { %v497_v33 = vpop.f32.mrb[13].mxu0  ;;  %v660_v34 = vadd.f32 %v659_v32, %v495_v31  ;;  %v661_v35 = vpop.f32.mrb[13].mxu1  ;;  %v1245_v31 = vunpack.c.h.bf16 %v1248_v5 }
 0x124   : > { %v498_v36 = vpop.f32.mrb[14].mxu0  ;;  %v662_v37 = vpop.f32.mrb[14].mxu1 }
 0x125   : > { %v500_v38 = vpop.f32.mrb[15].mxu0  ;;  %v663_v39 = vadd.f32 %v662_v37, %v498_v36  ;;  %v664_v40 = vpop.f32.mrb[15].mxu1 }
 0x13a   : > { %v853_v43 = vpop.f32.mrb[16].mxu0  ;;  %v869_v47 = vpop.f32.mrb[16].mxu1 }
 0x13b   : > { %v884_v45 = vadd.f32 %v853_v43, %v636_v4  ;;  %v855_v48 = vpop.f32.mrb[17].mxu0  ;;  %v888_v49 = vadd.f32 %v869_v47, %v652_v24  ;;  %v871_v51 = vpop.f32.mrb[17].mxu1 }
 0x13c   : > { %v856_v52 = vpop.f32.mrb[18].mxu0  ;;  %v872_v56 = vpop.f32.mrb[18].mxu1 }
 0x13d   : > { %v899_v53 = vadd.f32 %v1209_v44, %v884_v45  ;;  %v885_v54 = vadd.f32 %v856_v52, %v639_v9  ;;  %v858_v57 = vpop.f32.mrb[19].mxu0  ;;  %v903_v58 = vadd.f32 %v1209_v44, %v888_v49  ;;  %v889_v59 = vadd.f32 %v872_v56, %v655_v29  ;;  %v874_v61 = vpop.f32.mrb[19].mxu1 }
 0x13f   : > { %v923_v62 = vadd.f32 %v1232_v46, %v899_v53  ;;  %v900_v63 = vadd.f32 %v1209_v44, %v885_v54  ;;  %v927_v0 = vadd.f32 %v1240_v50, %v903_v58  ;;  %v904_v2 = vadd.f32 %v1209_v44, %v889_v59 }
 0x141   : > { %v931_v1 = vmax.f32 %v923_v62, 0.0  ;;  %v924_v4 = vadd.f32 %v1233_v55, %v900_v63  ;;  %v935_v6 = vmax.f32 %v927_v0, 0.0  ;;  %v928_v7 = vadd.f32 %v1241_v60, %v904_v2 }
 0x142   : > { %v861_v8 = vpop.f32.mrb[20].mxu0  ;;  %v877_v13 = vpop.f32.mrb[20].mxu1 }
 0x143   : > { %v1222_v9 = vpack.c.bf16 %v931_v1, %v931_v1  ;;  %v932_v10 = vmax.f32 %v924_v4, 0.0  ;;  %v886_v11 = vadd.f32 %v861_v8, %v1629_v14  ;;  %v863_v15 = vpop.f32.mrb[21].mxu0  ;;  %v1226_v16 = vpack.c.bf16 %v935_v6, %v935_v6  ;;  %v879_v21 = vpop.f32.mrb[21].mxu1 }
 0x144   : > { %v936_v17 = vmax.f32 %v928_v7, 0.0  ;;  %v890_v18 = vadd.f32 %v877_v13, %v660_v34  ;;  %v864_v22 = vpop.f32.mrb[22].mxu0  ;;  %v880_v14 = vpop.f32.mrb[22].mxu1 }
 0x145   : > { %972 = vst.msk [vmem:[%s1647_s12] sm:$0xf] %vm971_vm1, %v1222_v9  ;;  %v1223_v23 = vpack.c.bf16 %v932_v10, %v932_v10  ;;  %v901_v24 = vadd.f32 %v1209_v44, %v886_v11  ;;  %v887_v25 = vadd.f32 %v864_v22, %v1631_v19  ;;  %v866_v27 = vpop.f32.mrb[23].mxu0  ;;  %976 = vst.msk [vmem:[%s1647_s12 + $0x10] sm:$0xf] %vm971_vm1, %v1226_v16  ;;  %v882_v32 = vpop.f32.mrb[23].mxu1 }
 0x146   : > { %v1227_v28 = vpack.c.bf16 %v936_v17, %v936_v17  ;;  %v905_v29 = vadd.f32 %v1209_v44, %v890_v18  ;;  %v891_v30 = vadd.f32 %v880_v14, %v663_v39 }
 0x147   : > { %973 = vst.msk [vmem:[%s1647_s12 + $0x4] sm:$0xf] %vm971_vm1, %v1223_v23  ;;  %v925_v33 = vadd.f32 %v1236_v12, %v901_v24  ;;  %v902_v34 = vadd.f32 %v1209_v44, %v887_v25 }
 0x148   : > { %977 = vst.msk [vmem:[%s1647_s12 + $0x14] sm:$0xf] %vm971_vm1, %v1227_v28  ;;  %v929_v19 = vadd.f32 %v1244_v20, %v905_v29  ;;  %v906_v35 = vadd.f32 %v1209_v44, %v891_v30 }
 0x149   : > { %v933_v36 = vmax.f32 %v925_v33, 0.0  ;;  %v926_v37 = vadd.f32 %v1237_v26, %v902_v34 }
 0x14a   : > { %v937_v38 = vmax.f32 %v929_v19, 0.0  ;;  %v930_v40 = vadd.f32 %v1245_v31, %v906_v35 }
 0x14b   : > { %v1224_v41 = vpack.c.bf16 %v933_v36, %v933_v36  ;;  %v934_v39 = vmax.f32 %v926_v37, 0.0 }
 0x14c   : > { %v1228_v42 = vpack.c.bf16 %v937_v38, %v937_v38  ;;  %v938_v43 = vmax.f32 %v930_v40, 0.0 }
 0x14d   : > { %974 = vst.msk [vmem:[%s1647_s12 + $0x8] sm:$0xf] %vm971_vm1, %v1224_v41  ;;  %v1225_v45 = vpack.c.bf16 %v934_v39, %v934_v39 }
 0x14e   : > { %978 = vst.msk [vmem:[%s1647_s12 + $0x18] sm:$0xf] %vm971_vm1, %v1228_v42  ;;  %v1229_v46 = vpack.c.bf16 %v938_v43, %v938_v43 }
 0x14f   : > { %975 = vst.msk [vmem:[%s1647_s12 + $0xc] sm:$0xf] %vm971_vm1, %v1225_v45 }
 0x150   : > { %979 = vst.msk [vmem:[%s1647_s12 + $0x1c] sm:$0xf] %vm971_vm1, %v1229_v46 }
 0x151 PF: > { %s14_s17 = sadd.s32 1, %s1375_s17   ;;  %s1681_s15 = smov %s1371_s16 }
 0x152   : > { %p11_p5 = scmp.ge.s32.totalorder %s14_s17, 4   ;;  %s1682_s16 = smov %s1684_s18 }
 0x154   :  { %13 = sbr.rel (!%p11_p5) target bundleno = 2 (0x2), region = 71 }

// kernel: _lambda_.15
= control target key start
LH: loop header
LB: loop body
LE: loop exit
PB: predicated region body
PF: predicated region fallthrough
CT: control target
= control target key end

     0   :  { %s500_s12 = smov 0   ;;  %s502_s13 = smov 0   ;;  %s548_s0 = inlined_call_operand.vmem [shape: bf16[2,1,16,64], index: 0, kind: input, shape index: {}]   ;;  %s549_s1 = inlined_call_operand.vmem [shape: bf16[1,64,128], index: 1, kind: input, shape index: {}]   ;;  %s550_s2 = inlined_call_operand.vmem [shape: f32[1,128], index: 2, kind: input, shape index: {}]   ;;  %s551_s3 = inlined_call_operand.vmem [shape: bf16[2,16,128], index: 3, kind: output, shape index: {}]  }
   0x1   :  { %s504_s14 = smov 0  }
   0x2 LB: > { %s25_s15 = sadd.s32 1, %s472_s13  ;;  %p381_p0 = scmp.ge.s32.totalorder %s476_s14, 1  ;;  %s476_s14 = sphi %s504_s14, %s13_s14   ;;  %s472_s13 = sphi %s502_s13, %s553_s13   ;;  %s468_s12 = sphi %s500_s12, %s552_s12  }
   0x3   : > { %p27_p1 = scmp.ge.s32.totalorder %s25_s15, 2  ;;  %p151_p2 = scmp.lt.s32.totalorder %s476_s14, 3 }
   0x5   : > { %s555_s15 = smov (%p27_p1, %s25_s15), 0  ;;  %p152_p3 = pnand %p381_p0, %p151_p2 }
   0x6   : > { %v449_v0 = vld [vmem:[%s549_s1] sm:$0xff] (!%p152_p3)   ;;  %v478_v1 = vmov (!%p152_p3), 0.0   ;;  %v450_v2 = vld [vmem:[%s549_s1 + $0x8] sm:$0xff] (!%p152_p3)   ;;  %vm479_vm0 = vmmov (!%p152_p3), 0   ;;  %p179_p4 = scmp.lt.s32.totalorder (!%p152_p3), %s468_s12, 1  ;;  %v451_v3 = vld [vmem:[%s549_s1 + $0x10] sm:$0xff] (!%p152_p3)  }
   0x7   : > { %155 = sbr.rel (%p152_p3) target bundleno = 242 (0xf2), region = 32  ;;  %411 = vmatprep.subr.bf16.mxu0 (!%p152_p3), %v478_v1  ;;  %419 = vmatprep.mubr.msk.bf16.mxu0 (!%p152_p3), %vm479_vm0, %v478_v1  ;;  %v452_v4 = vld [vmem:[%s549_s1 + $0x18] sm:$0xff] (!%p152_p3)   ;;  %vm241_vm1 = vcmask (!%p152_p3), 523264   ;;  %v386_v6 = vld [vmem:[%s550_s2] ss:$0 sm:$0xff] (!%p152_p3) }
   0x8   : > { %412 = vmatpush3.bf16.msra.mxu0 (!%p152_p3), %v449_v0 }
   0x9   : > { %413 = vmatprep.subr.bf16.mxu0 (!%p152_p3), %v478_v1 }
   0xc   : > { %414 = vmatpush3.bf16.msra.mxu0 (!%p152_p3), %v450_v2 }
   0xd   : > { %415 = vmatprep.subr.bf16.mxu0 (!%p152_p3), %v478_v1 }
   0xe   : > { %s557_s12 = smov (!%p179_p4, %s468_s12), 1 }
   0xf   : > { %s397_s22 = sshll.u32 %s557_s12, 3 }
  0x10   : > { %s183_s25 = scalar_lea.vmem %s548_s0, %s397_s22  ;;  %416 = vmatpush3.bf16.msra.mxu0 %v451_v3  ;;  %s192_s5 = scalar_lea.vmem %s551_s3, %s397_s22 }
  0x11   : > { %417 = vmatprep.subr.bf16.mxu0 %v478_v1  ;;  %v453_v5 = vld [vmem:[%s183_s25] sm:$0xff]  }
  0x14   : > { %418 = vmatpush3.bf16.msra.mxu0 %v452_v4 }
  0x17   : > { %420 = vmatmul.mubr.msk.bf16.vlgmr.msra.gmra.mrb[0].mxu0 %vm241_vm1, %v453_v5 }
  0xea   : > { %v279_v7 = vpop.f32.mrb[0].mxu0 }
  0xeb   : > { %v421_v8 = vpop.f32.mrb[1].mxu0  ;;  %v280_v10 = vadd.f32 %v386_v6, %v279_v7 }
  0xec   : > { %v282_v9 = vpop.f32.mrb[2].mxu0 }
  0xed   : > { %v283_v11 = vadd.f32 %v386_v6, %v282_v9  ;;  %v422_v12 = vpop.f32.mrb[3].mxu0 }
  0xef   : > { %v404_v13 = vpack.c.bf16 %v283_v11, %v280_v10 }
  0xf1   : > { %405 = vst [vmem:[%s192_s5] sm:$0xff] %v404_v13  }
  0xf2 PF: > { %s13_s14 = sadd.s32 1, %s476_s14   ;;  %s552_s12 = smov %s472_s13 }
  0xf3   : > { %p10_p5 = scmp.ge.s32.totalorder %s13_s14, 4   ;;  %s553_s13 = smov %s555_s15 }
  0xf5   :  { %12 = sbr.rel (!%p10_p5) target bundleno = 2 (0x2), region = 62 }

// kernel: _lambda_.14
= control target key start
LH: loop header
LB: loop body
LE: loop exit
PB: predicated region body
PF: predicated region fallthrough
CT: control target
= control target key end

     0   :  { %s1003_s12 = smov 0   ;;  %s1005_s13 = smov 0   ;;  %s1210_s0 = inlined_call_operand.vmem [shape: bf16[2,2,20,192], index: 0, kind: input, shape index: {}]   ;;  %s1211_s1 = inlined_call_operand.vmem [shape: bf16[3,192,128], index: 1, kind: input, shape index: {}]   ;;  %s1212_s2 = inlined_call_operand.vmem [shape: f32[1,128], index: 2, kind: input, shape index: {}]   ;;  %s1213_s3 = inlined_call_operand.vmem [shape: bf16[2,16,128], index: 3, kind: output, shape index: {}]  }
   0x1   :  { %s1007_s14 = smov 0  }
   0x2 LB: > { %s25_s15 = sadd.s32 1, %s976_s13  ;;  %p773_p0 = scmp.ge.s32.totalorder %s980_s14, 1  ;;  %s980_s14 = sphi %s1007_s14, %s13_s14   ;;  %s976_s13 = sphi %s1005_s13, %s1215_s13   ;;  %s972_s12 = sphi %s1003_s12, %s1214_s12  }
   0x3   : > { %p27_p1 = scmp.ge.s32.totalorder %s25_s15, 2  ;;  %p151_p2 = scmp.lt.s32.totalorder %s980_s14, 3 }
   0x5   : > { %s1217_s15 = smov (%p27_p1, %s25_s15), 0  ;;  %p152_p3 = pnand %p773_p0, %p151_p2 }
   0x6   : > { %v913_v0 = vld [vmem:[%s1211_s1 + $0x60] sm:$0xff] (!%p152_p3)   ;;  %v982_v1 = vmov (!%p152_p3), 0   ;;  %v915_v3 = vld [vmem:[%s1211_s1 + $0x68] sm:$0xff] (!%p152_p3)   ;;  %v917_v5 = vld [vmem:[%s1211_s1 + $0x70] sm:$0xff] (!%p152_p3)   ;;  %p179_p4 = scmp.lt.s32.totalorder (!%p152_p3), %s972_s12, 1  ;;  %vm330_vm0 = vcmask (!%p152_p3), 523264  }
   0x7   : > { %155 = sbr.rel (%p152_p3) target bundleno = 326 (0x146), region = 32  ;;  %334 = vmatprep.subr.bf16.mxu0 (!%p152_p3), %v982_v1  ;;  %459 = vmatprep.subr.bf16.mxu1 (!%p152_p3), %v982_v1  ;;  %v914_v2 = vld [vmem:[%s1211_s1] sm:$0xff] (!%p152_p3)   ;;  %v916_v4 = vld [vmem:[%s1211_s1 + $0x8] sm:$0xff] (!%p152_p3)   ;;  %v918_v6 = vld [vmem:[%s1211_s1 + $0x10] sm:$0xff] (!%p152_p3)   ;;  %vm541_vm1 = vcmask (!%p152_p3), 1045504  }
   0x8   : > { %335 = vmatpush1.bf16.msra.mxu0 (!%p152_p3), %v913_v0  ;;  %460 = vmatpush1.bf16.msra.mxu1 (!%p152_p3), %v914_v2  ;;  %v919_v7 = vld [vmem:[%s1211_s1 + $0x78] sm:$0xff] (!%p152_p3)   ;;  %v921_v9 = vld [vmem:[%s1211_s1 + $0x80] sm:$0xff] (!%p152_p3)   ;;  %v923_v11 = vld [vmem:[%s1211_s1 + $0x88] sm:$0xff] (!%p152_p3)  }
   0x9   : > { %336 = vmatprep.subr.bf16.mxu0 (!%p152_p3), %v982_v1  ;;  %461 = vmatprep.subr.bf16.mxu1 (!%p152_p3), %v982_v1  ;;  %v920_v8 = vld [vmem:[%s1211_s1 + $0x18] sm:$0xff] (!%p152_p3)   ;;  %v922_v10 = vld [vmem:[%s1211_s1 + $0x20] sm:$0xff] (!%p152_p3)   ;;  %v924_v12 = vld [vmem:[%s1211_s1 + $0x28] sm:$0xff] (!%p152_p3)  }
   0xa   : > { %v925_v13 = vld [vmem:[%s1211_s1 + $0x90] sm:$0xff] (!%p152_p3)   ;;  %v927_v18 = vld [vmem:[%s1211_s1 + $0x98] sm:$0xff] (!%p152_p3)   ;;  %v929_v21 = vld [vmem:[%s1211_s1 + $0xa0] sm:$0xff] (!%p152_p3)  }
   0xb   : > { %v926_v14 = vld [vmem:[%s1211_s1 + $0x30] sm:$0xff] (!%p152_p3)   ;;  %v928_v20 = vld [vmem:[%s1211_s1 + $0x38] sm:$0xff] (!%p152_p3)   ;;  %v930_v22 = vld [vmem:[%s1211_s1 + $0x40] sm:$0xff] (!%p152_p3)  }
   0xc   : > { %337 = vmatpush1.bf16.msra.mxu0 (!%p152_p3), %v915_v3  ;;  %462 = vmatpush1.bf16.msra.mxu1 (!%p152_p3), %v916_v4  ;;  %v931_v23 = vld [vmem:[%s1211_s1 + $0xa8] sm:$0xff] (!%p152_p3)   ;;  %v933_v25 = vld [vmem:[%s1211_s1 + $0xb0] sm:$0xff] (!%p152_p3)   ;;  %v935_v31 = vld [vmem:[%s1211_s1 + $0xb8] sm:$0xff] (!%p152_p3)  }
   0xd   : > { %338 = vmatprep.subr.bf16.mxu0 (!%p152_p3), %v982_v1  ;;  %463 = vmatprep.subr.bf16.mxu1 (!%p152_p3), %v982_v1  ;;  %v932_v24 = vld [vmem:[%s1211_s1 + $0x48] sm:$0xff] (!%p152_p3)   ;;  %v934_v28 = vld [vmem:[%s1211_s1 + $0x50] sm:$0xff] (!%p152_p3)   ;;  %v936_v32 = vld [vmem:[%s1211_s1 + $0x58] sm:$0xff] (!%p152_p3)  }
   0xe   : > { %s1219_s12 = smov (!%p179_p4, %s972_s12), 1  ;;  %v942_v37 = vld [vmem:[%s1211_s1 + $0xc0] sm:$0xff]   ;;  %v943_v39 = vld [vmem:[%s1211_s1 + $0xc8] sm:$0xff]   ;;  %v944_v40 = vld [vmem:[%s1211_s1 + $0xd0] sm:$0xff]  }
   0xf   : > { %s887_s11 = smul.u32 48, %s1219_s12  ;;  %v945_v41 = vld [vmem:[%s1211_s1 + $0xd8] sm:$0xff]   ;;  %v946_v42 = vld [vmem:[%s1211_s1 + $0xe0] sm:$0xff]   ;;  %v947_v43 = vld [vmem:[%s1211_s1 + $0xe8] sm:$0xff]   ;;  %s879_s26 = sshll.u32 %s1219_s12, 3 }
  0x10   : > { %339 = vmatpush1.bf16.msra.mxu0 %v917_v5  ;;  %464 = vmatpush1.bf16.msra.mxu1 %v918_v6  ;;  %v948_v44 = vld [vmem:[%s1211_s1 + $0xf0] sm:$0xff]   ;;  %v949_v45 = vld [vmem:[%s1211_s1 + $0xf8] sm:$0xff]   ;;  %v950_v46 = vld [vmem:[%s1211_s1 + $0x100] sm:$0xff]   ;;  %s192_s28 = scalar_lea.vmem %s1213_s3, %s879_s26 }
  0x11   : > { %340 = vmatprep.subr.bf16.mxu0 %v982_v1  ;;  %465 = vmatprep.subr.bf16.mxu1 %v982_v1  ;;  %s1082_s22 = scalar_lea.vmem %s1210_s0, %s887_s11  ;;  %v951_v47 = vld [vmem:[%s1211_s1 + $0x108] sm:$0xff]   ;;  %v952_v48 = vld [vmem:[%s1211_s1 + $0x110] sm:$0xff]   ;;  %v953_v51 = vld [vmem:[%s1211_s1 + $0x118] sm:$0xff]  }
  0x12   : > { %v939_v15 = vld [vmem:[%s1082_s22 + $0x1c] ss:$8 sps:$4 sm:$0xff]   ;;  %v1092_v17 = vld [vmem:[%s1082_s22 + $0x8] sm:$0xff]  ;;  %v502_v27 = vld [vmem:[%s1082_s22 + $0x10] sm:$0x33] }
  0x13   : > { %v195_v16 = vld [vmem:[%s1082_s22] sm:$0xff]  ;;  %817 = vmatprep.mubr.msk.bf16.mxu0 %vm330_vm0, %v939_v15  ;;  %v860_v30 = vcombine.high %v502_v27, %v502_v27  ;;  %v859_v50 = vcombine.low %v502_v27, %v502_v27 }
  0x14   : > { %341 = vmatpush1.bf16.msra.mxu0 %v919_v7  ;;  %466 = vmatpush1.bf16.msra.mxu1 %v920_v8  ;;  %v819_v19 = vcombine.high %v195_v16, %v1092_v17  ;;  %v500_v26 = vld [vmem:[%s1082_s22] sm:$0xcc]  ;;  %v818_v36 = vcombine.low %v195_v16, %v1092_v17 }
  0x15   : > { %342 = vmatprep.subr.bf16.mxu0 %v982_v1  ;;  %467 = vmatprep.subr.bf16.mxu1 %v982_v1  ;;  %v858_v29 = vcombine.high %v500_v26, %v1092_v17  ;;  %v546_v34 = vrot.slane %v860_v30, 2  ;;  %v937_v35 = vld [vmem:[%s1082_s22 + $0x18] ss:$8 sps:$4 sm:$0xff]   ;;  %v857_v49 = vcombine.low %v500_v26, %v1092_v17  ;;  %v543_v53 = vrot.slane %v859_v50, 2 }
  0x16   : > { %832 = vmatprep.mubr.msk.bf16.mxu1 %vm330_vm0, %v819_v19 }
  0x17   : > { %v545_v33 = vrot.slane %v858_v29, 2  ;;  %v542_v52 = vrot.slane %v857_v49, 2 }
  0x18   : > { %343 = vmatpush1.bf16.msra.mxu0 %v921_v9  ;;  %468 = vmatpush1.bf16.msra.mxu1 %v922_v10 }
  0x19   : > { %344 = vmatprep.subr.bf16.mxu0 %v982_v1  ;;  %469 = vmatprep.subr.bf16.mxu1 %v982_v1  ;;  %v547_v38 = vsel %vm541_vm1, %v545_v33, %v546_v34  ;;  %v544_v54 = vsel %vm541_vm1, %v542_v52, %v543_v53 }
  0x1c   : > { %345 = vmatpush1.bf16.msra.mxu0 %v923_v11  ;;  %470 = vmatpush1.bf16.msra.mxu1 %v924_v12 }
  0x1d   : > { %346 = vmatprep.subr.bf16.mxu0 %v982_v1  ;;  %471 = vmatprep.subr.bf16.mxu1 %v982_v1 }
  0x20   : > { %347 = vmatpush1.bf16.msra.mxu0 %v925_v13  ;;  %472 = vmatpush1.bf16.msra.mxu1 %v926_v14 }
  0x21   : > { %348 = vmatprep.subr.bf16.mxu0 %v982_v1  ;;  %473 = vmatprep.subr.bf16.mxu1 %v982_v1 }
  0x24   : > { %349 = vmatpush1.bf16.msra.mxu0 %v927_v18  ;;  %474 = vmatpush1.bf16.msra.mxu1 %v928_v20 }
  0x25   : > { %350 = vmatprep.subr.bf16.mxu0 %v982_v1  ;;  %475 = vmatprep.subr.bf16.mxu1 %v982_v1 }
  0x28   : > { %351 = vmatpush1.bf16.msra.mxu0 %v929_v21  ;;  %476 = vmatpush1.bf16.msra.mxu1 %v930_v22 }
  0x29   : > { %352 = vmatprep.subr.bf16.mxu0 %v982_v1  ;;  %477 = vmatprep.subr.bf16.mxu1 %v982_v1 }
  0x2c   : > { %353 = vmatpush1.bf16.msra.mxu0 %v931_v23  ;;  %478 = vmatpush1.bf16.msra.mxu1 %v932_v24 }
  0x2d   : > { %354 = vmatprep.subr.bf16.mxu0 %v982_v1  ;;  %479 = vmatprep.subr.bf16.mxu1 %v982_v1 }
  0x30   : > { %355 = vmatpush1.bf16.msra.mxu0 %v933_v25  ;;  %480 = vmatpush1.bf16.msra.mxu1 %v934_v28 }
  0x31   : > { %356 = vmatprep.subr.bf16.mxu0 %v982_v1  ;;  %481 = vmatprep.subr.bf16.mxu1 %v982_v1 }
  0x34   : > { %357 = vmatpush1.bf16.msra.mxu0 %v935_v31  ;;  %482 = vmatpush1.bf16.msra.mxu1 %v936_v32 }
  0x35   : > { %624 = vmatprep.subr.bf16.mxu0 %v982_v1 }
  0x37   : > { %367 = vmatmul.mubr.bf16.vlgmr.msra.gmra.mrb[0].mxu0 %v937_v35  ;;  %492 = vmatmul.mubr.bf16.vlgmr.msra.gmra.mrb[0].mxu1 %v818_v36 }
  0x38   : > { %625 = vmatpush1.bf16.msra.mxu0 %v942_v37  ;;  %873 = vmatprep.mubr.msk.bf16.mxu0 %vm330_vm0, %v547_v38 }
  0x39   : > { %626 = vmatprep.subr.bf16.mxu0 %v982_v1 }
  0x3c   : > { %627 = vmatpush1.bf16.msra.mxu0 %v943_v39 }
  0x3d   : > { %628 = vmatprep.subr.bf16.mxu0 %v982_v1 }
  0x40   : > { %629 = vmatpush1.bf16.msra.mxu0 %v944_v40 }
  0x41   : > { %630 = vmatprep.subr.bf16.mxu0 %v982_v1 }
  0x44   : > { %631 = vmatpush1.bf16.msra.mxu0 %v945_v41 }
  0x45   : > { %632 = vmatprep.subr.bf16.mxu0 %v982_v1 }
  0x48   : > { %633 = vmatpush1.bf16.msra.mxu0 %v946_v42 }
  0x49   : > { %634 = vmatprep.subr.bf16.mxu0 %v982_v1 }
  0x4c   : > { %635 = vmatpush1.bf16.msra.mxu0 %v947_v43 }
  0x4d   : > { %636 = vmatprep.subr.bf16.mxu0 %v982_v1 }
  0x50   : > { %637 = vmatpush1.bf16.msra.mxu0 %v948_v44 }
  0x51   : > { %638 = vmatprep.subr.bf16.mxu0 %v982_v1 }
  0x54   : > { %639 = vmatpush1.bf16.msra.mxu0 %v949_v45 }
  0x55   : > { %640 = vmatprep.subr.bf16.mxu0 %v982_v1 }
  0x58   : > { %641 = vmatpush1.bf16.msra.mxu0 %v950_v46 }
  0x59   : > { %642 = vmatprep.subr.bf16.mxu0 %v982_v1 }
  0x5c   : > { %643 = vmatpush1.bf16.msra.mxu0 %v951_v47 }
  0x5d   : > { %644 = vmatprep.subr.bf16.mxu0 %v982_v1 }
  0x60   : > { %645 = vmatpush1.bf16.msra.mxu0 %v952_v48 }
  0x61   : > { %646 = vmatprep.subr.bf16.mxu0 %v982_v1  ;;  %v874_v1 = vld [vmem:[%s1212_s2] ss:$0 sm:$0xff] }
  0x64   : > { %647 = vmatpush1.bf16.msra.mxu0 %v953_v51 }
  0x67   : > { %657 = vmatmul.mubr.bf16.vlgmr.msra.gmra.mrb[4].mxu0 %v544_v54 }
 0x10a   : > { %v368_v55 = vpop.f32.mrb[0].mxu0  ;;  %v493_v56 = vpop.f32.mrb[0].mxu1 }
 0x10b   : > { %v370_v57 = vpop.f32.mrb[1].mxu0  ;;  %v494_v58 = vadd.f32 %v493_v56, %v368_v55  ;;  %v495_v59 = vpop.f32.mrb[1].mxu1 }
 0x10c   : > { %v371_v60 = vpop.f32.mrb[2].mxu0  ;;  %v496_v61 = vpop.f32.mrb[2].mxu1 }
 0x10d   : > { %v373_v62 = vpop.f32.mrb[3].mxu0  ;;  %v497_v63 = vadd.f32 %v496_v61, %v371_v60  ;;  %v498_v0 = vpop.f32.mrb[3].mxu1 }
 0x13a   : > { %v658_v2 = vpop.f32.mrb[4].mxu0 }
 0x13b   : > { %v665_v3 = vadd.f32 %v658_v2, %v494_v58  ;;  %v660_v4 = vpop.f32.mrb[5].mxu0 }
 0x13c   : > { %v661_v5 = vpop.f32.mrb[6].mxu0 }
 0x13d   : > { %v674_v6 = vadd.f32 %v874_v1, %v665_v3  ;;  %v666_v7 = vadd.f32 %v661_v5, %v497_v63  ;;  %v663_v8 = vpop.f32.mrb[7].mxu0 }
 0x13f   : > { %v675_v9 = vadd.f32 %v874_v1, %v666_v7  ;;  %v676_v10 = vmax.f32 %v674_v6, 0.0 }
 0x141   : > { %v677_v11 = vmax.f32 %v675_v9, 0.0 }
 0x143   : > { %v885_v12 = vpack.c.bf16 %v677_v11, %v676_v10 }
 0x145   : > { %886 = vst [vmem:[%s192_s28] sm:$0xff] %v885_v12  }
 0x146 PF: > { %s13_s14 = sadd.s32 1, %s980_s14   ;;  %s1214_s12 = smov %s976_s13 }
 0x147   : > { %p10_p5 = scmp.ge.s32.totalorder %s13_s14, 4   ;;  %s1215_s13 = smov %s1217_s15 }
 0x149   :  { %12 = sbr.rel (!%p10_p5) target bundleno = 2 (0x2), region = 65 }

// kernel: _lambda_.18
= control target key start
LH: loop header
LB: loop body
LE: loop exit
PB: predicated region body
PF: predicated region fallthrough
CT: control target
= control target key end

     0   :  { %s586_s12 = smov 0   ;;  %s588_s13 = smov 0   ;;  %s674_s0 = inlined_call_operand.vmem [shape: bf16[2,1,16,128], index: 0, kind: input, shape index: {}]   ;;  %s675_s1 = inlined_call_operand.vmem [shape: bf16[1,128,256], index: 1, kind: input, shape index: {}]   ;;  %s676_s2 = inlined_call_operand.vmem [shape: f32[1,256], index: 2, kind: input, shape index: {}]   ;;  %s677_s3 = inlined_call_operand.vmem [shape: bf16[2,16,256], index: 3, kind: output, shape index: {}]  }
   0x1   :  { %s590_s14 = smov 0  }
   0x2 LB: > { %s25_s15 = sadd.s32 1, %s559_s13  ;;  %p461_p0 = scmp.ge.s32.totalorder %s563_s14, 1  ;;  %s563_s14 = sphi %s590_s14, %s13_s14   ;;  %s559_s13 = sphi %s588_s13, %s679_s13   ;;  %s555_s12 = sphi %s586_s12, %s678_s12  }
   0x3   : > { %p27_p1 = scmp.ge.s32.totalorder %s25_s15, 2  ;;  %p151_p2 = scmp.lt.s32.totalorder %s563_s14, 3 }
   0x5   : > { %s681_s15 = smov (%p27_p1, %s25_s15), 0  ;;  %p152_p3 = pnand %p461_p0, %p151_p2 }
   0x6   : > { %v516_v0 = vld [vmem:[%s675_s1 + $0x4] ss:$8 sps:$4 sm:$0xff] (!%p152_p3)   ;;  %p180_p4 = scmp.lt.s32.totalorder (!%p152_p3), %s555_s12, 1  ;;  %v518_v1 = vld [vmem:[%s675_s1] ss:$8 sps:$4 sm:$0xff] (!%p152_p3)   ;;  %v565_v2 = vmov (!%p152_p3), 0   ;;  %v217_v18 = vlaneseq (!%p152_p3) }
   0x7   : > { %155 = sbr.rel (%p152_p3) target bundleno = 259 (0x103), region = 32  ;;  %345 = vmatprep.mubr.bf16.mxu0 (!%p152_p3), %v565_v2  ;;  %313 = vmatprep.subr.bf16.mxu0 (!%p152_p3), %v516_v0  ;;  %v519_v3 = vld [vmem:[%s675_s1 + $0x14] ss:$8 sps:$4 sm:$0xff] (!%p152_p3)   ;;  %v521_v4 = vld [vmem:[%s675_s1 + $0x10] ss:$8 sps:$4 sm:$0xff] (!%p152_p3)  }
   0x8   : > { %314 = vmatpush1.bf16.msra.mxu0 (!%p152_p3), %v518_v1  ;;  %v522_v5 = vld [vmem:[%s675_s1 + $0x24] ss:$8 sps:$4 sm:$0xff] (!%p152_p3)   ;;  %v524_v6 = vld [vmem:[%s675_s1 + $0x20] ss:$8 sps:$4 sm:$0xff] (!%p152_p3)   ;;  %v525_v7 = vld [vmem:[%s675_s1 + $0x34] ss:$8 sps:$4 sm:$0xff] (!%p152_p3)  }
   0x9   : > { %315 = vmatprep.subr.bf16.mxu0 (!%p152_p3), %v519_v3  ;;  %v527_v8 = vld [vmem:[%s675_s1 + $0x30] ss:$8 sps:$4 sm:$0xff] (!%p152_p3)   ;;  %v528_v9 = vld [vmem:[%s675_s1 + $0x44] ss:$8 sps:$4 sm:$0xff] (!%p152_p3)   ;;  %v530_v10 = vld [vmem:[%s675_s1 + $0x40] ss:$8 sps:$4 sm:$0xff] (!%p152_p3)  }
   0xa   : > { %v531_v11 = vld [vmem:[%s675_s1 + $0x54] ss:$8 sps:$4 sm:$0xff] (!%p152_p3)   ;;  %v533_v12 = vld [vmem:[%s675_s1 + $0x50] ss:$8 sps:$4 sm:$0xff] (!%p152_p3)   ;;  %v534_v13 = vld [vmem:[%s675_s1 + $0x64] ss:$8 sps:$4 sm:$0xff] (!%p152_p3)  }
   0xb   : > { %v536_v14 = vld [vmem:[%s675_s1 + $0x60] ss:$8 sps:$4 sm:$0xff] (!%p152_p3)   ;;  %v537_v15 = vld [vmem:[%s675_s1 + $0x74] ss:$8 sps:$4 sm:$0xff] (!%p152_p3)   ;;  %v539_v16 = vld [vmem:[%s675_s1 + $0x70] ss:$8 sps:$4 sm:$0xff] (!%p152_p3)  }
   0xc   : > { %316 = vmatpush1.bf16.msra.mxu0 (!%p152_p3), %v521_v4  ;;  %v218_v19 = vshrl.u32 (!%p152_p3), %v217_v18, 7  ;;  %v215_v21 = vld [vmem:[%s676_s2] sm:$0x3] (!%p152_p3) }
   0xd   : > { %317 = vmatprep.subr.bf16.mxu0 (!%p152_p3), %v522_v5 }
   0xe   : > { %s683_s12 = smov (!%p180_p4, %s555_s12), 1  ;;  %v219_v20 = vsub.s32 0, %v218_v19  ;;  %v223_v22 = vsub.s32 1, %v218_v19 }
   0xf   : > { %s487_s26 = sshll.u32 %s683_s12, 3  ;;  %s488_s4 = sshll.u32 %s683_s12, 4 }
  0x10   : > { %s184_s6 = scalar_lea.vmem %s674_s0, %s487_s26  ;;  %318 = vmatpush1.bf16.msra.mxu0 %v524_v6  ;;  %v220_v23 = vrot.slane %v215_v21, %v219_v20  ;;  %v224_v24 = vrot.slane %v215_v21, %v223_v22  ;;  %s194_s7 = scalar_lea.vmem %s677_s3, %s488_s4 }
  0x11   : > { %319 = vmatprep.subr.bf16.mxu0 %v525_v7  ;;  %v540_v17 = vld [vmem:[%s184_s6] sm:$0xff]  }
  0x14   : > { %320 = vmatpush1.bf16.msra.mxu0 %v527_v8 }
  0x15   : > { %321 = vmatprep.subr.bf16.mxu0 %v528_v9 }
  0x18   : > { %322 = vmatpush1.bf16.msra.mxu0 %v530_v10 }
  0x19   : > { %323 = vmatprep.subr.bf16.mxu0 %v531_v11 }
  0x1c   : > { %324 = vmatpush1.bf16.msra.mxu0 %v533_v12 }
  0x1d   : > { %325 = vmatprep.subr.bf16.mxu0 %v534_v13 }
  0x20   : > { %326 = vmatpush1.bf16.msra.mxu0 %v536_v14 }
  0x21   : > { %327 = vmatprep.subr.bf16.mxu0 %v537_v15 }
  0x24   : > { %328 = vmatpush1.bf16.msra.mxu0 %v539_v16 }
  0x27   : > { %346 = vmatmul.mubr.bf16.vlgmr.msra.gmra.mrb[0].mxu0 %v540_v17 }
  0xfa   : > { %v347_v25 = vpop.f32.mrb[0].mxu0 }
  0xfb   : > { %v348_v26 = vadd.f32 %v347_v25, %v220_v23  ;;  %v349_v27 = vpop.f32.mrb[1].mxu0 }
  0xfc   : > { %v350_v28 = vadd.f32 %v349_v27, %v224_v24  ;;  %v351_v29 = vpop.f32.mrb[2].mxu0 }
  0xfd   : > { %v352_v30 = vadd.f32 %v351_v29, %v220_v23  ;;  %v353_v31 = vpop.f32.mrb[3].mxu0 }
  0xfe   : > { %v489_v32 = vpack.c.bf16 %v350_v28, %v348_v26  ;;  %v354_v33 = vadd.f32 %v353_v31, %v224_v24 }
 0x100   : > { %368 = vst [vmem:[%s194_s7] sm:$0xff] %v489_v32  ;;  %v490_v34 = vpack.c.bf16 %v354_v33, %v352_v30 }
 0x102   : > { %369 = vst [vmem:[%s194_s7 + $0x8] sm:$0xff] %v490_v34 }
 0x103 PF: > { %s13_s14 = sadd.s32 1, %s563_s14   ;;  %s678_s12 = smov %s559_s13 }
 0x104   : > { %p10_p5 = scmp.ge.s32.totalorder %s13_s14, 4   ;;  %s679_s13 = smov %s681_s15 }
 0x106   :  { %12 = sbr.rel (!%p10_p5) target bundleno = 2 (0x2), region = 62 }

// kernel: _lambda_.16
= control target key start
LH: loop header
LB: loop body
LE: loop exit
PB: predicated region body
PF: predicated region fallthrough
CT: control target
= control target key end

     0   :  { %s1806_s15 = smov 0   ;;  %s1808_s16 = smov 0   ;;  %s2126_s0 = inlined_call_operand.vmem [shape: bf16[2,1,24,384], index: 0, kind: input, shape index: {}]   ;;  %s2127_s1 = inlined_call_operand.vmem [shape: bf16[3,384,128], index: 1, kind: input, shape index: {}]   ;;  %s2128_s2 = inlined_call_operand.vmem [shape: f32[1,128], index: 2, kind: input, shape index: {}]   ;;  %s2129_s3 = inlined_call_operand.vmem [shape: bf16[2,16,128], index: 3, kind: input, shape index: {}]   ;;  %s2130_s4 = inlined_call_operand.vmem [shape: bf16[2,16,128], index: 4, kind: output, shape index: {}]  }
   0x1   :  { %s1810_s17 = smov 0  }
   0x2 LB: > { %s26_s18 = sadd.s32 1, %s1773_s16  ;;  %p1287_p0 = scmp.ge.s32.totalorder %s1777_s17, 1  ;;  %s1777_s17 = sphi %s1810_s17, %s14_s17   ;;  %s1773_s16 = sphi %s1808_s16, %s2132_s16   ;;  %s1769_s15 = sphi %s1806_s15, %s2131_s15  }
   0x3   : > { %p28_p1 = scmp.ge.s32.totalorder %s26_s18, 2  ;;  %p193_p2 = scmp.lt.s32.totalorder %s1777_s17, 3 }
   0x5   : > { %s2134_s18 = smov (%p28_p1, %s26_s18), 0  ;;  %p194_p3 = pnand %p1287_p0, %p193_p2 }
   0x6   : > { %v1671_v0 = vld [vmem:[%s2127_s1 + $0x100] sm:$0xff] (!%p194_p3)   ;;  %v1779_v1 = vmov (!%p194_p3), 0.0   ;;  %v1674_v4 = vld [vmem:[%s2127_s1 + $0x108] sm:$0xff] (!%p194_p3)   ;;  %v1677_v7 = vld [vmem:[%s2127_s1 + $0x110] sm:$0xff] (!%p194_p3)   ;;  %vm1780_vm0 = vmmov (!%p194_p3), 0   ;;  %p232_p4 = scmp.lt.s32.totalorder (!%p194_p3), %s1769_s15, 1 }
   0x7   : > { %197 = sbr.rel (%p194_p3) target bundleno = 333 (0x14d), region = 36  ;;  %1584 = vmatprep.subr.bf16.mxu1 (!%p194_p3), %v1779_v1  ;;  %v1672_v2 = vld [vmem:[%s2127_s1 + $0xc0] sm:$0xff] (!%p194_p3)   ;;  %1491 = vmatprep.subr.bf16.mxu0 (!%p194_p3), %v1671_v0  ;;  %v1675_v5 = vld [vmem:[%s2127_s1 + $0xc8] sm:$0xff] (!%p194_p3)   ;;  %v1678_v8 = vld [vmem:[%s2127_s1 + $0xd0] sm:$0xff] (!%p194_p3)   ;;  %vm386_vm1 = vcmask (!%p194_p3), 1045504  }
   0x8   : > { %v1673_v3 = vld [vmem:[%s2127_s1 + $0x140] sm:$0xff] (!%p194_p3)   ;;  %1492 = vmatpush3.bf16.msra.mxu0 (!%p194_p3), %v1672_v2  ;;  %v1676_v6 = vld [vmem:[%s2127_s1 + $0x148] sm:$0xff] (!%p194_p3)   ;;  %1600 = vmatprep.mubr.msk.bf16.mxu1 (!%p194_p3), %vm1780_vm0, %v1779_v1  ;;  %v1679_v9 = vld [vmem:[%s2127_s1 + $0x150] sm:$0xff] (!%p194_p3)  }
   0x9   : > { %1585 = vmatpush3.bf16.msra.mxu1 (!%p194_p3), %v1673_v3  ;;  %1493 = vmatprep.subr.bf16.mxu0 (!%p194_p3), %v1674_v4  ;;  %v1680_v10 = vld [vmem:[%s2127_s1 + $0x118] sm:$0xff] (!%p194_p3)   ;;  %v1683_v13 = vld [vmem:[%s2127_s1 + $0x120] sm:$0xff] (!%p194_p3)   ;;  %v1686_v16 = vld [vmem:[%s2127_s1 + $0x128] sm:$0xff] (!%p194_p3)  }
   0xa   : > { %1586 = vmatprep.subr.bf16.mxu1 (!%p194_p3), %v1779_v1  ;;  %v1681_v11 = vld [vmem:[%s2127_s1 + $0xd8] sm:$0xff] (!%p194_p3)   ;;  %v1684_v14 = vld [vmem:[%s2127_s1 + $0xe0] sm:$0xff] (!%p194_p3)   ;;  %v1687_v17 = vld [vmem:[%s2127_s1 + $0xe8] sm:$0xff] (!%p194_p3)  }
   0xb   : > { %v1682_v12 = vld [vmem:[%s2127_s1 + $0x158] sm:$0xff] (!%p194_p3)   ;;  %v1685_v15 = vld [vmem:[%s2127_s1 + $0x160] sm:$0xff] (!%p194_p3)   ;;  %v1688_v18 = vld [vmem:[%s2127_s1 + $0x168] sm:$0xff] (!%p194_p3)  }
   0xc   : > { %1494 = vmatpush3.bf16.msra.mxu0 (!%p194_p3), %v1675_v5  ;;  %v1689_v19 = vld [vmem:[%s2127_s1 + $0x130] sm:$0xff] (!%p194_p3)   ;;  %v1692_v22 = vld [vmem:[%s2127_s1 + $0x138] sm:$0xff] (!%p194_p3)   ;;  %v1699_v38 = vld [vmem:[%s2127_s1 + $0x40] sm:$0xff] (!%p194_p3)  }
   0xd   : > { %1587 = vmatpush3.bf16.msra.mxu1 (!%p194_p3), %v1676_v6  ;;  %1495 = vmatprep.subr.bf16.mxu0 (!%p194_p3), %v1677_v7  ;;  %v1690_v20 = vld [vmem:[%s2127_s1 + $0xf0] sm:$0xff] (!%p194_p3)   ;;  %v1693_v26 = vld [vmem:[%s2127_s1 + $0xf8] sm:$0xff] (!%p194_p3)   ;;  %v1702_v42 = vld [vmem:[%s2127_s1] sm:$0xff] (!%p194_p3)  }
   0xe   : > { %1588 = vmatprep.subr.bf16.mxu1 %v1779_v1  ;;  %s2136_s15 = smov (!%p232_p4, %s1769_s15), 1  ;;  %v1691_v21 = vld [vmem:[%s2127_s1 + $0x170] sm:$0xff]   ;;  %v1694_v31 = vld [vmem:[%s2127_s1 + $0x178] sm:$0xff]   ;;  %v1703_v46 = vld [vmem:[%s2127_s1 + $0x80] sm:$0xff]  }
   0xf   : > { %s1644_s29 = smul.u32 36, %s2136_s15  ;;  %v1704_v48 = vld [vmem:[%s2127_s1 + $0x48] sm:$0xff]   ;;  %v1707_v51 = vld [vmem:[%s2127_s1 + $0x50] sm:$0xff]   ;;  %v1710_v54 = vld [vmem:[%s2127_s1 + $0x58] sm:$0xff]   ;;  %s1478_s12 = sshll.u32 %s2136_s15, 3 }
  0x10   : > { %1496 = vmatpush3.bf16.msra.mxu0 %v1678_v8  ;;  %v1705_v49 = vld [vmem:[%s2127_s1 + $0x8] sm:$0xff]   ;;  %v1708_v52 = vld [vmem:[%s2127_s1 + $0x10] sm:$0xff]   ;;  %v1711_v55 = vld [vmem:[%s2127_s1 + $0x18] sm:$0xff]   ;;  %s245_s20 = scalar_lea.vmem %s2129_s3, %s1478_s12  ;;  %s255_s23 = scalar_lea.vmem %s2130_s4, %s1478_s12 }
  0x11   : > { %1589 = vmatpush3.bf16.msra.mxu1 %v1679_v9  ;;  %1497 = vmatprep.subr.bf16.mxu0 %v1680_v10  ;;  %s1902_s14 = scalar_lea.vmem %s2126_s0, %s1644_s29  ;;  %v1706_v50 = vld [vmem:[%s2127_s1 + $0x88] sm:$0xff]   ;;  %v1709_v53 = vld [vmem:[%s2127_s1 + $0x90] sm:$0xff]   ;;  %v1712_v56 = vld [vmem:[%s2127_s1 + $0x98] sm:$0xff]  }
  0x12   : > { %1590 = vmatprep.subr.bf16.mxu1 %v1779_v1  ;;  %v310_v23 = vld [vmem:[%s1902_s14] sm:$0xcc]  ;;  %v1912_v24 = vld [vmem:[%s1902_s14 + $0xc] sm:$0xff]  ;;  %v314_v25 = vld [vmem:[%s1902_s14 + $0x18] sm:$0x33] }
  0x13   : > { %v1342_v27 = vcombine.high %v310_v23, %v1912_v24  ;;  %v1345_v28 = vcombine.high %v314_v25, %v314_v25  ;;  %v1341_v29 = vcombine.low %v310_v23, %v1912_v24  ;;  %v1344_v30 = vcombine.low %v314_v25, %v314_v25  ;;  %v311_v32 = vld [vmem:[%s1902_s14 + $0x8] sm:$0xc]  ;;  %v1926_v33 = vld [vmem:[%s1902_s14 + $0x14] sm:$0xf]  ;;  %v1713_v57 = vld [vmem:[%s2127_s1 + $0x60] sm:$0xff]  }
  0x14   : > { %1498 = vmatpush3.bf16.msra.mxu0 %v1681_v11  ;;  %v1343_v39 = vcombine.low %v311_v32, %v1926_v33  ;;  %v1701_v40 = vld [vmem:[%s1902_s14 + $0x20] ss:$0 sps:$4 sm:$0x33]   ;;  %v1716_v60 = vld [vmem:[%s2127_s1 + $0x68] sm:$0xff]   ;;  %v1719_v0 = vld [vmem:[%s2127_s1 + $0x70] sm:$0xff]  }
  0x15   : > { %1591 = vmatpush3.bf16.msra.mxu1 %v1682_v12  ;;  %1499 = vmatprep.subr.bf16.mxu0 %v1683_v13  ;;  %v390_v34 = vrot.slane %v1342_v27, 2  ;;  %v391_v35 = vrot.slane %v1345_v28, 2  ;;  %v387_v36 = vrot.slane %v1341_v29, 2  ;;  %v388_v37 = vrot.slane %v1344_v30, 2  ;;  %v1714_v58 = vld [vmem:[%s2127_s1 + $0x20] sm:$0xff]   ;;  %v1717_v61 = vld [vmem:[%s2127_s1 + $0x28] sm:$0xff]  }
  0x16   : > { %1592 = vmatprep.subr.bf16.mxu1 %v1779_v1  ;;  %v393_v43 = vrot.slane %v1343_v39, 2  ;;  %v394_v44 = vrot.slane %v1701_v40, 2  ;;  %v1715_v59 = vld [vmem:[%s2127_s1 + $0xa0] sm:$0xff]   ;;  %v1718_v62 = vld [vmem:[%s2127_s1 + $0xa8] sm:$0xff]   ;;  %v1720_v3 = vld [vmem:[%s2127_s1 + $0x30] sm:$0xff]  }
  0x17   : > { %v392_v41 = vsel %vm386_vm1, %v390_v34, %v391_v35  ;;  %v389_v45 = vsel %vm386_vm1, %v387_v36, %v388_v37  ;;  %v258_v63 = vld [vmem:[%s1902_s14] sm:$0xff]  ;;  %v1721_v4 = vld [vmem:[%s2127_s1 + $0xb0] sm:$0xff]   ;;  %v1722_v5 = vld [vmem:[%s2127_s1 + $0x78] sm:$0xff]  }
  0x18   : > { %1500 = vmatpush3.bf16.msra.mxu0 %v1684_v14  ;;  %575 = vmatprep.mubr.bf16.mxu0 %v392_v41  ;;  %v395_v47 = vsel %vm386_vm1, %v393_v43, %v394_v44  ;;  %v1372_v2 = vcombine.high %v258_v63, %v1912_v24  ;;  %v1723_v6 = vld [vmem:[%s2127_s1 + $0x38] sm:$0xff]   ;;  %v1727_v8 = vld [vmem:[%s2127_s1 + $0x1c0] sm:$0xff]   ;;  %v1728_v9 = vld [vmem:[%s1902_s14 + $0x8] ss:$12 sps:$4 sm:$0xff]   ;;  %v1371_v10 = vcombine.low %v258_v63, %v1912_v24 }
  0x19   : > { %1593 = vmatpush3.bf16.msra.mxu1 %v1685_v15  ;;  %1501 = vmatprep.subr.bf16.mxu0 %v1686_v16  ;;  %v1724_v7 = vld [vmem:[%s2127_s1 + $0xb8] sm:$0xff]   ;;  %v1729_v11 = vld [vmem:[%s2127_s1 + $0x180] sm:$0xff]   ;;  %v1731_v13 = vld [vmem:[%s2127_s1 + $0x1c8] sm:$0xff]  }
  0x1a   : > { %1594 = vmatprep.subr.bf16.mxu1 %v1779_v1  ;;  %v1730_v12 = vld [vmem:[%s2127_s1 + $0x200] sm:$0xff]   ;;  %v1732_v14 = vld [vmem:[%s2127_s1 + $0x188] sm:$0xff]   ;;  %v1734_v16 = vld [vmem:[%s2127_s1 + $0x1d0] sm:$0xff]  }
  0x1b   : > { %v1733_v15 = vld [vmem:[%s2127_s1 + $0x208] sm:$0xff]   ;;  %v867_v23 = vld [vmem:[%s1902_s14 + $0x18] sm:$0xff]  ;;  %v1741_v28 = vld [vmem:[%s2127_s1 + $0x1a0] sm:$0xff]  }
  0x1c   : > { %1502 = vmatpush3.bf16.msra.mxu0 %v1687_v17  ;;  %v1735_v17 = vld [vmem:[%s2127_s1 + $0x190] sm:$0xff]   ;;  %v1447_v25 = vcombine.high %v1912_v24, %v867_v23  ;;  %v1742_v29 = vld [vmem:[%s2127_s1 + $0x220] sm:$0xff]   ;;  %v1743_v30 = vld [vmem:[%s2127_s1 + $0x1e8] sm:$0xff]   ;;  %v1446_v39 = vcombine.low %v1912_v24, %v867_v23 }
  0x1d   : > { %1595 = vmatpush3.bf16.msra.mxu1 %v1688_v18  ;;  %1503 = vmatprep.subr.bf16.mxu0 %v1689_v19  ;;  %v1736_v18 = vld [vmem:[%s2127_s1 + $0x210] sm:$0xff]   ;;  %v1737_v19 = vld [vmem:[%s2127_s1 + $0x1d8] sm:$0xff]   ;;  %v1745_v32 = vld [vmem:[%s2127_s1 + $0x228] sm:$0xff]  }
  0x1e   : > { %1596 = vmatprep.subr.bf16.mxu1 %v1779_v1  ;;  %v1747_v34 = vld [vmem:[%s2127_s1 + $0x1b0] sm:$0xff]   ;;  %v1749_v36 = vld [vmem:[%s2127_s1 + $0x1f8] sm:$0xff]  }
  0x1f   : > { %v1748_v35 = vld [vmem:[%s2127_s1 + $0x230] sm:$0xff]   ;;  %v1750_v37 = vld [vmem:[%s2127_s1 + $0x1b8] sm:$0xff]  }
  0x20   : > { %1504 = vmatpush3.bf16.msra.mxu0 %v1690_v20  ;;  %v1738_v20 = vld [vmem:[%s2127_s1 + $0x198] sm:$0xff]  }
  0x21   : > { %1597 = vmatpush3.bf16.msra.mxu1 %v1691_v21  ;;  %1505 = vmatprep.subr.bf16.mxu0 %v1692_v22  ;;  %v1739_v21 = vld [vmem:[%s2127_s1 + $0x218] sm:$0xff]   ;;  %v1740_v22 = vld [vmem:[%s2127_s1 + $0x1e0] sm:$0xff]  }
  0x22   : > { %1598 = vmatprep.subr.bf16.mxu1 %v1779_v1 }
  0x24   : > { %1506 = vmatpush3.bf16.msra.mxu0 %v1693_v26  ;;  %v868_v26 = vld [vmem:[%s1902_s14 + $0x20] sm:$0xf] }
  0x25   : > { %1599 = vmatpush3.bf16.msra.mxu1 %v1694_v31  ;;  %1522 = vmatprep.subr.bf16.mxu0 %v1699_v38  ;;  %v1448_v27 = vcombine.low %v1926_v33, %v868_v26  ;;  %v1744_v31 = vld [vmem:[%s2127_s1 + $0x1a8] sm:$0xff]   ;;  %v1746_v33 = vld [vmem:[%s2127_s1 + $0x1f0] sm:$0xff]   ;;  %v1751_v38 = vld [vmem:[%s2127_s1 + $0x238] sm:$0xff]  }
  0x26   : > { %1604 = vmatprep.subr.bf16.mxu1 %v1779_v1 }
  0x27   : > { %576 = vmatmul.mubr.bf16.vlgmr.msra.gmra.mrb[0].mxu0 %v389_v45 }
  0x28   : > { %1601 = vmatmul.mubr.bf16.vlgmr.msra.gmra.mrb[0].mxu1 %v395_v47  ;;  %1523 = vmatpush3.bf16.msra.mxu0 %v1702_v42 }
  0x29   : > { %1605 = vmatpush3.bf16.msra.mxu1 %v1703_v46  ;;  %1524 = vmatprep.subr.bf16.mxu0 %v1704_v48 }
  0x2a   : > { %1606 = vmatprep.subr.bf16.mxu1 %v1779_v1  ;;  %1620 = vmatprep.mubr.msk.bf16.mxu1 %vm1780_vm0, %v1779_v1 }
  0x2b   : > { %817 = vmatprep.mubr.bf16.mxu0 %v1372_v2 }
  0x2c   : > { %1525 = vmatpush3.bf16.msra.mxu0 %v1705_v49 }
  0x2d   : > { %1607 = vmatpush3.bf16.msra.mxu1 %v1706_v50  ;;  %1526 = vmatprep.subr.bf16.mxu0 %v1707_v51 }
  0x2e   : > { %1608 = vmatprep.subr.bf16.mxu1 %v1779_v1 }
  0x30   : > { %1527 = vmatpush3.bf16.msra.mxu0 %v1708_v52 }
  0x31   : > { %1609 = vmatpush3.bf16.msra.mxu1 %v1709_v53  ;;  %1528 = vmatprep.subr.bf16.mxu0 %v1710_v54 }
  0x32   : > { %1610 = vmatprep.subr.bf16.mxu1 %v1779_v1 }
  0x34   : > { %1529 = vmatpush3.bf16.msra.mxu0 %v1711_v55 }
  0x35   : > { %1611 = vmatpush3.bf16.msra.mxu1 %v1712_v56  ;;  %1530 = vmatprep.subr.bf16.mxu0 %v1713_v57 }
  0x36   : > { %1612 = vmatprep.subr.bf16.mxu1 %v1779_v1 }
  0x38   : > { %1531 = vmatpush3.bf16.msra.mxu0 %v1714_v58 }
  0x39   : > { %1613 = vmatpush3.bf16.msra.mxu1 %v1715_v59  ;;  %1532 = vmatprep.subr.bf16.mxu0 %v1716_v60 }
  0x3a   : > { %1614 = vmatprep.subr.bf16.mxu1 %v1779_v1 }
  0x3c   : > { %1533 = vmatpush3.bf16.msra.mxu0 %v1717_v61 }
  0x3d   : > { %1615 = vmatpush3.bf16.msra.mxu1 %v1718_v62  ;;  %1534 = vmatprep.subr.bf16.mxu0 %v1719_v0 }
  0x3e   : > { %1616 = vmatprep.subr.bf16.mxu1 %v1779_v1 }
  0x40   : > { %1535 = vmatpush3.bf16.msra.mxu0 %v1720_v3 }
  0x41   : > { %1617 = vmatpush3.bf16.msra.mxu1 %v1721_v4  ;;  %1536 = vmatprep.subr.bf16.mxu0 %v1722_v5 }
  0x42   : > { %1618 = vmatprep.subr.bf16.mxu1 %v1779_v1 }
  0x44   : > { %1537 = vmatpush3.bf16.msra.mxu0 %v1723_v6 }
  0x45   : > { %1619 = vmatpush3.bf16.msra.mxu1 %v1724_v7  ;;  %1553 = vmatprep.subr.bf16.mxu0 %v1727_v8  ;;  %v1483_v7 = vld [vmem:[%s245_s20] sm:$0xff]  }
  0x46   : > { %1624 = vmatprep.subr.bf16.mxu1 %v1779_v1 }
  0x47   : > { %818 = vmatmul.mubr.bf16.vlgmr.msra.gmra.mrb[4].mxu0 %v1371_v10 }
  0x48   : > { %1621 = vmatmul.mubr.bf16.vlgmr.msra.gmra.mrb[4].mxu1 %v1728_v9  ;;  %1554 = vmatpush3.bf16.msra.mxu0 %v1729_v11 }
  0x49   : > { %1625 = vmatpush3.bf16.msra.mxu1 %v1730_v12  ;;  %1555 = vmatprep.subr.bf16.mxu0 %v1731_v13  ;;  %v1473_v13 = vld [vmem:[%s2128_s2] ss:$0 sm:$0xff] }
  0x4a   : > { %1626 = vmatprep.subr.bf16.mxu1 %v1779_v1  ;;  %1640 = vmatprep.mubr.msk.bf16.mxu1 %vm1780_vm0, %v1779_v1 }
  0x4b   : > { %1105 = vmatprep.mubr.bf16.mxu0 %v1447_v25 }
  0x4c   : > { %1556 = vmatpush3.bf16.msra.mxu0 %v1732_v14 }
  0x4d   : > { %1627 = vmatpush3.bf16.msra.mxu1 %v1733_v15  ;;  %1557 = vmatprep.subr.bf16.mxu0 %v1734_v16  ;;  %v1484_v15 = vunpack.c.l.bf16 %v1483_v7 }
  0x4e   : > { %1628 = vmatprep.subr.bf16.mxu1 %v1779_v1 }
  0x50   : > { %1558 = vmatpush3.bf16.msra.mxu0 %v1735_v17 }
  0x51   : > { %1629 = vmatpush3.bf16.msra.mxu1 %v1736_v18  ;;  %1559 = vmatprep.subr.bf16.mxu0 %v1737_v19  ;;  %v1485_v19 = vunpack.c.h.bf16 %v1483_v7 }
  0x52   : > { %1630 = vmatprep.subr.bf16.mxu1 %v1779_v1 }
  0x54   : > { %1560 = vmatpush3.bf16.msra.mxu0 %v1738_v20 }
  0x55   : > { %1631 = vmatpush3.bf16.msra.mxu1 %v1739_v21  ;;  %1561 = vmatprep.subr.bf16.mxu0 %v1740_v22 }
  0x56   : > { %1632 = vmatprep.subr.bf16.mxu1 %v1779_v1 }
  0x58   : > { %1562 = vmatpush3.bf16.msra.mxu0 %v1741_v28 }
  0x59   : > { %1633 = vmatpush3.bf16.msra.mxu1 %v1742_v29  ;;  %1563 = vmatprep.subr.bf16.mxu0 %v1743_v30 }
  0x5a   : > { %1634 = vmatprep.subr.bf16.mxu1 %v1779_v1 }
  0x5c   : > { %1564 = vmatpush3.bf16.msra.mxu0 %v1744_v31 }
  0x5d   : > { %1635 = vmatpush3.bf16.msra.mxu1 %v1745_v32  ;;  %1565 = vmatprep.subr.bf16.mxu0 %v1746_v33 }
  0x5e   : > { %1636 = vmatprep.subr.bf16.mxu1 %v1779_v1 }
  0x60   : > { %1566 = vmatpush3.bf16.msra.mxu0 %v1747_v34 }
  0x61   : > { %1637 = vmatpush3.bf16.msra.mxu1 %v1748_v35  ;;  %1567 = vmatprep.subr.bf16.mxu0 %v1749_v36 }
  0x62   : > { %1638 = vmatprep.subr.bf16.mxu1 %v1779_v1 }
  0x64   : > { %1568 = vmatpush3.bf16.msra.mxu0 %v1750_v37 }
  0x65   : > { %1639 = vmatpush3.bf16.msra.mxu1 %v1751_v38 }
  0x67   : > { %1106 = vmatmul.mubr.bf16.vlgmr.msra.gmra.mrb[8].mxu0 %v1446_v39 }
  0x68   : > { %1641 = vmatmul.mubr.bf16.vlgmr.msra.gmra.mrb[8].mxu1 %v1448_v27 }
  0xfa   : > { %v1507_v40 = vpop.f32.mrb[0].mxu0 }
  0xfb   : > { %v1508_v41 = vpop.f32.mrb[1].mxu0  ;;  %v618_v42 = vpop.f32.mrb[0].mxu1 }
  0xfc   : > { %v1509_v43 = vadd.f32 %v1508_v41, %v1507_v40  ;;  %v1510_v44 = vpop.f32.mrb[2].mxu0  ;;  %v1602_v45 = vpop.f32.mrb[1].mxu1 }
  0xfd   : > { %v1511_v46 = vpop.f32.mrb[3].mxu0  ;;  %v621_v47 = vpop.f32.mrb[2].mxu1 }
  0xfe   : > { %v619_v48 = vadd.f32 %v1509_v43, %v618_v42  ;;  %v1512_v49 = vadd.f32 %v1511_v46, %v1510_v44  ;;  %v1603_v50 = vpop.f32.mrb[3].mxu1 }
 0x100   : > { %v622_v51 = vadd.f32 %v1512_v49, %v621_v47 }
 0x11a   : > { %v1538_v1 = vpop.f32.mrb[4].mxu0 }
 0x11b   : > { %v1539_v52 = vpop.f32.mrb[5].mxu0  ;;  %v860_v24 = vpop.f32.mrb[4].mxu1 }
 0x11c   : > { %v1540_v53 = vadd.f32 %v1539_v52, %v1538_v1  ;;  %v1541_v54 = vpop.f32.mrb[6].mxu0  ;;  %v1622_v55 = vpop.f32.mrb[5].mxu1 }
 0x11d   : > { %v1542_v56 = vpop.f32.mrb[7].mxu0  ;;  %v863_v57 = vpop.f32.mrb[6].mxu1 }
 0x11e   : > { %v820_v58 = vadd.f32 %v1540_v53, %v619_v48  ;;  %v1543_v59 = vadd.f32 %v1542_v56, %v1541_v54  ;;  %v1623_v60 = vpop.f32.mrb[7].mxu1 }
 0x120   : > { %v861_v61 = vadd.f32 %v860_v24, %v820_v58  ;;  %v823_v62 = vadd.f32 %v1543_v59, %v622_v51 }
 0x122   : > { %v864_v63 = vadd.f32 %v863_v57, %v823_v62 }
 0x13a   : > { %v1569_v0 = vpop.f32.mrb[8].mxu0 }
 0x13b   : > { %v1148_v2 = vpop.f32.mrb[8].mxu1  ;;  %v1570_v3 = vpop.f32.mrb[9].mxu0 }
 0x13c   : > { %v1571_v4 = vadd.f32 %v1570_v3, %v1569_v0  ;;  %v1642_v5 = vpop.f32.mrb[9].mxu1  ;;  %v1572_v6 = vpop.f32.mrb[10].mxu0 }
 0x13d   : > { %v1151_v8 = vpop.f32.mrb[10].mxu1  ;;  %v1573_v9 = vpop.f32.mrb[11].mxu0 }
 0x13e   : > { %v1149_v10 = vadd.f32 %v1571_v4, %v1148_v2  ;;  %v1574_v11 = vadd.f32 %v1573_v9, %v1572_v6  ;;  %v1643_v12 = vpop.f32.mrb[11].mxu1 }
 0x140   : > { %v1155_v14 = vadd.f32 %v1149_v10, %v861_v61  ;;  %v1152_v16 = vadd.f32 %v1574_v11, %v1151_v8 }
 0x142   : > { %v1164_v17 = vadd.f32 %v1473_v13, %v1155_v14  ;;  %v1156_v18 = vadd.f32 %v1152_v16, %v864_v63 }
 0x144   : > { %v1170_v20 = vadd.f32 %v1484_v15, %v1164_v17  ;;  %v1165_v21 = vadd.f32 %v1473_v13, %v1156_v18 }
 0x146   : > { %v1171_v22 = vadd.f32 %v1485_v19, %v1165_v21  ;;  %v1172_v23 = vmax.f32 %v1170_v20, 0.0 }
 0x148   : > { %v1173_v25 = vmax.f32 %v1171_v22, 0.0 }
 0x14a   : > { %v1489_v26 = vpack.c.bf16 %v1173_v25, %v1172_v23 }
 0x14c   : > { %1490 = vst [vmem:[%s255_s23] sm:$0xff] %v1489_v26  }
 0x14d PF: > { %s14_s17 = sadd.s32 1, %s1777_s17   ;;  %s2131_s15 = smov %s1773_s16 }
 0x14e   : > { %p11_p5 = scmp.ge.s32.totalorder %s14_s17, 4   ;;  %s2132_s16 = smov %s2134_s18 }
 0x150   :  { %13 = sbr.rel (!%p11_p5) target bundleno = 2 (0x2), region = 71 }

// kernel: _lambda_.17
= control target key start
LH: loop header
LB: loop body
LE: loop exit
PB: predicated region body
PF: predicated region fallthrough
CT: control target
= control target key end

     0   :  { %s2105_s12 = smov 0   ;;  %s2107_s13 = smov 0   ;;  %s2619_s0 = inlined_call_operand.vmem [shape: bf16[2,1,24,384], index: 0, kind: input, shape index: {}]   ;;  %s2620_s1 = inlined_call_operand.vmem [shape: bf16[3,384,256], index: 1, kind: input, shape index: {}]   ;;  %s2621_s2 = inlined_call_operand.vmem [shape: f32[1,256], index: 2, kind: input, shape index: {}]   ;;  %s2622_s3 = inlined_call_operand.vmem [shape: bf16[2,16,256], index: 3, kind: output, shape index: {}]  }
   0x1   :  { %s2109_s14 = smov 0  }
   0x2 LB: > { %s25_s15 = sadd.s32 1, %s2078_s13  ;;  %p1523_p0 = scmp.ge.s32.totalorder %s2082_s14, 1  ;;  %s2082_s14 = sphi %s2109_s14, %s13_s14   ;;  %s2078_s13 = sphi %s2107_s13, %s2624_s13   ;;  %s2074_s12 = sphi %s2105_s12, %s2623_s12  }
   0x3   : > { %p27_p1 = scmp.ge.s32.totalorder %s25_s15, 2  ;;  %p151_p2 = scmp.lt.s32.totalorder %s2082_s14, 3 }
   0x5   : > { %s2626_s15 = smov (%p27_p1, %s25_s15), 0  ;;  %p152_p3 = pnand %p1523_p0, %p151_p2 }
   0x6   : > { %v1832_v0 = vld [vmem:[%s2620_s1 + $0x184] ss:$8 sps:$4 sm:$0xff] (!%p152_p3)   ;;  %v2084_v2 = vmov (!%p152_p3), 0   ;;  %v1836_v3 = vld [vmem:[%s2620_s1 + $0x180] ss:$8 sps:$4 sm:$0xff] (!%p152_p3)   ;;  %p180_p4 = scmp.lt.s32.totalorder (!%p152_p3), %s2074_s12, 1 }
   0x7   : > { %155 = sbr.rel (%p152_p3) target bundleno = 392 (0x188), region = 32  ;;  %v1834_v1 = vld [vmem:[%s2620_s1 + $0x284] ss:$8 sps:$4 sm:$0xff] (!%p152_p3)   ;;  %653 = vmatprep.mubr.bf16.mxu0 (!%p152_p3), %v2084_v2  ;;  %578 = vmatprep.subr.bf16.mxu1 (!%p152_p3), %v1832_v0  ;;  %v1837_v4 = vld [vmem:[%s2620_s1 + $0x280] ss:$8 sps:$4 sm:$0xff] (!%p152_p3)   ;;  %vm325_vm0 = vcmask (!%p152_p3), 1045504  }
   0x8   : > { %621 = vmatprep.subr.bf16.mxu0 (!%p152_p3), %v1834_v1  ;;  %v1838_v5 = vld [vmem:[%s2620_s1 + $0x194] ss:$8 sps:$4 sm:$0xff] (!%p152_p3)   ;;  %579 = vmatpush1.bf16.msra.mxu1 (!%p152_p3), %v1836_v3  ;;  %v1842_v7 = vld [vmem:[%s2620_s1 + $0x190] ss:$8 sps:$4 sm:$0xff] (!%p152_p3)   ;;  %v1844_v9 = vld [vmem:[%s2620_s1 + $0x1a4] ss:$8 sps:$4 sm:$0xff] (!%p152_p3)  }
   0x9   : > { %622 = vmatpush1.bf16.msra.mxu0 (!%p152_p3), %v1837_v4  ;;  %v1840_v6 = vld [vmem:[%s2620_s1 + $0x294] ss:$8 sps:$4 sm:$0xff] (!%p152_p3)   ;;  %580 = vmatprep.subr.bf16.mxu1 (!%p152_p3), %v1838_v5  ;;  %v1843_v8 = vld [vmem:[%s2620_s1 + $0x290] ss:$8 sps:$4 sm:$0xff] (!%p152_p3)   ;;  %v1846_v10 = vld [vmem:[%s2620_s1 + $0x2a4] ss:$8 sps:$4 sm:$0xff] (!%p152_p3)  }
   0xa   : > { %623 = vmatprep.subr.bf16.mxu0 (!%p152_p3), %v1840_v6  ;;  %v1848_v11 = vld [vmem:[%s2620_s1 + $0x1a0] ss:$8 sps:$4 sm:$0xff] (!%p152_p3)   ;;  %v1850_v13 = vld [vmem:[%s2620_s1 + $0x1b4] ss:$8 sps:$4 sm:$0xff] (!%p152_p3)   ;;  %v1854_v15 = vld [vmem:[%s2620_s1 + $0x1b0] ss:$8 sps:$4 sm:$0xff] (!%p152_p3)  }
   0xb   : > { %v1849_v12 = vld [vmem:[%s2620_s1 + $0x2a0] ss:$8 sps:$4 sm:$0xff] (!%p152_p3)   ;;  %v1852_v14 = vld [vmem:[%s2620_s1 + $0x2b4] ss:$8 sps:$4 sm:$0xff] (!%p152_p3)   ;;  %v1855_v16 = vld [vmem:[%s2620_s1 + $0x2b0] ss:$8 sps:$4 sm:$0xff] (!%p152_p3)  }
   0xc   : > { %581 = vmatpush1.bf16.msra.mxu1 (!%p152_p3), %v1842_v7  ;;  %v1856_v17 = vld [vmem:[%s2620_s1 + $0x1c4] ss:$8 sps:$4 sm:$0xff] (!%p152_p3)   ;;  %v1860_v19 = vld [vmem:[%s2620_s1 + $0x1c0] ss:$8 sps:$4 sm:$0xff] (!%p152_p3)   ;;  %v1862_v21 = vld [vmem:[%s2620_s1 + $0x1d4] ss:$8 sps:$4 sm:$0xff] (!%p152_p3)  }
   0xd   : > { %624 = vmatpush1.bf16.msra.mxu0 (!%p152_p3), %v1843_v8  ;;  %582 = vmatprep.subr.bf16.mxu1 (!%p152_p3), %v1844_v9  ;;  %v1858_v18 = vld [vmem:[%s2620_s1 + $0x2c4] ss:$8 sps:$4 sm:$0xff] (!%p152_p3)   ;;  %v1861_v20 = vld [vmem:[%s2620_s1 + $0x2c0] ss:$8 sps:$4 sm:$0xff] (!%p152_p3)   ;;  %v1864_v22 = vld [vmem:[%s2620_s1 + $0x2d4] ss:$8 sps:$4 sm:$0xff] (!%p152_p3)  }
   0xe   : > { %625 = vmatprep.subr.bf16.mxu0 %v1846_v10  ;;  %s2628_s12 = smov (!%p180_p4, %s2074_s12), 1  ;;  %v1866_v23 = vld [vmem:[%s2620_s1 + $0x1d0] ss:$8 sps:$4 sm:$0xff]   ;;  %v1868_v25 = vld [vmem:[%s2620_s1 + $0x1e4] ss:$8 sps:$4 sm:$0xff]  }
   0xf   : > { %s1806_s6 = smul.u32 36, %s2628_s12  ;;  %v1867_v24 = vld [vmem:[%s2620_s1 + $0x2d0] ss:$8 sps:$4 sm:$0xff]   ;;  %v1870_v26 = vld [vmem:[%s2620_s1 + $0x2e4] ss:$8 sps:$4 sm:$0xff]   ;;  %s1783_s21 = sshll.u32 %s2628_s12, 4 }
  0x10   : > { %583 = vmatpush1.bf16.msra.mxu1 %v1848_v11  ;;  %v1872_v27 = vld [vmem:[%s2620_s1 + $0x1e0] ss:$8 sps:$4 sm:$0xff]   ;;  %v1874_v31 = vld [vmem:[%s2620_s1 + $0x1f4] ss:$8 sps:$4 sm:$0xff]   ;;  %v1878_v35 = vld [vmem:[%s2620_s1 + $0x1f0] ss:$8 sps:$4 sm:$0xff]   ;;  %s194_s24 = scalar_lea.vmem %s2622_s3, %s1783_s21 }
  0x11   : > { %626 = vmatpush1.bf16.msra.mxu0 %v1849_v12  ;;  %584 = vmatprep.subr.bf16.mxu1 %v1850_v13  ;;  %s2203_s19 = scalar_lea.vmem %s2619_s0, %s1806_s6  ;;  %v1873_v30 = vld [vmem:[%s2620_s1 + $0x2e0] ss:$8 sps:$4 sm:$0xff]   ;;  %v1876_v34 = vld [vmem:[%s2620_s1 + $0x2f4] ss:$8 sps:$4 sm:$0xff]   ;;  %v1879_v36 = vld [vmem:[%s2620_s1 + $0x2f0] ss:$8 sps:$4 sm:$0xff]  }
  0x12   : > { %627 = vmatprep.subr.bf16.mxu0 %v1852_v14  ;;  %v250_v28 = vld [vmem:[%s2203_s19 + $0x8] sm:$0xc]  ;;  %v2219_v29 = vld [vmem:[%s2203_s19 + $0x14] sm:$0xf]  ;;  %v1880_v37 = vld [vmem:[%s2620_s1 + $0x204] ss:$8 sps:$4 sm:$0xff]  }
  0x13   : > { %v1577_v32 = vcombine.low %v250_v28, %v2219_v29  ;;  %v1883_v33 = vld [vmem:[%s2203_s19 + $0x20] ss:$0 sps:$4 sm:$0x33]   ;;  %v1886_v40 = vld [vmem:[%s2620_s1 + $0x104] ss:$8 sps:$4 sm:$0xff]  }
  0x14   : > { %585 = vmatpush1.bf16.msra.mxu1 %v1854_v15  ;;  %v333_v39 = vrot.slane %v1883_v33, 2  ;;  %v1884_v41 = vld [vmem:[%s2620_s1 + $0x100] ss:$8 sps:$4 sm:$0xff]   ;;  %v1888_v44 = vld [vmem:[%s2620_s1 + $0x214] ss:$8 sps:$4 sm:$0xff]   ;;  %v2293_v58 = vld [vmem:[%s2203_s19 + $0xc] sm:$0xff] }
  0x15   : > { %628 = vmatpush1.bf16.msra.mxu0 %v1855_v16  ;;  %586 = vmatprep.subr.bf16.mxu1 %v1856_v17  ;;  %v332_v38 = vrot.slane %v1577_v32, 2  ;;  %v1887_v43 = vld [vmem:[%s2620_s1 + $0x200] ss:$8 sps:$4 sm:$0xff]   ;;  %v1892_v45 = vld [vmem:[%s2620_s1 + $0x114] ss:$8 sps:$4 sm:$0xff]  }
  0x16   : > { %629 = vmatprep.subr.bf16.mxu0 %v1858_v18  ;;  %v1890_v46 = vld [vmem:[%s2620_s1 + $0x110] ss:$8 sps:$4 sm:$0xff]   ;;  %v1894_v48 = vld [vmem:[%s2620_s1 + $0x224] ss:$8 sps:$4 sm:$0xff]   ;;  %v1896_v50 = vld [vmem:[%s2620_s1 + $0x120] ss:$8 sps:$4 sm:$0xff]  }
  0x17   : > { %v334_v42 = vsel %vm325_vm0, %v332_v38, %v333_v39  ;;  %v1893_v47 = vld [vmem:[%s2620_s1 + $0x210] ss:$8 sps:$4 sm:$0xff]   ;;  %v1898_v49 = vld [vmem:[%s2620_s1 + $0x124] ss:$8 sps:$4 sm:$0xff]   ;;  %v1899_v51 = vld [vmem:[%s2620_s1 + $0x220] ss:$8 sps:$4 sm:$0xff]  }
  0x18   : > { %587 = vmatpush1.bf16.msra.mxu1 %v1860_v19  ;;  %v1900_v52 = vld [vmem:[%s2620_s1 + $0x234] ss:$8 sps:$4 sm:$0xff]   ;;  %v1902_v54 = vld [vmem:[%s2620_s1 + $0x130] ss:$8 sps:$4 sm:$0xff]   ;;  %v1906_v56 = vld [vmem:[%s2620_s1 + $0x244] ss:$8 sps:$4 sm:$0xff]  }
  0x19   : > { %630 = vmatpush1.bf16.msra.mxu0 %v1861_v20  ;;  %588 = vmatprep.subr.bf16.mxu1 %v1862_v21  ;;  %v1904_v53 = vld [vmem:[%s2620_s1 + $0x134] ss:$8 sps:$4 sm:$0xff]   ;;  %v1905_v55 = vld [vmem:[%s2620_s1 + $0x230] ss:$8 sps:$4 sm:$0xff]   ;;  %v249_v57 = vld [vmem:[%s2203_s19] sm:$0xcc] }
  0x1a   : > { %631 = vmatprep.subr.bf16.mxu0 %v1864_v22  ;;  %v253_v59 = vld [vmem:[%s2203_s19 + $0x18] sm:$0x33]  ;;  %v1910_v60 = vld [vmem:[%s2620_s1 + $0x144] ss:$8 sps:$4 sm:$0xff]   ;;  %v1576_v61 = vcombine.high %v249_v57, %v2293_v58  ;;  %v1908_v63 = vld [vmem:[%s2620_s1 + $0x140] ss:$8 sps:$4 sm:$0xff]   ;;  %v1575_v14 = vcombine.low %v249_v57, %v2293_v58 }
  0x1b   : > { %v1579_v62 = vcombine.high %v253_v59, %v253_v59  ;;  %v1911_v3 = vld [vmem:[%s2620_s1 + $0x240] ss:$8 sps:$4 sm:$0xff]   ;;  %v1912_v4 = vld [vmem:[%s2620_s1 + $0x254] ss:$8 sps:$4 sm:$0xff]   ;;  %v1914_v7 = vld [vmem:[%s2620_s1 + $0x150] ss:$8 sps:$4 sm:$0xff]   ;;  %v1578_v15 = vcombine.low %v253_v59, %v253_v59 }
  0x1c   : > { %589 = vmatpush1.bf16.msra.mxu1 %v1866_v23  ;;  %v329_v0 = vrot.slane %v1576_v61, 2  ;;  %v1916_v5 = vld [vmem:[%s2620_s1 + $0x154] ss:$8 sps:$4 sm:$0xff]   ;;  %v1917_v8 = vld [vmem:[%s2620_s1 + $0x250] ss:$8 sps:$4 sm:$0xff]   ;;  %v326_v19 = vrot.slane %v1575_v14, 2 }
  0x1d   : > { %632 = vmatpush1.bf16.msra.mxu0 %v1867_v24  ;;  %590 = vmatprep.subr.bf16.mxu1 %v1868_v25  ;;  %v330_v1 = vrot.slane %v1579_v62, 2  ;;  %v1918_v9 = vld [vmem:[%s2620_s1 + $0x264] ss:$8 sps:$4 sm:$0xff]   ;;  %v1920_v11 = vld [vmem:[%s2620_s1 + $0x160] ss:$8 sps:$4 sm:$0xff]   ;;  %v327_v20 = vrot.slane %v1578_v15, 2 }
  0x1e   : > { %633 = vmatprep.subr.bf16.mxu0 %v1870_v26  ;;  %v1922_v10 = vld [vmem:[%s2620_s1 + $0x164] ss:$8 sps:$4 sm:$0xff]   ;;  %v1923_v12 = vld [vmem:[%s2620_s1 + $0x260] ss:$8 sps:$4 sm:$0xff]   ;;  %v1924_v13 = vld [vmem:[%s2620_s1 + $0x274] ss:$8 sps:$4 sm:$0xff]  }
  0x1f   : > { %v331_v6 = vsel %vm325_vm0, %v329_v0, %v330_v1  ;;  %v1928_v16 = vld [vmem:[%s2620_s1 + $0x174] ss:$8 sps:$4 sm:$0xff]   ;;  %v1926_v17 = vld [vmem:[%s2620_s1 + $0x170] ss:$8 sps:$4 sm:$0xff]   ;;  %v1936_v21 = vld [vmem:[%s2620_s1 + $0x4] ss:$8 sps:$4 sm:$0xff]   ;;  %v328_v25 = vsel %vm325_vm0, %v326_v19, %v327_v20 }
  0x20   : > { %591 = vmatpush1.bf16.msra.mxu1 %v1872_v27  ;;  %610 = vmatprep.mubr.bf16.mxu1 %v331_v6  ;;  %v1929_v18 = vld [vmem:[%s2620_s1 + $0x270] ss:$8 sps:$4 sm:$0xff]   ;;  %v1939_v22 = vld [vmem:[%s2620_s1 + $0x304] ss:$8 sps:$4 sm:$0xff]   ;;  %v1934_v23 = vld [vmem:[%s2620_s1] ss:$8 sps:$4 sm:$0xff]  }
  0x21   : > { %634 = vmatpush1.bf16.msra.mxu0 %v1873_v30  ;;  %592 = vmatprep.subr.bf16.mxu1 %v1874_v31  ;;  %v1940_v24 = vld [vmem:[%s2203_s19 + $0x8] ss:$12 sps:$4 sm:$0xff]   ;;  %v1941_v30 = vld [vmem:[%s2620_s1 + $0x10] ss:$8 sps:$4 sm:$0xff]   ;;  %v1949_v32 = vld [vmem:[%s2620_s1 + $0x24] ss:$8 sps:$4 sm:$0xff]  }
  0x22   : > { %635 = vmatprep.subr.bf16.mxu0 %v1876_v34  ;;  %v1937_v26 = vld [vmem:[%s2620_s1 + $0x300] ss:$8 sps:$4 sm:$0xff]   ;;  %v1943_v27 = vld [vmem:[%s2620_s1 + $0x14] ss:$8 sps:$4 sm:$0xff]   ;;  %v1944_v31 = vld [vmem:[%s2620_s1 + $0x310] ss:$8 sps:$4 sm:$0xff]  }
  0x23   : > { %v1946_v28 = vld [vmem:[%s2620_s1 + $0x314] ss:$8 sps:$4 sm:$0xff]   ;;  %v1952_v33 = vld [vmem:[%s2620_s1 + $0x324] ss:$8 sps:$4 sm:$0xff]   ;;  %v1947_v34 = vld [vmem:[%s2620_s1 + $0x20] ss:$8 sps:$4 sm:$0xff]  }
  0x24   : > { %593 = vmatpush1.bf16.msra.mxu1 %v1878_v35  ;;  %v1950_v35 = vld [vmem:[%s2620_s1 + $0x320] ss:$8 sps:$4 sm:$0xff]   ;;  %v1953_v38 = vld [vmem:[%s2620_s1 + $0x30] ss:$8 sps:$4 sm:$0xff]   ;;  %v1985_v61 = vld [vmem:[%s2620_s1 + $0x84] ss:$8 sps:$4 sm:$0xff]  }
  0x25   : > { %636 = vmatpush1.bf16.msra.mxu0 %v1879_v36  ;;  %594 = vmatprep.subr.bf16.mxu1 %v1880_v37  ;;  %v1955_v36 = vld [vmem:[%s2620_s1 + $0x34] ss:$8 sps:$4 sm:$0xff]   ;;  %v1956_v39 = vld [vmem:[%s2620_s1 + $0x330] ss:$8 sps:$4 sm:$0xff]   ;;  %v1988_v62 = vld [vmem:[%s2620_s1 + $0x384] ss:$8 sps:$4 sm:$0xff]  }
  0x26   : > { %963 = vmatprep.subr.bf16.mxu0 %v1886_v40  ;;  %v1958_v37 = vld [vmem:[%s2620_s1 + $0x334] ss:$8 sps:$4 sm:$0xff]   ;;  %v1961_v40 = vld [vmem:[%s2620_s1 + $0x44] ss:$8 sps:$4 sm:$0xff]   ;;  %v1977_v59 = vld [vmem:[%s2620_s1 + $0x70] ss:$8 sps:$4 sm:$0xff]  }
  0x27   : > { %v1986_v0 = vld [vmem:[%s2620_s1 + $0x380] ss:$8 sps:$4 sm:$0xff]   ;;  %v1991_v1 = vld [vmem:[%s2620_s1 + $0x94] ss:$8 sps:$4 sm:$0xff]   ;;  %v1997_v6 = vld [vmem:[%s2620_s1 + $0xa4] ss:$8 sps:$4 sm:$0xff]  }
  0x28   : > { %654 = vmatmul.mubr.bf16.vlgmr.msra.gmra.mrb[0].mxu0 %v334_v42  ;;  %595 = vmatpush1.bf16.msra.mxu1 %v1887_v43  ;;  %v1959_v42 = vld [vmem:[%s2620_s1 + $0x40] ss:$8 sps:$4 sm:$0xff]   ;;  %v2009_v14 = vld [vmem:[%s2620_s1 + $0xc4] ss:$8 sps:$4 sm:$0xff]   ;;  %v2018_v19 = vld [vmem:[%s2620_s1 + $0x3d4] ss:$8 sps:$4 sm:$0xff]  }
  0x29   : > { %964 = vmatpush1.bf16.msra.mxu0 %v1884_v41  ;;  %596 = vmatprep.subr.bf16.mxu1 %v1888_v44  ;;  %v1964_v41 = vld [vmem:[%s2620_s1 + $0x344] ss:$8 sps:$4 sm:$0xff]   ;;  %v1962_v43 = vld [vmem:[%s2620_s1 + $0x340] ss:$8 sps:$4 sm:$0xff]   ;;  %v1967_v44 = vld [vmem:[%s2620_s1 + $0x54] ss:$8 sps:$4 sm:$0xff]  }
  0x2a   : > { %965 = vmatprep.subr.bf16.mxu0 %v1892_v45  ;;  %995 = vmatprep.mubr.bf16.mxu0 %v2084_v2  ;;  %v1970_v45 = vld [vmem:[%s2620_s1 + $0x354] ss:$8 sps:$4 sm:$0xff]   ;;  %v2012_v15 = vld [vmem:[%s2620_s1 + $0x3c4] ss:$8 sps:$4 sm:$0xff]   ;;  %v2013_v20 = vld [vmem:[%s2620_s1 + $0xd0] ss:$8 sps:$4 sm:$0xff]  }
  0x2c   : > { %597 = vmatpush1.bf16.msra.mxu1 %v1893_v47  ;;  %v1968_v47 = vld [vmem:[%s2620_s1 + $0x350] ss:$8 sps:$4 sm:$0xff]  }
  0x2d   : > { %966 = vmatpush1.bf16.msra.mxu0 %v1890_v46  ;;  %598 = vmatprep.subr.bf16.mxu1 %v1894_v48  ;;  %v1965_v46 = vld [vmem:[%s2620_s1 + $0x50] ss:$8 sps:$4 sm:$0xff]   ;;  %v1973_v48 = vld [vmem:[%s2620_s1 + $0x64] ss:$8 sps:$4 sm:$0xff]  }
  0x2e   : > { %967 = vmatprep.subr.bf16.mxu0 %v1898_v49  ;;  %v1976_v49 = vld [vmem:[%s2620_s1 + $0x364] ss:$8 sps:$4 sm:$0xff]  }
  0x30   : > { %599 = vmatpush1.bf16.msra.mxu1 %v1899_v51  ;;  %v1974_v51 = vld [vmem:[%s2620_s1 + $0x360] ss:$8 sps:$4 sm:$0xff]  }
  0x31   : > { %968 = vmatpush1.bf16.msra.mxu0 %v1896_v50  ;;  %600 = vmatprep.subr.bf16.mxu1 %v1900_v52  ;;  %v1971_v50 = vld [vmem:[%s2620_s1 + $0x60] ss:$8 sps:$4 sm:$0xff]   ;;  %v1979_v52 = vld [vmem:[%s2620_s1 + $0x74] ss:$8 sps:$4 sm:$0xff]  }
  0x32   : > { %969 = vmatprep.subr.bf16.mxu0 %v1904_v53  ;;  %v1982_v53 = vld [vmem:[%s2620_s1 + $0x374] ss:$8 sps:$4 sm:$0xff]  }
  0x34   : > { %601 = vmatpush1.bf16.msra.mxu1 %v1905_v55  ;;  %v2440_v55 = vld [vmem:[%s2203_s19 + $0x18] sm:$0xff] }
  0x35   : > { %970 = vmatpush1.bf16.msra.mxu0 %v1902_v54  ;;  %602 = vmatprep.subr.bf16.mxu1 %v1906_v56  ;;  %v2437_v54 = vld [vmem:[%s2203_s19] sm:$0xff]  ;;  %v1729_v57 = vcombine.high %v2293_v58, %v2440_v55 }
  0x36   : > { %971 = vmatprep.subr.bf16.mxu0 %v1910_v60  ;;  %v1630_v56 = vcombine.high %v2437_v54, %v2293_v58  ;;  %v1980_v60 = vld [vmem:[%s2620_s1 + $0x370] ss:$8 sps:$4 sm:$0xff]  }
  0x38   : > { %603 = vmatpush1.bf16.msra.mxu1 %v1911_v3  ;;  %v1994_v3 = vld [vmem:[%s2620_s1 + $0x394] ss:$8 sps:$4 sm:$0xff]  }
  0x39   : > { %972 = vmatpush1.bf16.msra.mxu0 %v1908_v63  ;;  %604 = vmatprep.subr.bf16.mxu1 %v1912_v4  ;;  %v1983_v63 = vld [vmem:[%s2620_s1 + $0x80] ss:$8 sps:$4 sm:$0xff]   ;;  %v1989_v4 = vld [vmem:[%s2620_s1 + $0x90] ss:$8 sps:$4 sm:$0xff]  }
  0x3a   : > { %973 = vmatprep.subr.bf16.mxu0 %v1916_v5  ;;  %v1992_v5 = vld [vmem:[%s2620_s1 + $0x390] ss:$8 sps:$4 sm:$0xff]  }
  0x3c   : > { %605 = vmatpush1.bf16.msra.mxu1 %v1917_v8  ;;  %v1995_v8 = vld [vmem:[%s2620_s1 + $0xa0] ss:$8 sps:$4 sm:$0xff]  }
  0x3d   : > { %974 = vmatpush1.bf16.msra.mxu0 %v1914_v7  ;;  %606 = vmatprep.subr.bf16.mxu1 %v1918_v9  ;;  %v2000_v7 = vld [vmem:[%s2620_s1 + $0x3a4] ss:$8 sps:$4 sm:$0xff]   ;;  %v1998_v9 = vld [vmem:[%s2620_s1 + $0x3a0] ss:$8 sps:$4 sm:$0xff]  }
  0x3e   : > { %975 = vmatprep.subr.bf16.mxu0 %v1922_v10  ;;  %v2003_v10 = vld [vmem:[%s2620_s1 + $0xb4] ss:$8 sps:$4 sm:$0xff]  }
  0x40   : > { %607 = vmatpush1.bf16.msra.mxu1 %v1923_v12  ;;  %v2001_v12 = vld [vmem:[%s2620_s1 + $0xb0] ss:$8 sps:$4 sm:$0xff]  }
  0x41   : > { %976 = vmatpush1.bf16.msra.mxu0 %v1920_v11  ;;  %608 = vmatprep.subr.bf16.mxu1 %v1924_v13  ;;  %v2006_v11 = vld [vmem:[%s2620_s1 + $0x3b4] ss:$8 sps:$4 sm:$0xff]   ;;  %v2004_v13 = vld [vmem:[%s2620_s1 + $0x3b0] ss:$8 sps:$4 sm:$0xff]  }
  0x42   : > { %977 = vmatprep.subr.bf16.mxu0 %v1928_v16  ;;  %v2007_v16 = vld [vmem:[%s2620_s1 + $0xc0] ss:$8 sps:$4 sm:$0xff]  }
  0x44   : > { %609 = vmatpush1.bf16.msra.mxu1 %v1929_v18  ;;  %v2015_v18 = vld [vmem:[%s2620_s1 + $0xd4] ss:$8 sps:$4 sm:$0xff]  }
  0x45   : > { %978 = vmatpush1.bf16.msra.mxu0 %v1926_v17  ;;  %920 = vmatprep.subr.bf16.mxu1 %v1936_v21  ;;  %v2010_v17 = vld [vmem:[%s2620_s1 + $0x3c0] ss:$8 sps:$4 sm:$0xff]   ;;  %v2016_v21 = vld [vmem:[%s2620_s1 + $0x3d0] ss:$8 sps:$4 sm:$0xff]  }
  0x46   : > { %1308 = vmatprep.subr.bf16.mxu0 %v1939_v22  ;;  %v2021_v22 = vld [vmem:[%s2620_s1 + $0xe4] ss:$8 sps:$4 sm:$0xff]  }
  0x47   : > { %611 = vmatmul.mubr.bf16.vlgmr.msra.gmra.mrb[0].mxu1 %v328_v25  ;;  %v2022_v25 = vld [vmem:[%s2620_s1 + $0x3e0] ss:$8 sps:$4 sm:$0xff]  }
  0x48   : > { %996 = vmatmul.mubr.bf16.vlgmr.msra.gmra.mrb[4].mxu0 %v1940_v24  ;;  %921 = vmatpush1.bf16.msra.mxu1 %v1934_v23  ;;  %v2024_v23 = vld [vmem:[%s2620_s1 + $0x3e4] ss:$8 sps:$4 sm:$0xff]   ;;  %v2019_v24 = vld [vmem:[%s2620_s1 + $0xe0] ss:$8 sps:$4 sm:$0xff]  }
  0x49   : > { %1309 = vmatpush1.bf16.msra.mxu0 %v1937_v26  ;;  %922 = vmatprep.subr.bf16.mxu1 %v1943_v27  ;;  %v2027_v26 = vld [vmem:[%s2620_s1 + $0xf4] ss:$8 sps:$4 sm:$0xff]  }
  0x4a   : > { %1310 = vmatprep.subr.bf16.mxu0 %v1946_v28  ;;  %952 = vmatprep.mubr.bf16.mxu1 %v1630_v56  ;;  %v2030_v27 = vld [vmem:[%s2620_s1 + $0x3f4] ss:$8 sps:$4 sm:$0xff]   ;;  %v2025_v28 = vld [vmem:[%s2620_s1 + $0xf0] ss:$8 sps:$4 sm:$0xff]  }
  0x4b   : > { %1340 = vmatprep.mubr.bf16.mxu0 %v1729_v57 }
  0x4c   : > { %923 = vmatpush1.bf16.msra.mxu1 %v1941_v30  ;;  %v2028_v30 = vld [vmem:[%s2620_s1 + $0x3f0] ss:$8 sps:$4 sm:$0xff]  }
  0x4d   : > { %1311 = vmatpush1.bf16.msra.mxu0 %v1944_v31  ;;  %924 = vmatprep.subr.bf16.mxu1 %v1949_v32  ;;  %v2037_v31 = vld [vmem:[%s2620_s1 + $0x404] ss:$8 sps:$4 sm:$0xff]   ;;  %v1629_v32 = vcombine.low %v2437_v54, %v2293_v58 }
  0x4e   : > { %1312 = vmatprep.subr.bf16.mxu0 %v1952_v33  ;;  %v1728_v33 = vcombine.low %v2293_v58, %v2440_v55  ;;  %v2043_v58 = vld [vmem:[%s2620_s1 + $0x424] ss:$8 sps:$4 sm:$0xff]  }
  0x50   : > { %925 = vmatpush1.bf16.msra.mxu1 %v1947_v34  ;;  %v2035_v34 = vld [vmem:[%s2620_s1 + $0x400] ss:$8 sps:$4 sm:$0xff]  }
  0x51   : > { %1313 = vmatpush1.bf16.msra.mxu0 %v1950_v35  ;;  %926 = vmatprep.subr.bf16.mxu1 %v1955_v36  ;;  %v2040_v35 = vld [vmem:[%s2620_s1 + $0x414] ss:$8 sps:$4 sm:$0xff]   ;;  %v2038_v36 = vld [vmem:[%s2620_s1 + $0x410] ss:$8 sps:$4 sm:$0xff]  }
  0x52   : > { %1314 = vmatprep.subr.bf16.mxu0 %v1958_v37  ;;  %v2041_v37 = vld [vmem:[%s2620_s1 + $0x420] ss:$8 sps:$4 sm:$0xff]  }
  0x54   : > { %927 = vmatpush1.bf16.msra.mxu1 %v1953_v38  ;;  %v2046_v38 = vld [vmem:[%s2620_s1 + $0x434] ss:$8 sps:$4 sm:$0xff]  }
  0x55   : > { %1315 = vmatpush1.bf16.msra.mxu0 %v1956_v39  ;;  %928 = vmatprep.subr.bf16.mxu1 %v1961_v40  ;;  %v2049_v39 = vld [vmem:[%s2620_s1 + $0x444] ss:$8 sps:$4 sm:$0xff]   ;;  %v2047_v40 = vld [vmem:[%s2620_s1 + $0x440] ss:$8 sps:$4 sm:$0xff]  }
  0x56   : > { %1316 = vmatprep.subr.bf16.mxu0 %v1964_v41  ;;  %v2052_v41 = vld [vmem:[%s2620_s1 + $0x454] ss:$8 sps:$4 sm:$0xff]  }
  0x58   : > { %929 = vmatpush1.bf16.msra.mxu1 %v1959_v42  ;;  %v2050_v42 = vld [vmem:[%s2620_s1 + $0x450] ss:$8 sps:$4 sm:$0xff]  }
  0x59   : > { %1317 = vmatpush1.bf16.msra.mxu0 %v1962_v43  ;;  %930 = vmatprep.subr.bf16.mxu1 %v1967_v44  ;;  %v2055_v43 = vld [vmem:[%s2620_s1 + $0x464] ss:$8 sps:$4 sm:$0xff]   ;;  %v2053_v44 = vld [vmem:[%s2620_s1 + $0x460] ss:$8 sps:$4 sm:$0xff]  }
  0x5a   : > { %1318 = vmatprep.subr.bf16.mxu0 %v1970_v45  ;;  %v2058_v45 = vld [vmem:[%s2620_s1 + $0x474] ss:$8 sps:$4 sm:$0xff]  }
  0x5c   : > { %931 = vmatpush1.bf16.msra.mxu1 %v1965_v46  ;;  %v2056_v46 = vld [vmem:[%s2620_s1 + $0x470] ss:$8 sps:$4 sm:$0xff]  }
  0x5d   : > { %1319 = vmatpush1.bf16.msra.mxu0 %v1968_v47  ;;  %932 = vmatprep.subr.bf16.mxu1 %v1973_v48  ;;  %v1007_v47 = vld [vmem:[%s2203_s19 + $0x20] sm:$0xf] }
  0x5e   : > { %1320 = vmatprep.subr.bf16.mxu0 %v1976_v49  ;;  %v1730_v48 = vcombine.low %v2219_v29, %v1007_v47 }
  0x60   : > { %933 = vmatpush1.bf16.msra.mxu1 %v1971_v50 }
  0x61   : > { %1321 = vmatpush1.bf16.msra.mxu0 %v1974_v51  ;;  %934 = vmatprep.subr.bf16.mxu1 %v1979_v52 }
  0x62   : > { %1322 = vmatprep.subr.bf16.mxu0 %v1982_v53 }
  0x64   : > { %935 = vmatpush1.bf16.msra.mxu1 %v1977_v59 }
  0x65   : > { %1323 = vmatpush1.bf16.msra.mxu0 %v1980_v60  ;;  %936 = vmatprep.subr.bf16.mxu1 %v1985_v61 }
  0x66   : > { %1324 = vmatprep.subr.bf16.mxu0 %v1988_v62 }
  0x68   : > { %937 = vmatpush1.bf16.msra.mxu1 %v1983_v63 }
  0x69   : > { %1325 = vmatpush1.bf16.msra.mxu0 %v1986_v0  ;;  %938 = vmatprep.subr.bf16.mxu1 %v1991_v1 }
  0x6a   : > { %1326 = vmatprep.subr.bf16.mxu0 %v1994_v3 }
  0x6c   : > { %939 = vmatpush1.bf16.msra.mxu1 %v1989_v4 }
  0x6d   : > { %1327 = vmatpush1.bf16.msra.mxu0 %v1992_v5  ;;  %940 = vmatprep.subr.bf16.mxu1 %v1997_v6  ;;  %v1400_v6 = vlaneseq }
  0x6e   : > { %1328 = vmatprep.subr.bf16.mxu0 %v2000_v7 }
  0x6f   : > { %v1401_v7 = vshrl.u32 %v1400_v6, 7 }
  0x70   : > { %941 = vmatpush1.bf16.msra.mxu1 %v1995_v8 }
  0x71   : > { %1329 = vmatpush1.bf16.msra.mxu0 %v1998_v9  ;;  %942 = vmatprep.subr.bf16.mxu1 %v2003_v10  ;;  %v1402_v8 = vsub.s32 0, %v1401_v7  ;;  %v1398_v9 = vld [vmem:[%s2621_s2] sm:$0x3]  ;;  %v1406_v10 = vsub.s32 1, %v1401_v7 }
  0x72   : > { %1330 = vmatprep.subr.bf16.mxu0 %v2006_v11 }
  0x73   : > { %v1403_v11 = vrot.slane %v1398_v9, %v1402_v8 }
  0x74   : > { %943 = vmatpush1.bf16.msra.mxu1 %v2001_v12 }
  0x75   : > { %1331 = vmatpush1.bf16.msra.mxu0 %v2004_v13  ;;  %944 = vmatprep.subr.bf16.mxu1 %v2009_v14  ;;  %v1407_v13 = vrot.slane %v1398_v9, %v1406_v10 }
  0x76   : > { %1332 = vmatprep.subr.bf16.mxu0 %v2012_v15 }
  0x78   : > { %945 = vmatpush1.bf16.msra.mxu1 %v2007_v16 }
  0x79   : > { %1333 = vmatpush1.bf16.msra.mxu0 %v2010_v17  ;;  %946 = vmatprep.subr.bf16.mxu1 %v2015_v18 }
  0x7a   : > { %1334 = vmatprep.subr.bf16.mxu0 %v2018_v19 }
  0x7c   : > { %947 = vmatpush1.bf16.msra.mxu1 %v2013_v20 }
  0x7d   : > { %1335 = vmatpush1.bf16.msra.mxu0 %v2016_v21  ;;  %948 = vmatprep.subr.bf16.mxu1 %v2021_v22 }
  0x7e   : > { %1336 = vmatprep.subr.bf16.mxu0 %v2024_v23 }
  0x80   : > { %949 = vmatpush1.bf16.msra.mxu1 %v2019_v24 }
  0x81   : > { %1337 = vmatpush1.bf16.msra.mxu0 %v2022_v25  ;;  %950 = vmatprep.subr.bf16.mxu1 %v2027_v26 }
  0x82   : > { %1338 = vmatprep.subr.bf16.mxu0 %v2030_v27 }
  0x84   : > { %951 = vmatpush1.bf16.msra.mxu1 %v2025_v28 }
  0x85   : > { %1339 = vmatpush1.bf16.msra.mxu0 %v2028_v30 }
  0x86   : > { %1351 = vmatprep.subr.bf16.mxu0 %v2037_v31 }
  0x87   : > { %953 = vmatmul.mubr.bf16.vlgmr.msra.gmra.mrb[4].mxu1 %v1629_v32 }
  0x88   : > { %1341 = vmatmul.mubr.bf16.vlgmr.msra.gmra.mrb[4].mxu0 %v1728_v33 }
  0x89   : > { %1352 = vmatpush1.bf16.msra.mxu0 %v2035_v34  ;;  %1383 = vmatprep.mubr.bf16.mxu0 %v2084_v2  ;;  %v2044_v2 = vld [vmem:[%s2620_s1 + $0x430] ss:$8 sps:$4 sm:$0xff]  }
  0x8a   : > { %1353 = vmatprep.subr.bf16.mxu0 %v2040_v35 }
  0x8d   : > { %1354 = vmatpush1.bf16.msra.mxu0 %v2038_v36 }
  0x8e   : > { %1355 = vmatprep.subr.bf16.mxu0 %v2043_v58 }
  0x91   : > { %1356 = vmatpush1.bf16.msra.mxu0 %v2041_v37 }
  0x92   : > { %1357 = vmatprep.subr.bf16.mxu0 %v2046_v38 }
  0x95   : > { %1358 = vmatpush1.bf16.msra.mxu0 %v2044_v2 }
  0x96   : > { %1359 = vmatprep.subr.bf16.mxu0 %v2049_v39 }
  0x99   : > { %1360 = vmatpush1.bf16.msra.mxu0 %v2047_v40 }
  0x9a   : > { %1361 = vmatprep.subr.bf16.mxu0 %v2052_v41 }
  0x9d   : > { %1362 = vmatpush1.bf16.msra.mxu0 %v2050_v42 }
  0x9e   : > { %1363 = vmatprep.subr.bf16.mxu0 %v2055_v43 }
  0xa1   : > { %1364 = vmatpush1.bf16.msra.mxu0 %v2053_v44 }
  0xa2   : > { %1365 = vmatprep.subr.bf16.mxu0 %v2058_v45 }
  0xa5   : > { %1366 = vmatpush1.bf16.msra.mxu0 %v2056_v46 }
  0xa8   : > { %1384 = vmatmul.mubr.bf16.vlgmr.msra.gmra.mrb[4].mxu0 %v1730_v48 }
  0xfb   : > { %v655_v49 = vpop.f32.mrb[0].mxu0 }
  0xfc   : > { %v657_v50 = vpop.f32.mrb[1].mxu0 }
  0xfd   : > { %v659_v51 = vpop.f32.mrb[2].mxu0 }
  0xfe   : > { %v661_v52 = vpop.f32.mrb[3].mxu0 }
 0x11a   : > { %v612_v53 = vpop.f32.mrb[0].mxu1 }
 0x11b   : > { %v656_v54 = vadd.f32 %v655_v49, %v612_v53  ;;  %v614_v55 = vpop.f32.mrb[1].mxu1 }
 0x11c   : > { %v658_v56 = vadd.f32 %v657_v50, %v614_v55  ;;  %v616_v57 = vpop.f32.mrb[2].mxu1 }
 0x11d   : > { %v660_v59 = vadd.f32 %v659_v51, %v616_v57  ;;  %v618_v60 = vpop.f32.mrb[3].mxu1 }
 0x11e   : > { %v662_v61 = vadd.f32 %v661_v52, %v618_v60 }
 0x15a   : > { %v954_v62 = vpop.f32.mrb[4].mxu1 }
 0x15b   : > { %v955_v63 = vadd.f32 %v954_v62, %v656_v54  ;;  %v956_v0 = vpop.f32.mrb[5].mxu1 }
 0x15c   : > { %v957_v1 = vadd.f32 %v956_v0, %v658_v56  ;;  %v958_v3 = vpop.f32.mrb[6].mxu1 }
 0x15d   : > { %v959_v29 = vadd.f32 %v958_v3, %v660_v59  ;;  %v960_v4 = vpop.f32.mrb[7].mxu1 }
 0x15e   : > { %v961_v5 = vadd.f32 %v960_v4, %v662_v61 }
 0x17b   : > { %v1385_v12 = vpop.f32.mrb[4].mxu0 }
 0x17c   : > { %v1788_v14 = vadd.f32 %v1385_v12, %v955_v63  ;;  %v1387_v15 = vpop.f32.mrb[5].mxu0 }
 0x17d   : > { %v1791_v16 = vadd.f32 %v1387_v15, %v957_v1  ;;  %v1389_v17 = vpop.f32.mrb[6].mxu0 }
 0x17e   : > { %v1410_v18 = vadd.f32 %v1788_v14, %v1403_v11  ;;  %v1794_v19 = vadd.f32 %v1389_v17, %v959_v29  ;;  %v1391_v20 = vpop.f32.mrb[7].mxu0 }
 0x17f   : > { %v1411_v21 = vadd.f32 %v1791_v16, %v1407_v13  ;;  %v1797_v22 = vadd.f32 %v1391_v20, %v961_v5 }
 0x180   : > { %v1414_v23 = vmax.f32 %v1410_v18, 0.0  ;;  %v1412_v24 = vadd.f32 %v1794_v19, %v1403_v11 }
 0x181   : > { %v1415_v25 = vmax.f32 %v1411_v21, 0.0  ;;  %v1413_v26 = vadd.f32 %v1797_v22, %v1407_v13 }
 0x182   : > { %v1416_v27 = vmax.f32 %v1412_v24, 0.0 }
 0x183   : > { %v1784_v28 = vpack.c.bf16 %v1415_v25, %v1414_v23  ;;  %v1417_v30 = vmax.f32 %v1413_v26, 0.0 }
 0x185   : > { %1430 = vst [vmem:[%s194_s24] sm:$0xff] %v1784_v28  ;;  %v1785_v31 = vpack.c.bf16 %v1417_v30, %v1416_v27 }
 0x187   : > { %1431 = vst [vmem:[%s194_s24 + $0x8] sm:$0xff] %v1785_v31 }
 0x188 PF: > { %s13_s14 = sadd.s32 1, %s2082_s14   ;;  %s2623_s12 = smov %s2078_s13 }
 0x189   : > { %p10_p5 = scmp.ge.s32.totalorder %s13_s14, 4   ;;  %s2624_s13 = smov %s2626_s15 }
 0x18b   :  { %12 = sbr.rel (!%p10_p5) target bundleno = 2 (0x2), region = 64 }

// kernel: _lambda_.19
= control target key start
LH: loop header
LB: loop body
LE: loop exit
PB: predicated region body
PF: predicated region fallthrough
CT: control target
= control target key end

     0   :  { %s3756_s15 = smov 0   ;;  %s3758_s16 = smov 0   ;;  %s4759_s0 = inlined_call_operand.vmem [shape: bf16[2,1,24,768], index: 0, kind: input, shape index: {}]   ;;  %s4760_s1 = inlined_call_operand.vmem [shape: bf16[3,768,256], index: 1, kind: input, shape index: {}]   ;;  %s4761_s2 = inlined_call_operand.vmem [shape: f32[1,256], index: 2, kind: input, shape index: {}]   ;;  %s4762_s3 = inlined_call_operand.vmem [shape: bf16[2,16,256], index: 3, kind: input, shape index: {}]   ;;  %s4763_s4 = inlined_call_operand.vmem [shape: bf16[2,16,256], index: 4, kind: output, shape index: {}]  }
   0x1   :  { %s3760_s17 = smov 0  }
   0x2 LB: > { %s26_s18 = sadd.s32 1, %s3725_s16  ;;  %p2672_p0 = scmp.ge.s32.totalorder %s3729_s17, 1  ;;  %s3729_s17 = sphi %s3760_s17, %s14_s17   ;;  %s3725_s16 = sphi %s3758_s16, %s4765_s16   ;;  %s3721_s15 = sphi %s3756_s15, %s4764_s15  }
   0x3   : > { %p28_p1 = scmp.ge.s32.totalorder %s26_s18, 2  ;;  %p194_p2 = scmp.lt.s32.totalorder %s3729_s17, 3 }
   0x5   : > { %s4767_s18 = smov (%p28_p1, %s26_s18), 0  ;;  %p195_p3 = pnand %p2672_p0, %p194_p2 }
   0x6   : > { %v3247_v0 = vld [vmem:[%s4760_s1 + $0x304] ss:$8 sps:$4 sm:$0xff] (!%p195_p3)   ;;  %v3251_v2 = vld [vmem:[%s4760_s1 + $0x300] ss:$8 sps:$4 sm:$0xff] (!%p195_p3)   ;;  %v3253_v4 = vld [vmem:[%s4760_s1 + $0x314] ss:$8 sps:$4 sm:$0xff] (!%p195_p3)  }
   0x7   : > { %198 = sbr.rel (%p195_p3) target bundleno = 554 (0x22a), region = 36  ;;  %v3249_v1 = vld [vmem:[%s4760_s1 + $0x104] ss:$8 sps:$4 sm:$0xff] (!%p195_p3)   ;;  %1014 = vmatprep.subr.bf16.mxu1 (!%p195_p3), %v3247_v0  ;;  %v3252_v3 = vld [vmem:[%s4760_s1 + $0x100] ss:$8 sps:$4 sm:$0xff] (!%p195_p3)   ;;  %p235_p4 = scmp.lt.s32.totalorder (!%p195_p3), %s3721_s15, 1 }
   0x8   : > { %1696 = vmatprep.subr.bf16.mxu0 (!%p195_p3), %v3249_v1  ;;  %1015 = vmatpush1.bf16.msra.mxu1 (!%p195_p3), %v3251_v2  ;;  %v3255_v5 = vld [vmem:[%s4760_s1 + $0x114] ss:$8 sps:$4 sm:$0xff] (!%p195_p3)   ;;  %v3257_v6 = vld [vmem:[%s4760_s1 + $0x310] ss:$8 sps:$4 sm:$0xff] (!%p195_p3)   ;;  %v3259_v8 = vld [vmem:[%s4760_s1 + $0x324] ss:$8 sps:$4 sm:$0xff] (!%p195_p3)  }
   0x9   : > { %1697 = vmatpush1.bf16.msra.mxu0 (!%p195_p3), %v3252_v3  ;;  %1016 = vmatprep.subr.bf16.mxu1 (!%p195_p3), %v3253_v4  ;;  %v3258_v7 = vld [vmem:[%s4760_s1 + $0x110] ss:$8 sps:$4 sm:$0xff] (!%p195_p3)   ;;  %v3261_v9 = vld [vmem:[%s4760_s1 + $0x124] ss:$8 sps:$4 sm:$0xff] (!%p195_p3)   ;;  %v3263_v10 = vld [vmem:[%s4760_s1 + $0x320] ss:$8 sps:$4 sm:$0xff] (!%p195_p3)  }
   0xa   : > { %1698 = vmatprep.subr.bf16.mxu0 (!%p195_p3), %v3255_v5  ;;  %v3264_v11 = vld [vmem:[%s4760_s1 + $0x120] ss:$8 sps:$4 sm:$0xff] (!%p195_p3)   ;;  %v3265_v12 = vld [vmem:[%s4760_s1 + $0x334] ss:$8 sps:$4 sm:$0xff] (!%p195_p3)   ;;  %v3269_v14 = vld [vmem:[%s4760_s1 + $0x330] ss:$8 sps:$4 sm:$0xff] (!%p195_p3)  }
   0xb   : > { %v3267_v13 = vld [vmem:[%s4760_s1 + $0x134] ss:$8 sps:$4 sm:$0xff] (!%p195_p3)   ;;  %v3270_v15 = vld [vmem:[%s4760_s1 + $0x130] ss:$8 sps:$4 sm:$0xff] (!%p195_p3)   ;;  %v3271_v16 = vld [vmem:[%s4760_s1 + $0x344] ss:$8 sps:$4 sm:$0xff] (!%p195_p3)  }
   0xc   : > { %1017 = vmatpush1.bf16.msra.mxu1 (!%p195_p3), %v3257_v6  ;;  %v3273_v17 = vld [vmem:[%s4760_s1 + $0x144] ss:$8 sps:$4 sm:$0xff] (!%p195_p3)   ;;  %v3275_v18 = vld [vmem:[%s4760_s1 + $0x340] ss:$8 sps:$4 sm:$0xff] (!%p195_p3)   ;;  %v3277_v20 = vld [vmem:[%s4760_s1 + $0x354] ss:$8 sps:$4 sm:$0xff] (!%p195_p3)  }
   0xd   : > { %1699 = vmatpush1.bf16.msra.mxu0 (!%p195_p3), %v3258_v7  ;;  %1018 = vmatprep.subr.bf16.mxu1 (!%p195_p3), %v3259_v8  ;;  %v3276_v19 = vld [vmem:[%s4760_s1 + $0x140] ss:$8 sps:$4 sm:$0xff] (!%p195_p3)   ;;  %v3279_v21 = vld [vmem:[%s4760_s1 + $0x154] ss:$8 sps:$4 sm:$0xff] (!%p195_p3)   ;;  %v3281_v22 = vld [vmem:[%s4760_s1 + $0x350] ss:$8 sps:$4 sm:$0xff] (!%p195_p3)  }
   0xe   : > { %1700 = vmatprep.subr.bf16.mxu0 %v3261_v9  ;;  %v3282_v23 = vld [vmem:[%s4760_s1 + $0x150] ss:$8 sps:$4 sm:$0xff]   ;;  %v3283_v24 = vld [vmem:[%s4760_s1 + $0x364] ss:$8 sps:$4 sm:$0xff]   ;;  %v3287_v26 = vld [vmem:[%s4760_s1 + $0x360] ss:$8 sps:$4 sm:$0xff]  }
   0xf   : > { %v3285_v25 = vld [vmem:[%s4760_s1 + $0x164] ss:$8 sps:$4 sm:$0xff]   ;;  %v3288_v27 = vld [vmem:[%s4760_s1 + $0x160] ss:$8 sps:$4 sm:$0xff]   ;;  %v3289_v28 = vld [vmem:[%s4760_s1 + $0x374] ss:$8 sps:$4 sm:$0xff]  }
  0x10   : > { %1019 = vmatpush1.bf16.msra.mxu1 %v3263_v10  ;;  %v3291_v29 = vld [vmem:[%s4760_s1 + $0x174] ss:$8 sps:$4 sm:$0xff]   ;;  %v3293_v30 = vld [vmem:[%s4760_s1 + $0x370] ss:$8 sps:$4 sm:$0xff]   ;;  %v3295_v32 = vld [vmem:[%s4760_s1 + $0x384] ss:$8 sps:$4 sm:$0xff]  }
  0x11   : > { %1701 = vmatpush1.bf16.msra.mxu0 %v3264_v11  ;;  %1020 = vmatprep.subr.bf16.mxu1 %v3265_v12  ;;  %v3294_v31 = vld [vmem:[%s4760_s1 + $0x170] ss:$8 sps:$4 sm:$0xff]   ;;  %v3297_v33 = vld [vmem:[%s4760_s1 + $0x184] ss:$8 sps:$4 sm:$0xff]   ;;  %v3299_v34 = vld [vmem:[%s4760_s1 + $0x380] ss:$8 sps:$4 sm:$0xff]  }
  0x12   : > { %1702 = vmatprep.subr.bf16.mxu0 %v3267_v13  ;;  %v3300_v35 = vld [vmem:[%s4760_s1 + $0x180] ss:$8 sps:$4 sm:$0xff]   ;;  %s4769_s15 = smov (!%p235_p4, %s3721_s15), 1  ;;  %v3301_v36 = vld [vmem:[%s4760_s1 + $0x394] ss:$8 sps:$4 sm:$0xff]   ;;  %vm509_vm0 = vcmask 1045504  }
  0x13   : > { %v3303_v37 = vld [vmem:[%s4760_s1 + $0x194] ss:$8 sps:$4 sm:$0xff]   ;;  %v3305_v38 = vld [vmem:[%s4760_s1 + $0x390] ss:$8 sps:$4 sm:$0xff]   ;;  %s3222_s5 = smul.u32 72, %s4769_s15  ;;  %s3186_s25 = sshll.u32 %s4769_s15, 4 }
  0x14   : > { %1021 = vmatpush1.bf16.msra.mxu1 %v3269_v14  ;;  %v3306_v39 = vld [vmem:[%s4760_s1 + $0x190] ss:$8 sps:$4 sm:$0xff]   ;;  %v3307_v40 = vld [vmem:[%s4760_s1 + $0x3a4] ss:$8 sps:$4 sm:$0xff]   ;;  %v3311_v42 = vld [vmem:[%s4760_s1 + $0x3a0] ss:$8 sps:$4 sm:$0xff]   ;;  %s249_s28 = scalar_lea.vmem %s4762_s3, %s3186_s25  ;;  %s260_s7 = scalar_lea.vmem %s4763_s4, %s3186_s25 }
  0x15   : > { %1703 = vmatpush1.bf16.msra.mxu0 %v3270_v15  ;;  %1022 = vmatprep.subr.bf16.mxu1 %v3271_v16  ;;  %v3309_v41 = vld [vmem:[%s4760_s1 + $0x1a4] ss:$8 sps:$4 sm:$0xff]   ;;  %v3312_v43 = vld [vmem:[%s4760_s1 + $0x1a0] ss:$8 sps:$4 sm:$0xff]   ;;  %s3916_s22 = scalar_lea.vmem %s4759_s0, %s3222_s5  ;;  %v3313_v44 = vld [vmem:[%s4760_s1 + $0x3b4] ss:$8 sps:$4 sm:$0xff]  }
  0x16   : > { %1704 = vmatprep.subr.bf16.mxu0 %v3273_v17  ;;  %v3315_v45 = vld [vmem:[%s4760_s1 + $0x1b4] ss:$8 sps:$4 sm:$0xff]   ;;  %v3317_v46 = vld [vmem:[%s4760_s1 + $0x3b0] ss:$8 sps:$4 sm:$0xff]   ;;  %v364_v48 = vld [vmem:[%s3916_s22] sm:$0xcc] }
  0x17   : > { %v3318_v47 = vld [vmem:[%s4760_s1 + $0x1b0] ss:$8 sps:$4 sm:$0xff]   ;;  %v3319_v51 = vld [vmem:[%s4760_s1 + $0x3c4] ss:$8 sps:$4 sm:$0xff]   ;;  %v3323_v60 = vld [vmem:[%s4760_s1 + $0x3c0] ss:$8 sps:$4 sm:$0xff]  }
  0x18   : > { %1023 = vmatpush1.bf16.msra.mxu1 %v3275_v18  ;;  %v3932_v49 = vld [vmem:[%s3916_s22 + $0x18] sm:$0xff]  ;;  %v370_v50 = vld [vmem:[%s3916_s22 + $0x30] sm:$0x33]  ;;  %v3321_v52 = vld [vmem:[%s4760_s1 + $0x1c4] ss:$8 sps:$4 sm:$0xff]  }
  0x19   : > { %1705 = vmatpush1.bf16.msra.mxu0 %v3276_v19  ;;  %1024 = vmatprep.subr.bf16.mxu1 %v3277_v20  ;;  %v2775_v53 = vcombine.high %v364_v48, %v3932_v49  ;;  %v2781_v54 = vcombine.high %v370_v50, %v370_v50  ;;  %v263_v55 = vld [vmem:[%s3916_s22 + $0x8] sm:$0xff]  ;;  %v3944_v56 = vld [vmem:[%s3916_s22 + $0x20] sm:$0xff]  ;;  %v3325_v63 = vld [vmem:[%s4760_s1 + $0x3d4] ss:$8 sps:$4 sm:$0xff]   ;;  %v2774_v7 = vcombine.low %v364_v48, %v3932_v49 }
  0x1a   : > { %1706 = vmatprep.subr.bf16.mxu0 %v3279_v21  ;;  %v2885_v59 = vcombine.high %v263_v55, %v3944_v56  ;;  %v3324_v61 = vld [vmem:[%s4760_s1 + $0x1c0] ss:$8 sps:$4 sm:$0xff]   ;;  %v3327_v0 = vld [vmem:[%s4760_s1 + $0x1d4] ss:$8 sps:$4 sm:$0xff]   ;;  %v3329_v1 = vld [vmem:[%s4760_s1 + $0x3d0] ss:$8 sps:$4 sm:$0xff]   ;;  %v2780_v8 = vcombine.low %v370_v50, %v370_v50  ;;  %v2884_v18 = vcombine.low %v263_v55, %v3944_v56 }
  0x1b   : > { %v513_v57 = vrot.slane %v2775_v53, 2  ;;  %v514_v58 = vrot.slane %v2781_v54, 2  ;;  %v3330_v2 = vld [vmem:[%s4760_s1 + $0x1d0] ss:$8 sps:$4 sm:$0xff]   ;;  %v3331_v3 = vld [vmem:[%s4760_s1 + $0x3e4] ss:$8 sps:$4 sm:$0xff]  }
  0x1c   : > { %1025 = vmatpush1.bf16.msra.mxu1 %v3281_v22  ;;  %1728 = vmatprep.mubr.bf16.mxu0 %v2885_v59  ;;  %v3333_v4 = vld [vmem:[%s4760_s1 + $0x1e4] ss:$8 sps:$4 sm:$0xff]   ;;  %v3335_v5 = vld [vmem:[%s4760_s1 + $0x3e0] ss:$8 sps:$4 sm:$0xff]   ;;  %v3337_v9 = vld [vmem:[%s4760_s1 + $0x3f4] ss:$8 sps:$4 sm:$0xff]  }
  0x1d   : > { %1707 = vmatpush1.bf16.msra.mxu0 %v3282_v23  ;;  %1026 = vmatprep.subr.bf16.mxu1 %v3283_v24  ;;  %v515_v62 = vsel %vm509_vm0, %v513_v57, %v514_v58  ;;  %v3336_v6 = vld [vmem:[%s4760_s1 + $0x1e0] ss:$8 sps:$4 sm:$0xff]   ;;  %v3339_v10 = vld [vmem:[%s4760_s1 + $0x1f4] ss:$8 sps:$4 sm:$0xff]   ;;  %v3341_v11 = vld [vmem:[%s4760_s1 + $0x3f0] ss:$8 sps:$4 sm:$0xff]  }
  0x1e   : > { %1708 = vmatprep.subr.bf16.mxu0 %v3285_v25  ;;  %1046 = vmatprep.mubr.bf16.mxu1 %v515_v62  ;;  %v3342_v12 = vld [vmem:[%s4760_s1 + $0x1f0] ss:$8 sps:$4 sm:$0xff]   ;;  %v510_v13 = vrot.slane %v2774_v7, 2  ;;  %v511_v14 = vrot.slane %v2780_v8, 2  ;;  %v3347_v15 = vld [vmem:[%s4760_s1 + $0x404] ss:$8 sps:$4 sm:$0xff]  }
  0x1f   : > { %v3352_v16 = vld [vmem:[%s4760_s1 + $0x204] ss:$8 sps:$4 sm:$0xff]   ;;  %v3345_v17 = vld [vmem:[%s4760_s1 + $0x400] ss:$8 sps:$4 sm:$0xff]   ;;  %v3357_v21 = vld [vmem:[%s4760_s1 + $0x414] ss:$8 sps:$4 sm:$0xff]  }
  0x20   : > { %1027 = vmatpush1.bf16.msra.mxu1 %v3287_v26  ;;  %v3350_v19 = vld [vmem:[%s4760_s1 + $0x200] ss:$8 sps:$4 sm:$0xff]   ;;  %v512_v20 = vsel %vm509_vm0, %v510_v13, %v511_v14  ;;  %v3360_v22 = vld [vmem:[%s4760_s1 + $0x214] ss:$8 sps:$4 sm:$0xff]   ;;  %v3355_v23 = vld [vmem:[%s4760_s1 + $0x410] ss:$8 sps:$4 sm:$0xff]  }
  0x21   : > { %1709 = vmatpush1.bf16.msra.mxu0 %v3288_v27  ;;  %1028 = vmatprep.subr.bf16.mxu1 %v3289_v28  ;;  %v3358_v24 = vld [vmem:[%s4760_s1 + $0x210] ss:$8 sps:$4 sm:$0xff]   ;;  %v3363_v25 = vld [vmem:[%s4760_s1 + $0x424] ss:$8 sps:$4 sm:$0xff]   ;;  %v3361_v27 = vld [vmem:[%s4760_s1 + $0x420] ss:$8 sps:$4 sm:$0xff]  }
  0x22   : > { %1710 = vmatprep.subr.bf16.mxu0 %v3291_v29  ;;  %v3366_v26 = vld [vmem:[%s4760_s1 + $0x224] ss:$8 sps:$4 sm:$0xff]   ;;  %v3364_v28 = vld [vmem:[%s4760_s1 + $0x220] ss:$8 sps:$4 sm:$0xff]   ;;  %v3369_v29 = vld [vmem:[%s4760_s1 + $0x434] ss:$8 sps:$4 sm:$0xff]  }
  0x23   : > { %v3396_v48 = vld [vmem:[%s4760_s1 + $0x274] ss:$8 sps:$4 sm:$0xff]   ;;  %v4097_v53 = vld [vmem:[%s3916_s22 + $0x28] sm:$0xff]  ;;  %v3391_v58 = vld [vmem:[%s4760_s1 + $0x470] ss:$8 sps:$4 sm:$0xff]  }
  0x24   : > { %1029 = vmatpush1.bf16.msra.mxu1 %v3293_v30  ;;  %v3372_v30 = vld [vmem:[%s4760_s1 + $0x234] ss:$8 sps:$4 sm:$0xff]   ;;  %v3394_v59 = vld [vmem:[%s4760_s1 + $0x270] ss:$8 sps:$4 sm:$0xff]   ;;  %v3402_v62 = vld [vmem:[%s4760_s1 + $0x284] ss:$8 sps:$4 sm:$0xff]  }
  0x25   : > { %1711 = vmatpush1.bf16.msra.mxu0 %v3294_v31  ;;  %1030 = vmatprep.subr.bf16.mxu1 %v3295_v32  ;;  %v3367_v31 = vld [vmem:[%s4760_s1 + $0x430] ss:$8 sps:$4 sm:$0xff]   ;;  %v3409_v7 = vld [vmem:[%s4760_s1 + $0x4a0] ss:$8 sps:$4 sm:$0xff]   ;;  %v3423_v13 = vld [vmem:[%s4760_s1 + $0x4c4] ss:$8 sps:$4 sm:$0xff]  }
  0x26   : > { %1712 = vmatprep.subr.bf16.mxu0 %v3297_v33  ;;  %v3370_v32 = vld [vmem:[%s4760_s1 + $0x230] ss:$8 sps:$4 sm:$0xff]   ;;  %v3375_v33 = vld [vmem:[%s4760_s1 + $0x444] ss:$8 sps:$4 sm:$0xff]   ;;  %v3412_v8 = vld [vmem:[%s4760_s1 + $0x2a0] ss:$8 sps:$4 sm:$0xff]  }
  0x27   : > { %v3426_v14 = vld [vmem:[%s4760_s1 + $0x2c4] ss:$8 sps:$4 sm:$0xff]  }
  0x28   : > { %1031 = vmatpush1.bf16.msra.mxu1 %v3299_v34  ;;  %v3378_v34 = vld [vmem:[%s4760_s1 + $0x244] ss:$8 sps:$4 sm:$0xff]  }
  0x29   : > { %1713 = vmatpush1.bf16.msra.mxu0 %v3300_v35  ;;  %1032 = vmatprep.subr.bf16.mxu1 %v3301_v36  ;;  %v3373_v35 = vld [vmem:[%s4760_s1 + $0x440] ss:$8 sps:$4 sm:$0xff]  }
  0x2a   : > { %1714 = vmatprep.subr.bf16.mxu0 %v3303_v37  ;;  %v3376_v36 = vld [vmem:[%s4760_s1 + $0x240] ss:$8 sps:$4 sm:$0xff]   ;;  %v3381_v37 = vld [vmem:[%s4760_s1 + $0x454] ss:$8 sps:$4 sm:$0xff]  }
  0x2c   : > { %1033 = vmatpush1.bf16.msra.mxu1 %v3305_v38  ;;  %v3384_v38 = vld [vmem:[%s4760_s1 + $0x254] ss:$8 sps:$4 sm:$0xff]  }
  0x2d   : > { %1715 = vmatpush1.bf16.msra.mxu0 %v3306_v39  ;;  %1034 = vmatprep.subr.bf16.mxu1 %v3307_v40  ;;  %v3379_v39 = vld [vmem:[%s4760_s1 + $0x450] ss:$8 sps:$4 sm:$0xff]  }
  0x2e   : > { %1716 = vmatprep.subr.bf16.mxu0 %v3309_v41  ;;  %v3382_v40 = vld [vmem:[%s4760_s1 + $0x250] ss:$8 sps:$4 sm:$0xff]   ;;  %v3387_v41 = vld [vmem:[%s4760_s1 + $0x464] ss:$8 sps:$4 sm:$0xff]  }
  0x30   : > { %1035 = vmatpush1.bf16.msra.mxu1 %v3311_v42  ;;  %v3390_v42 = vld [vmem:[%s4760_s1 + $0x264] ss:$8 sps:$4 sm:$0xff]  }
  0x31   : > { %1717 = vmatpush1.bf16.msra.mxu0 %v3312_v43  ;;  %1036 = vmatprep.subr.bf16.mxu1 %v3313_v44  ;;  %v3385_v43 = vld [vmem:[%s4760_s1 + $0x460] ss:$8 sps:$4 sm:$0xff]  }
  0x32   : > { %1718 = vmatprep.subr.bf16.mxu0 %v3315_v45  ;;  %v3388_v44 = vld [vmem:[%s4760_s1 + $0x260] ss:$8 sps:$4 sm:$0xff]  }
  0x33   : > { %v4078_v45 = vld [vmem:[%s3916_s22 + $0x8] sm:$0xcc] }
  0x34   : > { %1037 = vmatpush1.bf16.msra.mxu1 %v3317_v46  ;;  %v4081_v46 = vld [vmem:[%s3916_s22 + $0x38] sm:$0x33]  ;;  %v2777_v50 = vcombine.high %v4078_v45, %v3944_v56 }
  0x35   : > { %1719 = vmatpush1.bf16.msra.mxu0 %v3318_v47  ;;  %1038 = vmatprep.subr.bf16.mxu1 %v3319_v51  ;;  %v3393_v47 = vld [vmem:[%s4760_s1 + $0x474] ss:$8 sps:$4 sm:$0xff]   ;;  %v2783_v51 = vcombine.high %v4081_v46, %v4081_v46 }
  0x36   : > { %1720 = vmatprep.subr.bf16.mxu0 %v3321_v52  ;;  %v4094_v52 = vld [vmem:[%s3916_s22 + $0x10] sm:$0xff]  ;;  %v519_v54 = vrot.slane %v2777_v50, 2 }
  0x37   : > { %v520_v55 = vrot.slane %v2783_v51, 2  ;;  %v2887_v57 = vcombine.high %v4094_v52, %v4097_v53 }
  0x38   : > { %1039 = vmatpush1.bf16.msra.mxu1 %v3323_v60 }
  0x39   : > { %1721 = vmatpush1.bf16.msra.mxu0 %v3324_v61  ;;  %1040 = vmatprep.subr.bf16.mxu1 %v3325_v63  ;;  %v521_v60 = vsel %vm509_vm0, %v519_v54, %v520_v55  ;;  %v3399_v61 = vld [vmem:[%s4760_s1 + $0x484] ss:$8 sps:$4 sm:$0xff]   ;;  %v3397_v63 = vld [vmem:[%s4760_s1 + $0x480] ss:$8 sps:$4 sm:$0xff]  }
  0x3a   : > { %1722 = vmatprep.subr.bf16.mxu0 %v3327_v0  ;;  %v3400_v0 = vld [vmem:[%s4760_s1 + $0x280] ss:$8 sps:$4 sm:$0xff]  }
  0x3b   : > { %v3463_v54 = vld [vmem:[%s4760_s1 + $0x520] ss:$8 sps:$4 sm:$0xff]  }
  0x3c   : > { %1041 = vmatpush1.bf16.msra.mxu1 %v3329_v1  ;;  %v3405_v1 = vld [vmem:[%s4760_s1 + $0x494] ss:$8 sps:$4 sm:$0xff]   ;;  %v3466_v55 = vld [vmem:[%s4760_s1 + $0x620] ss:$8 sps:$4 sm:$0xff]  }
  0x3d   : > { %1723 = vmatpush1.bf16.msra.mxu0 %v3330_v2  ;;  %1042 = vmatprep.subr.bf16.mxu1 %v3331_v3  ;;  %v3408_v2 = vld [vmem:[%s4760_s1 + $0x294] ss:$8 sps:$4 sm:$0xff]   ;;  %v3403_v3 = vld [vmem:[%s4760_s1 + $0x490] ss:$8 sps:$4 sm:$0xff]  }
  0x3e   : > { %1724 = vmatprep.subr.bf16.mxu0 %v3333_v4  ;;  %v3406_v4 = vld [vmem:[%s4760_s1 + $0x290] ss:$8 sps:$4 sm:$0xff]  }
  0x40   : > { %1043 = vmatpush1.bf16.msra.mxu1 %v3335_v5  ;;  %v3411_v5 = vld [vmem:[%s4760_s1 + $0x4a4] ss:$8 sps:$4 sm:$0xff]  }
  0x41   : > { %1725 = vmatpush1.bf16.msra.mxu0 %v3336_v6  ;;  %1044 = vmatprep.subr.bf16.mxu1 %v3337_v9  ;;  %v3414_v6 = vld [vmem:[%s4760_s1 + $0x2a4] ss:$8 sps:$4 sm:$0xff]   ;;  %v3417_v9 = vld [vmem:[%s4760_s1 + $0x4b4] ss:$8 sps:$4 sm:$0xff]  }
  0x42   : > { %1726 = vmatprep.subr.bf16.mxu0 %v3339_v10  ;;  %v3420_v10 = vld [vmem:[%s4760_s1 + $0x2b4] ss:$8 sps:$4 sm:$0xff]  }
  0x44   : > { %1045 = vmatpush1.bf16.msra.mxu1 %v3341_v11  ;;  %v3415_v11 = vld [vmem:[%s4760_s1 + $0x4b0] ss:$8 sps:$4 sm:$0xff]  }
  0x45   : > { %1727 = vmatpush1.bf16.msra.mxu0 %v3342_v12  ;;  %1057 = vmatprep.subr.bf16.mxu1 %v3347_v15  ;;  %v3418_v12 = vld [vmem:[%s4760_s1 + $0x2b0] ss:$8 sps:$4 sm:$0xff]   ;;  %v3421_v15 = vld [vmem:[%s4760_s1 + $0x4c0] ss:$8 sps:$4 sm:$0xff]  }
  0x46   : > { %1739 = vmatprep.subr.bf16.mxu0 %v3352_v16  ;;  %v3424_v16 = vld [vmem:[%s4760_s1 + $0x2c0] ss:$8 sps:$4 sm:$0xff]  }
  0x47   : > { %1047 = vmatmul.mubr.bf16.vlgmr.msra.gmra.mrb[0].mxu1 %v512_v20  ;;  %v3430_v20 = vld [vmem:[%s4760_s1 + $0x2d0] ss:$8 sps:$4 sm:$0xff]  }
  0x48   : > { %1729 = vmatmul.mubr.bf16.vlgmr.msra.gmra.mrb[0].mxu0 %v2884_v18  ;;  %1058 = vmatpush1.bf16.msra.mxu1 %v3345_v17  ;;  %v3429_v17 = vld [vmem:[%s4760_s1 + $0x4d4] ss:$8 sps:$4 sm:$0xff]  }
  0x49   : > { %1740 = vmatpush1.bf16.msra.mxu0 %v3350_v19  ;;  %1059 = vmatprep.subr.bf16.mxu1 %v3357_v21  ;;  %v3432_v18 = vld [vmem:[%s4760_s1 + $0x2d4] ss:$8 sps:$4 sm:$0xff]   ;;  %v3427_v19 = vld [vmem:[%s4760_s1 + $0x4d0] ss:$8 sps:$4 sm:$0xff]   ;;  %v3435_v21 = vld [vmem:[%s4760_s1 + $0x4e4] ss:$8 sps:$4 sm:$0xff]  }
  0x4a   : > { %1741 = vmatprep.subr.bf16.mxu0 %v3360_v22  ;;  %1089 = vmatprep.mubr.bf16.mxu1 %v521_v60  ;;  %v3438_v22 = vld [vmem:[%s4760_s1 + $0x2e4] ss:$8 sps:$4 sm:$0xff]   ;;  %v3472_v60 = vld [vmem:[%s4760_s1 + $0x630] ss:$8 sps:$4 sm:$0xff]  }
  0x4b   : > { %1771 = vmatprep.mubr.bf16.mxu0 %v2887_v57 }
  0x4c   : > { %1060 = vmatpush1.bf16.msra.mxu1 %v3355_v23  ;;  %v3433_v23 = vld [vmem:[%s4760_s1 + $0x4e0] ss:$8 sps:$4 sm:$0xff]  }
  0x4d   : > { %1742 = vmatpush1.bf16.msra.mxu0 %v3358_v24  ;;  %1061 = vmatprep.subr.bf16.mxu1 %v3363_v25  ;;  %v3436_v24 = vld [vmem:[%s4760_s1 + $0x2e0] ss:$8 sps:$4 sm:$0xff]   ;;  %v2776_v25 = vcombine.low %v4078_v45, %v3944_v56  ;;  %v3442_v56 = vld [vmem:[%s4760_s1 + $0x2f0] ss:$8 sps:$4 sm:$0xff]   ;;  %v3468_v45 = vld [vmem:[%s4760_s1 + $0x624] ss:$8 sps:$4 sm:$0xff]  }
  0x4e   : > { %1743 = vmatprep.subr.bf16.mxu0 %v3366_v26  ;;  %v2782_v26 = vcombine.low %v4081_v46, %v4081_v46 }
  0x50   : > { %1062 = vmatpush1.bf16.msra.mxu1 %v3361_v27  ;;  %v3441_v27 = vld [vmem:[%s4760_s1 + $0x4f4] ss:$8 sps:$4 sm:$0xff]  }
  0x51   : > { %1744 = vmatpush1.bf16.msra.mxu0 %v3364_v28  ;;  %1063 = vmatprep.subr.bf16.mxu1 %v3369_v29  ;;  %v3444_v28 = vld [vmem:[%s4760_s1 + $0x2f4] ss:$8 sps:$4 sm:$0xff]   ;;  %v3439_v29 = vld [vmem:[%s4760_s1 + $0x4f0] ss:$8 sps:$4 sm:$0xff]  }
  0x52   : > { %1745 = vmatprep.subr.bf16.mxu0 %v3372_v30  ;;  %v516_v30 = vrot.slane %v2776_v25, 2  ;;  %v3519_v25 = vld [vmem:[%s4760_s1 + $0x5b4] ss:$8 sps:$4 sm:$0xff]  }
  0x54   : > { %1064 = vmatpush1.bf16.msra.mxu1 %v3367_v31  ;;  %v517_v31 = vrot.slane %v2782_v26, 2  ;;  %v3522_v26 = vld [vmem:[%s4760_s1 + $0x6b4] ss:$8 sps:$4 sm:$0xff]  }
  0x55   : > { %1746 = vmatpush1.bf16.msra.mxu0 %v3370_v32  ;;  %1065 = vmatprep.subr.bf16.mxu1 %v3375_v33  ;;  %v3449_v32 = vld [vmem:[%s4760_s1 + $0x504] ss:$8 sps:$4 sm:$0xff]  }
  0x56   : > { %1747 = vmatprep.subr.bf16.mxu0 %v3378_v34  ;;  %v3454_v33 = vld [vmem:[%s4760_s1 + $0x604] ss:$8 sps:$4 sm:$0xff]   ;;  %v3447_v34 = vld [vmem:[%s4760_s1 + $0x500] ss:$8 sps:$4 sm:$0xff]  }
  0x58   : > { %1066 = vmatpush1.bf16.msra.mxu1 %v3373_v35  ;;  %v2886_v35 = vcombine.low %v4094_v52, %v4097_v53 }
  0x59   : > { %1748 = vmatpush1.bf16.msra.mxu0 %v3376_v36  ;;  %1067 = vmatprep.subr.bf16.mxu1 %v3381_v37  ;;  %v3452_v36 = vld [vmem:[%s4760_s1 + $0x600] ss:$8 sps:$4 sm:$0xff]   ;;  %v518_v37 = vsel %vm509_vm0, %v516_v30, %v517_v31 }
  0x5a   : > { %1749 = vmatprep.subr.bf16.mxu0 %v3384_v38  ;;  %v3459_v38 = vld [vmem:[%s4760_s1 + $0x514] ss:$8 sps:$4 sm:$0xff]   ;;  %v3523_v30 = vld [vmem:[%s4760_s1 + $0x5c0] ss:$8 sps:$4 sm:$0xff]  }
  0x5b   : > { %v3526_v31 = vld [vmem:[%s4760_s1 + $0x6c0] ss:$8 sps:$4 sm:$0xff]  }
  0x5c   : > { %1068 = vmatpush1.bf16.msra.mxu1 %v3379_v39  ;;  %v3462_v39 = vld [vmem:[%s4760_s1 + $0x614] ss:$8 sps:$4 sm:$0xff]  }
  0x5d   : > { %1750 = vmatpush1.bf16.msra.mxu0 %v3382_v40  ;;  %1069 = vmatprep.subr.bf16.mxu1 %v3387_v41  ;;  %v3457_v40 = vld [vmem:[%s4760_s1 + $0x510] ss:$8 sps:$4 sm:$0xff]  }
  0x5e   : > { %1751 = vmatprep.subr.bf16.mxu0 %v3390_v42  ;;  %v3460_v41 = vld [vmem:[%s4760_s1 + $0x610] ss:$8 sps:$4 sm:$0xff]  }
  0x5f   : > { %v4236_v42 = vld [vmem:[%s3916_s22 + $0x10] sm:$0xcc] }
  0x60   : > { %1070 = vmatpush1.bf16.msra.mxu1 %v3385_v43  ;;  %v4239_v43 = vld [vmem:[%s3916_s22 + $0x40] sm:$0x33]  ;;  %v2779_v46 = vcombine.high %v4236_v42, %v4097_v53 }
  0x61   : > { %1752 = vmatpush1.bf16.msra.mxu0 %v3388_v44  ;;  %1071 = vmatprep.subr.bf16.mxu1 %v3393_v47  ;;  %v3465_v44 = vld [vmem:[%s4760_s1 + $0x524] ss:$8 sps:$4 sm:$0xff]   ;;  %v2785_v47 = vcombine.high %v4239_v43, %v4239_v43 }
  0x62   : > { %1753 = vmatprep.subr.bf16.mxu0 %v3396_v48  ;;  %v4252_v48 = vld [vmem:[%s3916_s22 + $0x30] sm:$0xff]  ;;  %v525_v50 = vrot.slane %v2779_v46, 2 }
  0x63   : > { %v526_v51 = vrot.slane %v2785_v47, 2  ;;  %v3081_v52 = vcombine.high %v3932_v49, %v4252_v48  ;;  %v3474_v49 = vld [vmem:[%s4760_s1 + $0x634] ss:$8 sps:$4 sm:$0xff]   ;;  %v3541_v46 = vld [vmem:[%s4760_s1 + $0x5f0] ss:$8 sps:$4 sm:$0xff]  }
  0x64   : > { %1072 = vmatpush1.bf16.msra.mxu1 %v3391_v58  ;;  %v3471_v58 = vld [vmem:[%s4760_s1 + $0x534] ss:$8 sps:$4 sm:$0xff]   ;;  %v3551_v47 = vld [vmem:[%s4760_s1 + $0x4] ss:$8 sps:$4 sm:$0xff]  }
  0x65   : > { %1754 = vmatpush1.bf16.msra.mxu0 %v3394_v59  ;;  %1073 = vmatprep.subr.bf16.mxu1 %v3399_v61  ;;  %v527_v57 = vsel %vm509_vm0, %v525_v50, %v526_v51  ;;  %v3469_v59 = vld [vmem:[%s4760_s1 + $0x530] ss:$8 sps:$4 sm:$0xff]   ;;  %v3477_v61 = vld [vmem:[%s4760_s1 + $0x544] ss:$8 sps:$4 sm:$0xff]  }
  0x66   : > { %1755 = vmatprep.subr.bf16.mxu0 %v3402_v62  ;;  %v3480_v62 = vld [vmem:[%s4760_s1 + $0x644] ss:$8 sps:$4 sm:$0xff]   ;;  %v3704_v51 = vld [vmem:[%s3916_s22 + $0x18] sm:$0xff] }
  0x67   : > { %v3556_v50 = vld [vmem:[%s4760_s1 + $0x704] ss:$8 sps:$4 sm:$0xff]  }
  0x68   : > { %1074 = vmatpush1.bf16.msra.mxu1 %v3397_v63  ;;  %v3475_v63 = vld [vmem:[%s4760_s1 + $0x540] ss:$8 sps:$4 sm:$0xff]  }
  0x69   : > { %1756 = vmatpush1.bf16.msra.mxu0 %v3400_v0  ;;  %1075 = vmatprep.subr.bf16.mxu1 %v3405_v1  ;;  %v3478_v0 = vld [vmem:[%s4760_s1 + $0x640] ss:$8 sps:$4 sm:$0xff]   ;;  %v3483_v1 = vld [vmem:[%s4760_s1 + $0x554] ss:$8 sps:$4 sm:$0xff]  }
  0x6a   : > { %1757 = vmatprep.subr.bf16.mxu0 %v3408_v2  ;;  %v3486_v2 = vld [vmem:[%s4760_s1 + $0x654] ss:$8 sps:$4 sm:$0xff]  }
  0x6c   : > { %1076 = vmatpush1.bf16.msra.mxu1 %v3403_v3  ;;  %v3481_v3 = vld [vmem:[%s4760_s1 + $0x550] ss:$8 sps:$4 sm:$0xff]  }
  0x6d   : > { %1758 = vmatpush1.bf16.msra.mxu0 %v3406_v4  ;;  %1077 = vmatprep.subr.bf16.mxu1 %v3411_v5  ;;  %v3484_v4 = vld [vmem:[%s4760_s1 + $0x650] ss:$8 sps:$4 sm:$0xff]   ;;  %v3489_v5 = vld [vmem:[%s4760_s1 + $0x564] ss:$8 sps:$4 sm:$0xff]  }
  0x6e   : > { %1759 = vmatprep.subr.bf16.mxu0 %v3414_v6  ;;  %v3492_v6 = vld [vmem:[%s4760_s1 + $0x664] ss:$8 sps:$4 sm:$0xff]  }
  0x70   : > { %1078 = vmatpush1.bf16.msra.mxu1 %v3409_v7  ;;  %v3487_v7 = vld [vmem:[%s4760_s1 + $0x560] ss:$8 sps:$4 sm:$0xff]  }
  0x71   : > { %1760 = vmatpush1.bf16.msra.mxu0 %v3412_v8  ;;  %1079 = vmatprep.subr.bf16.mxu1 %v3417_v9  ;;  %v3490_v8 = vld [vmem:[%s4760_s1 + $0x660] ss:$8 sps:$4 sm:$0xff]   ;;  %v3495_v9 = vld [vmem:[%s4760_s1 + $0x574] ss:$8 sps:$4 sm:$0xff]  }
  0x72   : > { %1761 = vmatprep.subr.bf16.mxu0 %v3420_v10  ;;  %v3498_v10 = vld [vmem:[%s4760_s1 + $0x674] ss:$8 sps:$4 sm:$0xff]  }
  0x74   : > { %1080 = vmatpush1.bf16.msra.mxu1 %v3415_v11  ;;  %v3493_v11 = vld [vmem:[%s4760_s1 + $0x570] ss:$8 sps:$4 sm:$0xff]  }
  0x75   : > { %1762 = vmatpush1.bf16.msra.mxu0 %v3418_v12  ;;  %1081 = vmatprep.subr.bf16.mxu1 %v3423_v13  ;;  %v3496_v12 = vld [vmem:[%s4760_s1 + $0x670] ss:$8 sps:$4 sm:$0xff]   ;;  %v3501_v13 = vld [vmem:[%s4760_s1 + $0x584] ss:$8 sps:$4 sm:$0xff]  }
  0x76   : > { %1763 = vmatprep.subr.bf16.mxu0 %v3426_v14  ;;  %v3504_v14 = vld [vmem:[%s4760_s1 + $0x684] ss:$8 sps:$4 sm:$0xff]  }
  0x78   : > { %1082 = vmatpush1.bf16.msra.mxu1 %v3421_v15  ;;  %v3499_v15 = vld [vmem:[%s4760_s1 + $0x580] ss:$8 sps:$4 sm:$0xff]  }
  0x79   : > { %1764 = vmatpush1.bf16.msra.mxu0 %v3424_v16  ;;  %1083 = vmatprep.subr.bf16.mxu1 %v3429_v17  ;;  %v3502_v16 = vld [vmem:[%s4760_s1 + $0x680] ss:$8 sps:$4 sm:$0xff]   ;;  %v3507_v17 = vld [vmem:[%s4760_s1 + $0x594] ss:$8 sps:$4 sm:$0xff]  }
  0x7a   : > { %1765 = vmatprep.subr.bf16.mxu0 %v3432_v18  ;;  %v3510_v18 = vld [vmem:[%s4760_s1 + $0x694] ss:$8 sps:$4 sm:$0xff]  }
  0x7c   : > { %1084 = vmatpush1.bf16.msra.mxu1 %v3427_v19  ;;  %v3505_v19 = vld [vmem:[%s4760_s1 + $0x590] ss:$8 sps:$4 sm:$0xff]  }
  0x7d   : > { %1766 = vmatpush1.bf16.msra.mxu0 %v3430_v20  ;;  %1085 = vmatprep.subr.bf16.mxu1 %v3435_v21  ;;  %v3508_v20 = vld [vmem:[%s4760_s1 + $0x690] ss:$8 sps:$4 sm:$0xff]   ;;  %v3513_v21 = vld [vmem:[%s4760_s1 + $0x5a4] ss:$8 sps:$4 sm:$0xff]  }
  0x7e   : > { %1767 = vmatprep.subr.bf16.mxu0 %v3438_v22  ;;  %v3516_v22 = vld [vmem:[%s4760_s1 + $0x6a4] ss:$8 sps:$4 sm:$0xff]  }
  0x80   : > { %1086 = vmatpush1.bf16.msra.mxu1 %v3433_v23  ;;  %v3511_v23 = vld [vmem:[%s4760_s1 + $0x5a0] ss:$8 sps:$4 sm:$0xff]  }
  0x81   : > { %1768 = vmatpush1.bf16.msra.mxu0 %v3436_v24  ;;  %1087 = vmatprep.subr.bf16.mxu1 %v3441_v27  ;;  %v3514_v24 = vld [vmem:[%s4760_s1 + $0x6a0] ss:$8 sps:$4 sm:$0xff]   ;;  %v3517_v27 = vld [vmem:[%s4760_s1 + $0x5b0] ss:$8 sps:$4 sm:$0xff]  }
  0x82   : > { %1769 = vmatprep.subr.bf16.mxu0 %v3444_v28  ;;  %v3520_v28 = vld [vmem:[%s4760_s1 + $0x6b0] ss:$8 sps:$4 sm:$0xff]  }
  0x84   : > { %1088 = vmatpush1.bf16.msra.mxu1 %v3439_v29  ;;  %v3525_v29 = vld [vmem:[%s4760_s1 + $0x5c4] ss:$8 sps:$4 sm:$0xff]  }
  0x85   : > { %1770 = vmatpush1.bf16.msra.mxu0 %v3442_v56  ;;  %1100 = vmatprep.subr.bf16.mxu1 %v3449_v32  ;;  %v3528_v56 = vld [vmem:[%s4760_s1 + $0x6c4] ss:$8 sps:$4 sm:$0xff]   ;;  %v3531_v32 = vld [vmem:[%s4760_s1 + $0x5d4] ss:$8 sps:$4 sm:$0xff]  }
  0x86   : > { %2383 = vmatprep.subr.bf16.mxu0 %v3454_v33  ;;  %v3534_v33 = vld [vmem:[%s4760_s1 + $0x6d4] ss:$8 sps:$4 sm:$0xff]  }
  0x87   : > { %1090 = vmatmul.mubr.bf16.vlgmr.msra.gmra.mrb[0].mxu1 %v518_v37  ;;  %v3540_v37 = vld [vmem:[%s4760_s1 + $0x6e4] ss:$8 sps:$4 sm:$0xff]  }
  0x88   : > { %1772 = vmatmul.mubr.bf16.vlgmr.msra.gmra.mrb[0].mxu0 %v2886_v35  ;;  %1101 = vmatpush1.bf16.msra.mxu1 %v3447_v34  ;;  %v3529_v34 = vld [vmem:[%s4760_s1 + $0x5d0] ss:$8 sps:$4 sm:$0xff]  }
  0x89   : > { %2384 = vmatpush1.bf16.msra.mxu0 %v3452_v36  ;;  %1102 = vmatprep.subr.bf16.mxu1 %v3459_v38  ;;  %v3532_v35 = vld [vmem:[%s4760_s1 + $0x6d0] ss:$8 sps:$4 sm:$0xff]   ;;  %v3537_v36 = vld [vmem:[%s4760_s1 + $0x5e4] ss:$8 sps:$4 sm:$0xff]   ;;  %v3535_v38 = vld [vmem:[%s4760_s1 + $0x5e0] ss:$8 sps:$4 sm:$0xff]  }
  0x8a   : > { %2385 = vmatprep.subr.bf16.mxu0 %v3462_v39  ;;  %1132 = vmatprep.mubr.bf16.mxu1 %v527_v57  ;;  %v3538_v39 = vld [vmem:[%s4760_s1 + $0x6e0] ss:$8 sps:$4 sm:$0xff]  }
  0x8b   : > { %2415 = vmatprep.mubr.bf16.mxu0 %v3081_v52  ;;  %v3080_v52 = vcombine.low %v3704_v51, %v4252_v48  ;;  %v3554_v57 = vld [vmem:[%s4760_s1 + $0x700] ss:$8 sps:$4 sm:$0xff]   ;;  %v3561_v48 = vld [vmem:[%s4760_s1 + $0x14] ss:$8 sps:$4 sm:$0xff]  }
  0x8c   : > { %1103 = vmatpush1.bf16.msra.mxu1 %v3457_v40  ;;  %v2778_v40 = vcombine.low %v4236_v42, %v4097_v53  ;;  %v3544_v53 = vld [vmem:[%s4760_s1 + $0x6f0] ss:$8 sps:$4 sm:$0xff]   ;;  %v3640_v51 = vld [vmem:[%s4760_s1 + $0x7e0] ss:$8 sps:$4 sm:$0xff]  }
  0x8d   : > { %2386 = vmatpush1.bf16.msra.mxu0 %v3460_v41  ;;  %1104 = vmatprep.subr.bf16.mxu1 %v3465_v44  ;;  %v2784_v41 = vcombine.low %v4239_v43, %v4239_v43  ;;  %v3543_v44 = vld [vmem:[%s4760_s1 + $0x5f4] ss:$8 sps:$4 sm:$0xff]  }
  0x8e   : > { %2387 = vmatprep.subr.bf16.mxu0 %v3468_v45  ;;  %v3546_v45 = vld [vmem:[%s4760_s1 + $0x6f4] ss:$8 sps:$4 sm:$0xff]   ;;  %v522_v42 = vrot.slane %v2778_v40, 2  ;;  %v3630_v40 = vld [vmem:[%s4760_s1 + $0x7c4] ss:$8 sps:$4 sm:$0xff]  }
  0x8f   : > { %v523_v43 = vrot.slane %v2784_v41, 2  ;;  %v3625_v41 = vld [vmem:[%s4760_s1 + $0xc0] ss:$8 sps:$4 sm:$0xff]  }
  0x90   : > { %1105 = vmatpush1.bf16.msra.mxu1 %v3463_v54  ;;  %v4432_v54 = vld [vmem:[%s3916_s22 + $0x38] sm:$0xff] }
  0x91   : > { %2388 = vmatpush1.bf16.msra.mxu0 %v3466_v55  ;;  %1106 = vmatprep.subr.bf16.mxu1 %v3471_v58  ;;  %v3549_v55 = vld [vmem:[%s4760_s1] ss:$8 sps:$4 sm:$0xff]   ;;  %v524_v58 = vsel %vm509_vm0, %v522_v42, %v523_v43  ;;  %v3634_v42 = vld [vmem:[%s4760_s1 + $0x7d0] ss:$8 sps:$4 sm:$0xff]   ;;  %v3639_v43 = vld [vmem:[%s4760_s1 + $0xe4] ss:$8 sps:$4 sm:$0xff]  }
  0x92   : > { %2389 = vmatprep.subr.bf16.mxu0 %v3474_v49  ;;  %v3564_v49 = vld [vmem:[%s4760_s1 + $0x714] ss:$8 sps:$4 sm:$0xff]  }
  0x94   : > { %1107 = vmatpush1.bf16.msra.mxu1 %v3469_v59  ;;  %v3651_v59 = vld [vmem:[%s3916_s22 + $0x4] ss:$24 sps:$4 sm:$0xff]  }
  0x95   : > { %2390 = vmatpush1.bf16.msra.mxu0 %v3472_v60  ;;  %1108 = vmatprep.subr.bf16.mxu1 %v3477_v61  ;;  %v4449_v60 = vld [vmem:[%s3916_s22 + $0x20] sm:$0xff] }
  0x96   : > { %2391 = vmatprep.subr.bf16.mxu0 %v3480_v62  ;;  %v3083_v61 = vcombine.high %v4449_v60, %v4432_v54  ;;  %v3559_v62 = vld [vmem:[%s4760_s1 + $0x10] ss:$8 sps:$4 sm:$0xff]  }
  0x98   : > { %1109 = vmatpush1.bf16.msra.mxu1 %v3475_v63  ;;  %v3562_v63 = vld [vmem:[%s4760_s1 + $0x710] ss:$8 sps:$4 sm:$0xff]  }
  0x99   : > { %2392 = vmatpush1.bf16.msra.mxu0 %v3478_v0  ;;  %1110 = vmatprep.subr.bf16.mxu1 %v3483_v1  ;;  %v3567_v0 = vld [vmem:[%s4760_s1 + $0x24] ss:$8 sps:$4 sm:$0xff]  }
  0x9a   : > { %2393 = vmatprep.subr.bf16.mxu0 %v3486_v2  ;;  %v3570_v1 = vld [vmem:[%s4760_s1 + $0x724] ss:$8 sps:$4 sm:$0xff]   ;;  %v3565_v2 = vld [vmem:[%s4760_s1 + $0x20] ss:$8 sps:$4 sm:$0xff]  }
  0x9c   : > { %1111 = vmatpush1.bf16.msra.mxu1 %v3481_v3  ;;  %v3568_v3 = vld [vmem:[%s4760_s1 + $0x720] ss:$8 sps:$4 sm:$0xff]  }
  0x9d   : > { %2394 = vmatpush1.bf16.msra.mxu0 %v3484_v4  ;;  %1112 = vmatprep.subr.bf16.mxu1 %v3489_v5  ;;  %v3573_v4 = vld [vmem:[%s4760_s1 + $0x34] ss:$8 sps:$4 sm:$0xff]  }
  0x9e   : > { %2395 = vmatprep.subr.bf16.mxu0 %v3492_v6  ;;  %v3576_v5 = vld [vmem:[%s4760_s1 + $0x734] ss:$8 sps:$4 sm:$0xff]   ;;  %v3571_v6 = vld [vmem:[%s4760_s1 + $0x30] ss:$8 sps:$4 sm:$0xff]  }
  0xa0   : > { %1113 = vmatpush1.bf16.msra.mxu1 %v3487_v7  ;;  %v3574_v7 = vld [vmem:[%s4760_s1 + $0x730] ss:$8 sps:$4 sm:$0xff]  }
  0xa1   : > { %2396 = vmatpush1.bf16.msra.mxu0 %v3490_v8  ;;  %1114 = vmatprep.subr.bf16.mxu1 %v3495_v9  ;;  %v3579_v8 = vld [vmem:[%s4760_s1 + $0x44] ss:$8 sps:$4 sm:$0xff]  }
  0xa2   : > { %2397 = vmatprep.subr.bf16.mxu0 %v3498_v10  ;;  %v3582_v9 = vld [vmem:[%s4760_s1 + $0x744] ss:$8 sps:$4 sm:$0xff]   ;;  %v3577_v10 = vld [vmem:[%s4760_s1 + $0x40] ss:$8 sps:$4 sm:$0xff]  }
  0xa4   : > { %1115 = vmatpush1.bf16.msra.mxu1 %v3493_v11  ;;  %v3580_v11 = vld [vmem:[%s4760_s1 + $0x740] ss:$8 sps:$4 sm:$0xff]  }
  0xa5   : > { %2398 = vmatpush1.bf16.msra.mxu0 %v3496_v12  ;;  %1116 = vmatprep.subr.bf16.mxu1 %v3501_v13  ;;  %v3585_v12 = vld [vmem:[%s4760_s1 + $0x54] ss:$8 sps:$4 sm:$0xff]  }
  0xa6   : > { %2399 = vmatprep.subr.bf16.mxu0 %v3504_v14  ;;  %v3588_v13 = vld [vmem:[%s4760_s1 + $0x754] ss:$8 sps:$4 sm:$0xff]   ;;  %v3583_v14 = vld [vmem:[%s4760_s1 + $0x50] ss:$8 sps:$4 sm:$0xff]  }
  0xa8   : > { %1117 = vmatpush1.bf16.msra.mxu1 %v3499_v15  ;;  %v3586_v15 = vld [vmem:[%s4760_s1 + $0x750] ss:$8 sps:$4 sm:$0xff]  }
  0xa9   : > { %2400 = vmatpush1.bf16.msra.mxu0 %v3502_v16  ;;  %1118 = vmatprep.subr.bf16.mxu1 %v3507_v17  ;;  %v3591_v16 = vld [vmem:[%s4760_s1 + $0x64] ss:$8 sps:$4 sm:$0xff]  }
  0xaa   : > { %2401 = vmatprep.subr.bf16.mxu0 %v3510_v18  ;;  %v3594_v17 = vld [vmem:[%s4760_s1 + $0x764] ss:$8 sps:$4 sm:$0xff]   ;;  %v3589_v18 = vld [vmem:[%s4760_s1 + $0x60] ss:$8 sps:$4 sm:$0xff]  }
  0xac   : > { %1119 = vmatpush1.bf16.msra.mxu1 %v3505_v19  ;;  %v3592_v19 = vld [vmem:[%s4760_s1 + $0x760] ss:$8 sps:$4 sm:$0xff]  }
  0xad   : > { %2402 = vmatpush1.bf16.msra.mxu0 %v3508_v20  ;;  %1120 = vmatprep.subr.bf16.mxu1 %v3513_v21  ;;  %v3597_v20 = vld [vmem:[%s4760_s1 + $0x74] ss:$8 sps:$4 sm:$0xff]  }
  0xae   : > { %2403 = vmatprep.subr.bf16.mxu0 %v3516_v22  ;;  %v3600_v21 = vld [vmem:[%s4760_s1 + $0x774] ss:$8 sps:$4 sm:$0xff]   ;;  %v3595_v22 = vld [vmem:[%s4760_s1 + $0x70] ss:$8 sps:$4 sm:$0xff]  }
  0xb0   : > { %1121 = vmatpush1.bf16.msra.mxu1 %v3511_v23  ;;  %v3598_v23 = vld [vmem:[%s4760_s1 + $0x770] ss:$8 sps:$4 sm:$0xff]  }
  0xb1   : > { %2404 = vmatpush1.bf16.msra.mxu0 %v3514_v24  ;;  %1122 = vmatprep.subr.bf16.mxu1 %v3519_v25  ;;  %v3603_v24 = vld [vmem:[%s4760_s1 + $0x84] ss:$8 sps:$4 sm:$0xff]  }
  0xb2   : > { %2405 = vmatprep.subr.bf16.mxu0 %v3522_v26  ;;  %v3606_v25 = vld [vmem:[%s4760_s1 + $0x784] ss:$8 sps:$4 sm:$0xff]   ;;  %v3601_v26 = vld [vmem:[%s4760_s1 + $0x80] ss:$8 sps:$4 sm:$0xff]  }
  0xb4   : > { %1123 = vmatpush1.bf16.msra.mxu1 %v3517_v27  ;;  %v3604_v27 = vld [vmem:[%s4760_s1 + $0x780] ss:$8 sps:$4 sm:$0xff]  }
  0xb5   : > { %2406 = vmatpush1.bf16.msra.mxu0 %v3520_v28  ;;  %1124 = vmatprep.subr.bf16.mxu1 %v3525_v29  ;;  %v3609_v28 = vld [vmem:[%s4760_s1 + $0x94] ss:$8 sps:$4 sm:$0xff]  }
  0xb6   : > { %2407 = vmatprep.subr.bf16.mxu0 %v3528_v56  ;;  %v3612_v29 = vld [vmem:[%s4760_s1 + $0x794] ss:$8 sps:$4 sm:$0xff]   ;;  %v3607_v56 = vld [vmem:[%s4760_s1 + $0x90] ss:$8 sps:$4 sm:$0xff]  }
  0xb8   : > { %1125 = vmatpush1.bf16.msra.mxu1 %v3523_v30  ;;  %v3610_v30 = vld [vmem:[%s4760_s1 + $0x790] ss:$8 sps:$4 sm:$0xff]  }
  0xb9   : > { %2408 = vmatpush1.bf16.msra.mxu0 %v3526_v31  ;;  %1126 = vmatprep.subr.bf16.mxu1 %v3531_v32  ;;  %v3615_v31 = vld [vmem:[%s4760_s1 + $0xa4] ss:$8 sps:$4 sm:$0xff]  }
  0xba   : > { %2409 = vmatprep.subr.bf16.mxu0 %v3534_v33  ;;  %v3618_v32 = vld [vmem:[%s4760_s1 + $0x7a4] ss:$8 sps:$4 sm:$0xff]   ;;  %v3613_v33 = vld [vmem:[%s4760_s1 + $0xa0] ss:$8 sps:$4 sm:$0xff]  }
  0xbc   : > { %1127 = vmatpush1.bf16.msra.mxu1 %v3529_v34  ;;  %v3616_v34 = vld [vmem:[%s4760_s1 + $0x7a0] ss:$8 sps:$4 sm:$0xff]  }
  0xbd   : > { %2410 = vmatpush1.bf16.msra.mxu0 %v3532_v35  ;;  %1128 = vmatprep.subr.bf16.mxu1 %v3537_v36  ;;  %v3621_v35 = vld [vmem:[%s4760_s1 + $0xb4] ss:$8 sps:$4 sm:$0xff]  }
  0xbe   : > { %2411 = vmatprep.subr.bf16.mxu0 %v3540_v37  ;;  %v3624_v36 = vld [vmem:[%s4760_s1 + $0x7b4] ss:$8 sps:$4 sm:$0xff]   ;;  %v3619_v37 = vld [vmem:[%s4760_s1 + $0xb0] ss:$8 sps:$4 sm:$0xff]  }
  0xc0   : > { %1129 = vmatpush1.bf16.msra.mxu1 %v3535_v38  ;;  %v3622_v38 = vld [vmem:[%s4760_s1 + $0x7b0] ss:$8 sps:$4 sm:$0xff]  }
  0xc1   : > { %2412 = vmatpush1.bf16.msra.mxu0 %v3538_v39  ;;  %1130 = vmatprep.subr.bf16.mxu1 %v3543_v44  ;;  %v3627_v39 = vld [vmem:[%s4760_s1 + $0xc4] ss:$8 sps:$4 sm:$0xff]   ;;  %v3628_v44 = vld [vmem:[%s4760_s1 + $0x7c0] ss:$8 sps:$4 sm:$0xff]  }
  0xc2   : > { %2413 = vmatprep.subr.bf16.mxu0 %v3546_v45  ;;  %v3633_v45 = vld [vmem:[%s4760_s1 + $0xd4] ss:$8 sps:$4 sm:$0xff]  }
  0xc4   : > { %1131 = vmatpush1.bf16.msra.mxu1 %v3541_v46  ;;  %v3636_v46 = vld [vmem:[%s4760_s1 + $0x7d4] ss:$8 sps:$4 sm:$0xff]  }
  0xc5   : > { %2414 = vmatpush1.bf16.msra.mxu0 %v3544_v53  ;;  %1653 = vmatprep.subr.bf16.mxu1 %v3551_v47  ;;  %v3631_v53 = vld [vmem:[%s4760_s1 + $0xd0] ss:$8 sps:$4 sm:$0xff]   ;;  %v3642_v47 = vld [vmem:[%s4760_s1 + $0x7e4] ss:$8 sps:$4 sm:$0xff]  }
  0xc6   : > { %2426 = vmatprep.subr.bf16.mxu0 %v3556_v50  ;;  %v3637_v50 = vld [vmem:[%s4760_s1 + $0xe0] ss:$8 sps:$4 sm:$0xff]  }
  0xc7   : > { %1133 = vmatmul.mubr.bf16.vlgmr.msra.gmra.mrb[0].mxu1 %v524_v58  ;;  %v3646_v58 = vld [vmem:[%s4760_s1 + $0x7f0] ss:$8 sps:$4 sm:$0xff]  }
  0xc8   : > { %2416 = vmatmul.mubr.bf16.vlgmr.msra.gmra.mrb[0].mxu0 %v3080_v52  ;;  %1654 = vmatpush1.bf16.msra.mxu1 %v3549_v55  ;;  %v3645_v52 = vld [vmem:[%s4760_s1 + $0xf4] ss:$8 sps:$4 sm:$0xff]  }
  0xc9   : > { %2427 = vmatpush1.bf16.msra.mxu0 %v3554_v57  ;;  %1655 = vmatprep.subr.bf16.mxu1 %v3561_v48  ;;  %v3648_v55 = vld [vmem:[%s4760_s1 + $0x7f4] ss:$8 sps:$4 sm:$0xff]   ;;  %v3643_v57 = vld [vmem:[%s4760_s1 + $0xf0] ss:$8 sps:$4 sm:$0xff]   ;;  %v3656_v48 = vld [vmem:[%s4760_s1 + $0x804] ss:$8 sps:$4 sm:$0xff]  }
  0xca   : > { %2428 = vmatprep.subr.bf16.mxu0 %v3564_v49  ;;  %1685 = vmatprep.mubr.bf16.mxu1 %v3651_v59  ;;  %v4631_v49 = vld [vmem:[%s3916_s22 + $0x40] sm:$0xff] }
  0xcb   : > { %2458 = vmatprep.mubr.bf16.mxu0 %v3083_v61  ;;  %v3649_v59 = vld [vmem:[%s3916_s22] ss:$24 sps:$4 sm:$0xff]   ;;  %v3082_v61 = vcombine.low %v4449_v60, %v4432_v54  ;;  %v3662_v60 = vld [vmem:[%s4760_s1 + $0x824] ss:$8 sps:$4 sm:$0xff]  }
  0xcc   : > { %1656 = vmatpush1.bf16.msra.mxu1 %v3559_v62  ;;  %v3654_v62 = vld [vmem:[%s4760_s1 + $0x800] ss:$8 sps:$4 sm:$0xff]   ;;  %v3657_v54 = vld [vmem:[%s4760_s1 + $0x810] ss:$8 sps:$4 sm:$0xff]  }
  0xcd   : > { %2429 = vmatpush1.bf16.msra.mxu0 %v3562_v63  ;;  %1657 = vmatprep.subr.bf16.mxu1 %v3567_v0  ;;  %v4640_v63 = vld [vmem:[%s3916_s22 + $0x28] sm:$0xff] }
  0xce   : > { %2430 = vmatprep.subr.bf16.mxu0 %v3570_v1  ;;  %v3085_v0 = vcombine.high %v4640_v63, %v4631_v49  ;;  %v3659_v1 = vld [vmem:[%s4760_s1 + $0x814] ss:$8 sps:$4 sm:$0xff]  }
  0xd0   : > { %1658 = vmatpush1.bf16.msra.mxu1 %v3565_v2  ;;  %v3660_v2 = vld [vmem:[%s4760_s1 + $0x820] ss:$8 sps:$4 sm:$0xff]  }
  0xd1   : > { %2431 = vmatpush1.bf16.msra.mxu0 %v3568_v3  ;;  %1659 = vmatprep.subr.bf16.mxu1 %v3573_v4  ;;  %v3665_v3 = vld [vmem:[%s4760_s1 + $0x834] ss:$8 sps:$4 sm:$0xff]   ;;  %v3663_v4 = vld [vmem:[%s4760_s1 + $0x830] ss:$8 sps:$4 sm:$0xff]  }
  0xd2   : > { %2432 = vmatprep.subr.bf16.mxu0 %v3576_v5  ;;  %v3668_v5 = vld [vmem:[%s4760_s1 + $0x844] ss:$8 sps:$4 sm:$0xff]  }
  0xd4   : > { %1660 = vmatpush1.bf16.msra.mxu1 %v3571_v6  ;;  %v3666_v6 = vld [vmem:[%s4760_s1 + $0x840] ss:$8 sps:$4 sm:$0xff]  }
  0xd5   : > { %2433 = vmatpush1.bf16.msra.mxu0 %v3574_v7  ;;  %1661 = vmatprep.subr.bf16.mxu1 %v3579_v8  ;;  %v3671_v7 = vld [vmem:[%s4760_s1 + $0x854] ss:$8 sps:$4 sm:$0xff]   ;;  %v3669_v8 = vld [vmem:[%s4760_s1 + $0x850] ss:$8 sps:$4 sm:$0xff]  }
  0xd6   : > { %2434 = vmatprep.subr.bf16.mxu0 %v3582_v9  ;;  %v3674_v9 = vld [vmem:[%s4760_s1 + $0x864] ss:$8 sps:$4 sm:$0xff]  }
  0xd8   : > { %1662 = vmatpush1.bf16.msra.mxu1 %v3577_v10  ;;  %v3672_v10 = vld [vmem:[%s4760_s1 + $0x860] ss:$8 sps:$4 sm:$0xff]  }
  0xd9   : > { %2435 = vmatpush1.bf16.msra.mxu0 %v3580_v11  ;;  %1663 = vmatprep.subr.bf16.mxu1 %v3585_v12  ;;  %v3677_v11 = vld [vmem:[%s4760_s1 + $0x874] ss:$8 sps:$4 sm:$0xff]   ;;  %v3675_v12 = vld [vmem:[%s4760_s1 + $0x870] ss:$8 sps:$4 sm:$0xff]  }
  0xda   : > { %2436 = vmatprep.subr.bf16.mxu0 %v3588_v13  ;;  %v3680_v13 = vld [vmem:[%s4760_s1 + $0x884] ss:$8 sps:$4 sm:$0xff]  }
  0xdc   : > { %1664 = vmatpush1.bf16.msra.mxu1 %v3583_v14  ;;  %v3678_v14 = vld [vmem:[%s4760_s1 + $0x880] ss:$8 sps:$4 sm:$0xff]  }
  0xdd   : > { %2437 = vmatpush1.bf16.msra.mxu0 %v3586_v15  ;;  %1665 = vmatprep.subr.bf16.mxu1 %v3591_v16  ;;  %v3683_v15 = vld [vmem:[%s4760_s1 + $0x894] ss:$8 sps:$4 sm:$0xff]   ;;  %v3681_v16 = vld [vmem:[%s4760_s1 + $0x890] ss:$8 sps:$4 sm:$0xff]  }
  0xde   : > { %2438 = vmatprep.subr.bf16.mxu0 %v3594_v17  ;;  %v3686_v17 = vld [vmem:[%s4760_s1 + $0x8a4] ss:$8 sps:$4 sm:$0xff]  }
  0xe0   : > { %1666 = vmatpush1.bf16.msra.mxu1 %v3589_v18  ;;  %v3684_v18 = vld [vmem:[%s4760_s1 + $0x8a0] ss:$8 sps:$4 sm:$0xff]  }
  0xe1   : > { %2439 = vmatpush1.bf16.msra.mxu0 %v3592_v19  ;;  %1667 = vmatprep.subr.bf16.mxu1 %v3597_v20  ;;  %v3689_v19 = vld [vmem:[%s4760_s1 + $0x8b4] ss:$8 sps:$4 sm:$0xff]   ;;  %v3687_v20 = vld [vmem:[%s4760_s1 + $0x8b0] ss:$8 sps:$4 sm:$0xff]  }
  0xe2   : > { %2440 = vmatprep.subr.bf16.mxu0 %v3600_v21  ;;  %v3692_v21 = vld [vmem:[%s4760_s1 + $0x8c4] ss:$8 sps:$4 sm:$0xff]  }
  0xe4   : > { %1668 = vmatpush1.bf16.msra.mxu1 %v3595_v22  ;;  %v3690_v22 = vld [vmem:[%s4760_s1 + $0x8c0] ss:$8 sps:$4 sm:$0xff]  }
  0xe5   : > { %2441 = vmatpush1.bf16.msra.mxu0 %v3598_v23  ;;  %1669 = vmatprep.subr.bf16.mxu1 %v3603_v24  ;;  %v3695_v23 = vld [vmem:[%s4760_s1 + $0x8d4] ss:$8 sps:$4 sm:$0xff]   ;;  %v3693_v24 = vld [vmem:[%s4760_s1 + $0x8d0] ss:$8 sps:$4 sm:$0xff]  }
  0xe6   : > { %2442 = vmatprep.subr.bf16.mxu0 %v3606_v25  ;;  %v3698_v25 = vld [vmem:[%s4760_s1 + $0x8e4] ss:$8 sps:$4 sm:$0xff]  }
  0xe8   : > { %1670 = vmatpush1.bf16.msra.mxu1 %v3601_v26  ;;  %v3696_v26 = vld [vmem:[%s4760_s1 + $0x8e0] ss:$8 sps:$4 sm:$0xff]  }
  0xe9   : > { %2443 = vmatpush1.bf16.msra.mxu0 %v3604_v27  ;;  %1671 = vmatprep.subr.bf16.mxu1 %v3609_v28  ;;  %v3701_v27 = vld [vmem:[%s4760_s1 + $0x8f4] ss:$8 sps:$4 sm:$0xff]   ;;  %v3699_v28 = vld [vmem:[%s4760_s1 + $0x8f0] ss:$8 sps:$4 sm:$0xff]  }
  0xea   : > { %2444 = vmatprep.subr.bf16.mxu0 %v3612_v29  ;;  %v3084_v29 = vcombine.low %v4640_v63, %v4631_v49 }
  0xec   : > { %1672 = vmatpush1.bf16.msra.mxu1 %v3607_v56 }
  0xed   : > { %2445 = vmatpush1.bf16.msra.mxu0 %v3610_v30  ;;  %1673 = vmatprep.subr.bf16.mxu1 %v3615_v31 }
  0xee   : > { %2446 = vmatprep.subr.bf16.mxu0 %v3618_v32 }
  0xf0   : > { %1674 = vmatpush1.bf16.msra.mxu1 %v3613_v33  ;;  %v2518_v33 = vlaneseq }
  0xf1   : > { %2447 = vmatpush1.bf16.msra.mxu0 %v3616_v34  ;;  %1675 = vmatprep.subr.bf16.mxu1 %v3621_v35 }
  0xf2   : > { %2448 = vmatprep.subr.bf16.mxu0 %v3624_v36  ;;  %v2519_v34 = vshrl.u32 %v2518_v33, 7  ;;  %v2516_v36 = vld [vmem:[%s4761_s2] sm:$0x3] }
  0xf4   : > { %1676 = vmatpush1.bf16.msra.mxu1 %v3619_v37  ;;  %v2520_v35 = vsub.s32 0, %v2519_v34  ;;  %v2524_v37 = vsub.s32 1, %v2519_v34 }
  0xf5   : > { %2449 = vmatpush1.bf16.msra.mxu0 %v3622_v38  ;;  %1677 = vmatprep.subr.bf16.mxu1 %v3627_v39  ;;  %v2532_v38 = vld [vmem:[%s249_s28] sm:$0xff] }
  0xf6   : > { %2450 = vmatprep.subr.bf16.mxu0 %v3630_v40  ;;  %v2521_v39 = vrot.slane %v2516_v36, %v2520_v35 }
  0xf8   : > { %1678 = vmatpush1.bf16.msra.mxu1 %v3625_v41  ;;  %v2525_v41 = vrot.slane %v2516_v36, %v2524_v37 }
  0xf9   : > { %2451 = vmatpush1.bf16.msra.mxu0 %v3628_v44  ;;  %1679 = vmatprep.subr.bf16.mxu1 %v3633_v45  ;;  %v2533_v44 = vld [vmem:[%s249_s28 + $0x8] sm:$0xff] }
  0xfa   : > { %2452 = vmatprep.subr.bf16.mxu0 %v3636_v46  ;;  %v2534_v46 = vunpack.c.l.bf16 %v2532_v38 }
  0xfc   : > { %1680 = vmatpush1.bf16.msra.mxu1 %v3631_v53 }
  0xfd   : > { %2453 = vmatpush1.bf16.msra.mxu0 %v3634_v42  ;;  %1681 = vmatprep.subr.bf16.mxu1 %v3639_v43  ;;  %v2535_v43 = vunpack.c.h.bf16 %v2532_v38 }
  0xfe   : > { %2454 = vmatprep.subr.bf16.mxu0 %v3642_v47 }
 0x100   : > { %1682 = vmatpush1.bf16.msra.mxu1 %v3637_v50 }
 0x101   : > { %2455 = vmatpush1.bf16.msra.mxu0 %v3640_v51  ;;  %1683 = vmatprep.subr.bf16.mxu1 %v3645_v52  ;;  %v2536_v52 = vunpack.c.l.bf16 %v2533_v44 }
 0x102   : > { %2456 = vmatprep.subr.bf16.mxu0 %v3648_v55 }
 0x104   : > { %1684 = vmatpush1.bf16.msra.mxu1 %v3643_v57 }
 0x105   : > { %2457 = vmatpush1.bf16.msra.mxu0 %v3646_v58 }
 0x106   : > { %2469 = vmatprep.subr.bf16.mxu0 %v3656_v48  ;;  %v2537_v48 = vunpack.c.h.bf16 %v2533_v44 }
 0x107   : > { %1686 = vmatmul.mubr.bf16.vlgmr.msra.gmra.mrb[0].mxu1 %v3649_v59 }
 0x108   : > { %2459 = vmatmul.mubr.bf16.vlgmr.msra.gmra.mrb[0].mxu0 %v3082_v61 }
 0x109   : > { %2470 = vmatpush1.bf16.msra.mxu0 %v3654_v62  ;;  %2501 = vmatprep.mubr.bf16.mxu0 %v3085_v0 }
 0x10a   : > { %2471 = vmatprep.subr.bf16.mxu0 %v3659_v1 }
 0x10d   : > { %2472 = vmatpush1.bf16.msra.mxu0 %v3657_v54 }
 0x10e   : > { %2473 = vmatprep.subr.bf16.mxu0 %v3662_v60 }
 0x111   : > { %2474 = vmatpush1.bf16.msra.mxu0 %v3660_v2 }
 0x112   : > { %2475 = vmatprep.subr.bf16.mxu0 %v3665_v3 }
 0x115   : > { %2476 = vmatpush1.bf16.msra.mxu0 %v3663_v4 }
 0x116   : > { %2477 = vmatprep.subr.bf16.mxu0 %v3668_v5 }
 0x119   : > { %2478 = vmatpush1.bf16.msra.mxu0 %v3666_v6 }
 0x11a   : > { %2479 = vmatprep.subr.bf16.mxu0 %v3671_v7 }
 0x11d   : > { %2480 = vmatpush1.bf16.msra.mxu0 %v3669_v8 }
 0x11e   : > { %2481 = vmatprep.subr.bf16.mxu0 %v3674_v9 }
 0x121   : > { %2482 = vmatpush1.bf16.msra.mxu0 %v3672_v10 }
 0x122   : > { %2483 = vmatprep.subr.bf16.mxu0 %v3677_v11 }
 0x125   : > { %2484 = vmatpush1.bf16.msra.mxu0 %v3675_v12 }
 0x126   : > { %2485 = vmatprep.subr.bf16.mxu0 %v3680_v13 }
 0x129   : > { %2486 = vmatpush1.bf16.msra.mxu0 %v3678_v14 }
 0x12a   : > { %2487 = vmatprep.subr.bf16.mxu0 %v3683_v15 }
 0x12d   : > { %2488 = vmatpush1.bf16.msra.mxu0 %v3681_v16 }
 0x12e   : > { %2489 = vmatprep.subr.bf16.mxu0 %v3686_v17 }
 0x131   : > { %2490 = vmatpush1.bf16.msra.mxu0 %v3684_v18 }
 0x132   : > { %2491 = vmatprep.subr.bf16.mxu0 %v3689_v19 }
 0x135   : > { %2492 = vmatpush1.bf16.msra.mxu0 %v3687_v20 }
 0x136   : > { %2493 = vmatprep.subr.bf16.mxu0 %v3692_v21 }
 0x139   : > { %2494 = vmatpush1.bf16.msra.mxu0 %v3690_v22 }
 0x13a   : > { %2495 = vmatprep.subr.bf16.mxu0 %v3695_v23 }
 0x13d   : > { %2496 = vmatpush1.bf16.msra.mxu0 %v3693_v24 }
 0x13e   : > { %2497 = vmatprep.subr.bf16.mxu0 %v3698_v25 }
 0x141   : > { %2498 = vmatpush1.bf16.msra.mxu0 %v3696_v26 }
 0x142   : > { %2499 = vmatprep.subr.bf16.mxu0 %v3701_v27 }
 0x145   : > { %2500 = vmatpush1.bf16.msra.mxu0 %v3699_v28 }
 0x148   : > { %2502 = vmatmul.mubr.bf16.vlgmr.msra.gmra.mrb[0].mxu0 %v3084_v29 }
 0x1da   : > { %v1687_v56 = vpop.f32.mrb[0].mxu1 }
 0x1db   : > { %v1689_v30 = vpop.f32.mrb[1].mxu1 }
 0x1dc   : > { %v1691_v31 = vpop.f32.mrb[2].mxu1 }
 0x1dd   : > { %v1693_v32 = vpop.f32.mrb[3].mxu1 }
 0x21b   : > { %v2503_v40 = vpop.f32.mrb[0].mxu0 }
 0x21c   : > { %v3190_v45 = vadd.f32 %v2503_v40, %v1687_v56  ;;  %v2505_v53 = vpop.f32.mrb[1].mxu0 }
 0x21d   : > { %v3191_v42 = vadd.f32 %v2505_v53, %v1689_v30  ;;  %v2507_v47 = vpop.f32.mrb[2].mxu0 }
 0x21e   : > { %v2528_v50 = vadd.f32 %v3190_v45, %v2521_v39  ;;  %v3192_v51 = vadd.f32 %v2507_v47, %v1691_v31  ;;  %v2509_v55 = vpop.f32.mrb[3].mxu0 }
 0x21f   : > { %v2529_v57 = vadd.f32 %v3191_v42, %v2525_v41  ;;  %v3193_v58 = vadd.f32 %v2509_v55, %v1693_v32 }
 0x220   : > { %v2538_v49 = vadd.f32 %v2534_v46, %v2528_v50  ;;  %v2530_v59 = vadd.f32 %v3192_v51, %v2521_v39 }
 0x221   : > { %v2539_v61 = vadd.f32 %v2535_v43, %v2529_v57  ;;  %v2531_v62 = vadd.f32 %v3193_v58, %v2525_v41 }
 0x222   : > { %v2542_v63 = vmax.f32 %v2538_v49, 0.0  ;;  %v2540_v0 = vadd.f32 %v2536_v52, %v2530_v59 }
 0x223   : > { %v2543_v1 = vmax.f32 %v2539_v61, 0.0  ;;  %v2541_v54 = vadd.f32 %v2537_v48, %v2531_v62 }
 0x224   : > { %v2544_v60 = vmax.f32 %v2540_v0, 0.0 }
 0x225   : > { %v3188_v2 = vpack.c.bf16 %v2543_v1, %v2542_v63  ;;  %v2545_v3 = vmax.f32 %v2541_v54, 0.0 }
 0x227   : > { %2558 = vst [vmem:[%s260_s7] sm:$0xff] %v3188_v2  ;;  %v3189_v4 = vpack.c.bf16 %v2545_v3, %v2544_v60 }
 0x229   : > { %2559 = vst [vmem:[%s260_s7 + $0x8] sm:$0xff] %v3189_v4 }
 0x22a PF: > { %s14_s17 = sadd.s32 1, %s3729_s17   ;;  %s4764_s15 = smov %s3725_s16 }
 0x22b   : > { %p11_p5 = scmp.ge.s32.totalorder %s14_s17, 4   ;;  %s4765_s16 = smov %s4767_s18 }
 0x22d   :  { %13 = sbr.rel (!%p11_p5) target bundleno = 2 (0x2), region = 71 }

</bundles_post_ra>
